<compile_context>
chip_gen: v6e
topology: v6e:2x2x1
jax: 0.10.0
libtpu: 0.0.40
codegen_flags: <defaults>
</compile_context>

<pallas_src>
import functools
import math

import jax
import jax.numpy as jnp
from jax.experimental import pallas as pl
from jax.experimental.pallas import tpu as pltpu

LN_EPS = 1e-5                 # PyTorch nn.LayerNorm default
_INV_SQRT2 = 0.7071067811865476


def _layer_norm(x, gamma, beta):
    x = x.astype(jnp.float32)
    mu = jnp.mean(x, axis=-1, keepdims=True)
    var = jnp.mean((x - mu) ** 2, axis=-1, keepdims=True)
    return (x - mu) * jax.lax.rsqrt(var + LN_EPS) * gamma + beta


def _gelu_exact(x):
    # F.gelu default (erf-based, not the tanh approximation)
    return 0.5 * x * (1.0 + jax.lax.erf(x * _INV_SQRT2))


def encoder_block_kernel(
    # ---- inputs -------------------------------------------------------------
    x_ref,                       # (1, N, D)   f32, full sequence for this batch
    ln1_g_ref, ln1_b_ref,        # (1, D)      f32
    wq_ref, wk_ref, wv_ref,      # (D, D)      bf16 (wq pre-scaled by 1/sqrt(D))
    wproj_ref,                   # (D, D)      bf16
    bproj_ref,                   # (1, D)      f32
    ln2_g_ref, ln2_b_ref,        # (1, D)      f32
    w1_ref,                      # (D, mlp)    bf16, resident (fetched once)
    b1_ref,                      # (1, mlp)    f32
    w2_ref,                      # (mlp, D)    bf16, resident (fetched once)
    b2_ref,                      # (1, D)      f32
    # ---- output -------------------------------------------------------------
    o_ref,                       # (1, TQ, D)
    # ---- scratch ------------------------------------------------------------
    ln1_scr,                     # (N, D) bf16   LN1(x) over the full sequence
    k_scr, v_scr,                # (N, D) bf16   K / V for all heads (lane-dense)
    *, num_heads, mlp_panel,
):
    i = pl.program_id(1)                      # query-tile index
    tq = o_ref.shape[1]
    dim = o_ref.shape[2]
    hd = dim // num_heads
    mlp_dim = w1_ref.shape[1]
    bf16 = jnp.bfloat16

    # ---- once per batch: LN1 over the full sequence + K / V for all heads ---------
    @pl.when(i == 0)
    def _():
        hf = _layer_norm(x_ref[0], ln1_g_ref[...], ln1_b_ref[...]).astype(bf16)
        ln1_scr[...] = hf
        k_scr[...] = jnp.dot(hf, wk_ref[...],
                             preferred_element_type=jnp.float32).astype(bf16)
        v_scr[...] = jnp.dot(hf, wv_ref[...],
                             preferred_element_type=jnp.float32).astype(bf16)

    # ---- per q-tile: Q projection (full width, scale folded into wq) --------------
    row0 = pl.multiple_of(i * tq, tq)
    q_ln = ln1_scr[pl.ds(row0, tq), :]                                 # (TQ, D) bf16
    q_all = jnp.dot(q_ln, wq_ref[...],
                    preferred_element_type=jnp.float32).astype(bf16)   # (TQ, D)

    # ---- attention per head (head_dim contraction depth is intrinsic) -------------
    heads_out = []
    for h in range(num_heads):                 # static unroll; num_heads is small
        lo = h * hd
        k_h = k_scr[:, lo:lo + hd]                                     # (N, hd) bf16
        v_h = v_scr[:, lo:lo + hd]                                     # (N, hd) bf16
        # scores = q_h @ k_h^T : contract head dim of both operands (no transpose copy)
        s = jax.lax.dot_general(
            q_all[:, lo:lo + hd], k_h,
            (((1,), (1,)), ((), ())),
            preferred_element_type=jnp.float32)                        # (TQ, N) f32
        s = s - jnp.max(s, axis=-1, keepdims=True)
        p = jnp.exp(s)
        p = p * pl.reciprocal(jnp.sum(p, axis=-1, keepdims=True), approx=True)
        heads_out.append(jnp.dot(p.astype(bf16), v_h,
                                 preferred_element_type=jnp.float32))  # (TQ, hd)
    o_cat = jnp.concatenate(heads_out, axis=-1).astype(bf16)           # (TQ, D)

    # ---- output projection (single full-depth matmul) + attention residual --------
    attn = jnp.dot(o_cat, wproj_ref[...],
                   preferred_element_type=jnp.float32)                 # (TQ, D) f32
    x_rows = x_ref[0, pl.ds(row0, tq), :].astype(jnp.float32)
    x1 = x_rows + attn + bproj_ref[...]

    # ---- LN2 + panelized MLP + residual --------------------------------------------
    h2 = _layer_norm(x1, ln2_g_ref[...], ln2_b_ref[...]).astype(bf16)
    f2 = jnp.zeros((tq, dim), jnp.float32)
    for c in range(0, mlp_dim, mlp_panel):     # static panel loop over mlp_dim
        f1 = jnp.dot(h2, w1_ref[:, c:c + mlp_panel],
                     preferred_element_type=jnp.float32) + b1_ref[:, c:c + mlp_panel]
        f1 = _gelu_exact(f1)
        # TODO(synk): dropout omitted (inference / eval semantics).
        f2 = f2 + jnp.dot(f1.astype(bf16), w2_ref[c:c + mlp_panel, :],
                          preferred_element_type=jnp.float32)
    f2 = f2 + b2_ref[...]
    o_ref[0] = (x1 + f2).astype(o_ref.dtype)


def transformer_encoder_block(x, params, num_heads, *, q_tile=256, mlp_panel=512):
    """x: (B, N, D) float32.  params: f32 weights matching the PyTorch module."""
    B, N, D = x.shape
    assert D % num_heads == 0, "embedding_dim must be divisible by num_heads"
    hd = D // num_heads
    tq = min(q_tile, N)
    assert N % tq == 0, "sequence length must be divisible by the q-tile size"
    nt = N // tq
    mlp_dim = params["w1_t"].shape[1]
    mlp_panel = min(mlp_panel, mlp_dim)
    assert mlp_dim % mlp_panel == 0, "mlp_dim must be divisible by the MLP panel size"
    bf16 = jnp.bfloat16
    scale = 1.0 / (D ** 0.5)      # module divides scores by sqrt(embedding_dim)

    # ---- weight preprocessing (plain XLA, outside the kernel) ---------------------
    # qkv weight^T is (D, 3D) with output columns ordered (qkv, head, hd).
    wqkv = params["wqkv_t"].reshape(D, 3, num_heads, hd)
    wq = (wqkv[:, 0].reshape(D, D) * scale).astype(bf16)   # softmax scale folded in
    wk = wqkv[:, 1].reshape(D, D).astype(bf16)
    wv = wqkv[:, 2].reshape(D, D).astype(bf16)
    wproj = params["wproj_t"].astype(bf16)                 # rows ordered (head, hd)
    w1 = params["w1_t"].astype(bf16)                       # (D, mlp)
    w2 = params["w2_t"].astype(bf16)                       # (mlp, D)

    ln1_g, ln1_b = params["ln1_g"], params["ln1_b"]
    ln2_g, ln2_b = params["ln2_g"], params["ln2_b"]
    bproj, b1, b2 = params["bproj"], params["b1"], params["b2"]

    def const_spec(p):
        # Constant block index -> the pipeline DMAs this array exactly once per core
        # and keeps it resident in VMEM (no per-step / per-batch re-fetch).
        zeros = (0,) * p.ndim
        return pl.BlockSpec(p.shape, lambda b, i: zeros)

    in_specs = [
        pl.BlockSpec((1, N, D), lambda b, i: (b, 0, 0)),   # x: one fetch per batch
        const_spec(ln1_g), const_spec(ln1_b),
        const_spec(wq), const_spec(wk), const_spec(wv), const_spec(wproj),
        const_spec(bproj),
        const_spec(ln2_g), const_spec(ln2_b),
        const_spec(w1), const_spec(b1), const_spec(w2), const_spec(b2),
    ]

    scratch_shapes = [
        pltpu.VMEM((N, D), bf16),      # LN1(x) over the full sequence
        pltpu.VMEM((N, D), bf16),      # K (all heads, lane-dense)
        pltpu.VMEM((N, D), bf16),      # V (all heads, lane-dense)
    ]

    # ---- generation-aware VMEM budget ----------------------------------------------
    def nbytes(shape, dtype):
        return math.prod(shape) * jnp.dtype(dtype).itemsize

    pipeline_bytes = 2 * (
        nbytes((1, N, D), x.dtype)                      # x block
        + nbytes((1, tq, D), x.dtype)                   # output block
        + 4 * nbytes((D, D), bf16)                      # wq / wk / wv / wproj
        + nbytes((D, mlp_dim), bf16) + nbytes((mlp_dim, D), bf16)
        + 6 * nbytes((1, D), jnp.float32) + nbytes((1, mlp_dim), jnp.float32))
    scratch_bytes = 3 * nbytes((N, D), bf16)
    temp_bytes = ((num_heads + 2) * nbytes((tq, N), jnp.float32)
                  + 3 * nbytes((tq, mlp_panel), jnp.float32)
                  + 6 * nbytes((tq, D), jnp.float32))
    need = pipeline_bytes + scratch_bytes + temp_bytes
    try:
        cap = int(0.85 * pltpu.get_tpu_info().vmem_capacity_bytes)
    except Exception:  # pragma: no cover - conservative fallback (fits v5e/v6e/v7x)
        cap = 64 << 20
    vmem_limit = max(min(int(1.25 * need) + (4 << 20), cap), 16 << 20)

    kernel = functools.partial(encoder_block_kernel,
                               num_heads=num_heads, mlp_panel=mlp_panel)

    return pl.pallas_call(
        kernel,
        out_shape=jax.ShapeDtypeStruct((B, N, D), x.dtype),
        grid_spec=pltpu.PrefetchScalarGridSpec(
            num_scalar_prefetch=0,
            grid=(B, nt),
            in_specs=in_specs,
            out_specs=pl.BlockSpec((1, tq, D), lambda b, i: (b, i, 0)),
            scratch_shapes=scratch_shapes,
        ),
        compiler_params=pltpu.CompilerParams(
            dimension_semantics=("parallel", "arbitrary"),
            vmem_limit_bytes=vmem_limit,
        ),
    )(x, ln1_g, ln1_b, wq, wk, wv, wproj, bproj, ln2_g, ln2_b, w1, b1, w2, b2)


def reference_block(x, params, num_heads):
    """Pure-JAX reference of the PyTorch module forward (eval mode)."""
    B, N, D = x.shape
    hd = D // num_heads

    def ln(v, g, b):
        mu = jnp.mean(v, axis=-1, keepdims=True)
        var = jnp.mean((v - mu) ** 2, axis=-1, keepdims=True)
        return (v - mu) * jax.lax.rsqrt(var + LN_EPS) * g + b

    h = ln(x, params["ln1_g"], params["ln1_b"])
    qkv = (h @ params["wqkv_t"]).reshape(B, N, 3, num_heads, hd)
    q = jnp.transpose(qkv[:, :, 0], (0, 2, 1, 3))
    k = jnp.transpose(qkv[:, :, 1], (0, 2, 1, 3))
    v = jnp.transpose(qkv[:, :, 2], (0, 2, 1, 3))
    s = jnp.einsum("bhqd,bhkd->bhqk", q, k) / (D ** 0.5)
    p = jax.nn.softmax(s, axis=-1)
    o = jnp.einsum("bhqk,bhkd->bhqd", p, v)
    o = jnp.transpose(o, (0, 2, 1, 3)).reshape(B, N, D)
    x1 = x + o @ params["wproj_t"] + params["bproj"]
    h2 = ln(x1, params["ln2_g"], params["ln2_b"])
    f1 = _gelu_exact(h2 @ params["w1_t"] + params["b1"])
    f2 = f1 @ params["w2_t"] + params["b2"]
    return x1 + f2


def make_params(key, dim, num_heads, mlp_dim):
    ks = jax.random.split(key, 7)
    s = 0.02
    return {
        # LayerNorm 1 / 2 (PyTorch init: gamma=1, beta=0)
        "ln1_g": jnp.ones((1, dim), jnp.float32),
        "ln1_b": jnp.zeros((1, dim), jnp.float32),
        "ln2_g": jnp.ones((1, dim), jnp.float32),
        "ln2_b": jnp.zeros((1, dim), jnp.float32),
        # qkv: nn.Linear(dim, 3*dim, bias=False) -> weight (3D, D); stored as W^T (D, 3D)
        "wqkv_t": jax.random.normal(ks[0], (dim, 3 * dim), jnp.float32) * s,
        # projection: nn.Linear(dim, dim)
        "wproj_t": jax.random.normal(ks[1], (dim, dim), jnp.float32) * s,
        "bproj": jax.random.normal(ks[2], (1, dim), jnp.float32) * s,
        # MLP: fc1 W^T (dim, mlp_dim); fc2 W^T (mlp_dim, dim)
        "w1_t": jax.random.normal(ks[3], (dim, mlp_dim), jnp.float32) * s,
        "b1": jax.random.normal(ks[4], (1, mlp_dim), jnp.float32) * s,
        "w2_t": jax.random.normal(ks[5], (mlp_dim, dim), jnp.float32) * s,
        "b2": jax.random.normal(ks[6], (1, dim), jnp.float32) * s,
    }


if __name__ == "__main__":
    # Small but lane-dense shapes (D, mlp_dim, N are multiples of 128).
    B, N, D = 2, 256, 256
    NUM_HEADS = 4          # head_dim = 64
    MLP_DIM = 512

    key = jax.random.PRNGKey(0)
    kx, kp = jax.random.split(key)
    x = jax.random.normal(kx, (B, N, D), jnp.float32)
    params = make_params(kp, D, NUM_HEADS, MLP_DIM)

    # q_tile=128 exercises the multi-tile path (per-batch LN1/K/V prologue reuse).
    out = transformer_encoder_block(x, params, NUM_HEADS, q_tile=128)
    jax.block_until_ready(out)
    assert out.shape == (B, N, D) and out.dtype == jnp.float32

    # Loose check against a plain-JAX reference (kernel uses bf16 matmul operands
    # and an approximate softmax reciprocal).
    ref = reference_block(x, params, NUM_HEADS)
    max_err = float(jnp.max(jnp.abs(out - ref)))
    assert max_err < 5e-2, f"max abs err vs reference: {max_err}"
    print("KERNEL_OK")
</pallas_src>

<mosaic_0001>
module attributes {stable_mosaic.version = 11 : i64} {
  func.func @encoder_block_kernel(%arg0: i32, %arg1: i32, %arg2: memref<1x256x256xf32, #tpu.memory_space<vmem>>, %arg3: memref<1x256xf32, #tpu.memory_space<vmem>>, %arg4: memref<1x256xf32, #tpu.memory_space<vmem>>, %arg5: memref<256x256xbf16, #tpu.memory_space<vmem>>, %arg6: memref<256x256xbf16, #tpu.memory_space<vmem>>, %arg7: memref<256x256xbf16, #tpu.memory_space<vmem>>, %arg8: memref<256x256xbf16, #tpu.memory_space<vmem>>, %arg9: memref<1x256xf32, #tpu.memory_space<vmem>>, %arg10: memref<1x256xf32, #tpu.memory_space<vmem>>, %arg11: memref<1x256xf32, #tpu.memory_space<vmem>>, %arg12: memref<256x512xbf16, #tpu.memory_space<vmem>>, %arg13: memref<1x512xf32, #tpu.memory_space<vmem>>, %arg14: memref<512x256xbf16, #tpu.memory_space<vmem>>, %arg15: memref<1x256xf32, #tpu.memory_space<vmem>>, %arg16: memref<1x128x256xf32, #tpu.memory_space<vmem>>, %arg17: memref<256x256xbf16, #tpu.memory_space<vmem>>, %arg18: memref<256x256xbf16, #tpu.memory_space<vmem>>, %arg19: memref<256x256xbf16, #tpu.memory_space<vmem>>) attributes {dimension_semantics = [#tpu.dimension_semantics<parallel>, #tpu.dimension_semantics<arbitrary>], iteration_bounds = array<i64: 2, 2>, scalar_prefetch = 0 : i64, scratch_operands = 3 : i64, tpu.core_type = #tpu.core_type<tc>, window_params = [{transform_indices = @transform_0, window_bounds = array<i64: 1, 256, 256>}, {pipeline_mode = #tpu.pipeline_mode<synchronous>, transform_indices = @transform_1, window_bounds = array<i64: 1, 256>}, {pipeline_mode = #tpu.pipeline_mode<synchronous>, transform_indices = @transform_2, window_bounds = array<i64: 1, 256>}, {pipeline_mode = #tpu.pipeline_mode<synchronous>, transform_indices = @transform_3, window_bounds = array<i64: 256, 256>}, {pipeline_mode = #tpu.pipeline_mode<synchronous>, transform_indices = @transform_4, window_bounds = array<i64: 256, 256>}, {pipeline_mode = #tpu.pipeline_mode<synchronous>, transform_indices = @transform_5, window_bounds = array<i64: 256, 256>}, {pipeline_mode = #tpu.pipeline_mode<synchronous>, transform_indices = @transform_6, window_bounds = array<i64: 256, 256>}, {pipeline_mode = #tpu.pipeline_mode<synchronous>, transform_indices = @transform_7, window_bounds = array<i64: 1, 256>}, {pipeline_mode = #tpu.pipeline_mode<synchronous>, transform_indices = @transform_8, window_bounds = array<i64: 1, 256>}, {pipeline_mode = #tpu.pipeline_mode<synchronous>, transform_indices = @transform_9, window_bounds = array<i64: 1, 256>}, {pipeline_mode = #tpu.pipeline_mode<synchronous>, transform_indices = @transform_10, window_bounds = array<i64: 256, 512>}, {pipeline_mode = #tpu.pipeline_mode<synchronous>, transform_indices = @transform_11, window_bounds = array<i64: 1, 512>}, {pipeline_mode = #tpu.pipeline_mode<synchronous>, transform_indices = @transform_12, window_bounds = array<i64: 512, 256>}, {pipeline_mode = #tpu.pipeline_mode<synchronous>, transform_indices = @transform_13, window_bounds = array<i64: 1, 256>}, {transform_indices = @transform_14, window_bounds = array<i64: 1, 128, 256>}]} {
    %c0_i32 = arith.constant 0 : i32
    %0 = arith.cmpi eq, %arg1, %c0_i32 : i32
    %1 = arith.extui %0 : i1 to i32
    %c0_i32_0 = arith.constant 0 : i32
    %2 = arith.cmpi ne, %1, %c0_i32_0 : i32
    scf.if %2 {
      %c0_65 = arith.constant 0 : index
      %c0_66 = arith.constant 0 : index
      %c0_67 = arith.constant 0 : index
      %135 = vector.load %arg2[%c0_65, %c0_66, %c0_67] : memref<1x256x256xf32, #tpu.memory_space<vmem>>, vector<1x256x256xf32>
      %136 = vector.shape_cast %135 : vector<1x256x256xf32> to vector<256x256xf32>
      %c0_68 = arith.constant 0 : index
      %c0_69 = arith.constant 0 : index
      %137 = vector.load %arg3[%c0_68, %c0_69] : memref<1x256xf32, #tpu.memory_space<vmem>>, vector<1x256xf32>
      %c0_70 = arith.constant 0 : index
      %c0_71 = arith.constant 0 : index
      %138 = vector.load %arg4[%c0_70, %c0_71] : memref<1x256xf32, #tpu.memory_space<vmem>>, vector<1x256xf32>
      %cst_72 = arith.constant dense<0.000000e+00> : vector<256xf32>
      %139 = vector.multi_reduction <add>, %136, %cst_72 [1] : vector<256x256xf32> to vector<256xf32>
      %140 = vector.shape_cast %139 : vector<256xf32> to vector<256x1xf32>
      %cst_73 = arith.constant 2.560000e+02 : f32
      %141 = vector.broadcast %cst_73 : f32 to vector<256x1xf32>
      %142 = arith.divf %140, %141 : vector<256x1xf32>
      %143 = vector.broadcast %142 : vector<256x1xf32> to vector<256x256xf32>
      %144 = arith.subf %136, %143 : vector<256x256xf32>
      %145 = arith.mulf %144, %144 : vector<256x256xf32>
      %cst_74 = arith.constant dense<0.000000e+00> : vector<256xf32>
      %146 = vector.multi_reduction <add>, %145, %cst_74 [1] : vector<256x256xf32> to vector<256xf32>
      %147 = vector.shape_cast %146 : vector<256xf32> to vector<256x1xf32>
      %cst_75 = arith.constant 2.560000e+02 : f32
      %148 = vector.broadcast %cst_75 : f32 to vector<256x1xf32>
      %149 = arith.divf %147, %148 : vector<256x1xf32>
      %150 = vector.broadcast %142 : vector<256x1xf32> to vector<256x256xf32>
      %151 = arith.subf %136, %150 : vector<256x256xf32>
      %cst_76 = arith.constant 9.99999974E-6 : f32
      %152 = vector.broadcast %cst_76 : f32 to vector<256x1xf32>
      %153 = arith.addf %149, %152 : vector<256x1xf32>
      %154 = math.rsqrt %153 : vector<256x1xf32>
      %155 = vector.broadcast %154 : vector<256x1xf32> to vector<256x256xf32>
      %156 = arith.mulf %151, %155 : vector<256x256xf32>
      %157 = vector.broadcast %137 : vector<1x256xf32> to vector<256x256xf32>
      %158 = arith.mulf %156, %157 : vector<256x256xf32>
      %159 = vector.broadcast %138 : vector<1x256xf32> to vector<256x256xf32>
      %160 = arith.addf %158, %159 : vector<256x256xf32>
      %161 = arith.truncf %160 : vector<256x256xf32> to vector<256x256xbf16>
      %c0_77 = arith.constant 0 : index
      %c0_78 = arith.constant 0 : index
      %162 = vector.load %arg17[%c0_77, %c0_78] : memref<256x256xbf16, #tpu.memory_space<vmem>>, vector<256x256xbf16>
      tpu.vector_store %arg17[%c0_77, %c0_78], %161 {strides = array<i32>} : memref<256x256xbf16, #tpu.memory_space<vmem>>, vector<256x256xbf16>,
      %c0_79 = arith.constant 0 : index
      %c0_80 = arith.constant 0 : index
      %163 = vector.load %arg6[%c0_79, %c0_80] : memref<256x256xbf16, #tpu.memory_space<vmem>>, vector<256x256xbf16>
      %cst_81 = arith.constant dense<0.000000e+00> : vector<256x256xf32>
      %164 = tpu.matmul %161, %163, %cst_81 {dimension_numbers = #tpu.dot_dimension_numbers<[1], [0], [0], [1], [0, 0, 1, 1], [], []>} : vector<256x256xbf16>, vector<256x256xbf16>, vector<256x256xf32> -> vector<256x256xf32>
      %165 = arith.truncf %164 : vector<256x256xf32> to vector<256x256xbf16>
      %c0_82 = arith.constant 0 : index
      %c0_83 = arith.constant 0 : index
      %166 = vector.load %arg18[%c0_82, %c0_83] : memref<256x256xbf16, #tpu.memory_space<vmem>>, vector<256x256xbf16>
      tpu.vector_store %arg18[%c0_82, %c0_83], %165 {strides = array<i32>} : memref<256x256xbf16, #tpu.memory_space<vmem>>, vector<256x256xbf16>,
      %c0_84 = arith.constant 0 : index
      %c0_85 = arith.constant 0 : index
      %167 = vector.load %arg7[%c0_84, %c0_85] : memref<256x256xbf16, #tpu.memory_space<vmem>>, vector<256x256xbf16>
      %cst_86 = arith.constant dense<0.000000e+00> : vector<256x256xf32>
      %168 = tpu.matmul %161, %167, %cst_86 {dimension_numbers = #tpu.dot_dimension_numbers<[1], [0], [0], [1], [0, 0, 1, 1], [], []>} : vector<256x256xbf16>, vector<256x256xbf16>, vector<256x256xf32> -> vector<256x256xf32>
      %169 = arith.truncf %168 : vector<256x256xf32> to vector<256x256xbf16>
      %c0_87 = arith.constant 0 : index
      %c0_88 = arith.constant 0 : index
      %170 = vector.load %arg19[%c0_87, %c0_88] : memref<256x256xbf16, #tpu.memory_space<vmem>>, vector<256x256xbf16>
      tpu.vector_store %arg19[%c0_87, %c0_88], %169 {strides = array<i32>} : memref<256x256xbf16, #tpu.memory_space<vmem>>, vector<256x256xbf16>,
    } else {
    }
    %c128_i32 = arith.constant 128 : i32
    %3 = arith.muli %arg1, %c128_i32 : i32
    %4 = tpu.assume_multiple %3, 128 : i32
    %5 = arith.index_cast %4 : i32 to index
    %c0 = arith.constant 0 : index
    %6 = vector.load %arg17[%5, %c0] : memref<256x256xbf16, #tpu.memory_space<vmem>>, vector<128x256xbf16>
    %c0_1 = arith.constant 0 : index
    %c0_2 = arith.constant 0 : index
    %7 = vector.load %arg5[%c0_1, %c0_2] : memref<256x256xbf16, #tpu.memory_space<vmem>>, vector<256x256xbf16>
    %cst = arith.constant dense<0.000000e+00> : vector<128x256xf32>
    %8 = tpu.matmul %6, %7, %cst {dimension_numbers = #tpu.dot_dimension_numbers<[1], [0], [0], [1], [0, 0, 1, 1], [], []>} : vector<128x256xbf16>, vector<256x256xbf16>, vector<128x256xf32> -> vector<128x256xf32>
    %9 = arith.truncf %8 : vector<128x256xf32> to vector<128x256xbf16>
    %c0_3 = arith.constant 0 : index
    %c0_4 = arith.constant 0 : index
    %10 = vector.load %arg18[%c0_3, %c0_4] : memref<256x256xbf16, #tpu.memory_space<vmem>>, vector<256x64xbf16>
    %c0_5 = arith.constant 0 : index
    %c0_6 = arith.constant 0 : index
    %11 = vector.load %arg19[%c0_5, %c0_6] : memref<256x256xbf16, #tpu.memory_space<vmem>>, vector<256x64xbf16>
    %12 = vector.extract_strided_slice %9 {offsets = [0, 0], sizes = [128, 64], strides = [1, 1]} : vector<128x256xbf16> to vector<128x64xbf16>
    %cst_7 = arith.constant dense<0.000000e+00> : vector<128x256xf32>
    %13 = tpu.matmul %12, %10, %cst_7 {dimension_numbers = #tpu.dot_dimension_numbers<[1], [1], [0], [0], [0, 0, 1, 0], [], []>} : vector<128x64xbf16>, vector<256x64xbf16>, vector<128x256xf32> -> vector<128x256xf32>
    %cst_8 = arith.constant dense<0xFF800000> : vector<128xf32>
    %14 = vector.multi_reduction <maximumf>, %13, %cst_8 [1] : vector<128x256xf32> to vector<128xf32>
    %15 = vector.shape_cast %14 : vector<128xf32> to vector<128x1xf32>
    %16 = vector.broadcast %15 : vector<128x1xf32> to vector<128x256xf32>
    %17 = arith.subf %13, %16 : vector<128x256xf32>
    %18 = math.exp %17 : vector<128x256xf32>
    %cst_9 = arith.constant dense<0.000000e+00> : vector<128xf32>
    %19 = vector.multi_reduction <add>, %18, %cst_9 [1] : vector<128x256xf32> to vector<128xf32>
    %20 = vector.shape_cast %19 : vector<128xf32> to vector<128x1xf32>
    %21 = tpu.reciprocal %20 {approx = true} : vector<128x1xf32> -> vector<128x1xf32>
    %22 = vector.broadcast %21 : vector<128x1xf32> to vector<128x256xf32>
    %23 = arith.mulf %18, %22 : vector<128x256xf32>
    %24 = arith.truncf %23 : vector<128x256xf32> to vector<128x256xbf16>
    %cst_10 = arith.constant dense<0.000000e+00> : vector<128x64xf32>
    %25 = tpu.matmul %24, %11, %cst_10 {dimension_numbers = #tpu.dot_dimension_numbers<[1], [0], [0], [1], [0, 0, 1, 1], [], []>} : vector<128x256xbf16>, vector<256x64xbf16>, vector<128x64xf32> -> vector<128x64xf32>
    %c0_11 = arith.constant 0 : index
    %c64 = arith.constant 64 : index
    %26 = vector.load %arg18[%c0_11, %c64] : memref<256x256xbf16, #tpu.memory_space<vmem>>, vector<256x64xbf16>
    %c0_12 = arith.constant 0 : index
    %c64_13 = arith.constant 64 : index
    %27 = vector.load %arg19[%c0_12, %c64_13] : memref<256x256xbf16, #tpu.memory_space<vmem>>, vector<256x64xbf16>
    %28 = vector.extract_strided_slice %9 {offsets = [0, 64], sizes = [128, 64], strides = [1, 1]} : vector<128x256xbf16> to vector<128x64xbf16>
    %cst_14 = arith.constant dense<0.000000e+00> : vector<128x256xf32>
    %29 = tpu.matmul %28, %26, %cst_14 {dimension_numbers = #tpu.dot_dimension_numbers<[1], [1], [0], [0], [0, 0, 1, 0], [], []>} : vector<128x64xbf16>, vector<256x64xbf16>, vector<128x256xf32> -> vector<128x256xf32>
    %cst_15 = arith.constant dense<0xFF800000> : vector<128xf32>
    %30 = vector.multi_reduction <maximumf>, %29, %cst_15 [1] : vector<128x256xf32> to vector<128xf32>
    %31 = vector.shape_cast %30 : vector<128xf32> to vector<128x1xf32>
    %32 = vector.broadcast %31 : vector<128x1xf32> to vector<128x256xf32>
    %33 = arith.subf %29, %32 : vector<128x256xf32>
    %34 = math.exp %33 : vector<128x256xf32>
    %cst_16 = arith.constant dense<0.000000e+00> : vector<128xf32>
    %35 = vector.multi_reduction <add>, %34, %cst_16 [1] : vector<128x256xf32> to vector<128xf32>
    %36 = vector.shape_cast %35 : vector<128xf32> to vector<128x1xf32>
    %37 = tpu.reciprocal %36 {approx = true} : vector<128x1xf32> -> vector<128x1xf32>
    %38 = vector.broadcast %37 : vector<128x1xf32> to vector<128x256xf32>
    %39 = arith.mulf %34, %38 : vector<128x256xf32>
    %40 = arith.truncf %39 : vector<128x256xf32> to vector<128x256xbf16>
    %cst_17 = arith.constant dense<0.000000e+00> : vector<128x64xf32>
    %41 = tpu.matmul %40, %27, %cst_17 {dimension_numbers = #tpu.dot_dimension_numbers<[1], [0], [0], [1], [0, 0, 1, 1], [], []>} : vector<128x256xbf16>, vector<256x64xbf16>, vector<128x64xf32> -> vector<128x64xf32>
    %c0_18 = arith.constant 0 : index
    %c128 = arith.constant 128 : index
    %42 = vector.load %arg18[%c0_18, %c128] : memref<256x256xbf16, #tpu.memory_space<vmem>>, vector<256x64xbf16>
    %c0_19 = arith.constant 0 : index
    %c128_20 = arith.constant 128 : index
    %43 = vector.load %arg19[%c0_19, %c128_20] : memref<256x256xbf16, #tpu.memory_space<vmem>>, vector<256x64xbf16>
    %44 = vector.extract_strided_slice %9 {offsets = [0, 128], sizes = [128, 64], strides = [1, 1]} : vector<128x256xbf16> to vector<128x64xbf16>
    %cst_21 = arith.constant dense<0.000000e+00> : vector<128x256xf32>
    %45 = tpu.matmul %44, %42, %cst_21 {dimension_numbers = #tpu.dot_dimension_numbers<[1], [1], [0], [0], [0, 0, 1, 0], [], []>} : vector<128x64xbf16>, vector<256x64xbf16>, vector<128x256xf32> -> vector<128x256xf32>
    %cst_22 = arith.constant dense<0xFF800000> : vector<128xf32>
    %46 = vector.multi_reduction <maximumf>, %45, %cst_22 [1] : vector<128x256xf32> to vector<128xf32>
    %47 = vector.shape_cast %46 : vector<128xf32> to vector<128x1xf32>
    %48 = vector.broadcast %47 : vector<128x1xf32> to vector<128x256xf32>
    %49 = arith.subf %45, %48 : vector<128x256xf32>
    %50 = math.exp %49 : vector<128x256xf32>
    %cst_23 = arith.constant dense<0.000000e+00> : vector<128xf32>
    %51 = vector.multi_reduction <add>, %50, %cst_23 [1] : vector<128x256xf32> to vector<128xf32>
    %52 = vector.shape_cast %51 : vector<128xf32> to vector<128x1xf32>
    %53 = tpu.reciprocal %52 {approx = true} : vector<128x1xf32> -> vector<128x1xf32>
    %54 = vector.broadcast %53 : vector<128x1xf32> to vector<128x256xf32>
    %55 = arith.mulf %50, %54 : vector<128x256xf32>
    %56 = arith.truncf %55 : vector<128x256xf32> to vector<128x256xbf16>
    %cst_24 = arith.constant dense<0.000000e+00> : vector<128x64xf32>
    %57 = tpu.matmul %56, %43, %cst_24 {dimension_numbers = #tpu.dot_dimension_numbers<[1], [0], [0], [1], [0, 0, 1, 1], [], []>} : vector<128x256xbf16>, vector<256x64xbf16>, vector<128x64xf32> -> vector<128x64xf32>
    %c0_25 = arith.constant 0 : index
    %c192 = arith.constant 192 : index
    %58 = vector.load %arg18[%c0_25, %c192] : memref<256x256xbf16, #tpu.memory_space<vmem>>, vector<256x64xbf16>
    %c0_26 = arith.constant 0 : index
    %c192_27 = arith.constant 192 : index
    %59 = vector.load %arg19[%c0_26, %c192_27] : memref<256x256xbf16, #tpu.memory_space<vmem>>, vector<256x64xbf16>
    %60 = vector.extract_strided_slice %9 {offsets = [0, 192], sizes = [128, 64], strides = [1, 1]} : vector<128x256xbf16> to vector<128x64xbf16>
    %cst_28 = arith.constant dense<0.000000e+00> : vector<128x256xf32>
    %61 = tpu.matmul %60, %58, %cst_28 {dimension_numbers = #tpu.dot_dimension_numbers<[1], [1], [0], [0], [0, 0, 1, 0], [], []>} : vector<128x64xbf16>, vector<256x64xbf16>, vector<128x256xf32> -> vector<128x256xf32>
    %cst_29 = arith.constant dense<0xFF800000> : vector<128xf32>
    %62 = vector.multi_reduction <maximumf>, %61, %cst_29 [1] : vector<128x256xf32> to vector<128xf32>
    %63 = vector.shape_cast %62 : vector<128xf32> to vector<128x1xf32>
    %64 = vector.broadcast %63 : vector<128x1xf32> to vector<128x256xf32>
    %65 = arith.subf %61, %64 : vector<128x256xf32>
    %66 = math.exp %65 : vector<128x256xf32>
    %cst_30 = arith.constant dense<0.000000e+00> : vector<128xf32>
    %67 = vector.multi_reduction <add>, %66, %cst_30 [1] : vector<128x256xf32> to vector<128xf32>
    %68 = vector.shape_cast %67 : vector<128xf32> to vector<128x1xf32>
    %69 = tpu.reciprocal %68 {approx = true} : vector<128x1xf32> -> vector<128x1xf32>
    %70 = vector.broadcast %69 : vector<128x1xf32> to vector<128x256xf32>
    %71 = arith.mulf %66, %70 : vector<128x256xf32>
    %72 = arith.truncf %71 : vector<128x256xf32> to vector<128x256xbf16>
    %cst_31 = arith.constant dense<0.000000e+00> : vector<128x64xf32>
    %73 = tpu.matmul %72, %59, %cst_31 {dimension_numbers = #tpu.dot_dimension_numbers<[1], [0], [0], [1], [0, 0, 1, 1], [], []>} : vector<128x256xbf16>, vector<256x64xbf16>, vector<128x64xf32> -> vector<128x64xf32>
    %74 = tpu.concatenate %25, %41, %57, %73 in 1 : vector<128x64xf32>, vector<128x64xf32>, vector<128x64xf32>, vector<128x64xf32> -> vector<128x256xf32>
    %75 = arith.truncf %74 : vector<128x256xf32> to vector<128x256xbf16>
    %c0_32 = arith.constant 0 : index
    %c0_33 = arith.constant 0 : index
    %76 = vector.load %arg8[%c0_32, %c0_33] : memref<256x256xbf16, #tpu.memory_space<vmem>>, vector<256x256xbf16>
    %cst_34 = arith.constant dense<0.000000e+00> : vector<128x256xf32>
    %77 = tpu.matmul %75, %76, %cst_34 {dimension_numbers = #tpu.dot_dimension_numbers<[1], [0], [0], [1], [0, 0, 1, 1], [], []>} : vector<128x256xbf16>, vector<256x256xbf16>, vector<128x256xf32> -> vector<128x256xf32>
    %c0_35 = arith.constant 0 : index
    %78 = arith.index_cast %4 : i32 to index
    %c0_36 = arith.constant 0 : index
    %79 = vector.load %arg2[%c0_35, %78, %c0_36] : memref<1x256x256xf32, #tpu.memory_space<vmem>>, vector<1x128x256xf32>
    %80 = vector.shape_cast %79 : vector<1x128x256xf32> to vector<128x256xf32>
    %81 = arith.addf %80, %77 : vector<128x256xf32>
    %c0_37 = arith.constant 0 : index
    %c0_38 = arith.constant 0 : index
    %82 = vector.load %arg9[%c0_37, %c0_38] : memref<1x256xf32, #tpu.memory_space<vmem>>, vector<1x256xf32>
    %83 = vector.broadcast %82 : vector<1x256xf32> to vector<128x256xf32>
    %84 = arith.addf %81, %83 : vector<128x256xf32>
    %c0_39 = arith.constant 0 : index
    %c0_40 = arith.constant 0 : index
    %85 = vector.load %arg10[%c0_39, %c0_40] : memref<1x256xf32, #tpu.memory_space<vmem>>, vector<1x256xf32>
    %c0_41 = arith.constant 0 : index
    %c0_42 = arith.constant 0 : index
    %86 = vector.load %arg11[%c0_41, %c0_42] : memref<1x256xf32, #tpu.memory_space<vmem>>, vector<1x256xf32>
    %cst_43 = arith.constant dense<0.000000e+00> : vector<128xf32>
    %87 = vector.multi_reduction <add>, %84, %cst_43 [1] : vector<128x256xf32> to vector<128xf32>
    %88 = vector.shape_cast %87 : vector<128xf32> to vector<128x1xf32>
    %cst_44 = arith.constant 2.560000e+02 : f32
    %89 = vector.broadcast %cst_44 : f32 to vector<128x1xf32>
    %90 = arith.divf %88, %89 : vector<128x1xf32>
    %91 = vector.broadcast %90 : vector<128x1xf32> to vector<128x256xf32>
    %92 = arith.subf %84, %91 : vector<128x256xf32>
    %93 = arith.mulf %92, %92 : vector<128x256xf32>
    %cst_45 = arith.constant dense<0.000000e+00> : vector<128xf32>
    %94 = vector.multi_reduction <add>, %93, %cst_45 [1] : vector<128x256xf32> to vector<128xf32>
    %95 = vector.shape_cast %94 : vector<128xf32> to vector<128x1xf32>
    %cst_46 = arith.constant 2.560000e+02 : f32
    %96 = vector.broadcast %cst_46 : f32 to vector<128x1xf32>
    %97 = arith.divf %95, %96 : vector<128x1xf32>
    %98 = vector.broadcast %90 : vector<128x1xf32> to vector<128x256xf32>
    %99 = arith.subf %84, %98 : vector<128x256xf32>
    %cst_47 = arith.constant 9.99999974E-6 : f32
    %100 = vector.broadcast %cst_47 : f32 to vector<128x1xf32>
    %101 = arith.addf %97, %100 : vector<128x1xf32>
    %102 = math.rsqrt %101 : vector<128x1xf32>
    %103 = vector.broadcast %102 : vector<128x1xf32> to vector<128x256xf32>
    %104 = arith.mulf %99, %103 : vector<128x256xf32>
    %105 = vector.broadcast %85 : vector<1x256xf32> to vector<128x256xf32>
    %106 = arith.mulf %104, %105 : vector<128x256xf32>
    %107 = vector.broadcast %86 : vector<1x256xf32> to vector<128x256xf32>
    %108 = arith.addf %106, %107 : vector<128x256xf32>
    %109 = arith.truncf %108 : vector<128x256xf32> to vector<128x256xbf16>
    %cst_48 = arith.constant 0.000000e+00 : f32
    %110 = vector.broadcast %cst_48 : f32 to vector<128x256xf32>
    %c0_49 = arith.constant 0 : index
    %c0_50 = arith.constant 0 : index
    %111 = vector.load %arg12[%c0_49, %c0_50] : memref<256x512xbf16, #tpu.memory_space<vmem>>, vector<256x512xbf16>
    %cst_51 = arith.constant dense<0.000000e+00> : vector<128x512xf32>
    %112 = tpu.matmul %109, %111, %cst_51 {dimension_numbers = #tpu.dot_dimension_numbers<[1], [0], [0], [1], [0, 0, 1, 1], [], []>} : vector<128x256xbf16>, vector<256x512xbf16>, vector<128x512xf32> -> vector<128x512xf32>
    %c0_52 = arith.constant 0 : index
    %c0_53 = arith.constant 0 : index
    %113 = vector.load %arg13[%c0_52, %c0_53] : memref<1x512xf32, #tpu.memory_space<vmem>>, vector<1x512xf32>
    %114 = vector.broadcast %113 : vector<1x512xf32> to vector<128x512xf32>
    %115 = arith.addf %112, %114 : vector<128x512xf32>
    %cst_54 = arith.constant 5.000000e-01 : f32
    %116 = vector.broadcast %cst_54 : f32 to vector<128x512xf32>
    %117 = arith.mulf %116, %115 : vector<128x512xf32>
    %cst_55 = arith.constant 0.707106769 : f32
    %118 = vector.broadcast %cst_55 : f32 to vector<128x512xf32>
    %119 = arith.mulf %115, %118 : vector<128x512xf32>
    %120 = math.erf %119 : vector<128x512xf32>
    %cst_56 = arith.constant 1.000000e+00 : f32
    %121 = vector.broadcast %cst_56 : f32 to vector<128x512xf32>
    %122 = arith.addf %121, %120 : vector<128x512xf32>
    %123 = arith.mulf %117, %122 : vector<128x512xf32>
    %124 = arith.truncf %123 : vector<128x512xf32> to vector<128x512xbf16>
    %c0_57 = arith.constant 0 : index
    %c0_58 = arith.constant 0 : index
    %125 = vector.load %arg14[%c0_57, %c0_58] : memref<512x256xbf16, #tpu.memory_space<vmem>>, vector<512x256xbf16>
    %cst_59 = arith.constant dense<0.000000e+00> : vector<128x256xf32>
    %126 = tpu.matmul %124, %125, %cst_59 {dimension_numbers = #tpu.dot_dimension_numbers<[1], [0], [0], [1], [0, 0, 1, 1], [], []>} : vector<128x512xbf16>, vector<512x256xbf16>, vector<128x256xf32> -> vector<128x256xf32>
    %127 = arith.addf %110, %126 : vector<128x256xf32>
    %c0_60 = arith.constant 0 : index
    %c0_61 = arith.constant 0 : index
    %128 = vector.load %arg15[%c0_60, %c0_61] : memref<1x256xf32, #tpu.memory_space<vmem>>, vector<1x256xf32>
    %129 = vector.broadcast %128 : vector<1x256xf32> to vector<128x256xf32>
    %130 = arith.addf %127, %129 : vector<128x256xf32>
    %131 = arith.addf %84, %130 : vector<128x256xf32>
    %c0_62 = arith.constant 0 : index
    %c0_63 = arith.constant 0 : index
    %c0_64 = arith.constant 0 : index
    %132 = vector.load %arg16[%c0_62, %c0_63, %c0_64] : memref<1x128x256xf32, #tpu.memory_space<vmem>>, vector<1x128x256xf32>
    %133 = vector.shape_cast %132 : vector<1x128x256xf32> to vector<128x256xf32>
    %134 = vector.shape_cast %131 : vector<128x256xf32> to vector<1x128x256xf32>
    tpu.vector_store %arg16[%c0_62, %c0_63, %c0_64], %134 {strides = array<i32>} : memref<1x128x256xf32, #tpu.memory_space<vmem>>, vector<1x128x256xf32>,
    return
  }
  func.func @transform_0(%arg0: i32, %arg1: i32) -> (i32, i32, i32) {
    %c0_i32 = arith.constant 0 : i32
    %c0_i32_0 = arith.constant 0 : i32
    %c0_i32_1 = arith.constant 0 : i32
    return %arg0, %c0_i32, %c0_i32_0 : i32, i32, i32
  }
  func.func @transform_1(%arg0: i32, %arg1: i32) -> (i32, i32) {
    %c0_i32 = arith.constant 0 : i32
    %c0_i32_0 = arith.constant 0 : i32
    %c0_i32_1 = arith.constant 0 : i32
    return %c0_i32, %c0_i32_0 : i32, i32
  }
  func.func @transform_2(%arg0: i32, %arg1: i32) -> (i32, i32) {
    %c0_i32 = arith.constant 0 : i32
    %c0_i32_0 = arith.constant 0 : i32
    %c0_i32_1 = arith.constant 0 : i32
    return %c0_i32, %c0_i32_0 : i32, i32
  }
  func.func @transform_3(%arg0: i32, %arg1: i32) -> (i32, i32) {
    %c0_i32 = arith.constant 0 : i32
    %c0_i32_0 = arith.constant 0 : i32
    %c0_i32_1 = arith.constant 0 : i32
    return %c0_i32, %c0_i32_0 : i32, i32
  }
  func.func @transform_4(%arg0: i32, %arg1: i32) -> (i32, i32) {
    %c0_i32 = arith.constant 0 : i32
    %c0_i32_0 = arith.constant 0 : i32
    %c0_i32_1 = arith.constant 0 : i32
    return %c0_i32, %c0_i32_0 : i32, i32
  }
  func.func @transform_5(%arg0: i32, %arg1: i32) -> (i32, i32) {
    %c0_i32 = arith.constant 0 : i32
    %c0_i32_0 = arith.constant 0 : i32
    %c0_i32_1 = arith.constant 0 : i32
    return %c0_i32, %c0_i32_0 : i32, i32
  }
  func.func @transform_6(%arg0: i32, %arg1: i32) -> (i32, i32) {
    %c0_i32 = arith.constant 0 : i32
    %c0_i32_0 = arith.constant 0 : i32
    %c0_i32_1 = arith.constant 0 : i32
    return %c0_i32, %c0_i32_0 : i32, i32
  }
  func.func @transform_7(%arg0: i32, %arg1: i32) -> (i32, i32) {
    %c0_i32 = arith.constant 0 : i32
    %c0_i32_0 = arith.constant 0 : i32
    %c0_i32_1 = arith.constant 0 : i32
    return %c0_i32, %c0_i32_0 : i32, i32
  }
  func.func @transform_8(%arg0: i32, %arg1: i32) -> (i32, i32) {
    %c0_i32 = arith.constant 0 : i32
    %c0_i32_0 = arith.constant 0 : i32
    %c0_i32_1 = arith.constant 0 : i32
    return %c0_i32, %c0_i32_0 : i32, i32
  }
  func.func @transform_9(%arg0: i32, %arg1: i32) -> (i32, i32) {
    %c0_i32 = arith.constant 0 : i32
    %c0_i32_0 = arith.constant 0 : i32
    %c0_i32_1 = arith.constant 0 : i32
    return %c0_i32, %c0_i32_0 : i32, i32
  }
  func.func @transform_10(%arg0: i32, %arg1: i32) -> (i32, i32) {
    %c0_i32 = arith.constant 0 : i32
    %c0_i32_0 = arith.constant 0 : i32
    %c0_i32_1 = arith.constant 0 : i32
    return %c0_i32, %c0_i32_0 : i32, i32
  }
  func.func @transform_11(%arg0: i32, %arg1: i32) -> (i32, i32) {
    %c0_i32 = arith.constant 0 : i32
    %c0_i32_0 = arith.constant 0 : i32
    %c0_i32_1 = arith.constant 0 : i32
    return %c0_i32, %c0_i32_0 : i32, i32
  }
  func.func @transform_12(%arg0: i32, %arg1: i32) -> (i32, i32) {
    %c0_i32 = arith.constant 0 : i32
    %c0_i32_0 = arith.constant 0 : i32
    %c0_i32_1 = arith.constant 0 : i32
    return %c0_i32, %c0_i32_0 : i32, i32
  }
  func.func @transform_13(%arg0: i32, %arg1: i32) -> (i32, i32) {
    %c0_i32 = arith.constant 0 : i32
    %c0_i32_0 = arith.constant 0 : i32
    %c0_i32_1 = arith.constant 0 : i32
    return %c0_i32, %c0_i32_0 : i32, i32
  }
  func.func @transform_14(%arg0: i32, %arg1: i32) -> (i32, i32, i32) {
    %c0_i32 = arith.constant 0 : i32
    %c0_i32_0 = arith.constant 0 : i32
    return %arg0, %arg1, %c0_i32 : i32, i32, i32
  }
}

</mosaic_0001>

<bundles_post_ra>
// kernel: tpu_custom_call.1
= control target key start
LH: loop header
LB: loop body
LE: loop exit
PB: predicated region body
PF: predicated region fallthrough
CT: control target
= control target key end

     0   :  { %s15697_s0 = inlined_call_operand.hbm [shape: f32[2,256,256], index: 0, kind: input, shape index: {}]   ;;  %s15698_s1 = inlined_call_operand.hbm [shape: f32[1,256], index: 1, kind: input, shape index: {}]   ;;  %s15699_s2 = inlined_call_operand.vmem [shape: f32[1,256], index: 2, kind: input, shape index: {}]   ;;  %s15700_s3 = inlined_call_operand.hbm [shape: bf16[256,256], index: 3, kind: input, shape index: {}]   ;;  %s15701_s4 = inlined_call_operand.hbm [shape: bf16[256,256], index: 4, kind: input, shape index: {}]   ;;  %s15702_s5 = inlined_call_operand.hbm [shape: bf16[256,256], index: 5, kind: input, shape index: {}]   ;;  %s15703_s6 = inlined_call_operand.hbm [shape: bf16[256,256], index: 6, kind: input, shape index: {}]   ;;  %s15704_s7 = inlined_call_operand.vmem [shape: f32[1,256], index: 7, kind: input, shape index: {}]   ;;  %s15705_s8 = inlined_call_operand.vmem [shape: f32[1,256], index: 8, kind: input, shape index: {}]   ;;  %s15706_s9 = inlined_call_operand.vmem [shape: f32[1,256], index: 9, kind: input, shape index: {}]   ;;  %s15707_s10 = inlined_call_operand.hbm [shape: bf16[256,512], index: 10, kind: input, shape index: {}]   ;;  %s15708_s11 = inlined_call_operand.vmem [shape: f32[1,512], index: 11, kind: input, shape index: {}]   ;;  %s15709_s12 = inlined_call_operand.hbm [shape: bf16[512,256], index: 12, kind: input, shape index: {}]   ;;  %s15710_s13 = inlined_call_operand.vmem [shape: f32[1,256], index: 13, kind: input, shape index: {}]   ;;  %s15711_s14 = inlined_call_operand.hbm [shape: f32[2,256,256], index: 14, kind: output, shape index: {}]  }
   0x1   :  { %15889 = sst [smem:[#allocation161_spill]] %s15698_s1 }
   0x2   :  { %15890 = sst [smem:[#allocation162_spill]] %s15699_s2 }
   0x3   :  { %15891 = sst [smem:[#allocation163_spill]] %s15700_s3 }
   0x4   :  { %15892 = sst [smem:[#allocation164_spill]] %s15701_s4 }
   0x5   :  { %15893 = sst [smem:[#allocation165_spill]] %s15702_s5 }
   0x6   :  { %15894 = sst [smem:[#allocation166_spill]] %s15703_s6 }
   0x7   :  { %15895 = sst [smem:[#allocation167_spill]] %s15704_s7 }
   0x8   :  { %15896 = sst [smem:[#allocation168_spill]] %s15705_s8 }
   0x9   :  { %15897 = sst [smem:[#allocation169_spill]] %s15706_s9 }
   0xa   :  { %15898 = sst [smem:[#allocation170_spill]] %s15707_s10 }
   0xb   :  { %15899 = sst [smem:[#allocation171_spill]] %s15708_s11 }
   0xc   :  { %15900 = sst [smem:[#allocation172_spill]] %s15709_s12 }
   0xd   :  { %15901 = sst [smem:[#allocation173_spill]] %s15710_s13 }
   0xe   :  { %15902 = sst [smem:[#allocation174_spill]] %s15711_s14 }
   0xf   :  { %19 = vsyncpa [#allocation6], 0 }
  0x10   :  { %21 = vsyncpa [#allocation6 + $0x1], 0 }
  0x11   :  { %22 = vsyncpa [#allocation9], 0 }
  0x12   :  { %23 = vsyncpa [#allocation12], 0 }
  0x13   :  { %24 = vsyncpa [#allocation15], 0 }
  0x14   :  { %25 = vsyncpa [#allocation18], 0 }
  0x15   :  { %26 = vsyncpa [#allocation7], 0 }
  0x16   :  { %28 = vsyncpa [#allocation7 + $0x1], 0  ;;  %s11644_s29 = smov 0   ;;  %s11646_s30 = smov 0  }
  0x17   :  { %s11648_s15 = smov 0   ;;  %s11650_s16 = smov 0  }
  0x18   :  { %s11652_s17 = smov 0   ;;  %s11654_s18 = smov 0  }
  0x19   :  { %s11656_s19 = smov 0   ;;  %s11658_s20 = smov 0  }
  0x1a   :  { %s11660_s21 = smov 0   ;;  %s11662_s22 = smov 0  }
  0x1b   :  { %s11664_s23 = smov 0  }
  0x1c LB: > { %15903 = sst [smem:[#allocation26_spill]] %s11539_s20  ;;  %s15713_s24 = sadd.s32 4294967295, %s11551_s23   ;;  %s11551_s23 = sphi %s11664_s23, %s34_s23   ;;  %s11547_s22 = sphi %s11662_s22, %s16378_s22   ;;  %s11543_s21 = sphi %s11660_s21, %s16377_s21   ;;  %s11539_s20 = sphi %s11658_s20, %s16376_s20   ;;  %s11535_s19 = sphi %s11656_s19, %s16375_s19   ;;  %s11531_s18 = sphi %s11654_s18, %s16374_s18   ;;  %s11527_s17 = sphi %s11652_s17, %s16373_s17   ;;  %s11523_s16 = sphi %s11650_s16, %s16372_s16   ;;  %s11519_s15 = sphi %s11648_s15, %s16371_s15   ;;  %s11515_s30 = sphi %s11646_s30, %s16370_s30   ;;  %s11511_s29 = sphi %s11644_s29, %s16369_s29  }
  0x1d   : > { %p8840_p0 = scmp.ge.s32.totalorder %s11551_s23, 1  ;;  %p11703_p1 = scmp.eq.s32.totalorder %s15713_s24, 0 }
  0x1e   : > { %p378_p2 = scmp.lt.s32.totalorder %s11551_s23, 5  ;;  %s11553_s27 = smov [#allocation8]  }
  0x1f   : > { %s15904_s25 = scalar_select %p11703_p1, 1, 0 }
  0x20   : > { %p11708_p3 = pnand %p8840_p0, %p378_p2  ;;  %s391_s28 = sshll.u32 %s11553_s27, 4  ;;  %s392_s28 = int_to_ptr.vmem [resolvable:$true] %s391_s28 }
  0x21   : > { %s11554_s24 = smov [#allocation11]   ;;  %s11555_s13 = smov [#allocation14]  }
  0x22   : > { %s15905_s26 = scalar_select %p11708_p3, 1, 0 }
  0x23   : > { %p9886_p4 = pneg %p11708_p3  ;;  %s417_s20 = sshll.u32 %s11554_s24, 4  ;;  %s418_s20 = int_to_ptr.vmem [resolvable:$true] %s417_s20 }
  0x24   : > { %s443_s11 = sshll.u32 %s11555_s13, 4  ;;  %s11216_s27 = scalar_lea.vmem %s392_s28, 32  ;;  %s444_s11 = int_to_ptr.vmem [resolvable:$true] %s443_s11 }
  0x25   : > { %p11716_p5 = pnand %p9886_p4, %p11703_p1  ;;  %p11217_p7 = scmp.ne.s32.totalorder %s392_s28, %s11216_s27 }
  0x26   : > { %p11224_p10 = scmp.lt.s32.totalorder %s392_s28, %s392_s28  ;;  %p11225_p11 = scmp.lt.s32.totalorder %s11216_s27, %s11216_s27 }
  0x27   : > { %p11722_p6 = pneg %p11716_p5 }
  0x28   : > { %p11226_p12 = por %p11225_p11, %p11224_p10 }
  0x29   : > { %p11219_p8 = pnand %p11217_p7, %p11722_p6 }
  0x2b   : > { %p11220_p9 = pneg %p11219_p8 }
  0x2d   : > { %p11227_p13 = pnand %p11226_p12, %p11220_p9 }
  0x2f   : > { %11230 = shalt.err (!%p11227_p13)
}
  0x30   : > { %s15908_s1 = sld [smem:[#allocation161_spill]]  ;;  %s11242_s8 = scalar_lea.vmem %s418_s20, 4096 }
  0x31   : > { %p11243_p0 = scmp.ne.s32.totalorder %s418_s20, %s11242_s8  ;;  %p11250_p3 = scmp.lt.s32.totalorder %s418_s20, %s418_s20 }
  0x32   : > { %p11251_p7 = scmp.lt.s32.totalorder %s11242_s8, %s11242_s8 }
  0x33   : > { %p11245_p2 = pnand %p11243_p0, %p11722_p6 }
  0x34   : > { %p11252_p8 = por %p11251_p7, %p11250_p3 }
  0x35   : > { %p11246_p4 = pneg %p11245_p2 }
  0x36   : > { %9889 = dma.hbm_to_vmem [thread:$0]  (!%p11716_p5), %s15908_s1, 32, %s392_s28, [#allocation9]  }
  0x37   : > { %p11253_p1 = pnand %p11252_p8, %p11246_p4 }
  0x39   : > { %11256 = shalt.err (!%p11253_p1)
}
  0x3a   : > { %s11556_s27 = smov 128   ;;  %s11557_s7 = smov 8  }
  0x3b   : > { %s15909_s4 = sld [smem:[#allocation164_spill]]  ;;  %s11268_s13 = scalar_lea.vmem %s444_s11, 4096 }
  0x3c   : > { %p11269_p9 = scmp.ne.s32.totalorder %s444_s11, %s11268_s13  ;;  %p11276_p11 = scmp.lt.s32.totalorder %s444_s11, %s444_s11 }
  0x3d   : > { %p11277_p1 = scmp.lt.s32.totalorder %s11268_s13, %s11268_s13 }
  0x3e   : > { %p11271_p10 = pnand %p11269_p9, %p11722_p6 }
  0x3f   : > { %p11278_p12 = por %p11277_p1, %p11276_p11 }
  0x40   : > { %p11272_p3 = pneg %p11271_p10 }
  0x41   : > { %9895 = dma.hbm_to_vmem [thread:$0]  (!%p11716_p5), %s15909_s4, 4096, %s418_s20, [#allocation12], %s11556_s27, %s11556_s27, %s11557_s7  }
  0x42   : > { %p11279_p13 = pnand %p11278_p12, %p11272_p3 }
  0x44   : > { %11282 = shalt.err (!%p11279_p13)
}
  0x45   : > { %s15910_s6 = sld [smem:[#allocation166_spill]]  ;;  %s11558_s20 = smov [#allocation10]  }
  0x46   : > { %s404_s24 = sshll.u32 %s11558_s20, 4  ;;  %s11559_s28 = smov [#allocation13]   ;;  %s405_s24 = int_to_ptr.vmem [resolvable:$true] %s404_s24 }
  0x47   : > { %s430_s4 = sshll.u32 %s11559_s28, 4  ;;  %s11294_s2 = scalar_lea.vmem %s405_s24, 4096  ;;  %s431_s4 = int_to_ptr.vmem [resolvable:$true] %s430_s4 }
  0x48   : > { %p11295_p0 = scmp.ne.s32.totalorder %s405_s24, %s11294_s2  ;;  %p11302_p7 = scmp.lt.s32.totalorder %s405_s24, %s405_s24 }
  0x49   : > { %p11303_p8 = scmp.lt.s32.totalorder %s11294_s2, %s11294_s2 }
  0x4a   : > { %p11297_p2 = pnand %p11295_p0, %p11722_p6 }
  0x4b   : > { %9901 = dma.hbm_to_vmem [thread:$0]  (!%p11716_p5), %s15910_s6, 4096, %s444_s11, [#allocation15], %s11556_s27, %s11556_s27, %s11557_s7  }
  0x4c   : > { %p11298_p4 = pneg %p11297_p2  ;;  %p11304_p9 = por %p11303_p8, %p11302_p7 }
  0x4e   : > { %p11305_p10 = pnand %p11304_p9, %p11298_p4 }
  0x50   : > { %11308 = shalt.err (!%p11305_p10)
}
  0x51   : > { %s15911_s3 = sld [smem:[#allocation163_spill]]  ;;  %s11320_s13 = scalar_lea.vmem %s431_s4, 4096 }
  0x52   : > { %p11321_p3 = scmp.ne.s32.totalorder %s431_s4, %s11320_s13  ;;  %p11328_p12 = scmp.lt.s32.totalorder %s431_s4, %s431_s4 }
  0x53   : > { %p11329_p13 = scmp.lt.s32.totalorder %s11320_s13, %s11320_s13 }
  0x54   : > { %p11323_p11 = pnand %p11321_p3, %p11722_p6 }
  0x55   : > { %p11330_p0 = por %p11329_p13, %p11328_p12 }
  0x56   : > { %p11324_p1 = pneg %p11323_p11 }
  0x57   : > { %9892 = dma.hbm_to_vmem [thread:$0]  (!%p11716_p5), %s15911_s3, 4096, %s405_s24, [#allocation9], %s11556_s27, %s11556_s27, %s11557_s7  }
  0x58   : > { %p11331_p2 = pnand %p11330_p0, %p11324_p1 }
  0x5a   : > { %11334 = shalt.err (!%p11331_p2)
}
  0x5b   : > { %s15912_s5 = sld [smem:[#allocation165_spill]]  ;;  %s11560_s20 = smov [#allocation16]  }
  0x5c   : > { %s465_s24 = sshll.u32 %s11560_s20, 4  ;;  %s466_s24 = int_to_ptr.vmem [resolvable:$true] %s465_s24 }
  0x5d   : > { %s11346_s28 = scalar_lea.vmem %s466_s24, 8192  ;;  %p11354_p9 = scmp.lt.s32.totalorder %s466_s24, %s466_s24 }
  0x5e   : > { %p11347_p4 = scmp.ne.s32.totalorder %s466_s24, %s11346_s28  ;;  %p11355_p10 = scmp.lt.s32.totalorder %s11346_s28, %s11346_s28 }
  0x60   : > { %p11349_p7 = pnand %p11347_p4, %p11722_p6  ;;  %p11356_p3 = por %p11355_p10, %p11354_p9 }
  0x61   : > { %9898 = dma.hbm_to_vmem [thread:$0]  (!%p11716_p5), %s15912_s5, 4096, %s431_s4, [#allocation12], %s11556_s27, %s11556_s27, %s11557_s7  }
  0x62   : > { %p11350_p8 = pneg %p11349_p7 }
  0x64   : > { %p11357_p11 = pnand %p11356_p3, %p11350_p8 }
  0x66   : > { %11360 = shalt.err (!%p11357_p11)
}
  0x67   : > { %s15717_s1 = smov 256   ;;  %s15718_s11 = smov 16  }
  0x68   : > { %s15913_s10 = sld [smem:[#allocation170_spill]]  ;;  %s11563_s2 = smov [#allocation17]  }
  0x69   : > { %s481_s8 = sshll.u32 %s11563_s2, 4  ;;  %s482_s8 = int_to_ptr.vmem [resolvable:$true] %s481_s8 }
  0x6a   : > { %s11372_s20 = scalar_lea.vmem %s482_s8, 8192  ;;  %p11380_p0 = scmp.lt.s32.totalorder %s482_s8, %s482_s8 }
  0x6b   : > { %p11373_p1 = scmp.ne.s32.totalorder %s482_s8, %s11372_s20  ;;  %p11381_p2 = scmp.lt.s32.totalorder %s11372_s20, %s11372_s20 }
  0x6d   : > { %p11375_p12 = pnand %p11373_p1, %p11722_p6  ;;  %p11382_p4 = por %p11381_p2, %p11380_p0 }
  0x6e   : > { %9904 = dma.hbm_to_vmem [thread:$0]  (!%p11716_p5), %s15913_s10, 8192, %s466_s24, [#allocation15], %s15717_s1, %s15717_s1, %s15718_s11  }
  0x6f   : > { %p11376_p13 = pneg %p11375_p12 }
  0x71   : > { %p11383_p7 = pnand %p11382_p4, %p11376_p13 }
  0x73   : > { %11386 = shalt.err (!%p11383_p7)
}
  0x74   : > { %s15914_s12 = sld [smem:[#allocation172_spill]]  ;;  %s8839_s9 = sadd.s32 4294967294, %s11551_s23  }
  0x75   : > { %s43_s14 = sadd.s32 1, %s11543_s21  ;;  %s46_s4 = sadd.s32 1, %s11547_s22 }
  0x76   : > { %p44_p6 = scmp.ge.s32.totalorder %s43_s14, 2  ;;  %s53_s13 = sadd.s32 1, %s11531_s18 }
  0x77   : > { %p60_p8 = scmp.ne.s32.totalorder %s11531_s18, %s11527_s17  ;;  %p61_p9 = scmp.eq.s32.totalorder %s11551_s23, 0 }
  0x78   : > { %s16380_s14 = smov (%p44_p6, %s43_s14), 0  ;;  %s16382_s4 = smov (!%p44_p6, %s46_s4), %s11547_s22 }
  0x79   : > { %15915 = sst [smem:[#allocation27_spill]] %s16380_s14  ;;  %p11803_p10 = por %p61_p9, %p60_p8 }
  0x7a   : > { %9907 = dma.hbm_to_vmem [thread:$0]  (!%p11716_p5), %s15914_s12, 8192, %s482_s8, [#allocation18], %s11556_s27, %s11556_s27, %s11557_s7  }
  0x7b   : > { %p66_p5 = scmp.ne.s32.totalorder %s11527_s17, %s11523_s16  ;;  %p48_p3 = scmp.ge.s32.totalorder %s16382_s4, 2 }
  0x7c   : > { %s350_s27 = ssub.s32 %s11543_s21, %s16380_s14  ;;  %p15917_p11 = scmp.ne.s32.totalorder %s15904_s25, 0 }
  0x7d   : > { %s354_s8 = sadd.s32 1, %s11519_s15  ;;  %s16384_s4 = smov (%p48_p3, %s16382_s4), 0 }
  0x7e   : > { %p11813_p1 = por %p15917_p11, %p66_p5  ;;  %15919 = sst [smem:[#allocation28_spill]] %s16384_s4 }
  0x7f   : > { %p364_p12 = scmp.ne.s32.totalorder %s11519_s15, %s11515_s30  ;;  %s15920_s20 = sadd.s32 4294967295, %s11551_s23  }
  0x80   : > { %p365_p13 = scmp.eq.s32.totalorder %s15920_s20, 3  ;;  %s50_s28 = ssub.s32 %s11547_s22, %s16384_s4 }
  0x81   : > { %p370_p0 = scmp.ne.s32.totalorder %s11515_s30, %s11511_s29  ;;  %p51_p2 = scmp.eq.s32.totalorder %s50_s28, 0 }
  0x82   : > { %s351_s16 = sor.u32 %s350_s27, %s50_s28  ;;  %p11828_p7 = por %p365_p13, %p364_p12 }
  0x83   : > { %p352_p4 = scmp.eq.s32.totalorder %s351_s16, 0  ;;  %p371_p6 = scmp.eq.s32.totalorder %s8839_s9, 3 }
  0x84   : > { %s11833_s1 = scalar_select %p51_p2, %s11531_s18, %s53_s13  }
  0x85   : > { %s11836_s11 = scalar_select %p352_p4, %s11519_s15, %s354_s8  }
  0x86   : > { %p9923_p8 = scmp.lt.s32.totalorder %s11551_s23, 4  ;;  %s498_s3 = sand.u32 1, %s11531_s18  }
  0x87   : > { %s9338_s5 = sshll.u32 %s11547_s22, 13  ;;  %p11841_p9 = por %p371_p6, %p370_p0 }
  0x88   : > { %s8849_s6 = sshll.u32 %s498_s3, 9  ;;  %s508_s28 = scalar_lea.hbm %s15697_s0, %s9338_s5 }
  0x89   : > { %p11850_p5 = pnand %p9923_p8, %p11803_p10  ;;  %s502_s13 = scalar_lea.vmem [#allocation5], %s8849_s6 }
  0x8a   : > { %s509_s9 = sshll.u32 %s502_s13, 4  ;;  %s499_s8 = scalar_lea.sflag [#allocation6], %s498_s3  ;;  %s510_s9 = int_to_ptr.vmem [resolvable:$true] %s509_s9 }
  0x8b   : > { %p11389_p3 = pneg %p11850_p5  ;;  %s11400_s12 = scalar_lea.vmem %s510_s9, 8192 }
  0x8c   : > { %p11401_p11 = scmp.ne.s32.totalorder %s510_s9, %s11400_s12  ;;  %s11564_s4 = smov [#allocation5]  }
  0x8d   : > { %s11405_s14 = sshll.u32 %s11564_s4, 4  ;;  %s11406_s14 = int_to_ptr.vmem [resolvable:$false] %s11405_s14 }
  0x8e   : > { %p11403_p12 = pnand %p11401_p11, %p11389_p3  ;;  %s11407_s5 = scalar_lea.vmem %s11406_s14, 16384 }
  0x8f   : > { %p11408_p0 = scmp.lt.s32.totalorder %s510_s9, %s11406_s14  ;;  %p11409_p10 = scmp.lt.s32.totalorder %s11407_s5, %s11400_s12 }
  0x90   : > { %p11404_p13 = pneg %p11403_p12 }
  0x91   : > { %p11410_p2 = por %p11409_p10, %p11408_p0 }
  0x93   : > { %p11411_p4 = pnand %p11410_p2, %p11404_p13 }
  0x95   : > { %11414 = shalt.err (!%p11411_p4)
}
  0x96   : > { %s15924_s6 = smov 16   ;;  %s15925_s10 = smov 256  }
  0x97   : > { %9911 = dma.hbm_to_vmem [thread:$0]  (!%p11850_p5), %s508_s28, 8192, %s510_s9, %s499_s8, %s15925_s10, %s15925_s10, %s15924_s6  }
  0x98   : > { %p15926_p6 = scmp.ne.s32.totalorder %s15905_s26, 0 }
  0x9a   : > { %521 = sbr.rel (%p15926_p6) target bundleno = 3343 (0xd0f), region = 76 }
  0x9f   : > { %s523_s3 = sand.u32 1, %s11527_s17  }
  0xa0   : > { %s8853_s4 = sshll.u32 %s523_s3, 9  ;;  %s524_s7 = scalar_lea.sflag [#allocation6], %s523_s3 }
  0xa1   : > { %s11864_s27 = scalar_lea.vmem [#allocation5], %s8853_s4 }
  0xa2   : > { %11486 = dma.done.wait (%p11813_p1), %s524_s7, 8192  }
  0xa3   : > { %11488 = vsyncadd (%p11813_p1), %s524_s7, 4294959104  ;;  %p15927_p8 = scmp.ne.s32.totalorder %s15904_s25, 0 }
  0xa5   : > { %11490 = dma.done.wait (%p15927_p8), [#allocation9], 4128  }
  0xa6   : > { %11492 = vsyncadd (%p15927_p8), [#allocation9], 4294963168 }
  0xa7   : > { %11494 = dma.done.wait (%p15927_p8), [#allocation12], 8192  }
  0xa8   : > { %11496 = vsyncadd (%p15927_p8), [#allocation12], 4294959104 }
  0xa9   : > { %11498 = dma.done.wait (%p15927_p8), [#allocation15], 12288  }
  0xaa   : > { %11500 = vsyncadd (%p15927_p8), [#allocation15], 4294955008 }
  0xab   : > { %11502 = dma.done.wait (%p15927_p8), [#allocation18], 8192  }
  0xac   : > { %11504 = vsyncadd (%p15927_p8), [#allocation18], 4294959104  ;;  %s597_s12 = sand.u32 1, %s11515_s30   ;;  %p8862_p1 = scmp.ne.s32.totalorder %s11535_s19, 0 }
  0xad   : > { %s8861_s26 = sshll.u32 %s597_s12, 8 }
  0xae   : > { %s11889_s14 = scalar_lea.vmem [#allocation19], %s8861_s26  ;;  %605 = sbr.rel (%p8862_p1) target bundleno = 893 (0x37d), region = 112 }
  0xb3   : > { %v11893_v0 = vld [vmem:[%s11864_s27] sm:$0xff]  ;;  %v11896_v1 = vld [vmem:[%s11864_s27 + $0x8] sm:$0xff]  ;;  %v11899_v2 = vld [vmem:[%s11864_s27 + $0x10] sm:$0xff]  ;;  %s15950_s28 = sld [smem:[#allocation162_spill]] }
  0xb4   : > { %v672_v3 = vadd.f32 %v11896_v1, %v11893_v0  ;;  %v11904_v4 = vld [vmem:[%s11864_s27 + $0x18] sm:$0xff]  ;;  %v11907_v5 = vld [vmem:[%s11864_s27 + $0x20] sm:$0xff]  ;;  %v11910_v6 = vld [vmem:[%s11864_s27 + $0x28] sm:$0xff] }
  0xb5   : > { %v678_v7 = vadd.f32 %v11910_v6, %v11907_v5  ;;  %v11915_v8 = vld [vmem:[%s11864_s27 + $0x30] sm:$0xff]  ;;  %v11918_v9 = vld [vmem:[%s11864_s27 + $0x38] sm:$0xff]  ;;  %v675_v10 = vadd.f32 %v11904_v4, %v11899_v2  ;;  %v11925_v12 = vld [vmem:[%s11864_s27 + $0x40] sm:$0xff] }
  0xb6   : > { %673 = vadd.xlane.f32.xlu0 %v672_v3  ;;  %v681_v11 = vadd.f32 %v11918_v9, %v11915_v8  ;;  %v11928_v13 = vld [vmem:[%s11864_s27 + $0x48] sm:$0xff]  ;;  %v11931_v14 = vld [vmem:[%s11864_s27 + $0x50] sm:$0xff]  ;;  %v11934_v15 = vld [vmem:[%s11864_s27 + $0x58] sm:$0xff] }
  0xb7   : > { %679 = vadd.xlane.f32.xlu1 %v678_v7  ;;  %v684_v16 = vadd.f32 %v11928_v13, %v11925_v12  ;;  %v687_v17 = vadd.f32 %v11934_v15, %v11931_v14  ;;  %v11941_v18 = vld [vmem:[%s11864_s27 + $0x60] sm:$0xff]  ;;  %v11944_v19 = vld [vmem:[%s11864_s27 + $0x68] sm:$0xff]  ;;  %v11947_v20 = vld [vmem:[%s11864_s27 + $0x70] sm:$0xff] }
  0xb8   : > { %v11950_v21 = vld [vmem:[%s11864_s27 + $0x78] sm:$0xff]  ;;  %v690_v22 = vadd.f32 %v11944_v19, %v11941_v18  ;;  %v11957_v24 = vld [vmem:[%s11864_s27 + $0x80] sm:$0xff]  ;;  %v11960_v25 = vld [vmem:[%s11864_s27 + $0x88] sm:$0xff] }
  0xb9   : > { %v693_v23 = vadd.f32 %v11950_v21, %v11947_v20  ;;  %v11963_v26 = vld [vmem:[%s11864_s27 + $0x90] sm:$0xff]  ;;  %v11966_v27 = vld [vmem:[%s11864_s27 + $0x98] sm:$0xff]  ;;  %v11969_v28 = vld [vmem:[%s11864_s27 + $0xa0] sm:$0xff]  ;;  %v696_v30 = vadd.f32 %v11960_v25, %v11957_v24 }
  0xba   : > { %676 = vadd.xlane.f32.xlu0 %v675_v10  ;;  %v11972_v29 = vld [vmem:[%s11864_s27 + $0xa8] sm:$0xff]  ;;  %v11977_v31 = vld [vmem:[%s11864_s27 + $0xb0] sm:$0xff]  ;;  %v11980_v32 = vld [vmem:[%s11864_s27 + $0xb8] sm:$0xff]  ;;  %v699_v33 = vadd.f32 %v11966_v27, %v11963_v26 }
  0xbb   : > { %682 = vadd.xlane.f32.xlu1 %v681_v11  ;;  %v11985_v34 = vld [vmem:[%s11864_s27 + $0xc0] sm:$0xff]  ;;  %v11988_v35 = vld [vmem:[%s11864_s27 + $0xc8] sm:$0xff]  ;;  %v702_v36 = vadd.f32 %v11972_v29, %v11969_v28  ;;  %v705_v37 = vadd.f32 %v11980_v32, %v11977_v31  ;;  %v11995_v38 = vld [vmem:[%s11864_s27 + $0xd0] sm:$0xff] }
  0xbc   : > { %v11998_v39 = vld [vmem:[%s11864_s27 + $0xd8] sm:$0xff]  ;;  %v12001_v40 = vld [vmem:[%s11864_s27 + $0xe0] sm:$0xff]  ;;  %v12004_v41 = vld [vmem:[%s11864_s27 + $0xe8] sm:$0xff]  ;;  %v708_v42 = vadd.f32 %v11988_v35, %v11985_v34 }
  0xbd   : > { %v12009_v43 = vld [vmem:[%s11864_s27 + $0xf0] sm:$0xff]  ;;  %v12012_v44 = vld [vmem:[%s11864_s27 + $0xf8] sm:$0xff]  ;;  %v711_v45 = vadd.f32 %v11998_v39, %v11995_v38  ;;  %v12017_v46 = vld [vmem:[%s11864_s27 + $0x100] sm:$0xff]  ;;  %v714_v48 = vadd.f32 %v12004_v41, %v12001_v40 }
  0xbe   : > { %685 = vadd.xlane.f32.xlu0 %v684_v16  ;;  %v12020_v47 = vld [vmem:[%s11864_s27 + $0x108] sm:$0xff]  ;;  %v717_v49 = vadd.f32 %v12012_v44, %v12009_v43  ;;  %v12027_v50 = vld [vmem:[%s11864_s27 + $0x110] sm:$0xff]  ;;  %v12030_v51 = vld [vmem:[%s11864_s27 + $0x118] sm:$0xff] }
  0xbf   : > { %688 = vadd.xlane.f32.xlu1 %v687_v17  ;;  %v12033_v52 = vld [vmem:[%s11864_s27 + $0x120] sm:$0xff]  ;;  %v12036_v53 = vld [vmem:[%s11864_s27 + $0x128] sm:$0xff]  ;;  %v720_v54 = vadd.f32 %v12020_v47, %v12017_v46  ;;  %v723_v55 = vadd.f32 %v12030_v51, %v12027_v50  ;;  %v12043_v56 = vld [vmem:[%s11864_s27 + $0x130] sm:$0xff] }
  0xc0   : > { %v12046_v57 = vld [vmem:[%s11864_s27 + $0x138] sm:$0xff]  ;;  %v726_v58 = vadd.f32 %v12036_v53, %v12033_v52  ;;  %v10040_v3 = vld [vmem:[#allocation11 + $0x64] ss:$8 sps:$4 sm:$0xff]   ;;  %v10044_v10 = vld [vmem:[#allocation11 + $0x60] ss:$8 sps:$4 sm:$0xff]  }
  0xc1   : > { %v729_v59 = vadd.f32 %v12046_v57, %v12043_v56  ;;  %v10034_v60 = vld [vmem:[#allocation11 + $0x74] ss:$8 sps:$4 sm:$0xff]   ;;  %v10038_v62 = vld [vmem:[#allocation11 + $0x70] ss:$8 sps:$4 sm:$0xff]   ;;  %v10042_v7 = vld [vmem:[#allocation13 + $0x64] ss:$8 sps:$4 sm:$0xff]  }
  0xc2   : > { %691 = vadd.xlane.f32.xlu0 %v690_v22  ;;  %v10036_v61 = vld [vmem:[#allocation13 + $0x74] ss:$8 sps:$4 sm:$0xff]   ;;  %v10039_v63 = vld [vmem:[#allocation13 + $0x70] ss:$8 sps:$4 sm:$0xff]   ;;  %1751 = vmatprep.subr.bf16.mxu0 %v10034_v60  ;;  %v10045_v11 = vld [vmem:[#allocation13 + $0x60] ss:$8 sps:$4 sm:$0xff]  }
  0xc3   : > { %694 = vadd.xlane.f32.xlu1 %v693_v23  ;;  %2360 = vmatprep.subr.bf16.mxu1 %v10036_v61  ;;  %v10046_v16 = vld [vmem:[#allocation11 + $0x54] ss:$8 sps:$4 sm:$0xff]   ;;  %v10050_v22 = vld [vmem:[#allocation11 + $0x50] ss:$8 sps:$4 sm:$0xff]  }
  0xc4   : > { %1752 = vmatpush1.bf16.msra.mxu0 %v10038_v62  ;;  %2361 = vmatpush1.bf16.msra.mxu1 %v10039_v63  ;;  %v10048_v17 = vld [vmem:[#allocation13 + $0x54] ss:$8 sps:$4 sm:$0xff]   ;;  %v10051_v23 = vld [vmem:[#allocation13 + $0x50] ss:$8 sps:$4 sm:$0xff]  }
  0xc5   : > { %1753 = vmatprep.subr.bf16.mxu0 %v10040_v3  ;;  %2362 = vmatprep.subr.bf16.mxu1 %v10042_v7  ;;  %v10070_v60 = vld [vmem:[#allocation11 + $0x14] ss:$8 sps:$4 sm:$0xff]   ;;  %v10074_v62 = vld [vmem:[#allocation11 + $0x10] ss:$8 sps:$4 sm:$0xff]   ;;  %v10076_v3 = vld [vmem:[#allocation11 + $0x4] ss:$8 sps:$4 sm:$0xff]  }
  0xc6   : > { %697 = vadd.xlane.f32.xlu0 %v696_v30  ;;  %v10052_v30 = vld [vmem:[#allocation11 + $0x44] ss:$8 sps:$4 sm:$0xff]   ;;  %v10072_v61 = vld [vmem:[#allocation13 + $0x14] ss:$8 sps:$4 sm:$0xff]   ;;  %v10075_v63 = vld [vmem:[#allocation13 + $0x10] ss:$8 sps:$4 sm:$0xff]  }
  0xc7   : > { %700 = vadd.xlane.f32.xlu1 %v699_v33  ;;  %v10054_v33 = vld [vmem:[#allocation13 + $0x44] ss:$8 sps:$4 sm:$0xff]  }
  0xc8   : > { %1754 = vmatpush1.bf16.msra.mxu0 %v10044_v10  ;;  %2363 = vmatpush1.bf16.msra.mxu1 %v10045_v11  ;;  %v10078_v7 = vld [vmem:[#allocation13 + $0x4] ss:$8 sps:$4 sm:$0xff]   ;;  %v10080_v10 = vld [vmem:[#allocation11] ss:$8 sps:$4 sm:$0xff]  }
  0xc9   : > { %1755 = vmatprep.subr.bf16.mxu0 %v10046_v16  ;;  %2364 = vmatprep.subr.bf16.mxu1 %v10048_v17  ;;  %v10081_v11 = vld [vmem:[#allocation13] ss:$8 sps:$4 sm:$0xff]   ;;  %v10082_v16 = vld [vmem:[#allocation11 + $0xf4] ss:$8 sps:$4 sm:$0xff]  }
  0xca   : > { %703 = vadd.xlane.f32.xlu0 %v702_v36  ;;  %v10056_v36 = vld [vmem:[#allocation11 + $0x40] ss:$8 sps:$4 sm:$0xff]   ;;  %v10084_v17 = vld [vmem:[#allocation13 + $0xf4] ss:$8 sps:$4 sm:$0xff]  }
  0xcb   : > { %706 = vadd.xlane.f32.xlu1 %v705_v37  ;;  %v10057_v37 = vld [vmem:[#allocation13 + $0x40] ss:$8 sps:$4 sm:$0xff]  }
  0xcc   : > { %1756 = vmatpush1.bf16.msra.mxu0 %v10050_v22  ;;  %2365 = vmatpush1.bf16.msra.mxu1 %v10051_v23 }
  0xcd   : > { %1757 = vmatprep.subr.bf16.mxu0 %v10052_v30  ;;  %2366 = vmatprep.subr.bf16.mxu1 %v10054_v33 }
  0xce   : > { %709 = vadd.xlane.f32.xlu0 %v708_v42  ;;  %v10058_v42 = vld [vmem:[#allocation11 + $0x34] ss:$8 sps:$4 sm:$0xff]  }
  0xcf   : > { %712 = vadd.xlane.f32.xlu1 %v711_v45  ;;  %v10060_v45 = vld [vmem:[#allocation13 + $0x34] ss:$8 sps:$4 sm:$0xff]  }
  0xd0   : > { %1758 = vmatpush1.bf16.msra.mxu0 %v10056_v36  ;;  %2367 = vmatpush1.bf16.msra.mxu1 %v10057_v37 }
  0xd1   : > { %1759 = vmatprep.subr.bf16.mxu0 %v10058_v42  ;;  %2368 = vmatprep.subr.bf16.mxu1 %v10060_v45 }
  0xd2   : > { %715 = vadd.xlane.f32.xlu0 %v714_v48  ;;  %v10062_v48 = vld [vmem:[#allocation11 + $0x30] ss:$8 sps:$4 sm:$0xff]  }
  0xd3   : > { %718 = vadd.xlane.f32.xlu1 %v717_v49  ;;  %v10063_v49 = vld [vmem:[#allocation13 + $0x30] ss:$8 sps:$4 sm:$0xff]  }
  0xd4   : > { %1760 = vmatpush1.bf16.msra.mxu0 %v10062_v48  ;;  %2369 = vmatpush1.bf16.msra.mxu1 %v10063_v49 }
  0xd6   : > { %721 = vadd.xlane.f32.xlu0 %v720_v54  ;;  %v10064_v54 = vld [vmem:[#allocation11 + $0x24] ss:$8 sps:$4 sm:$0xff]  }
  0xd7   : > { %724 = vadd.xlane.f32.xlu1 %v723_v55  ;;  %v10066_v55 = vld [vmem:[#allocation13 + $0x24] ss:$8 sps:$4 sm:$0xff]   ;;  %1761 = vmatprep.subr.bf16.mxu0 %v10064_v54 }
  0xd8   : > { %2370 = vmatprep.subr.bf16.mxu1 %v10066_v55 }
  0xda   : > { %727 = vadd.xlane.f32.xlu0 %v726_v58  ;;  %v10068_v58 = vld [vmem:[#allocation11 + $0x20] ss:$8 sps:$4 sm:$0xff]  }
  0xdb   : > { %730 = vadd.xlane.f32.xlu1 %v729_v59  ;;  %v10069_v59 = vld [vmem:[#allocation13 + $0x20] ss:$8 sps:$4 sm:$0xff]   ;;  %1762 = vmatpush1.bf16.msra.mxu0 %v10068_v58 }
  0xdc   : > { %2371 = vmatpush1.bf16.msra.mxu1 %v10069_v59  ;;  %1763 = vmatprep.subr.bf16.mxu0 %v10070_v60 }
  0xdd   : > { %2372 = vmatprep.subr.bf16.mxu1 %v10072_v61 }
  0xdf   : > { %1764 = vmatpush1.bf16.msra.mxu0 %v10074_v62 }
  0xe0   : > { %2373 = vmatpush1.bf16.msra.mxu1 %v10075_v63  ;;  %1765 = vmatprep.subr.bf16.mxu0 %v10076_v3 }
  0xe1   : > { %2374 = vmatprep.subr.bf16.mxu1 %v10078_v7 }
  0xe3   : > { %1766 = vmatpush1.bf16.msra.mxu0 %v10080_v10 }
  0xe4   : > { %2375 = vmatpush1.bf16.msra.mxu1 %v10081_v11  ;;  %1767 = vmatprep.subr.bf16.mxu0 %v10082_v16  ;;  %v12097_v11 = vld [vmem:[%s11864_s27 + $0x150] sm:$0xff]  ;;  %v12100_v16 = vld [vmem:[%s11864_s27 + $0x158] sm:$0xff] }
  0xe5   : > { %2376 = vmatprep.subr.bf16.mxu1 %v10084_v17 }
 0x13f   : > { %v674_v22 = vpop.xlane.xlu0 %673 }
 0x140   : > { %v769_v23 = vmul.f32 0.00390625, %v674_v22  ;;  %v680_v30 = vpop.xlane.xlu1 %679 }
 0x141   : > { %v771_v33 = vmul.f32 0.00390625, %v680_v30 }
 0x142   : > { %v12053_v36 = vsub.f32 %v11893_v0, %v769_v23  ;;  %v12056_v37 = vsub.f32 %v11896_v1, %v769_v23  ;;  %v12069_v0 = vld [vmem:[%s11864_s27 + $0x140] sm:$0xff]  ;;  %v12072_v1 = vld [vmem:[%s11864_s27 + $0x148] sm:$0xff] }
 0x143   : > { %v677_v42 = vpop.xlane.xlu0 %676  ;;  %v12059_v45 = vsub.f32 %v11907_v5, %v771_v33  ;;  %v12062_v48 = vsub.f32 %v11910_v6, %v771_v33  ;;  %v732_v62 = vadd.f32 %v12072_v1, %v12069_v0 }
 0x144   : > { %v770_v49 = vmul.f32 0.00390625, %v677_v42  ;;  %v865_v54 = vmul.f32 %v12053_v36, %v12053_v36  ;;  %v866_v55 = vmul.f32 %v12056_v37, %v12056_v37  ;;  %v683_v58 = vpop.xlane.xlu1 %682 }
 0x145   : > { %v772_v59 = vmul.f32 0.00390625, %v683_v58  ;;  %v869_v3 = vmul.f32 %v12059_v45, %v12059_v45  ;;  %v870_v7 = vmul.f32 %v12062_v48, %v12062_v48 }
 0x146   : > { %v12075_v5 = vsub.f32 %v11899_v2, %v770_v49  ;;  %v12078_v6 = vsub.f32 %v11904_v4, %v770_v49  ;;  %v929_v60 = vadd.f32 %v866_v55, %v865_v54  ;;  %v12113_v54 = vld [vmem:[%s11864_s27 + $0x160] sm:$0xff]  ;;  %v12116_v55 = vld [vmem:[%s11864_s27 + $0x168] sm:$0xff] }
 0x147   : > { %v12081_v61 = vsub.f32 %v11915_v8, %v772_v59  ;;  %v686_v63 = vpop.xlane.xlu0 %685  ;;  %v12090_v2 = vsub.f32 %v11918_v9, %v772_v59  ;;  %v935_v23 = vadd.f32 %v870_v7, %v869_v3  ;;  %v735_v9 = vadd.f32 %v12100_v16, %v12097_v11  ;;  %v12132_v7 = vld [vmem:[%s11864_s27 + $0x178] sm:$0xff] }
 0x148   : > { %930 = vadd.xlane.f32.xlu0 %v929_v60  ;;  %v867_v4 = vmul.f32 %v12075_v5, %v12075_v5  ;;  %v868_v8 = vmul.f32 %v12078_v6, %v12078_v6  ;;  %v773_v10 = vmul.f32 0.00390625, %v686_v63  ;;  %v689_v17 = vpop.xlane.xlu1 %688  ;;  %v12129_v63 = vld [vmem:[%s11864_s27 + $0x170] sm:$0xff] }
 0x149   : > { %15928 = vst [vmem:[#allocation29_spill] sm:$0xff] %v12081_v61  ;;  %v774_v30 = vmul.f32 0.00390625, %v689_v17  ;;  %v871_v33 = vmul.f32 %v12081_v61, %v12081_v61  ;;  %v872_v58 = vmul.f32 %v12090_v2, %v12090_v2  ;;  %v741_v17 = vadd.f32 %v12132_v7, %v12129_v63 }
 0x14a   : > { %v932_v22 = vadd.f32 %v868_v8, %v867_v4  ;;  %v12107_v42 = vsub.f32 %v11925_v12, %v773_v10  ;;  %v12110_v49 = vsub.f32 %v11928_v13, %v773_v10  ;;  %v738_v12 = vadd.f32 %v12116_v55, %v12113_v54  ;;  %v10086_v8 = vld [vmem:[#allocation11 + $0xf0] ss:$8 sps:$4 sm:$0xff]  }
 0x14b   : > { %v692_v59 = vpop.xlane.xlu0 %691  ;;  %v12121_v60 = vsub.f32 %v11931_v14, %v774_v30  ;;  %v938_v13 = vadd.f32 %v872_v58, %v871_v33  ;;  %v10087_v10 = vld [vmem:[#allocation13 + $0xf0] ss:$8 sps:$4 sm:$0xff]   ;;  %1768 = vmatpush2.bf16.msra.mxu0 %v10086_v8  ;;  %v10088_v33 = vld [vmem:[#allocation11 + $0xe4] ss:$8 sps:$4 sm:$0xff]  }
 0x14c   : > { %733 = vadd.xlane.f32.xlu0 %v732_v62  ;;  %933 = vadd.xlane.f32.xlu1 %v932_v22  ;;  %15929 = vst [vmem:[#allocation30_spill] sm:$0xff] %v12107_v42  ;;  %15930 = vst [vmem:[#allocation31_spill] sm:$0xff] %v12110_v49  ;;  %v12124_v62 = vsub.f32 %v11934_v15, %v774_v30  ;;  %v775_v3 = vmul.f32 0.00390625, %v692_v59  ;;  %v873_v4 = vmul.f32 %v12107_v42, %v12107_v42  ;;  %v695_v15 = vpop.xlane.xlu1 %694  ;;  %v12145_v30 = vld [vmem:[%s11864_s27 + $0x180] sm:$0xff] }
 0x14d   : > { %15931 = vst [vmem:[#allocation32_spill] sm:$0xff] %v12121_v60  ;;  %v874_v14 = vmul.f32 %v12110_v49, %v12110_v49  ;;  %2377 = vmatpush2.bf16.msra.mxu1 %v10087_v10  ;;  %v776_v22 = vmul.f32 0.00390625, %v695_v15  ;;  %v10090_v58 = vld [vmem:[#allocation13 + $0xe4] ss:$8 sps:$4 sm:$0xff]   ;;  %v10093_v42 = vld [vmem:[#allocation13 + $0xe0] ss:$8 sps:$4 sm:$0xff]   ;;  %1769 = vmatprep.subr.bf16.mxu0 %v10088_v33 }
 0x14e   : > { %15932 = vst [vmem:[#allocation33_spill] sm:$0xff] %v12124_v62  ;;  %v12148_v59 = vsub.f32 %v11941_v18, %v775_v3  ;;  %v12151_v8 = vsub.f32 %v11944_v19, %v775_v3  ;;  %v12154_v10 = vld [vmem:[%s11864_s27 + $0x188] sm:$0xff]  ;;  %2378 = vmatprep.subr.bf16.mxu1 %v10090_v58  ;;  %v10094_v3 = vld [vmem:[#allocation11 + $0xd4] ss:$8 sps:$4 sm:$0xff]   ;;  %v10099_v58 = vld [vmem:[#allocation13 + $0xd0] ss:$8 sps:$4 sm:$0xff]  }
 0x14f   : > { %v941_v15 = vadd.f32 %v874_v14, %v873_v4  ;;  %v12160_v18 = vsub.f32 %v11950_v21, %v776_v22  ;;  %v744_v19 = vadd.f32 %v12154_v10, %v12145_v30  ;;  %v10096_v4 = vld [vmem:[#allocation13 + $0xd4] ss:$8 sps:$4 sm:$0xff]   ;;  %v10102_v49 = vld [vmem:[#allocation13 + $0xc4] ss:$8 sps:$4 sm:$0xff]  }
 0x150   : > { %936 = vadd.xlane.f32.xlu0 %v935_v23  ;;  %736 = vadd.xlane.f32.xlu1 %v735_v9  ;;  %v875_v23 = vmul.f32 %v12121_v60, %v12121_v60  ;;  %v876_v9 = vmul.f32 %v12124_v62, %v12124_v62  ;;  %15933 = vst [vmem:[#allocation34_spill] sm:$0xff] %v12148_v59  ;;  %15934 = vst [vmem:[#allocation35_spill] sm:$0xff] %v12151_v8  ;;  %v10092_v60 = vld [vmem:[#allocation11 + $0xe0] ss:$8 sps:$4 sm:$0xff]   ;;  %v698_v62 = vpop.xlane.xlu0 %697 }
 0x151   : > { %1770 = vmatpush2.bf16.msra.mxu0 %v10092_v60  ;;  %2379 = vmatpush2.bf16.msra.mxu1 %v10093_v42  ;;  %15936 = vst [vmem:[#allocation37_spill] sm:$0xff] %v12160_v18  ;;  %v777_v33 = vmul.f32 0.00390625, %v698_v62  ;;  %v12168_v60 = vld [vmem:[%s11864_s27 + $0x198] sm:$0xff]  ;;  %v878_v21 = vmul.f32 %v12151_v8, %v12151_v8  ;;  %v701_v42 = vpop.xlane.xlu1 %700  ;;  %v10100_v8 = vld [vmem:[#allocation11 + $0xc4] ss:$8 sps:$4 sm:$0xff]  }
 0x152   : > { %v944_v14 = vadd.f32 %v876_v9, %v875_v23  ;;  %1771 = vmatprep.subr.bf16.mxu0 %v10094_v3  ;;  %2380 = vmatprep.subr.bf16.mxu1 %v10096_v4  ;;  %v778_v62 = vmul.f32 0.00390625, %v701_v42  ;;  %v880_v9 = vmul.f32 %v12160_v18, %v12160_v18 }
 0x153   : > { %v12184_v3 = vsub.f32 %v11957_v24, %v777_v33  ;;  %v12187_v4 = vsub.f32 %v11960_v25, %v777_v33 }
 0x154   : > { %739 = vadd.xlane.f32.xlu0 %v738_v12  ;;  %939 = vadd.xlane.f32.xlu1 %v938_v13  ;;  %v12157_v12 = vsub.f32 %v11947_v20, %v776_v22  ;;  %v12165_v13 = vld [vmem:[%s11864_s27 + $0x190] sm:$0xff]  ;;  %v877_v20 = vmul.f32 %v12148_v59, %v12148_v59  ;;  %v704_v59 = vpop.xlane.xlu0 %703  ;;  %v12196_v24 = vsub.f32 %v11966_v27, %v778_v62 }
 0x155   : > { %v10098_v22 = vld [vmem:[#allocation11 + $0xd0] ss:$8 sps:$4 sm:$0xff]   ;;  %2381 = vmatpush2.bf16.msra.mxu1 %v10099_v58  ;;  %15937 = vst [vmem:[#allocation38_spill] sm:$0xff] %v12184_v3  ;;  %15938 = vst [vmem:[#allocation39_spill] sm:$0xff] %v12187_v4  ;;  %v10104_v58 = vld [vmem:[#allocation11 + $0xc0] ss:$8 sps:$4 sm:$0xff]   ;;  %v707_v18 = vpop.xlane.xlu1 %706  ;;  %v882_v27 = vmul.f32 %v12187_v4, %v12187_v4 }
 0x156   : > { %15935 = vst [vmem:[#allocation36_spill] sm:$0xff] %v12157_v12  ;;  %1772 = vmatpush2.bf16.msra.mxu0 %v10098_v22  ;;  %v879_v23 = vmul.f32 %v12157_v12, %v12157_v12  ;;  %v947_v42 = vadd.f32 %v878_v21, %v877_v20  ;;  %v12190_v22 = vld [vmem:[%s11864_s27 + $0x1a8] sm:$0xff]  ;;  %2382 = vmatprep.subr.bf16.mxu1 %v10102_v49  ;;  %15940 = vst [vmem:[#allocation41_spill] sm:$0xff] %v12196_v24  ;;  %v779_v49 = vmul.f32 0.00390625, %v704_v59  ;;  %v10108_v21 = vld [vmem:[#allocation13 + $0xb4] ss:$8 sps:$4 sm:$0xff]  }
 0x157   : > { %v10105_v12 = vld [vmem:[#allocation13 + $0xc0] ss:$8 sps:$4 sm:$0xff]   ;;  %1773 = vmatprep.subr.bf16.mxu0 %v10100_v8  ;;  %v12204_v8 = vld [vmem:[%s11864_s27 + $0x1b8] sm:$0xff]  ;;  %v780_v59 = vmul.f32 0.00390625, %v707_v18  ;;  %v10112_v4 = vld [vmem:[#allocation11 + $0xa4] ss:$8 sps:$4 sm:$0xff]  }
 0x158   : > { %742 = vadd.xlane.f32.xlu1 %v741_v17  ;;  %942 = vadd.xlane.f32.xlu0 %v941_v15  ;;  %v747_v17 = vadd.f32 %v12168_v60, %v12165_v13  ;;  %v12181_v15 = vld [vmem:[%s11864_s27 + $0x1a0] sm:$0xff]  ;;  %v710_v33 = vpop.xlane.xlu0 %709  ;;  %v950_v20 = vadd.f32 %v880_v9, %v879_v23  ;;  %15942 = vst [vmem:[#allocation43_spill] sm:$0xff] %v12204_v8  ;;  %v12226_v18 = vld [vmem:[%s11864_s27 + $0x1c8] sm:$0xff] }
 0x159   : > { %2383 = vmatpush2.bf16.msra.mxu1 %v10105_v12  ;;  %v750_v25 = vadd.f32 %v12190_v22, %v12181_v15  ;;  %v10106_v12 = vld [vmem:[#allocation11 + $0xb4] ss:$8 sps:$4 sm:$0xff]   ;;  %v713_v61 = vpop.xlane.xlu1 %712  ;;  %v884_v9 = vmul.f32 %v12196_v24, %v12196_v24  ;;  %v10116_v24 = vld [vmem:[#allocation11 + $0xa0] ss:$8 sps:$4 sm:$0xff]  }
 0x15a   : > { %1774 = vmatpush2.bf16.msra.mxu0 %v10104_v58  ;;  %v10111_v58 = vld [vmem:[#allocation13 + $0xb0] ss:$8 sps:$4 sm:$0xff]   ;;  %2384 = vmatprep.subr.bf16.mxu1 %v10108_v21 }
 0x15b   : > { %1775 = vmatprep.subr.bf16.mxu0 %v10106_v12  ;;  %v12223_v12 = vsub.f32 %v11972_v29, %v779_v49 }
 0x15c   : > { %945 = vadd.xlane.f32.xlu1 %v944_v14  ;;  %745 = vadd.xlane.f32.xlu0 %v744_v19  ;;  %v12193_v14 = vsub.f32 %v11963_v26, %v778_v62  ;;  %v12201_v19 = vld [vmem:[%s11864_s27 + $0x1b0] sm:$0xff]  ;;  %v881_v26 = vmul.f32 %v12184_v3, %v12184_v3  ;;  %v12220_v3 = vsub.f32 %v11969_v28, %v779_v49 }
 0x15d   : > { %15941 = vst [vmem:[#allocation42_spill] sm:$0xff] %v12201_v19  ;;  %v10110_v62 = vld [vmem:[#allocation11 + $0xb0] ss:$8 sps:$4 sm:$0xff]   ;;  %2385 = vmatpush2.bf16.msra.mxu1 %v10111_v58  ;;  %15944 = vst [vmem:[#allocation45_spill] sm:$0xff] %v12223_v12  ;;  %v12232_v28 = vsub.f32 %v11980_v32, %v780_v59  ;;  %v719_v32 = vpop.xlane.xlu1 %718 }
 0x15e   : > { %15939 = vst [vmem:[#allocation40_spill] sm:$0xff] %v12193_v14  ;;  %v883_v23 = vmul.f32 %v12193_v14, %v12193_v14  ;;  %1776 = vmatpush2.bf16.msra.mxu0 %v10110_v62  ;;  %15943 = vst [vmem:[#allocation44_spill] sm:$0xff] %v12220_v3  ;;  %v953_v21 = vadd.f32 %v882_v27, %v881_v26  ;;  %v10114_v14 = vld [vmem:[#allocation13 + $0xa4] ss:$8 sps:$4 sm:$0xff]   ;;  %v10120_v27 = vld [vmem:[#allocation13 + $0x94] ss:$8 sps:$4 sm:$0xff]  }
 0x15f   : > { %1777 = vmatprep.subr.bf16.mxu0 %v10112_v4  ;;  %2386 = vmatprep.subr.bf16.mxu1 %v10114_v14  ;;  %15946 = vst [vmem:[#allocation47_spill] sm:$0xff] %v12232_v28  ;;  %v12237_v26 = vld [vmem:[%s11864_s27 + $0x1d0] sm:$0xff]  ;;  %v885_v4 = vmul.f32 %v12220_v3, %v12220_v3  ;;  %v12244_v62 = vld [vmem:[%s11864_s27 + $0x1d8] sm:$0xff] }
 0x160   : > { %748 = vadd.xlane.f32.xlu1 %v747_v17  ;;  %948 = vadd.xlane.f32.xlu0 %v947_v42  ;;  %v753_v17 = vadd.f32 %v12204_v8, %v12201_v19  ;;  %v12217_v42 = vld [vmem:[%s11864_s27 + $0x1c0] sm:$0xff]  ;;  %v716_v8 = vpop.xlane.xlu0 %715  ;;  %v956_v49 = vadd.f32 %v884_v9, %v883_v23 }
 0x161   : > { %v10117_v19 = vld [vmem:[#allocation13 + $0xa0] ss:$8 sps:$4 sm:$0xff]   ;;  %v756_v29 = vadd.f32 %v12226_v18, %v12217_v42  ;;  %v10118_v14 = vld [vmem:[#allocation11 + $0x94] ss:$8 sps:$4 sm:$0xff]   ;;  %v10126_v3 = vld [vmem:[#allocation13 + $0x84] ss:$8 sps:$4 sm:$0xff]  }
 0x162   : > { %1778 = vmatpush2.bf16.msra.mxu0 %v10116_v24  ;;  %2387 = vmatpush2.bf16.msra.mxu1 %v10117_v19  ;;  %v10122_v24 = vld [vmem:[#allocation11 + $0x90] ss:$8 sps:$4 sm:$0xff]   ;;  %v12254_v23 = vld [vmem:[%s11864_s27 + $0x1e0] sm:$0xff] }
 0x163   : > { %v10123_v19 = vld [vmem:[#allocation13 + $0x90] ss:$8 sps:$4 sm:$0xff]   ;;  %1779 = vmatprep.subr.bf16.mxu0 %v10118_v14  ;;  %2388 = vmatprep.subr.bf16.mxu1 %v10120_v27  ;;  %v783_v14 = vmul.f32 0.00390625, %v716_v8  ;;  %v12262_v27 = vld [vmem:[%s11864_s27 + $0x1e8] sm:$0xff] }
 0x164   : > { %951 = vadd.xlane.f32.xlu1 %v950_v20  ;;  %751 = vadd.xlane.f32.xlu0 %v750_v25  ;;  %v12229_v25 = vsub.f32 %v11977_v31, %v780_v59  ;;  %v781_v20 = vmul.f32 0.00390625, %v710_v33  ;;  %v886_v31 = vmul.f32 %v12223_v12, %v12223_v12  ;;  %v782_v33 = vmul.f32 0.00390625, %v713_v61  ;;  %v722_v9 = vpop.xlane.xlu0 %721  ;;  %v10128_v12 = vld [vmem:[#allocation11 + $0x80] ss:$8 sps:$4 sm:$0xff]  }
 0x165   : > { %v888_v59 = vmul.f32 %v12232_v28, %v12232_v28  ;;  %v762_v8 = vadd.f32 %v12262_v27, %v12254_v23 }
 0x166   : > { %15945 = vst [vmem:[#allocation46_spill] sm:$0xff] %v12229_v25  ;;  %v12247_v58 = vsub.f32 %v11985_v34, %v781_v20  ;;  %1780 = vmatpush2.bf16.msra.mxu0 %v10122_v24  ;;  %2389 = vmatpush2.bf16.msra.mxu1 %v10123_v19  ;;  %v12257_v61 = vsub.f32 %v11988_v35, %v781_v20  ;;  %v10129_v24 = vld [vmem:[#allocation13 + $0x80] ss:$8 sps:$4 sm:$0xff]   ;;  %v784_v35 = vmul.f32 0.00390625, %v719_v32  ;;  %v725_v20 = vpop.xlane.xlu1 %724 }
 0x167   : > { %v759_v34 = vadd.f32 %v12244_v62, %v12237_v26  ;;  %v12265_v28 = vsub.f32 %v11995_v38, %v782_v33  ;;  %2390 = vmatprep.subr.bf16.mxu1 %v10126_v3  ;;  %v12284_v3 = vld [vmem:[%s11864_s27 + $0x1f8] sm:$0xff] }
 0x168   : > { %754 = vadd.xlane.f32.xlu1 %v753_v17  ;;  %954 = vadd.xlane.f32.xlu0 %v953_v21  ;;  %v887_v17 = vmul.f32 %v12229_v25, %v12229_v25  ;;  %v959_v21 = vadd.f32 %v886_v31, %v885_v4  ;;  %v10124_v25 = vld [vmem:[#allocation11 + $0x84] ss:$8 sps:$4 sm:$0xff]   ;;  %v785_v4 = vmul.f32 0.00390625, %v722_v9  ;;  %v889_v38 = vmul.f32 %v12247_v58, %v12247_v58 }
 0x169   : > { %1781 = vmatprep.subr.bf16.mxu0 %v10124_v25  ;;  %v12278_v31 = vsub.f32 %v12004_v41, %v783_v14  ;;  %v12281_v25 = vld [vmem:[%s11864_s27 + $0x1f0] sm:$0xff]  ;;  %v890_v32 = vmul.f32 %v12257_v61, %v12257_v61  ;;  %v12291_v19 = vsub.f32 %v12009_v43, %v784_v35 }
 0x16a   : > { %1782 = vmatpush2.bf16.msra.mxu0 %v10128_v12  ;;  %2391 = vmatpush2.bf16.msra.mxu1 %v10129_v24  ;;  %v891_v12 = vmul.f32 %v12265_v28, %v12265_v28  ;;  %v12302_v9 = vsub.f32 %v12020_v47, %v785_v4  ;;  %v731_v24 = vpop.xlane.xlu1 %730 }
 0x16b   : > { %v965_v43 = vadd.f32 %v890_v32, %v889_v38  ;;  %v895_v47 = vmul.f32 %v12291_v19, %v12291_v19 }
 0x16c   : > { %957 = vadd.xlane.f32.xlu1 %v956_v49  ;;  %757 = vadd.xlane.f32.xlu0 %v756_v29  ;;  %v12268_v29 = vsub.f32 %v11998_v39, %v782_v33  ;;  %v962_v49 = vadd.f32 %v888_v59, %v887_v17  ;;  %v12275_v39 = vsub.f32 %v12001_v40, %v783_v14  ;;  %v728_v33 = vpop.xlane.xlu0 %727  ;;  %v786_v17 = vmul.f32 0.00390625, %v725_v20 }
 0x16d   : > { %v12294_v40 = vsub.f32 %v12012_v44, %v784_v35  ;;  %v12299_v59 = vsub.f32 %v12017_v46, %v785_v4  ;;  %v894_v14 = vmul.f32 %v12278_v31, %v12278_v31  ;;  %v898_v38 = vmul.f32 %v12302_v9, %v12302_v9 }
 0x16e   : > { %v892_v41 = vmul.f32 %v12268_v29, %v12268_v29  ;;  %v893_v44 = vmul.f32 %v12275_v39, %v12275_v39  ;;  %v12311_v46 = vsub.f32 %v12027_v50, %v786_v17 }
 0x16f   : > { %v896_v20 = vmul.f32 %v12294_v40, %v12294_v40  ;;  %v897_v4 = vmul.f32 %v12299_v59, %v12299_v59 }
 0x170   : > { %760 = vadd.xlane.f32.xlu1 %v759_v34  ;;  %960 = vadd.xlane.f32.xlu0 %v959_v21  ;;  %v765_v34 = vadd.f32 %v12284_v3, %v12281_v25  ;;  %v787_v21 = vmul.f32 0.00390625, %v728_v33  ;;  %v968_v35 = vadd.f32 %v892_v41, %v891_v12  ;;  %v971_v33 = vadd.f32 %v894_v14, %v893_v44 }
 0x171   : > { %v974_v12 = vadd.f32 %v896_v20, %v895_v47  ;;  %v899_v41 = vmul.f32 %v12311_v46, %v12311_v46 }
 0x172   : > { %v12325_v50 = vsub.f32 %v12033_v52, %v787_v21  ;;  %v12328_v32 = vsub.f32 %v12036_v53, %v787_v21 }
 0x174   : > { %963 = vadd.xlane.f32.xlu1 %v962_v49  ;;  %763 = vadd.xlane.f32.xlu0 %v762_v8  ;;  %v12318_v49 = vsub.f32 %v12030_v51, %v786_v17  ;;  %v788_v8 = vmul.f32 0.00390625, %v731_v24  ;;  %v977_v17 = vadd.f32 %v898_v38, %v897_v4  ;;  %v901_v53 = vmul.f32 %v12325_v50, %v12325_v50 }
 0x176   : > { %v12331_v51 = vsub.f32 %v12043_v56, %v788_v8  ;;  %v900_v24 = vmul.f32 %v12318_v49, %v12318_v49  ;;  %v12338_v52 = vsub.f32 %v12046_v57, %v788_v8 }
 0x178   : > { %766 = vadd.xlane.f32.xlu1 %v765_v34  ;;  %966 = vadd.xlane.f32.xlu0 %v965_v43  ;;  %v902_v34 = vmul.f32 %v12328_v32, %v12328_v32  ;;  %v980_v56 = vadd.f32 %v900_v24, %v899_v41  ;;  %v903_v21 = vmul.f32 %v12331_v51, %v12331_v51 }
 0x179   : > { %v904_v44 = vmul.f32 %v12338_v52, %v12338_v52 }
 0x17a   : > { %v983_v43 = vadd.f32 %v902_v34, %v901_v53 }
 0x17b   : > { %v986_v57 = vadd.f32 %v904_v44, %v903_v21 }
 0x17c   : > { %969 = vadd.xlane.f32.xlu1 %v968_v35  ;;  %972 = vadd.xlane.f32.xlu0 %v971_v33  ;;  %v1186_v33 = vlaneseq }
 0x17e   : > { %v1187_v44 = vshrl.u32 %v1186_v33, 7 }
 0x180   : > { %975 = vadd.xlane.f32.xlu1 %v974_v12  ;;  %978 = vadd.xlane.f32.xlu0 %v977_v17  ;;  %v1188_v33 = vsub.s32 0, %v1187_v44 }
 0x184   : > { %981 = vadd.xlane.f32.xlu1 %v980_v56  ;;  %984 = vadd.xlane.f32.xlu0 %v983_v43 }
 0x188   : > { %987 = vadd.xlane.f32.xlu1 %v986_v57 }
 0x1d1   : > { %v931_v14 = vpop.xlane.xlu0 %930 }
 0x1d2   : > { %v1025_v35 = vmul.f32 0.00390625, %v931_v14 }
 0x1d4   : > { %v1057_v47 = vadd.f32 1e-05, %v1025_v35 }
 0x1d5   : > { %v934_v20 = vpop.xlane.xlu1 %933  ;;  %v734_v8 = vpop.xlane.xlu0 %733 }
 0x1d6   : > { %10130 = vrsqrt.f32 %v1057_v47  ;;  %v1026_v4 = vmul.f32 0.00390625, %v934_v20  ;;  %v789_v38 = vmul.f32 0.00390625, %v734_v8 }
 0x1d8   : > { %v1058_v12 = vadd.f32 1e-05, %v1026_v4  ;;  %v12349_v17 = vsub.f32 %v12069_v0, %v789_v38  ;;  %v12352_v41 = vsub.f32 %v12072_v1, %v789_v38 }
 0x1d9   : > { %v737_v24 = vpop.xlane.xlu1 %736  ;;  %v937_v53 = vpop.xlane.xlu0 %936 }
 0x1da   : > { %10132 = vrsqrt.f32 %v1058_v12  ;;  %v790_v34 = vmul.f32 0.00390625, %v737_v24  ;;  %v1027_v56 = vmul.f32 0.00390625, %v937_v53  ;;  %v905_v43 = vmul.f32 %v12349_v17, %v12349_v17  ;;  %v670_v53 = vld [vmem:[#allocation8] sm:$0x3] }
 0x1db   : > { %v906_v21 = vmul.f32 %v12352_v41, %v12352_v41 }
 0x1dc   : > { %v12359_v57 = vsub.f32 %v12097_v11, %v790_v34  ;;  %v12362_v0 = vsub.f32 %v12100_v16, %v790_v34  ;;  %v1059_v1 = vadd.f32 1e-05, %v1027_v56  ;;  %v1192_v11 = vsub.s32 1, %v1187_v44  ;;  %v671_v44 = vld [vmem:[%s15950_s28] sm:$0x3] }
 0x1dd   : > { %v940_v14 = vpop.xlane.xlu1 %939  ;;  %v740_v35 = vpop.xlane.xlu0 %739  ;;  %v989_v47 = vadd.f32 %v906_v21, %v905_v43 }
 0x1de   : > { %15947 = vst [vmem:[#allocation48_spill] sm:$0xff] %v12359_v57  ;;  %10134 = vrsqrt.f32 %v1059_v1  ;;  %v1028_v20 = vmul.f32 0.00390625, %v940_v14  ;;  %v791_v8 = vmul.f32 0.00390625, %v740_v35  ;;  %v907_v4 = vmul.f32 %v12359_v57, %v12359_v57 }
 0x1df   : > { %990 = vadd.xlane.f32.xlu0 %v989_v47  ;;  %v908_v38 = vmul.f32 %v12362_v0, %v12362_v0  ;;  %v12383_v47 = vrot.slane %v670_v53, %v1192_v11 }
 0x1e0   : > { %v1060_v12 = vadd.f32 1e-05, %v1028_v20  ;;  %v12369_v16 = vsub.f32 %v12113_v54, %v791_v8  ;;  %v12372_v24 = vsub.f32 %v12116_v55, %v791_v8  ;;  %v12381_v55 = vrot.slane %v670_v53, %v1188_v33 }
 0x1e1   : > { %v743_v34 = vpop.xlane.xlu1 %742  ;;  %v943_v56 = vpop.xlane.xlu0 %942  ;;  %v992_v43 = vadd.f32 %v908_v38, %v907_v4 }
 0x1e2   : > { %15948 = vst [vmem:[#allocation49_spill] sm:$0xff] %v12369_v16  ;;  %15949 = vst [vmem:[#allocation50_spill] sm:$0xff] %v12372_v24  ;;  %10136 = vrsqrt.f32 %v1060_v12  ;;  %v792_v21 = vmul.f32 0.00390625, %v743_v34  ;;  %v1029_v1 = vmul.f32 0.00390625, %v943_v56  ;;  %v909_v14 = vmul.f32 %v12369_v16, %v12369_v16 }
 0x1e3   : > { %v10131_v35 = vpop.eup %10130  ;;  %993 = vadd.xlane.f32.xlu1 %v992_v43  ;;  %v910_v54 = vmul.f32 %v12372_v24, %v12372_v24  ;;  %v12393_v16 = vrot.slane %v671_v44, %v1188_v33  ;;  %v12395_v24 = vrot.slane %v671_v44, %v1192_v11 }
 0x1e4   : > { %v12386_v20 = vsub.f32 %v12129_v63, %v792_v21  ;;  %v12389_v8 = vsub.f32 %v12132_v7, %v792_v21  ;;  %v1061_v4 = vadd.f32 1e-05, %v1029_v1  ;;  %v1121_v38 = vmul.f32 %v10131_v35, %v12053_v36 }
 0x1e5   : > { %v946_v12 = vpop.xlane.xlu1 %945  ;;  %v746_v34 = vpop.xlane.xlu0 %745  ;;  %v995_v56 = vadd.f32 %v910_v54, %v909_v14  ;;  %v1122_v43 = vmul.f32 %v10131_v35, %v12056_v37 }
 0x1e6   : > { %10138 = vrsqrt.f32 %v1061_v4  ;;  %v1030_v53 = vmul.f32 0.00390625, %v946_v12  ;;  %v793_v57 = vmul.f32 0.00390625, %v746_v34  ;;  %v911_v63 = vmul.f32 %v12386_v20, %v12386_v20 }
 0x1e7   : > { %v10133_v7 = vpop.eup %10132  ;;  %996 = vadd.xlane.f32.xlu0 %v995_v56  ;;  %v912_v36 = vmul.f32 %v12389_v8, %v12389_v8  ;;  %v1196_v21 = vmul.f32 %v12381_v55, %v1121_v38  ;;  %v1197_v1 = vmul.f32 %v12383_v47, %v1122_v43 }
 0x1e8   : > { %v1062_v37 = vadd.f32 1e-05, %v1030_v53  ;;  %v12404_v33 = vsub.f32 %v12145_v30, %v793_v57  ;;  %v12407_v11 = vsub.f32 %v12154_v10, %v793_v57  ;;  %v1123_v14 = vmul.f32 %v10133_v7, %v12075_v5 }
 0x1e9   : > { %v749_v44 = vpop.xlane.xlu1 %748  ;;  %v949_v35 = vpop.xlane.xlu0 %948  ;;  %v998_v54 = vadd.f32 %v912_v36, %v911_v63  ;;  %v1124_v4 = vmul.f32 %v10133_v7, %v12078_v6  ;;  %v1271_v12 = vadd.f32 %v12393_v16, %v1196_v21  ;;  %v1272_v38 = vadd.f32 %v12395_v24, %v1197_v1 }
 0x1ea   : > { %15951 = vst [vmem:[#allocation51_spill] sm:$0xff] %v12404_v33  ;;  %10140 = vrsqrt.f32 %v1062_v37  ;;  %v794_v34 = vmul.f32 0.00390625, %v749_v44  ;;  %v1031_v56 = vmul.f32 0.00390625, %v949_v35  ;;  %v913_v30 = vmul.f32 %v12404_v33, %v12404_v33 }
 0x1eb   : > { %v10135_v43 = vpop.eup %10134  ;;  %999 = vadd.xlane.f32.xlu1 %v998_v54  ;;  %v914_v5 = vmul.f32 %v12407_v11, %v12407_v11  ;;  %v1198_v10 = vmul.f32 %v12381_v55, %v1123_v14  ;;  %v1199_v57 = vmul.f32 %v12383_v47, %v1124_v4  ;;  %v9339_v6 = vpack.c.bf16 %v1272_v38, %v1271_v12 }
 0x1ec   : > { %v12420_v53 = vsub.f32 %v12165_v13, %v794_v34  ;;  %v12423_v63 = vsub.f32 %v12168_v60, %v794_v34  ;;  %v1063_v7 = vadd.f32 1e-05, %v1031_v56  ;;  %v1126_v14 = vmul.f32 %v10135_v43, %v12062_v48 }
 0x1ed   : > { %v952_v36 = vpop.xlane.xlu1 %951  ;;  %v752_v21 = vpop.xlane.xlu0 %751  ;;  %v1001_v1 = vadd.f32 %v914_v5, %v913_v30  ;;  %v1273_v37 = vadd.f32 %v12393_v16, %v1198_v10  ;;  %v1274_v44 = vadd.f32 %v12395_v24, %v1199_v57  ;;  %1527 = vst [vmem:[#allocation2] sm:$0xff] %v9339_v6  ;;  %v1125_v4 = vmul.f32 %v10135_v43, %v12059_v45  ;;  %v15952_v6 = vld [vmem:[#allocation29_spill] sm:$0xff] }
 0x1ee   : > { %v1032_v35 = vmul.f32 0.00390625, %v952_v36  ;;  %v795_v54 = vmul.f32 0.00390625, %v752_v21  ;;  %v915_v13 = vmul.f32 %v12420_v53, %v12420_v53  ;;  %v916_v30 = vmul.f32 %v12423_v63, %v12423_v63 }
 0x1ef   : > { %v10137_v60 = vpop.eup %10136  ;;  %1002 = vadd.xlane.f32.xlu0 %v1001_v1  ;;  %v1336_v34 = vpack.c.bf16 %v1274_v44, %v1272_v38  ;;  %v9340_v56 = vpack.c.bf16 %v1274_v44, %v1273_v37  ;;  %v1335_v33 = vpack.c.bf16 %v1273_v37, %v1271_v12  ;;  %10142 = vrsqrt.f32 %v1063_v7 }
 0x1f0   : > { %v1064_v5 = vadd.f32 1e-05, %v1032_v35  ;;  %v12434_v10 = vsub.f32 %v12181_v15, %v795_v54  ;;  %v12437_v48 = vsub.f32 %v12190_v22, %v795_v54  ;;  %v1128_v57 = vmul.f32 %v10137_v60, %v12090_v2  ;;  %v15954_v54 = vld [vmem:[#allocation43_spill] sm:$0xff] }
 0x1f1   : > { %1528 = vst [vmem:[#allocation2 + $0x8] sm:$0xff] %v9340_v56  ;;  %1783 = vmatprep.mubr.bf16.mxu0 %v1336_v34  ;;  %2392 = vmatprep.mubr.bf16.mxu1 %v1336_v34  ;;  %v755_v45 = vpop.xlane.xlu1 %754  ;;  %v955_v38 = vpop.xlane.xlu0 %954  ;;  %v1004_v43 = vadd.f32 %v916_v30, %v915_v13  ;;  %v1201_v12 = vmul.f32 %v12383_v47, %v1126_v14  ;;  %v15953_v14 = vld [vmem:[#allocation42_spill] sm:$0xff] }
 0x1f2   : > { %v1127_v36 = vmul.f32 %v10137_v60, %v15952_v6  ;;  %10144 = vrsqrt.f32 %v1064_v5  ;;  %v796_v21 = vmul.f32 0.00390625, %v755_v45  ;;  %1784 = vmatmul.mubr.bf16.vlgmr.msra.gmra.mxu0 %v1335_v33  ;;  %2393 = vmatmul.mubr.bf16.vlgmr.msra.gmra.mxu1 %v1335_v33  ;;  %v1033_v15 = vmul.f32 0.00390625, %v955_v38 }
 0x1f3   : > { %v917_v22 = vmul.f32 %v12434_v10, %v12434_v10  ;;  %v10139_v2 = vpop.eup %10138  ;;  %1005 = vadd.xlane.f32.xlu1 %v1004_v43  ;;  %v918_v7 = vmul.f32 %v12437_v48, %v12437_v48  ;;  %v1203_v1 = vmul.f32 %v12383_v47, %v1128_v57  ;;  %v1276_v37 = vadd.f32 %v12395_v24, %v1201_v12  ;;  %v15955_v43 = vld [vmem:[#allocation31_spill] sm:$0xff] }
 0x1f4   : > { %v1200_v44 = vmul.f32 %v12381_v55, %v1125_v4  ;;  %v12450_v35 = vsub.f32 %v15953_v14, %v796_v21  ;;  %v12453_v33 = vsub.f32 %v15954_v54, %v796_v21  ;;  %v1202_v13 = vmul.f32 %v12381_v55, %v1127_v36 }
 0x1f5   : > { %v1065_v60 = vadd.f32 1e-05, %v1033_v15  ;;  %v958_v34 = vpop.xlane.xlu1 %957  ;;  %v758_v56 = vpop.xlane.xlu0 %757  ;;  %v1007_v30 = vadd.f32 %v918_v7, %v917_v22  ;;  %v1278_v5 = vadd.f32 %v12395_v24, %v1203_v1  ;;  %v1130_v12 = vmul.f32 %v10139_v2, %v15955_v43 }
 0x1f6   : > { %v1275_v57 = vadd.f32 %v12393_v16, %v1200_v44  ;;  %v1034_v45 = vmul.f32 0.00390625, %v958_v34  ;;  %v797_v38 = vmul.f32 0.00390625, %v758_v56  ;;  %v1277_v4 = vadd.f32 %v12393_v16, %v1202_v13  ;;  %v15956_v56 = vld [vmem:[#allocation33_spill] sm:$0xff] }
 0x1f7   : > { %v10141_v6 = vpop.eup %10140  ;;  %1008 = vadd.xlane.f32.xlu0 %v1007_v30  ;;  %v1338_v21 = vpack.c.bf16 %v1278_v5, %v1276_v37  ;;  %v919_v36 = vmul.f32 %v12450_v35, %v12450_v35  ;;  %v920_v15 = vmul.f32 %v12453_v33, %v12453_v33  ;;  %10146 = vrsqrt.f32 %v1065_v60 }
 0x1f8   : > { %v9341_v14 = vpack.c.bf16 %v1276_v37, %v1275_v57  ;;  %v1066_v22 = vadd.f32 1e-05, %v1034_v45  ;;  %v12465_v7 = vsub.f32 %v12217_v42, %v797_v38  ;;  %v12468_v1 = vsub.f32 %v12226_v18, %v797_v38  ;;  %v15957_v45 = vld [vmem:[#allocation30_spill] sm:$0xff] }
 0x1f9   : > { %v1337_v44 = vpack.c.bf16 %v1277_v4, %v1275_v57  ;;  %1793 = vmatprep.mubr.bf16.mxu0 %v1338_v21  ;;  %2402 = vmatprep.mubr.bf16.mxu1 %v1338_v21  ;;  %v761_v54 = vpop.xlane.xlu1 %760  ;;  %v9342_v13 = vpack.c.bf16 %v1278_v5, %v1277_v4  ;;  %v961_v37 = vpop.xlane.xlu0 %960  ;;  %v1010_v34 = vadd.f32 %v920_v15, %v919_v36  ;;  %v15958_v36 = vld [vmem:[#allocation32_spill] sm:$0xff] }
 0x1fa   : > { %1529 = vst [vmem:[#allocation2 + $0x10] sm:$0xff] %v9341_v14  ;;  %v1132_v30 = vmul.f32 %v10141_v6, %v15956_v56  ;;  %10148 = vrsqrt.f32 %v1066_v22  ;;  %v798_v43 = vmul.f32 0.00390625, %v761_v54  ;;  %v1035_v42 = vmul.f32 0.00390625, %v961_v37 }
 0x1fb   : > { %1794 = vmatmul.mubr.bf16.gmra.mxu0 %v1337_v44  ;;  %2403 = vmatmul.mubr.bf16.gmra.mxu1 %v1337_v44  ;;  %v921_v18 = vmul.f32 %v12465_v7, %v12465_v7  ;;  %1530 = vst [vmem:[#allocation2 + $0x18] sm:$0xff] %v9342_v13  ;;  %v922_v60 = vmul.f32 %v12468_v1, %v12468_v1 }
 0x1fc   : > { %1011 = vadd.xlane.f32.xlu1 %v1010_v34  ;;  %v1205_v5 = vmul.f32 %v12383_v47, %v1130_v12  ;;  %v1207_v57 = vmul.f32 %v12383_v47, %v1132_v30  ;;  %v1129_v38 = vmul.f32 %v10139_v2, %v15957_v45  ;;  %v12479_v4 = vsub.f32 %v12237_v26, %v798_v43  ;;  %v10143_v34 = vpop.eup %10142 }
 0x1fd   : > { %v12482_v21 = vsub.f32 %v12244_v62, %v798_v43  ;;  %v1067_v14 = vadd.f32 1e-05, %v1035_v42  ;;  %v1131_v15 = vmul.f32 %v10141_v6, %v15958_v36  ;;  %v964_v22 = vpop.xlane.xlu1 %963  ;;  %v764_v44 = vpop.xlane.xlu0 %763  ;;  %v1013_v54 = vadd.f32 %v922_v60, %v921_v18 }
 0x1fe   : > { %v1280_v13 = vadd.f32 %v12395_v24, %v1205_v5  ;;  %v1282_v12 = vadd.f32 %v12395_v24, %v1207_v57  ;;  %v1204_v37 = vmul.f32 %v12381_v55, %v1129_v38  ;;  %v1036_v2 = vmul.f32 0.00390625, %v964_v22 }
 0x1ff   : > { %10150 = vrsqrt.f32 %v1067_v14  ;;  %v799_v26 = vmul.f32 0.00390625, %v764_v44  ;;  %v1206_v56 = vmul.f32 %v12381_v55, %v1131_v15  ;;  %v10145_v62 = vpop.eup %10144  ;;  %1014 = vadd.xlane.f32.xlu0 %v1013_v54  ;;  %v923_v43 = vmul.f32 %v12479_v4, %v12479_v4  ;;  %v15961_v15 = vld [vmem:[#allocation35_spill] sm:$0xff] }
 0x200   : > { %v1340_v30 = vpack.c.bf16 %v1282_v12, %v1280_v13  ;;  %v1279_v6 = vadd.f32 %v12393_v16, %v1204_v37  ;;  %v924_v42 = vmul.f32 %v12482_v21, %v12482_v21  ;;  %v1068_v18 = vadd.f32 1e-05, %v1036_v2 }
 0x201   : > { %v12495_v60 = vsub.f32 %v12254_v23, %v799_v26  ;;  %v12498_v5 = vsub.f32 %v12262_v27, %v799_v26  ;;  %v1281_v57 = vadd.f32 %v12393_v16, %v1206_v56  ;;  %v767_v45 = vpop.xlane.xlu1 %766  ;;  %v967_v14 = vpop.xlane.xlu0 %966  ;;  %v1134_v22 = vmul.f32 %v10143_v34, %v15961_v15  ;;  %v15962_v26 = vld [vmem:[#allocation37_spill] sm:$0xff] }
 0x202   : > { %1803 = vmatprep.mubr.bf16.mxu0 %v1340_v30  ;;  %2412 = vmatprep.mubr.bf16.mxu1 %v1340_v30  ;;  %v9343_v38 = vpack.c.bf16 %v1280_v13, %v1279_v6  ;;  %v1016_v36 = vadd.f32 %v924_v42, %v923_v43  ;;  %10152 = vrsqrt.f32 %v1068_v18  ;;  %v800_v44 = vmul.f32 0.00390625, %v767_v45  ;;  %v15965_v45 = vld [vmem:[#allocation34_spill] sm:$0xff] }
 0x203   : > { %15959 = vst [vmem:[#allocation29_spill] sm:$0xff] %v12495_v60  ;;  %15960 = vst [vmem:[#allocation42_spill] sm:$0xff] %v12498_v5  ;;  %v1339_v54 = vpack.c.bf16 %v1281_v57, %v1279_v6  ;;  %v9344_v37 = vpack.c.bf16 %v1282_v12, %v1281_v57  ;;  %v1037_v23 = vmul.f32 0.00390625, %v967_v14  ;;  %v925_v27 = vmul.f32 %v12495_v60, %v12495_v60 }
 0x204   : > { %1531 = vst [vmem:[#allocation2 + $0x20] sm:$0xff] %v9343_v38  ;;  %1017 = vadd.xlane.f32.xlu1 %v1016_v36  ;;  %v926_v2 = vmul.f32 %v12498_v5, %v12498_v5  ;;  %v1136_v56 = vmul.f32 %v10145_v62, %v15962_v26  ;;  %v12508_v13 = vsub.f32 %v12281_v25, %v800_v44  ;;  %v10147_v14 = vpop.eup %10146 }
 0x205   : > { %v12511_v30 = vsub.f32 %v12284_v3, %v800_v44  ;;  %1532 = vst [vmem:[#allocation2 + $0x28] sm:$0xff] %v9344_v37  ;;  %1804 = vmatmul.mubr.bf16.gmra.mxu0 %v1339_v54  ;;  %2413 = vmatmul.mubr.bf16.gmra.mxu1 %v1339_v54  ;;  %v1209_v12 = vmul.f32 %v12383_v47, %v1134_v22  ;;  %v1069_v6 = vadd.f32 1e-05, %v1037_v23  ;;  %v970_v43 = vpop.xlane.xlu1 %969  ;;  %v973_v42 = vpop.xlane.xlu0 %972  ;;  %v15966_v3 = vld [vmem:[#allocation36_spill] sm:$0xff] }
 0x206   : > { %15963 = vst [vmem:[#allocation43_spill] sm:$0xff] %v12508_v13  ;;  %v1019_v18 = vadd.f32 %v926_v2, %v925_v27  ;;  %v1211_v57 = vmul.f32 %v12383_v47, %v1136_v56  ;;  %v1133_v38 = vmul.f32 %v10143_v34, %v15965_v45  ;;  %v1038_v36 = vmul.f32 0.00390625, %v970_v43  ;;  %v15967_v43 = vld [vmem:[#allocation39_spill] sm:$0xff] }
 0x207   : > { %15964 = vst [vmem:[#allocation31_spill] sm:$0xff] %v12511_v30  ;;  %v1039_v25 = vmul.f32 0.00390625, %v973_v42  ;;  %v1284_v15 = vadd.f32 %v12395_v24, %v1209_v12  ;;  %v1135_v44 = vmul.f32 %v10145_v62, %v15966_v3  ;;  %v10149_v37 = vpop.eup %10148  ;;  %10154 = vrsqrt.f32 %v1069_v6 }
 0x208   : > { %1020 = vadd.xlane.f32.xlu0 %v1019_v18  ;;  %v1286_v22 = vadd.f32 %v12395_v24, %v1211_v57  ;;  %v1208_v54 = vmul.f32 %v12381_v55, %v1133_v38  ;;  %v927_v23 = vmul.f32 %v12508_v13, %v12508_v13  ;;  %v1070_v27 = vadd.f32 1e-05, %v1038_v36  ;;  %v15968_v18 = vld [vmem:[#allocation41_spill] sm:$0xff] }
 0x209   : > { %v1071_v2 = vadd.f32 1e-05, %v1039_v25  ;;  %v1210_v34 = vmul.f32 %v12381_v55, %v1135_v44  ;;  %v928_v26 = vmul.f32 %v12511_v30, %v12511_v30  ;;  %v976_v12 = vpop.xlane.xlu1 %975  ;;  %v979_v6 = vpop.xlane.xlu0 %978  ;;  %v1138_v42 = vmul.f32 %v10147_v14, %v15967_v43 }
 0x20a   : > { %v1342_v56 = vpack.c.bf16 %v1286_v22, %v1284_v15  ;;  %v1283_v62 = vadd.f32 %v12393_v16, %v1208_v54  ;;  %v1140_v57 = vmul.f32 %v10149_v37, %v15968_v18  ;;  %10156 = vrsqrt.f32 %v1070_v27  ;;  %v15970_v18 = vld [vmem:[#allocation40_spill] sm:$0xff] }
 0x20b   : > { %v1040_v45 = vmul.f32 0.00390625, %v976_v12  ;;  %v1285_v38 = vadd.f32 %v12393_v16, %v1210_v34  ;;  %v1041_v36 = vmul.f32 0.00390625, %v979_v6  ;;  %10158 = vrsqrt.f32 %v1071_v2  ;;  %v15969_v6 = vld [vmem:[#allocation38_spill] sm:$0xff] }
 0x20c   : > { %v10151_v25 = vpop.eup %10150  ;;  %1813 = vmatprep.mubr.bf16.mxu0 %v1342_v56  ;;  %2422 = vmatprep.mubr.bf16.mxu1 %v1342_v56  ;;  %v9345_v3 = vpack.c.bf16 %v1284_v15, %v1283_v62  ;;  %v1022_v44 = vadd.f32 %v928_v26, %v927_v23  ;;  %v1213_v13 = vmul.f32 %v12383_v47, %v1138_v42 }
 0x20d   : > { %v1072_v30 = vadd.f32 1e-05, %v1040_v45  ;;  %v1341_v54 = vpack.c.bf16 %v1285_v38, %v1283_v62  ;;  %v9346_v60 = vpack.c.bf16 %v1286_v22, %v1285_v38  ;;  %v1073_v5 = vadd.f32 1e-05, %v1041_v36  ;;  %v982_v43 = vpop.xlane.xlu1 %981  ;;  %v985_v27 = vpop.xlane.xlu0 %984  ;;  %v15971_v22 = vld [vmem:[#allocation45_spill] sm:$0xff]  ;;  %v15972_v38 = vld [vmem:[#allocation47_spill] sm:$0xff] }
 0x20e   : > { %1533 = vst [vmem:[#allocation2 + $0x30] sm:$0xff] %v9345_v3  ;;  %1023 = vadd.xlane.f32.xlu1 %v1022_v44  ;;  %v1215_v12 = vmul.f32 %v12383_v47, %v1140_v57  ;;  %v1288_v34 = vadd.f32 %v12395_v24, %v1213_v13  ;;  %v1137_v2 = vmul.f32 %v10147_v14, %v15969_v6  ;;  %v1042_v15 = vmul.f32 0.00390625, %v982_v43 }
 0x20f   : > { %v1139_v56 = vmul.f32 %v10149_v37, %v15970_v18  ;;  %10160 = vrsqrt.f32 %v1072_v30  ;;  %1534 = vst [vmem:[#allocation2 + $0x38] sm:$0xff] %v9346_v60  ;;  %1814 = vmatmul.mubr.bf16.gmra.mxu0 %v1341_v54  ;;  %2423 = vmatmul.mubr.bf16.gmra.mxu1 %v1341_v54  ;;  %v1043_v23 = vmul.f32 0.00390625, %v985_v27  ;;  %v1142_v26 = vmul.f32 %v10151_v25, %v15971_v22  ;;  %v10153_v62 = vpop.eup %10152  ;;  %v15973_v54 = vld [vmem:[#allocation44_spill] sm:$0xff]  ;;  %v15974_v22 = vld [vmem:[#allocation46_spill] sm:$0xff] }
 0x210   : > { %10162 = vrsqrt.f32 %v1073_v5  ;;  %v1290_v42 = vadd.f32 %v12395_v24, %v1215_v12  ;;  %v1212_v57 = vmul.f32 %v12381_v55, %v1137_v2  ;;  %v1074_v45 = vadd.f32 1e-05, %v1042_v15 }
 0x211   : > { %v1214_v13 = vmul.f32 %v12381_v55, %v1139_v56  ;;  %v1075_v14 = vadd.f32 1e-05, %v1043_v23  ;;  %v1144_v37 = vmul.f32 %v10153_v62, %v15972_v38  ;;  %v1217_v60 = vmul.f32 %v12383_v47, %v1142_v26  ;;  %v988_v36 = vpop.xlane.xlu1 %987 }
 0x212   : > { %v1344_v30 = vpack.c.bf16 %v1290_v42, %v1288_v34  ;;  %v1287_v3 = vadd.f32 %v12393_v16, %v1212_v57  ;;  %v1141_v5 = vmul.f32 %v10151_v25, %v15973_v54  ;;  %10164 = vrsqrt.f32 %v1074_v45 }
 0x213   : > { %v1289_v44 = vadd.f32 %v12393_v16, %v1214_v13  ;;  %v1044_v43 = vmul.f32 0.00390625, %v988_v36  ;;  %v1219_v27 = vmul.f32 %v12383_v47, %v1144_v37  ;;  %v1292_v12 = vadd.f32 %v12395_v24, %v1217_v60 }
 0x214   : > { %10166 = vrsqrt.f32 %v1075_v14  ;;  %1823 = vmatprep.mubr.bf16.mxu0 %v1344_v30  ;;  %2432 = vmatprep.mubr.bf16.mxu1 %v1344_v30  ;;  %v9347_v2 = vpack.c.bf16 %v1288_v34, %v1287_v3  ;;  %v10155_v56 = vpop.eup %10154  ;;  %v1143_v26 = vmul.f32 %v10153_v62, %v15974_v22  ;;  %v1216_v25 = vmul.f32 %v12381_v55, %v1141_v5 }
 0x215   : > { %v1343_v6 = vpack.c.bf16 %v1289_v44, %v1287_v3  ;;  %v9348_v18 = vpack.c.bf16 %v1290_v42, %v1289_v44  ;;  %v1076_v15 = vadd.f32 1e-05, %v1044_v43  ;;  %v1294_v23 = vadd.f32 %v12395_v24, %v1219_v27 }
 0x216   : > { %1535 = vst [vmem:[#allocation2 + $0x40] sm:$0xff] %v9347_v2  ;;  %v1146_v57 = vmul.f32 %v10155_v56, %v12257_v61  ;;  %v1145_v13 = vmul.f32 %v10155_v56, %v12247_v58  ;;  %v1218_v34 = vmul.f32 %v12381_v55, %v1143_v26  ;;  %v1291_v42 = vadd.f32 %v12393_v16, %v1216_v25 }
 0x217   : > { %1536 = vst [vmem:[#allocation2 + $0x48] sm:$0xff] %v9348_v18  ;;  %10168 = vrsqrt.f32 %v1076_v15  ;;  %1824 = vmatmul.mubr.bf16.gmra.mxu0 %v1343_v6  ;;  %2433 = vmatmul.mubr.bf16.gmra.mxu1 %v1343_v6  ;;  %v1346_v45 = vpack.c.bf16 %v1294_v23, %v1292_v12  ;;  %v10157_v14 = vpop.eup %10156 }
 0x218   : > { %v1221_v38 = vmul.f32 %v12383_v47, %v1146_v57  ;;  %v1220_v62 = vmul.f32 %v12381_v55, %v1145_v13  ;;  %v10159_v37 = vpop.eup %10158  ;;  %v1293_v61 = vadd.f32 %v12393_v16, %v1218_v34  ;;  %v9349_v60 = vpack.c.bf16 %v1292_v12, %v1291_v42 }
 0x219   : > { %1833 = vmatprep.mubr.bf16.mxu0 %v1346_v45  ;;  %2442 = vmatprep.mubr.bf16.mxu1 %v1346_v45  ;;  %v1148_v58 = vmul.f32 %v10157_v14, %v12268_v29  ;;  %v1147_v36 = vmul.f32 %v10157_v14, %v12265_v28  ;;  %v1150_v44 = vmul.f32 %v10159_v37, %v12278_v31 }
 0x21a   : > { %v1296_v30 = vadd.f32 %v12395_v24, %v1221_v38  ;;  %v1295_v3 = vadd.f32 %v12393_v16, %v1220_v62  ;;  %v1345_v54 = vpack.c.bf16 %v1293_v61, %v1291_v42  ;;  %v9350_v5 = vpack.c.bf16 %v1294_v23, %v1293_v61  ;;  %1537 = vst [vmem:[#allocation2 + $0x50] sm:$0xff] %v9349_v60 }
 0x21b   : > { %v1223_v43 = vmul.f32 %v12383_v47, %v1148_v58  ;;  %v1149_v27 = vmul.f32 %v10159_v37, %v12275_v39  ;;  %v1222_v12 = vmul.f32 %v12381_v55, %v1147_v36  ;;  %v1225_v29 = vmul.f32 %v12383_v47, %v1150_v44 }
 0x21c   : > { %v10161_v6 = vpop.eup %10160  ;;  %v9351_v2 = vpack.c.bf16 %v1296_v30, %v1295_v3  ;;  %1538 = vst [vmem:[#allocation2 + $0x58] sm:$0xff] %v9350_v5 }
 0x21d   : > { %v10163_v18 = vpop.eup %10162  ;;  %v1298_v28 = vadd.f32 %v12395_v24, %v1223_v43  ;;  %v1152_v56 = vmul.f32 %v10161_v6, %v12294_v40  ;;  %v1151_v31 = vmul.f32 %v10161_v6, %v12291_v19  ;;  %v1224_v15 = vmul.f32 %v12381_v55, %v1149_v27 }
 0x21e   : > { %v1297_v23 = vadd.f32 %v12393_v16, %v1222_v12  ;;  %1539 = vst [vmem:[#allocation2 + $0x60] sm:$0xff] %v9351_v2  ;;  %v1300_v39 = vadd.f32 %v12395_v24, %v1225_v29  ;;  %v1154_v22 = vmul.f32 %v10163_v18, %v12302_v9  ;;  %v1153_v26 = vmul.f32 %v10163_v18, %v12299_v59 }
 0x21f   : > { %1834 = vmatmul.mubr.bf16.gmra.mxu0 %v1345_v54  ;;  %2443 = vmatmul.mubr.bf16.gmra.mxu1 %v1345_v54  ;;  %v1348_v25 = vpack.c.bf16 %v1298_v28, %v1296_v30  ;;  %v1227_v57 = vmul.f32 %v12383_v47, %v1152_v56  ;;  %v1226_v40 = vmul.f32 %v12381_v55, %v1151_v31  ;;  %v10165_v13 = vpop.eup %10164 }
 0x220   : > { %v9352_v19 = vpack.c.bf16 %v1298_v28, %v1297_v23  ;;  %v1299_v45 = vadd.f32 %v12393_v16, %v1224_v15  ;;  %v1229_v34 = vmul.f32 %v12383_v47, %v1154_v22  ;;  %v1156_v14 = vmul.f32 %v10165_v13, %v12318_v49 }
 0x221   : > { %v10167_v42 = vpop.eup %10166  ;;  %1843 = vmatprep.mubr.bf16.mxu0 %v1348_v25  ;;  %2452 = vmatprep.mubr.bf16.mxu1 %v1348_v25  ;;  %v1302_v9 = vadd.f32 %v12395_v24, %v1227_v57  ;;  %v1301_v59 = vadd.f32 %v12393_v16, %v1226_v40  ;;  %v1155_v37 = vmul.f32 %v10165_v13, %v12311_v46 }
 0x222   : > { %1540 = vst [vmem:[#allocation2 + $0x68] sm:$0xff] %v9352_v19  ;;  %v9353_v38 = vpack.c.bf16 %v1300_v39, %v1299_v45  ;;  %v1304_v62 = vadd.f32 %v12395_v24, %v1229_v34  ;;  %v1228_v61 = vmul.f32 %v12381_v55, %v1153_v26  ;;  %v1347_v60 = vpack.c.bf16 %v1297_v23, %v1295_v3 }
 0x223   : > { %v1350_v58 = vpack.c.bf16 %v1302_v9, %v1300_v39  ;;  %v9354_v30 = vpack.c.bf16 %v1302_v9, %v1301_v59  ;;  %v1231_v36 = vmul.f32 %v12383_v47, %v1156_v14  ;;  %v1230_v54 = vmul.f32 %v12381_v55, %v1155_v37 }
 0x224   : > { %v10169_v44 = vpop.eup %10168  ;;  %1541 = vst [vmem:[#allocation2 + $0x70] sm:$0xff] %v9353_v38  ;;  %v1303_v5 = vadd.f32 %v12393_v16, %v1228_v61  ;;  %v1158_v49 = vmul.f32 %v10167_v42, %v12328_v32  ;;  %v1157_v43 = vmul.f32 %v10167_v42, %v12325_v50  ;;  %v1349_v23 = vpack.c.bf16 %v1301_v59, %v1299_v45 }
 0x225   : > { %1542 = vst [vmem:[#allocation2 + $0x78] sm:$0xff] %v9354_v30  ;;  %v1306_v46 = vadd.f32 %v12395_v24, %v1231_v36  ;;  %v1160_v27 = vmul.f32 %v10169_v44, %v12338_v52  ;;  %v1159_v3 = vmul.f32 %v10169_v44, %v12331_v51  ;;  %v1305_v6 = vadd.f32 %v12393_v16, %v1230_v54 }
 0x226   : > { %v9355_v12 = vpack.c.bf16 %v1304_v62, %v1303_v5  ;;  %v1233_v2 = vmul.f32 %v12383_v47, %v1158_v49  ;;  %v1232_v29 = vmul.f32 %v12381_v55, %v1157_v43 }
 0x227   : > { %1844 = vmatmul.mubr.bf16.gmra.mxu0 %v1347_v60  ;;  %2453 = vmatmul.mubr.bf16.gmra.mxu1 %v1347_v60  ;;  %v1235_v32 = vmul.f32 %v12383_v47, %v1160_v27  ;;  %v1234_v50 = vmul.f32 %v12381_v55, %v1159_v3  ;;  %v9356_v18 = vpack.c.bf16 %v1306_v46, %v1305_v6 }
 0x228   : > { %1853 = vmatprep.mubr.bf16.mxu0 %v1350_v58  ;;  %2462 = vmatprep.mubr.bf16.mxu1 %v1350_v58  ;;  %1543 = vst [vmem:[#allocation2 + $0x80] sm:$0xff] %v9355_v12  ;;  %v1308_v52 = vadd.f32 %v12395_v24, %v1233_v2  ;;  %v1307_v28 = vadd.f32 %v12393_v16, %v1232_v29 }
 0x229   : > { %v1310_v51 = vadd.f32 %v12395_v24, %v1235_v32  ;;  %v1309_v56 = vadd.f32 %v12393_v16, %v1234_v50  ;;  %1544 = vst [vmem:[#allocation2 + $0x88] sm:$0xff] %v9356_v18  ;;  %v1352_v39 = vpack.c.bf16 %v1306_v46, %v1304_v62  ;;  %v1351_v22 = vpack.c.bf16 %v1305_v6, %v1303_v5  ;;  %v15975_v6 = vld [vmem:[#allocation48_spill] sm:$0xff] }
 0x22a   : > { %v9357_v31 = vpack.c.bf16 %v1308_v52, %v1307_v28 }
 0x22b   : > { %v9358_v15 = vpack.c.bf16 %v1310_v51, %v1309_v56  ;;  %v1354_v26 = vpack.c.bf16 %v1310_v51, %v1308_v52  ;;  %v1353_v25 = vpack.c.bf16 %v1309_v56, %v1307_v28  ;;  %v15976_v28 = vld [vmem:[#allocation50_spill] sm:$0xff] }
 0x22c   : > { %1545 = vst [vmem:[#allocation2 + $0x90] sm:$0xff] %v9357_v31 }
 0x22d   : > { %1546 = vst [vmem:[#allocation2 + $0x98] sm:$0xff] %v9358_v15  ;;  %v15977_v15 = vld [vmem:[#allocation49_spill] sm:$0xff] }
 0x22f   : > { %1854 = vmatmul.mubr.bf16.gmra.mxu0 %v1349_v23  ;;  %2463 = vmatmul.mubr.bf16.gmra.mxu1 %v1349_v23 }
 0x230   : > { %1863 = vmatprep.mubr.bf16.mxu0 %v1352_v39  ;;  %2472 = vmatprep.mubr.bf16.mxu1 %v1352_v39 }
 0x237   : > { %1864 = vmatmul.mubr.bf16.gmra.mxu0 %v1351_v22  ;;  %2473 = vmatmul.mubr.bf16.gmra.mxu1 %v1351_v22 }
 0x238   : > { %1873 = vmatprep.mubr.bf16.mxu0 %v1354_v26  ;;  %2482 = vmatprep.mubr.bf16.mxu1 %v1354_v26 }
 0x23f   : > { %1874 = vmatmul.mubr.bf16.gmra.mxu0 %v1353_v25  ;;  %2483 = vmatmul.mubr.bf16.gmra.mxu1 %v1353_v25 }
 0x268   : > { %v991_v57 = vpop.xlane.xlu0 %990 }
 0x269   : > { %v1045_v40 = vmul.f32 0.00390625, %v991_v57 }
 0x26b   : > { %v1077_v13 = vadd.f32 1e-05, %v1045_v40 }
 0x26c   : > { %v994_v19 = vpop.xlane.xlu1 %993 }
 0x26d   : > { %10170 = vrsqrt.f32 %v1077_v13  ;;  %v1046_v45 = vmul.f32 0.00390625, %v994_v19 }
 0x26f   : > { %v1078_v34 = vadd.f32 1e-05, %v1046_v45 }
 0x270   : > { %v997_v42 = vpop.xlane.xlu0 %996 }
 0x271   : > { %10172 = vrsqrt.f32 %v1078_v34  ;;  %v1047_v9 = vmul.f32 0.00390625, %v997_v42 }
 0x273   : > { %v1079_v59 = vadd.f32 1e-05, %v1047_v9 }
 0x274   : > { %v1000_v14 = vpop.xlane.xlu1 %999 }
 0x275   : > { %10174 = vrsqrt.f32 %v1079_v59  ;;  %v1048_v38 = vmul.f32 0.00390625, %v1000_v14 }
 0x277   : > { %v1080_v62 = vadd.f32 1e-05, %v1048_v38 }
 0x278   : > { %v1003_v37 = vpop.xlane.xlu0 %1002 }
 0x279   : > { %10176 = vrsqrt.f32 %v1080_v62  ;;  %v1049_v61 = vmul.f32 0.00390625, %v1003_v37 }
 0x27a   : > { %v10171_v60 = vpop.eup %10170 }
 0x27b   : > { %v1081_v58 = vadd.f32 1e-05, %v1049_v61  ;;  %v1162_v30 = vmul.f32 %v10171_v60, %v12352_v41  ;;  %v1161_v36 = vmul.f32 %v10171_v60, %v12349_v17 }
 0x27c   : > { %v1006_v44 = vpop.xlane.xlu1 %1005 }
 0x27d   : > { %10178 = vrsqrt.f32 %v1081_v58  ;;  %v1050_v54 = vmul.f32 0.00390625, %v1006_v44  ;;  %v1237_v5 = vmul.f32 %v12383_v47, %v1162_v30  ;;  %v1236_v49 = vmul.f32 %v12381_v55, %v1161_v36  ;;  %v15978_v36 = vld [vmem:[#allocation51_spill] sm:$0xff] }
 0x27e   : > { %v10173_v43 = vpop.eup %10172 }
 0x27f   : > { %v1082_v46 = vadd.f32 1e-05, %v1050_v54  ;;  %v1164_v27 = vmul.f32 %v10173_v43, %v12362_v0  ;;  %v1312_v3 = vadd.f32 %v12395_v24, %v1237_v5  ;;  %v1163_v12 = vmul.f32 %v10173_v43, %v15975_v6 }
 0x280   : > { %v1009_v2 = vpop.xlane.xlu0 %1008  ;;  %v1311_v41 = vadd.f32 %v12393_v16, %v1236_v49 }
 0x281   : > { %10180 = vrsqrt.f32 %v1082_v46  ;;  %v1051_v17 = vmul.f32 0.00390625, %v1009_v2  ;;  %v1239_v29 = vmul.f32 %v12383_v47, %v1164_v27  ;;  %v1238_v32 = vmul.f32 %v12381_v55, %v1163_v12 }
 0x282   : > { %v10175_v50 = vpop.eup %10174  ;;  %v9359_v18 = vpack.c.bf16 %v1312_v3, %v1311_v41 }
 0x283   : > { %v1083_v52 = vadd.f32 1e-05, %v1051_v17  ;;  %v1314_v51 = vadd.f32 %v12395_v24, %v1239_v29  ;;  %v1313_v0 = vadd.f32 %v12393_v16, %v1238_v32  ;;  %v1166_v56 = vmul.f32 %v10175_v50, %v15976_v28 }
 0x284   : > { %1547 = vst [vmem:[#allocation2 + $0xa0] sm:$0xff] %v9359_v18  ;;  %v1165_v23 = vmul.f32 %v10175_v50, %v15977_v15 }
 0x285   : > { %v1012_v31 = vpop.xlane.xlu1 %1011  ;;  %10182 = vrsqrt.f32 %v1083_v52  ;;  %v1356_v22 = vpack.c.bf16 %v1314_v51, %v1312_v3  ;;  %v1355_v26 = vpack.c.bf16 %v1313_v0, %v1311_v41  ;;  %v9360_v57 = vpack.c.bf16 %v1314_v51, %v1313_v0 }
 0x286   : > { %v1052_v39 = vmul.f32 0.00390625, %v1012_v31  ;;  %v10177_v25 = vpop.eup %10176  ;;  %v1241_v40 = vmul.f32 %v12383_v47, %v1166_v56  ;;  %v1240_v13 = vmul.f32 %v12381_v55, %v1165_v23 }
 0x287   : > { %1883 = vmatprep.mubr.bf16.mxu0 %v1356_v22  ;;  %2492 = vmatprep.mubr.bf16.mxu1 %v1356_v22  ;;  %v1168_v45 = vmul.f32 %v10177_v25, %v12389_v8  ;;  %v1167_v34 = vmul.f32 %v10177_v25, %v12386_v20  ;;  %1548 = vst [vmem:[#allocation2 + $0xa8] sm:$0xff] %v9360_v57 }
 0x288   : > { %v1084_v19 = vadd.f32 1e-05, %v1052_v39  ;;  %1884 = vmatmul.mubr.bf16.gmra.mxu0 %v1355_v26  ;;  %2493 = vmatmul.mubr.bf16.gmra.mxu1 %v1355_v26  ;;  %v1015_v42 = vpop.xlane.xlu0 %1014  ;;  %v1316_v9 = vadd.f32 %v12395_v24, %v1241_v40  ;;  %v1315_v59 = vadd.f32 %v12393_v16, %v1240_v13 }
 0x289   : > { %v1053_v14 = vmul.f32 0.00390625, %v1015_v42  ;;  %v1243_v38 = vmul.f32 %v12383_v47, %v1168_v45  ;;  %v1242_v62 = vmul.f32 %v12381_v55, %v1167_v34 }
 0x28a   : > { %10184 = vrsqrt.f32 %v1084_v19  ;;  %v10179_v37 = vpop.eup %10178  ;;  %v9361_v61 = vpack.c.bf16 %v1316_v9, %v1315_v59 }
 0x28b   : > { %v1085_v60 = vadd.f32 1e-05, %v1053_v14  ;;  %v1318_v8 = vadd.f32 %v12395_v24, %v1243_v38  ;;  %v1317_v20 = vadd.f32 %v12393_v16, %v1242_v62  ;;  %v1170_v58 = vmul.f32 %v10179_v37, %v12407_v11 }
 0x28c   : > { %1549 = vst [vmem:[#allocation2 + $0xb0] sm:$0xff] %v9361_v61  ;;  %v1169_v44 = vmul.f32 %v10179_v37, %v15978_v36 }
 0x28d   : > { %v1018_v30 = vpop.xlane.xlu1 %1017  ;;  %10186 = vrsqrt.f32 %v1085_v60  ;;  %v1358_v5 = vpack.c.bf16 %v1318_v8, %v1316_v9  ;;  %v1357_v49 = vpack.c.bf16 %v1317_v20, %v1315_v59  ;;  %v9362_v46 = vpack.c.bf16 %v1318_v8, %v1317_v20 }
 0x28e   : > { %v1054_v54 = vmul.f32 0.00390625, %v1018_v30  ;;  %v10181_v43 = vpop.eup %10180  ;;  %v1245_v27 = vmul.f32 %v12383_v47, %v1170_v58  ;;  %v1244_v3 = vmul.f32 %v12381_v55, %v1169_v44 }
 0x28f   : > { %1893 = vmatprep.mubr.bf16.mxu0 %v1358_v5  ;;  %2502 = vmatprep.mubr.bf16.mxu1 %v1358_v5  ;;  %v1172_v12 = vmul.f32 %v10181_v43, %v12423_v63  ;;  %v1171_v11 = vmul.f32 %v10181_v43, %v12420_v53  ;;  %1550 = vst [vmem:[#allocation2 + $0xb8] sm:$0xff] %v9362_v46  ;;  %v15980_v43 = vld [vmem:[#allocation29_spill] sm:$0xff] }
 0x290   : > { %v1086_v6 = vadd.f32 1e-05, %v1054_v54  ;;  %1894 = vmatmul.mubr.bf16.gmra.mxu0 %v1357_v49  ;;  %2503 = vmatmul.mubr.bf16.gmra.mxu1 %v1357_v49  ;;  %v1320_v41 = vadd.f32 %v12395_v24, %v1245_v27  ;;  %v1319_v17 = vadd.f32 %v12393_v16, %v1244_v3  ;;  %v15979_v49 = vld [vmem:[#allocation42_spill] sm:$0xff] }
 0x291   : > { %v1021_v2 = vpop.xlane.xlu0 %1020  ;;  %v1247_v32 = vmul.f32 %v12383_v47, %v1172_v12  ;;  %v1246_v50 = vmul.f32 %v12381_v55, %v1171_v11 }
 0x292   : > { %10188 = vrsqrt.f32 %v1086_v6  ;;  %v1055_v29 = vmul.f32 0.00390625, %v1021_v2  ;;  %v10183_v18 = vpop.eup %10182  ;;  %v9363_v52 = vpack.c.bf16 %v1320_v41, %v1319_v17 }
 0x293   : > { %v1322_v63 = vadd.f32 %v12395_v24, %v1247_v32  ;;  %v1321_v53 = vadd.f32 %v12393_v16, %v1246_v50  ;;  %v1174_v0 = vmul.f32 %v10183_v18, %v12437_v48  ;;  %v1173_v28 = vmul.f32 %v10183_v18, %v12434_v10  ;;  %v15982_v32 = vld [vmem:[#allocation43_spill] sm:$0xff] }
 0x294   : > { %v1087_v51 = vadd.f32 1e-05, %v1055_v29  ;;  %1551 = vst [vmem:[#allocation2 + $0xc0] sm:$0xff] %v9363_v52 }
 0x295   : > { %v1360_v56 = vpack.c.bf16 %v1322_v63, %v1320_v41  ;;  %v1359_v31 = vpack.c.bf16 %v1321_v53, %v1319_v17  ;;  %v9364_v15 = vpack.c.bf16 %v1322_v63, %v1321_v53  ;;  %v1249_v22 = vmul.f32 %v12383_v47, %v1174_v0  ;;  %v15981_v17 = vld [vmem:[#allocation31_spill] sm:$0xff] }
 0x296   : > { %10190 = vrsqrt.f32 %v1087_v51  ;;  %v1248_v26 = vmul.f32 %v12381_v55, %v1173_v28 }
 0x297   : > { %v10185_v23 = vpop.eup %10184  ;;  %v1024_v39 = vpop.xlane.xlu1 %1023  ;;  %1903 = vmatprep.mubr.bf16.mxu0 %v1360_v56  ;;  %2512 = vmatprep.mubr.bf16.mxu1 %v1360_v56  ;;  %1552 = vst [vmem:[#allocation2 + $0xc8] sm:$0xff] %v9364_v15  ;;  %v1324_v10 = vadd.f32 %v12395_v24, %v1249_v22 }
 0x298   : > { %v1056_v25 = vmul.f32 0.00390625, %v1024_v39  ;;  %v1176_v57 = vmul.f32 %v10185_v23, %v12453_v33  ;;  %v1175_v48 = vmul.f32 %v10185_v23, %v12450_v35  ;;  %1904 = vmatmul.mubr.bf16.gmra.mxu0 %v1359_v31  ;;  %2513 = vmatmul.mubr.bf16.gmra.mxu1 %v1359_v31  ;;  %v1323_v40 = vadd.f32 %v12393_v16, %v1248_v26 }
 0x29a   : > { %v1088_v13 = vadd.f32 1e-05, %v1056_v25  ;;  %v1251_v19 = vmul.f32 %v12383_v47, %v1176_v57  ;;  %v1250_v45 = vmul.f32 %v12381_v55, %v1175_v48  ;;  %v10187_v34 = vpop.eup %10186  ;;  %v9365_v42 = vpack.c.bf16 %v1324_v10, %v1323_v40 }
 0x29b   : > { %v1178_v35 = vmul.f32 %v10187_v34, %v12468_v1  ;;  %v1177_v59 = vmul.f32 %v10187_v34, %v12465_v7 }
 0x29c   : > { %10192 = vrsqrt.f32 %v1088_v13  ;;  %v1326_v9 = vadd.f32 %v12395_v24, %v1251_v19  ;;  %v1325_v33 = vadd.f32 %v12393_v16, %v1250_v45  ;;  %1553 = vst [vmem:[#allocation2 + $0xd0] sm:$0xff] %v9365_v42 }
 0x29d   : > { %v1253_v37 = vmul.f32 %v12383_v47, %v1178_v35  ;;  %v1252_v60 = vmul.f32 %v12381_v55, %v1177_v59 }
 0x29e   : > { %v1362_v14 = vpack.c.bf16 %v1326_v9, %v1324_v10  ;;  %v1361_v38 = vpack.c.bf16 %v1325_v33, %v1323_v40  ;;  %v9366_v62 = vpack.c.bf16 %v1326_v9, %v1325_v33 }
 0x29f   : > { %v10189_v61 = vpop.eup %10188  ;;  %v1328_v20 = vadd.f32 %v12395_v24, %v1253_v37  ;;  %v1327_v7 = vadd.f32 %v12393_v16, %v1252_v60 }
 0x2a0   : > { %1913 = vmatprep.mubr.bf16.mxu0 %v1362_v14  ;;  %2522 = vmatprep.mubr.bf16.mxu1 %v1362_v14  ;;  %1554 = vst [vmem:[#allocation2 + $0xd8] sm:$0xff] %v9366_v62  ;;  %v1180_v8 = vmul.f32 %v10189_v61, %v12482_v21  ;;  %v1179_v1 = vmul.f32 %v10189_v61, %v12479_v4 }
 0x2a1   : > { %1914 = vmatmul.mubr.bf16.gmra.mxu0 %v1361_v38  ;;  %2523 = vmatmul.mubr.bf16.gmra.mxu1 %v1361_v38  ;;  %v9367_v44 = vpack.c.bf16 %v1328_v20, %v1327_v7 }
 0x2a2   : > { %v1255_v58 = vmul.f32 %v12383_v47, %v1180_v8  ;;  %v1254_v30 = vmul.f32 %v12381_v55, %v1179_v1 }
 0x2a3   : > { %v10191_v36 = vpop.eup %10190  ;;  %1555 = vst [vmem:[#allocation2 + $0xe0] sm:$0xff] %v9367_v44 }
 0x2a4   : > { %v1330_v54 = vadd.f32 %v12395_v24, %v1255_v58  ;;  %v1329_v5 = vadd.f32 %v12393_v16, %v1254_v30  ;;  %v1182_v21 = vmul.f32 %v10191_v36, %v15979_v49  ;;  %v1181_v46 = vmul.f32 %v10191_v36, %v15980_v43 }
 0x2a6   : > { %v1364_v4 = vpack.c.bf16 %v1330_v54, %v1328_v20  ;;  %v1363_v27 = vpack.c.bf16 %v1329_v5, %v1327_v7  ;;  %v9368_v3 = vpack.c.bf16 %v1330_v54, %v1329_v5  ;;  %v1257_v6 = vmul.f32 %v12383_v47, %v1182_v21 }
 0x2a7   : > { %v1256_v12 = vmul.f32 %v12381_v55, %v1181_v46 }
 0x2a8   : > { %1923 = vmatprep.mubr.bf16.mxu0 %v1364_v4  ;;  %2532 = vmatprep.mubr.bf16.mxu1 %v1364_v4  ;;  %1556 = vst [vmem:[#allocation2 + $0xe8] sm:$0xff] %v9368_v3  ;;  %v1332_v11 = vadd.f32 %v12395_v24, %v1257_v6 }
 0x2a9   : > { %v10193_v2 = vpop.eup %10192  ;;  %1924 = vmatmul.mubr.bf16.gmra.mxu0 %v1363_v27  ;;  %2533 = vmatmul.mubr.bf16.gmra.mxu1 %v1363_v27  ;;  %v1331_v41 = vadd.f32 %v12393_v16, %v1256_v12 }
 0x2aa   : > { %v1184_v29 = vmul.f32 %v10193_v2, %v15981_v17  ;;  %v1183_v50 = vmul.f32 %v10193_v2, %v15982_v32 }
 0x2ab   : > { %v9369_v18 = vpack.c.bf16 %v1332_v11, %v1331_v41 }
 0x2ac   : > { %v1259_v52 = vmul.f32 %v12383_v47, %v1184_v29  ;;  %v1258_v51 = vmul.f32 %v12381_v55, %v1183_v50 }
 0x2ad   : > { %1557 = vst [vmem:[#allocation2 + $0xf0] sm:$0xff] %v9369_v18 }
 0x2ae   : > { %v1334_v63 = vadd.f32 %v12395_v24, %v1259_v52  ;;  %v1333_v53 = vadd.f32 %v12393_v16, %v1258_v51 }
 0x2b0   : > { %v1366_v0 = vpack.c.bf16 %v1334_v63, %v1332_v11  ;;  %v1365_v28 = vpack.c.bf16 %v1333_v53, %v1331_v41  ;;  %v9370_v56 = vpack.c.bf16 %v1334_v63, %v1333_v53 }
 0x2b2   : > { %1933 = vmatprep.mubr.bf16.mxu0 %v1366_v0  ;;  %2542 = vmatprep.mubr.bf16.mxu1 %v1366_v0  ;;  %1558 = vst [vmem:[#allocation2 + $0xf8] sm:$0xff] %v9370_v56  ;;  %v1785_v31 = vpop.f32.mrf.mxu0  ;;  %v2394_v15 = vpop.f32.mrf.mxu1 }
 0x2b3   : > { %1934 = vmatmul.mubr.bf16.gmra.mxu0 %v1365_v28  ;;  %2543 = vmatmul.mubr.bf16.gmra.mxu1 %v1365_v28 }
 0x2b4   : > { %v1787_v23 = vpop.f32.mrf.mxu0  ;;  %v2396_v39 = vpop.f32.mrf.mxu1 }
 0x2b5   : > { %v9371_v47 = vpack.c.bf16 %v1787_v23, %v1785_v31  ;;  %v9403_v22 = vpack.c.bf16 %v2396_v39, %v2394_v15 }
 0x2b6   : > { %v1789_v55 = vpop.f32.mrf.mxu0  ;;  %v2398_v26 = vpop.f32.mrf.mxu1 }
 0x2b7   : > { %2136 = vst [vmem:[#allocation3] sm:$0xff] %v9371_v47  ;;  %2745 = vst [vmem:[#allocation4] sm:$0xff] %v9403_v22 }
 0x2b8   : > { %v1791_v24 = vpop.f32.mrf.mxu0  ;;  %v2400_v16 = vpop.f32.mrf.mxu1 }
 0x2b9   : > { %v9372_v25 = vpack.c.bf16 %v1791_v24, %v1789_v55  ;;  %v9404_v57 = vpack.c.bf16 %v2400_v16, %v2398_v26 }
 0x2bb   : > { %v1795_v48 = vpop.f32.mrf.mxu0  ;;  %v2404_v10 = vpop.f32.mrf.mxu1  ;;  %2137 = vst [vmem:[#allocation3 + $0x8] sm:$0xff] %v9372_v25  ;;  %2746 = vst [vmem:[#allocation4 + $0x8] sm:$0xff] %v9404_v57 }
 0x2bd   : > { %v1797_v40 = vpop.f32.mrf.mxu0  ;;  %v2406_v13 = vpop.f32.mrf.mxu1 }
 0x2be   : > { %v9373_v19 = vpack.c.bf16 %v1797_v40, %v1795_v48  ;;  %v9405_v45 = vpack.c.bf16 %v2406_v13, %v2404_v10 }
 0x2bf   : > { %v1799_v34 = vpop.f32.mrf.mxu0  ;;  %v2408_v42 = vpop.f32.mrf.mxu1 }
 0x2c0   : > { %2138 = vst [vmem:[#allocation3 + $0x10] sm:$0xff] %v9373_v19  ;;  %2747 = vst [vmem:[#allocation4 + $0x10] sm:$0xff] %v9405_v45 }
 0x2c1   : > { %v1801_v9 = vpop.f32.mrf.mxu0  ;;  %v2410_v33 = vpop.f32.mrf.mxu1 }
 0x2c2   : > { %v9374_v35 = vpack.c.bf16 %v1801_v9, %v1799_v34  ;;  %v9406_v59 = vpack.c.bf16 %v2410_v33, %v2408_v42 }
 0x2c4   : > { %2139 = vst [vmem:[#allocation3 + $0x18] sm:$0xff] %v9374_v35  ;;  %2748 = vst [vmem:[#allocation4 + $0x18] sm:$0xff] %v9406_v59 }
 0x2c5   : > { %v1805_v14 = vpop.f32.mrf.mxu0  ;;  %v2414_v38 = vpop.f32.mrf.mxu1 }
 0x2c7   : > { %v1807_v62 = vpop.f32.mrf.mxu0  ;;  %v2416_v37 = vpop.f32.mrf.mxu1 }
 0x2c8   : > { %v9375_v61 = vpack.c.bf16 %v1807_v62, %v1805_v14  ;;  %v9407_v60 = vpack.c.bf16 %v2416_v37, %v2414_v38 }
 0x2c9   : > { %v1809_v8 = vpop.f32.mrf.mxu0  ;;  %v2418_v20 = vpop.f32.mrf.mxu1 }
 0x2ca   : > { %2140 = vst [vmem:[#allocation3 + $0x20] sm:$0xff] %v9375_v61  ;;  %2749 = vst [vmem:[#allocation4 + $0x20] sm:$0xff] %v9407_v60 }
 0x2cb   : > { %v1811_v1 = vpop.f32.mrf.mxu0  ;;  %v2420_v7 = vpop.f32.mrf.mxu1 }
 0x2cc   : > { %v9376_v58 = vpack.c.bf16 %v1811_v1, %v1809_v8  ;;  %v9408_v30 = vpack.c.bf16 %v2420_v7, %v2418_v20 }
 0x2ce   : > { %2141 = vst [vmem:[#allocation3 + $0x28] sm:$0xff] %v9376_v58  ;;  %2750 = vst [vmem:[#allocation4 + $0x28] sm:$0xff] %v9408_v30 }
 0x2cf   : > { %v1815_v36 = vpop.f32.mrf.mxu0  ;;  %v2424_v44 = vpop.f32.mrf.mxu1 }
 0x2d1   : > { %v1817_v54 = vpop.f32.mrf.mxu0  ;;  %v2426_v5 = vpop.f32.mrf.mxu1 }
 0x2d2   : > { %v9377_v49 = vpack.c.bf16 %v1817_v54, %v1815_v36  ;;  %v9409_v21 = vpack.c.bf16 %v2426_v5, %v2424_v44 }
 0x2d3   : > { %v1819_v43 = vpop.f32.mrf.mxu0  ;;  %v2428_v46 = vpop.f32.mrf.mxu1 }
 0x2d4   : > { %2142 = vst [vmem:[#allocation3 + $0x30] sm:$0xff] %v9377_v49  ;;  %2751 = vst [vmem:[#allocation4 + $0x30] sm:$0xff] %v9409_v21 }
 0x2d5   : > { %v1821_v4 = vpop.f32.mrf.mxu0  ;;  %v2430_v27 = vpop.f32.mrf.mxu1 }
 0x2d6   : > { %v9378_v3 = vpack.c.bf16 %v1821_v4, %v1819_v43  ;;  %v9410_v6 = vpack.c.bf16 %v2430_v27, %v2428_v46 }
 0x2d7   : > { %v1825_v12 = vpop.f32.mrf.mxu0  ;;  %v2434_v11 = vpop.f32.mrf.mxu1 }
 0x2d8   : > { %2143 = vst [vmem:[#allocation3 + $0x38] sm:$0xff] %v9378_v3  ;;  %2752 = vst [vmem:[#allocation4 + $0x38] sm:$0xff] %v9410_v6 }
 0x2d9   : > { %v1827_v2 = vpop.f32.mrf.mxu0  ;;  %v2436_v41 = vpop.f32.mrf.mxu1 }
 0x2da   : > { %v9379_v17 = vpack.c.bf16 %v1827_v2, %v1825_v12  ;;  %v9411_v29 = vpack.c.bf16 %v2436_v41, %v2434_v11 }
 0x2db   : > { %v1829_v32 = vpop.f32.mrf.mxu0  ;;  %v2438_v50 = vpop.f32.mrf.mxu1 }
 0x2dc   : > { %2144 = vst [vmem:[#allocation3 + $0x40] sm:$0xff] %v9379_v17  ;;  %2753 = vst [vmem:[#allocation4 + $0x40] sm:$0xff] %v9411_v29 }
 0x2dd   : > { %v1831_v18 = vpop.f32.mrf.mxu0  ;;  %v2440_v52 = vpop.f32.mrf.mxu1 }
 0x2de   : > { %v9380_v51 = vpack.c.bf16 %v1831_v18, %v1829_v32  ;;  %v9412_v63 = vpack.c.bf16 %v2440_v52, %v2438_v50 }
 0x2df   : > { %v1835_v53 = vpop.f32.mrf.mxu0  ;;  %v2444_v0 = vpop.f32.mrf.mxu1 }
 0x2e0   : > { %2145 = vst [vmem:[#allocation3 + $0x48] sm:$0xff] %v9380_v51  ;;  %2754 = vst [vmem:[#allocation4 + $0x48] sm:$0xff] %v9412_v63 }
 0x2e1   : > { %v1837_v28 = vpop.f32.mrf.mxu0  ;;  %v2446_v56 = vpop.f32.mrf.mxu1 }
 0x2e2   : > { %v9381_v31 = vpack.c.bf16 %v1837_v28, %v1835_v53  ;;  %v9413_v15 = vpack.c.bf16 %v2446_v56, %v2444_v0 }
 0x2e3   : > { %v1839_v23 = vpop.f32.mrf.mxu0  ;;  %v2448_v39 = vpop.f32.mrf.mxu1 }
 0x2e4   : > { %2146 = vst [vmem:[#allocation3 + $0x50] sm:$0xff] %v9381_v31  ;;  %2755 = vst [vmem:[#allocation4 + $0x50] sm:$0xff] %v9413_v15 }
 0x2e5   : > { %v1841_v47 = vpop.f32.mrf.mxu0  ;;  %v2450_v22 = vpop.f32.mrf.mxu1 }
 0x2e6   : > { %v9382_v55 = vpack.c.bf16 %v1841_v47, %v1839_v23  ;;  %v9414_v26 = vpack.c.bf16 %v2450_v22, %v2448_v39 }
 0x2e7   : > { %v1845_v24 = vpop.f32.mrf.mxu0  ;;  %v2454_v16 = vpop.f32.mrf.mxu1 }
 0x2e8   : > { %2147 = vst [vmem:[#allocation3 + $0x58] sm:$0xff] %v9382_v55  ;;  %2756 = vst [vmem:[#allocation4 + $0x58] sm:$0xff] %v9414_v26 }
 0x2e9   : > { %v1847_v25 = vpop.f32.mrf.mxu0  ;;  %v2456_v57 = vpop.f32.mrf.mxu1 }
 0x2ea   : > { %v9383_v48 = vpack.c.bf16 %v1847_v25, %v1845_v24  ;;  %v9415_v10 = vpack.c.bf16 %v2456_v57, %v2454_v16 }
 0x2eb   : > { %v1849_v40 = vpop.f32.mrf.mxu0  ;;  %v2458_v13 = vpop.f32.mrf.mxu1 }
 0x2ec   : > { %2148 = vst [vmem:[#allocation3 + $0x60] sm:$0xff] %v9383_v48  ;;  %2757 = vst [vmem:[#allocation4 + $0x60] sm:$0xff] %v9415_v10 }
 0x2ed   : > { %v1851_v19 = vpop.f32.mrf.mxu0  ;;  %v2460_v45 = vpop.f32.mrf.mxu1 }
 0x2ee   : > { %v9384_v34 = vpack.c.bf16 %v1851_v19, %v1849_v40  ;;  %v9416_v42 = vpack.c.bf16 %v2460_v45, %v2458_v13 }
 0x2ef   : > { %v1855_v9 = vpop.f32.mrf.mxu0  ;;  %v2464_v33 = vpop.f32.mrf.mxu1 }
 0x2f0   : > { %2149 = vst [vmem:[#allocation3 + $0x68] sm:$0xff] %v9384_v34  ;;  %2758 = vst [vmem:[#allocation4 + $0x68] sm:$0xff] %v9416_v42 }
 0x2f1   : > { %v1857_v35 = vpop.f32.mrf.mxu0  ;;  %v2466_v59 = vpop.f32.mrf.mxu1 }
 0x2f2   : > { %v9385_v14 = vpack.c.bf16 %v1857_v35, %v1855_v9  ;;  %v9417_v38 = vpack.c.bf16 %v2466_v59, %v2464_v33 }
 0x2f3   : > { %v1859_v62 = vpop.f32.mrf.mxu0  ;;  %v2468_v37 = vpop.f32.mrf.mxu1 }
 0x2f4   : > { %2150 = vst [vmem:[#allocation3 + $0x70] sm:$0xff] %v9385_v14  ;;  %2759 = vst [vmem:[#allocation4 + $0x70] sm:$0xff] %v9417_v38 }
 0x2f5   : > { %v1861_v61 = vpop.f32.mrf.mxu0  ;;  %v2470_v60 = vpop.f32.mrf.mxu1 }
 0x2f6   : > { %v9386_v8 = vpack.c.bf16 %v1861_v61, %v1859_v62  ;;  %v9418_v20 = vpack.c.bf16 %v2470_v60, %v2468_v37 }
 0x2f7   : > { %v1865_v1 = vpop.f32.mrf.mxu0  ;;  %v2474_v7 = vpop.f32.mrf.mxu1 }
 0x2f8   : > { %2151 = vst [vmem:[#allocation3 + $0x78] sm:$0xff] %v9386_v8  ;;  %2760 = vst [vmem:[#allocation4 + $0x78] sm:$0xff] %v9418_v20 }
 0x2f9   : > { %v1867_v58 = vpop.f32.mrf.mxu0  ;;  %v2476_v30 = vpop.f32.mrf.mxu1 }
 0x2fa   : > { %v9387_v36 = vpack.c.bf16 %v1867_v58, %v1865_v1  ;;  %v9419_v44 = vpack.c.bf16 %v2476_v30, %v2474_v7 }
 0x2fb   : > { %v1869_v54 = vpop.f32.mrf.mxu0  ;;  %v2478_v5 = vpop.f32.mrf.mxu1 }
 0x2fc   : > { %2152 = vst [vmem:[#allocation3 + $0x80] sm:$0xff] %v9387_v36  ;;  %2761 = vst [vmem:[#allocation4 + $0x80] sm:$0xff] %v9419_v44 }
 0x2fd   : > { %v1871_v49 = vpop.f32.mrf.mxu0  ;;  %v2480_v21 = vpop.f32.mrf.mxu1 }
 0x2fe   : > { %v9388_v43 = vpack.c.bf16 %v1871_v49, %v1869_v54  ;;  %v9420_v46 = vpack.c.bf16 %v2480_v21, %v2478_v5 }
 0x2ff   : > { %v1875_v4 = vpop.f32.mrf.mxu0  ;;  %v2484_v27 = vpop.f32.mrf.mxu1 }
 0x300   : > { %2153 = vst [vmem:[#allocation3 + $0x88] sm:$0xff] %v9388_v43  ;;  %2762 = vst [vmem:[#allocation4 + $0x88] sm:$0xff] %v9420_v46 }
 0x301   : > { %v1877_v3 = vpop.f32.mrf.mxu0  ;;  %v2486_v6 = vpop.f32.mrf.mxu1 }
 0x302   : > { %v9389_v12 = vpack.c.bf16 %v1877_v3, %v1875_v4  ;;  %v9421_v11 = vpack.c.bf16 %v2486_v6, %v2484_v27 }
 0x303   : > { %v1879_v2 = vpop.f32.mrf.mxu0  ;;  %v2488_v41 = vpop.f32.mrf.mxu1 }
 0x304   : > { %2154 = vst [vmem:[#allocation3 + $0x90] sm:$0xff] %v9389_v12  ;;  %2763 = vst [vmem:[#allocation4 + $0x90] sm:$0xff] %v9421_v11 }
 0x305   : > { %v1881_v17 = vpop.f32.mrf.mxu0  ;;  %v2490_v29 = vpop.f32.mrf.mxu1 }
 0x306   : > { %v9390_v32 = vpack.c.bf16 %v1881_v17, %v1879_v2  ;;  %v9422_v50 = vpack.c.bf16 %v2490_v29, %v2488_v41 }
 0x308   : > { %2155 = vst [vmem:[#allocation3 + $0x98] sm:$0xff] %v9390_v32  ;;  %2764 = vst [vmem:[#allocation4 + $0x98] sm:$0xff] %v9422_v50 }
 0x348   : > { %v1885_v18 = vpop.f32.mrf.mxu0  ;;  %v2494_v52 = vpop.f32.mrf.mxu1 }
 0x34a   : > { %v1887_v51 = vpop.f32.mrf.mxu0  ;;  %v2496_v63 = vpop.f32.mrf.mxu1 }
 0x34b   : > { %v9391_v53 = vpack.c.bf16 %v1887_v51, %v1885_v18  ;;  %v9423_v0 = vpack.c.bf16 %v2496_v63, %v2494_v52 }
 0x34c   : > { %v1889_v28 = vpop.f32.mrf.mxu0  ;;  %v2498_v56 = vpop.f32.mrf.mxu1 }
 0x34d   : > { %2156 = vst [vmem:[#allocation3 + $0xa0] sm:$0xff] %v9391_v53  ;;  %2765 = vst [vmem:[#allocation4 + $0xa0] sm:$0xff] %v9423_v0 }
 0x34e   : > { %v1891_v31 = vpop.f32.mrf.mxu0  ;;  %v2500_v15 = vpop.f32.mrf.mxu1 }
 0x34f   : > { %v9392_v23 = vpack.c.bf16 %v1891_v31, %v1889_v28  ;;  %v9424_v39 = vpack.c.bf16 %v2500_v15, %v2498_v56 }
 0x350   : > { %v1895_v47 = vpop.f32.mrf.mxu0  ;;  %v2504_v22 = vpop.f32.mrf.mxu1 }
 0x351   : > { %2157 = vst [vmem:[#allocation3 + $0xa8] sm:$0xff] %v9392_v23  ;;  %2766 = vst [vmem:[#allocation4 + $0xa8] sm:$0xff] %v9424_v39 }
 0x352   : > { %v1897_v55 = vpop.f32.mrf.mxu0  ;;  %v2506_v26 = vpop.f32.mrf.mxu1 }
 0x353   : > { %v9393_v24 = vpack.c.bf16 %v1897_v55, %v1895_v47  ;;  %v9425_v16 = vpack.c.bf16 %v2506_v26, %v2504_v22 }
 0x354   : > { %v1899_v25 = vpop.f32.mrf.mxu0  ;;  %v2508_v57 = vpop.f32.mrf.mxu1 }
 0x355   : > { %2158 = vst [vmem:[#allocation3 + $0xb0] sm:$0xff] %v9393_v24  ;;  %2767 = vst [vmem:[#allocation4 + $0xb0] sm:$0xff] %v9425_v16 }
 0x356   : > { %v1901_v48 = vpop.f32.mrf.mxu0  ;;  %v2510_v10 = vpop.f32.mrf.mxu1 }
 0x357   : > { %v9394_v40 = vpack.c.bf16 %v1901_v48, %v1899_v25  ;;  %v9426_v13 = vpack.c.bf16 %v2510_v10, %v2508_v57 }
 0x358   : > { %v1905_v19 = vpop.f32.mrf.mxu0  ;;  %v2514_v45 = vpop.f32.mrf.mxu1 }
 0x359   : > { %2159 = vst [vmem:[#allocation3 + $0xb8] sm:$0xff] %v9394_v40  ;;  %2768 = vst [vmem:[#allocation4 + $0xb8] sm:$0xff] %v9426_v13 }
 0x35a   : > { %v1907_v34 = vpop.f32.mrf.mxu0  ;;  %v2516_v42 = vpop.f32.mrf.mxu1 }
 0x35b   : > { %v9395_v9 = vpack.c.bf16 %v1907_v34, %v1905_v19  ;;  %v9427_v33 = vpack.c.bf16 %v2516_v42, %v2514_v45 }
 0x35c   : > { %v1909_v35 = vpop.f32.mrf.mxu0  ;;  %v2518_v59 = vpop.f32.mrf.mxu1 }
 0x35d   : > { %2160 = vst [vmem:[#allocation3 + $0xc0] sm:$0xff] %v9395_v9  ;;  %2769 = vst [vmem:[#allocation4 + $0xc0] sm:$0xff] %v9427_v33 }
 0x35e   : > { %v1911_v14 = vpop.f32.mrf.mxu0  ;;  %v2520_v38 = vpop.f32.mrf.mxu1 }
 0x35f   : > { %v9396_v62 = vpack.c.bf16 %v1911_v14, %v1909_v35  ;;  %v9428_v37 = vpack.c.bf16 %v2520_v38, %v2518_v59 }
 0x361   : > { %v1915_v61 = vpop.f32.mrf.mxu0  ;;  %v2524_v60 = vpop.f32.mrf.mxu1  ;;  %2161 = vst [vmem:[#allocation3 + $0xc8] sm:$0xff] %v9396_v62  ;;  %2770 = vst [vmem:[#allocation4 + $0xc8] sm:$0xff] %v9428_v37 }
 0x363   : > { %v1917_v8 = vpop.f32.mrf.mxu0  ;;  %v2526_v20 = vpop.f32.mrf.mxu1 }
 0x364   : > { %v9397_v1 = vpack.c.bf16 %v1917_v8, %v1915_v61  ;;  %v9429_v7 = vpack.c.bf16 %v2526_v20, %v2524_v60 }
 0x365   : > { %v1919_v58 = vpop.f32.mrf.mxu0  ;;  %v2528_v30 = vpop.f32.mrf.mxu1 }
 0x366   : > { %2162 = vst [vmem:[#allocation3 + $0xd0] sm:$0xff] %v9397_v1  ;;  %2771 = vst [vmem:[#allocation4 + $0xd0] sm:$0xff] %v9429_v7 }
 0x367   : > { %v1921_v36 = vpop.f32.mrf.mxu0  ;;  %v2530_v44 = vpop.f32.mrf.mxu1 }
 0x368   : > { %v9398_v54 = vpack.c.bf16 %v1921_v36, %v1919_v58  ;;  %v9430_v5 = vpack.c.bf16 %v2530_v44, %v2528_v30 }
 0x369   : > { %v1925_v49 = vpop.f32.mrf.mxu0  ;;  %v2534_v21 = vpop.f32.mrf.mxu1 }
 0x36a   : > { %2163 = vst [vmem:[#allocation3 + $0xd8] sm:$0xff] %v9398_v54  ;;  %2772 = vst [vmem:[#allocation4 + $0xd8] sm:$0xff] %v9430_v5 }
 0x36b   : > { %v1927_v43 = vpop.f32.mrf.mxu0  ;;  %v2536_v46 = vpop.f32.mrf.mxu1 }
 0x36c   : > { %v9399_v4 = vpack.c.bf16 %v1927_v43, %v1925_v49  ;;  %v9431_v27 = vpack.c.bf16 %v2536_v46, %v2534_v21 }
 0x36d   : > { %v1929_v3 = vpop.f32.mrf.mxu0  ;;  %v2538_v6 = vpop.f32.mrf.mxu1 }
 0x36e   : > { %2164 = vst [vmem:[#allocation3 + $0xe0] sm:$0xff] %v9399_v4  ;;  %2773 = vst [vmem:[#allocation4 + $0xe0] sm:$0xff] %v9431_v27 }
 0x36f   : > { %v1931_v12 = vpop.f32.mrf.mxu0  ;;  %v2540_v11 = vpop.f32.mrf.mxu1 }
 0x370   : > { %v9400_v2 = vpack.c.bf16 %v1931_v12, %v1929_v3  ;;  %v9432_v41 = vpack.c.bf16 %v2540_v11, %v2538_v6 }
 0x372   : > { %2165 = vst [vmem:[#allocation3 + $0xe8] sm:$0xff] %v9400_v2  ;;  %2774 = vst [vmem:[#allocation4 + $0xe8] sm:$0xff] %v9432_v41 }
 0x373   : > { %v1935_v17 = vpop.f32.mrf.mxu0  ;;  %v2544_v29 = vpop.f32.mrf.mxu1 }
 0x375   : > { %v1937_v32 = vpop.f32.mrf.mxu0  ;;  %v2546_v50 = vpop.f32.mrf.mxu1 }
 0x376   : > { %v9401_v18 = vpack.c.bf16 %v1937_v32, %v1935_v17  ;;  %v9433_v52 = vpack.c.bf16 %v2546_v50, %v2544_v29 }
 0x377   : > { %v1939_v51 = vpop.f32.mrf.mxu0  ;;  %v2548_v63 = vpop.f32.mrf.mxu1 }
 0x378   : > { %2166 = vst [vmem:[#allocation3 + $0xf0] sm:$0xff] %v9401_v18  ;;  %2775 = vst [vmem:[#allocation4 + $0xf0] sm:$0xff] %v9433_v52 }
 0x379   : > { %v1941_v53 = vpop.f32.mrf.mxu0  ;;  %v2550_v0 = vpop.f32.mrf.mxu1 }
 0x37a   : > { %v9402_v28 = vpack.c.bf16 %v1941_v53, %v1939_v51  ;;  %v9434_v56 = vpack.c.bf16 %v2550_v0, %v2548_v63 }
 0x37c   : > { %2167 = vst [vmem:[#allocation3 + $0xf8] sm:$0xff] %v9402_v28  ;;  %2776 = vst [vmem:[#allocation4 + $0xf8] sm:$0xff] %v9434_v56 }
 0x37d PF: > { %v10274_v31 = vld [vmem:[#allocation10 + $0x74] ss:$8 sps:$4 sm:$0xff]   ;;  %v10276_v15 = vld [vmem:[#allocation10 + $0x70] ss:$8 sps:$4 sm:$0xff]   ;;  %v10277_v23 = vld [vmem:[#allocation10 + $0x64] ss:$8 sps:$4 sm:$0xff]  }
 0x37e   : > { %3071 = vmatprep.subr.bf16.mxu0 %v10274_v31  ;;  %v10279_v39 = vld [vmem:[#allocation10 + $0x60] ss:$8 sps:$4 sm:$0xff]   ;;  %v10280_v47 = vld [vmem:[#allocation10 + $0x54] ss:$8 sps:$4 sm:$0xff]   ;;  %v10282_v22 = vld [vmem:[#allocation10 + $0x50] ss:$8 sps:$4 sm:$0xff]  }
 0x37f   : > { %3072 = vmatpush1.bf16.msra.mxu0 %v10276_v15  ;;  %v10283_v55 = vld [vmem:[#allocation10 + $0x44] ss:$8 sps:$4 sm:$0xff]   ;;  %v10285_v26 = vld [vmem:[#allocation10 + $0x40] ss:$8 sps:$4 sm:$0xff]   ;;  %v10286_v24 = vld [vmem:[#allocation10 + $0x34] ss:$8 sps:$4 sm:$0xff]  }
 0x380   : > { %3073 = vmatprep.subr.bf16.mxu0 %v10277_v23  ;;  %v10288_v16 = vld [vmem:[#allocation10 + $0x30] ss:$8 sps:$4 sm:$0xff]   ;;  %v10289_v25 = vld [vmem:[#allocation10 + $0x24] ss:$8 sps:$4 sm:$0xff]   ;;  %s9023_s16 = sshll.u32 %s11535_s19, 7  ;;  %vm3344_vm0 = vcmask 523264  }
 0x381   : > { %v10291_v57 = vld [vmem:[#allocation10 + $0x20] ss:$8 sps:$4 sm:$0xff]   ;;  %v10292_v48 = vld [vmem:[#allocation10 + $0x14] ss:$8 sps:$4 sm:$0xff]   ;;  %s12674_s13 = scalar_lea.vmem [#allocation2], %s9023_s16  ;;  %s11565_s9 = smov 64  }
 0x382   : > { %v10324_v10 = vld [vmem:[%s12674_s13 + $0x4] ss:$8 sps:$4 sm:$0xff]   ;;  %v10294_v40 = vld [vmem:[#allocation10 + $0x10] ss:$8 sps:$4 sm:$0xff]   ;;  %v10298_v45 = vld [vmem:[#allocation10 + $0xf4] ss:$8 sps:$4 sm:$0xff]  }
 0x383   : > { %3074 = vmatpush1.bf16.msra.mxu0 %v10279_v39  ;;  %v10295_v13 = vld [vmem:[#allocation10 + $0x4] ss:$8 sps:$4 sm:$0xff]   ;;  %3103 = vmatprep.mubr.bf16.mxu0 %v10324_v10  ;;  %v10297_v19 = vld [vmem:[#allocation10] ss:$8 sps:$4 sm:$0xff]   ;;  %v10300_v34 = vld [vmem:[#allocation10 + $0xf0] ss:$8 sps:$4 sm:$0xff]  }
 0x384   : > { %3075 = vmatprep.subr.bf16.mxu0 %v10280_v47  ;;  %v10301_v42 = vld [vmem:[#allocation10 + $0xe4] ss:$8 sps:$4 sm:$0xff]   ;;  %v10303_v33 = vld [vmem:[#allocation10 + $0xe0] ss:$8 sps:$4 sm:$0xff]   ;;  %v10304_v59 = vld [vmem:[#allocation10 + $0xd4] ss:$8 sps:$4 sm:$0xff]  }
 0x385   : > { %v10346_v9 = vld [vmem:[#allocation3 + $0x70] ss:$8 sps:$4 sm:$0xff]   ;;  %v10348_v38 = vld [vmem:[#allocation3 + $0x60] ss:$8 sps:$4 sm:$0xff]   ;;  %v10325_v52 = vld [vmem:[%s12674_s13 + $0x14] ss:$8 sps:$4 sm:$0xff]  }
 0x386   : > { %v10347_v35 = vld [vmem:[#allocation3 + $0xf0] ss:$8 sps:$4 sm:$0xff]   ;;  %4017 = vrot.lane.b32.xlu0 %v10346_v9, %s11565_s9  ;;  %v3391_v14 = vsel %vm3344_vm0, %v10346_v9, 0  ;;  %v10349_v62 = vld [vmem:[#allocation3 + $0xe0] ss:$8 sps:$4 sm:$0xff]   ;;  %4015 = vrot.lane.b32.xlu1 %v10348_v38, %s11565_s9  ;;  %v3388_v8 = vsel %vm3344_vm0, %v10348_v38, 0 }
 0x387   : > { %3076 = vmatpush1.bf16.msra.mxu0 %v10282_v22  ;;  %9822 = vmatprep.subr.msk.bf16.mxu1 %vm3344_vm0, %v10347_v35  ;;  %v10306_v37 = vld [vmem:[#allocation10 + $0xd0] ss:$8 sps:$4 sm:$0xff]   ;;  %v10307_v60 = vld [vmem:[#allocation10 + $0xc4] ss:$8 sps:$4 sm:$0xff]   ;;  %v10309_v1 = vld [vmem:[#allocation10 + $0xc0] ss:$8 sps:$4 sm:$0xff]  }
 0x388   : > { %3077 = vmatprep.subr.bf16.mxu0 %v10283_v55  ;;  %9439 = vmatpush3.bf16.xpose.msra.mxu1 %v3391_v14  ;;  %v10351_v61 = vld [vmem:[#allocation3 + $0x50] ss:$8 sps:$4 sm:$0xff]   ;;  %v10353_v7 = vld [vmem:[#allocation3 + $0x40] ss:$8 sps:$4 sm:$0xff]   ;;  %v10328_v63 = vld [vmem:[%s12674_s13 + $0x24] ss:$8 sps:$4 sm:$0xff]  }
 0x389   : > { %9823 = vmatprep.subr.msk.bf16.mxu1 %vm3344_vm0, %v10349_v62  ;;  %v10350_v20 = vld [vmem:[#allocation3 + $0xd0] ss:$8 sps:$4 sm:$0xff]   ;;  %v10352_v30 = vld [vmem:[#allocation3 + $0xc0] ss:$8 sps:$4 sm:$0xff]   ;;  %v3385_v43 = vsel %vm3344_vm0, %v10351_v61, 0  ;;  %v3382_v46 = vsel %vm3344_vm0, %v10353_v7, 0 }
 0x38a   : > { %4033 = vrot.lane.b32.xlu0 %v10347_v35, %s11565_s9  ;;  %4031 = vrot.lane.b32.xlu1 %v10349_v62, %s11565_s9  ;;  %v10310_v58 = vld [vmem:[#allocation10 + $0xb4] ss:$8 sps:$4 sm:$0xff]   ;;  %v10312_v36 = vld [vmem:[#allocation10 + $0xb0] ss:$8 sps:$4 sm:$0xff]   ;;  %v10313_v54 = vld [vmem:[#allocation10 + $0xa4] ss:$8 sps:$4 sm:$0xff]  }
 0x38b   : > { %3078 = vmatpush1.bf16.msra.mxu0 %v10285_v26  ;;  %v10355_v44 = vld [vmem:[#allocation3 + $0x30] ss:$8 sps:$4 sm:$0xff]   ;;  %v10357_v5 = vld [vmem:[#allocation3 + $0x20] ss:$8 sps:$4 sm:$0xff]   ;;  %v10331_v0 = vld [vmem:[%s12674_s13 + $0x34] ss:$8 sps:$4 sm:$0xff]  }
 0x38c   : > { %3079 = vmatprep.subr.bf16.mxu0 %v10286_v24  ;;  %v10354_v49 = vld [vmem:[#allocation3 + $0xb0] ss:$8 sps:$4 sm:$0xff]   ;;  %v10315_v4 = vld [vmem:[#allocation10 + $0xa0] ss:$8 sps:$4 sm:$0xff]   ;;  %v3379_v27 = vsel %vm3344_vm0, %v10355_v44, 0  ;;  %v3376_v6 = vsel %vm3344_vm0, %v10357_v5, 0 }
 0x38d   : > { %v10359_v21 = vld [vmem:[#allocation3 + $0x10] ss:$8 sps:$4 sm:$0xff]   ;;  %v10356_v11 = vld [vmem:[#allocation3 + $0xa0] ss:$8 sps:$4 sm:$0xff]   ;;  %v10334_v56 = vld [vmem:[%s12674_s13 + $0x44] ss:$8 sps:$4 sm:$0xff]  }
 0x38e   : > { %4013 = vrot.lane.b32.xlu0 %v10351_v61, %s11565_s9  ;;  %4029 = vrot.lane.b32.xlu1 %v10350_v20, %s11565_s9  ;;  %v10316_v3 = vld [vmem:[#allocation10 + $0x94] ss:$8 sps:$4 sm:$0xff]   ;;  %v3373_v12 = vsel %vm3344_vm0, %v10359_v21, 0  ;;  %v10318_v2 = vld [vmem:[#allocation10 + $0x90] ss:$8 sps:$4 sm:$0xff]   ;;  %s2778_s8 = sshra.s32 %s9023_s16, 3 }
 0x38f   : > { %3080 = vmatpush1.bf16.msra.mxu0 %v10288_v16  ;;  %v10319_v41 = vld [vmem:[#allocation10 + $0x84] ss:$8 sps:$4 sm:$0xff]   ;;  %v10321_v32 = vld [vmem:[#allocation10 + $0x80] ss:$8 sps:$4 sm:$0xff]   ;;  %v10337_v15 = vld [vmem:[%s12674_s13 + $0x54] ss:$8 sps:$4 sm:$0xff]  }
 0x390   : > { %3081 = vmatprep.subr.bf16.mxu0 %v10289_v25  ;;  %9441 = vmatpush3.bf16.xpose.msra.mxu1 %v3388_v8  ;;  %v10358_v17 = vld [vmem:[#allocation3 + $0x90] ss:$8 sps:$4 sm:$0xff]   ;;  %v10361_v29 = vld [vmem:[#allocation3] ss:$8 sps:$4 sm:$0xff]   ;;  %v10340_v39 = vld [vmem:[%s12674_s13 + $0x64] ss:$8 sps:$4 sm:$0xff]  }
 0x391   : > { %9824 = vmatprep.subr.msk.bf16.mxu1 %vm3344_vm0, %v10350_v20  ;;  %v10360_v50 = vld [vmem:[#allocation3 + $0x80] ss:$8 sps:$4 sm:$0xff]   ;;  %v10327_v51 = vld [vmem:[%s12674_s13 + $0x10] ss:$8 sps:$4 sm:$0xff]   ;;  %v10343_v22 = vld [vmem:[%s12674_s13 + $0x74] ss:$8 sps:$4 sm:$0xff]  }
 0x392   : > { %4011 = vrot.lane.b32.xlu0 %v10353_v7, %s11565_s9  ;;  %4027 = vrot.lane.b32.xlu1 %v10352_v30, %s11565_s9  ;;  %v10322_v18 = vld [vmem:[%s12674_s13] ss:$8 sps:$4 sm:$0xff]   ;;  %v10333_v28 = vld [vmem:[%s12674_s13 + $0x30] ss:$8 sps:$4 sm:$0xff]   ;;  %v3370_v26 = vsel %vm3344_vm0, %v10361_v29, 0  ;;  %s9436_s5 = sshll.u32 %s2778_s8, 4 }
 0x393   : > { %3082 = vmatpush1.bf16.msra.mxu0 %v10291_v57  ;;  %v10330_v53 = vld [vmem:[%s12674_s13 + $0x20] ss:$8 sps:$4 sm:$0xff]   ;;  %v10339_v23 = vld [vmem:[%s12674_s13 + $0x50] ss:$8 sps:$4 sm:$0xff]   ;;  %s14594_s6 = scalar_lea.vmem %s11864_s27, %s9436_s5 [#allocation5]  ;;  %s16299_s4 = sld [smem:[#allocation167_spill]] }
 0x394   : > { %3083 = vmatprep.subr.bf16.mxu0 %v10292_v48  ;;  %v10336_v31 = vld [vmem:[%s12674_s13 + $0x40] ss:$8 sps:$4 sm:$0xff]   ;;  %v10345_v55 = vld [vmem:[%s12674_s13 + $0x70] ss:$8 sps:$4 sm:$0xff]   ;;  %s16329_s26 = sld [smem:[#allocation168_spill]]  ;;  %s9437_s3 = sshll.u32 %s11535_s19, 5 }
 0x395   : > { %v10342_v47 = vld [vmem:[%s12674_s13 + $0x60] ss:$8 sps:$4 sm:$0xff]   ;;  %v12725_v25 = vld [vmem:[#allocation4 + $0xf0] ss:$8 sps:$4 sm:$0xff]   ;;  %s16330_s28 = sld [smem:[#allocation169_spill]]  ;;  %s8680_s27 = sshll.u32 %s11889_s14, 4  ;;  %s15630_s27 = int_to_ptr.vmem [resolvable:$true] %s8680_s27 }
 0x396   : > { %4009 = vrot.lane.b32.xlu0 %v10355_v44, %s11565_s9  ;;  %4025 = vrot.lane.b32.xlu1 %v10354_v49, %s11565_s9  ;;  %v12761_v44 = vld [vmem:[#allocation4 + $0xd0] ss:$8 sps:$4 sm:$0xff]   ;;  %s16358_s10 = sld [smem:[#allocation26_spill]]  ;;  %s15637_s16 = scalar_lea.sflag [#allocation7], %s597_s12 }
 0x397   : > { %3084 = vmatpush1.bf16.msra.mxu0 %v10294_v40  ;;  %s16365_s2 = sld [smem:[#allocation174_spill]]  ;;  %s11415_s13 = scalar_lea.vmem %s15630_s27, 4096 }
 0x398   : > { %3085 = vmatprep.subr.bf16.mxu0 %v10295_v13  ;;  %9443 = vmatpush3.bf16.xpose.msra.mxu1 %v3385_v43  ;;  %v12771_v43 = vld [vmem:[#allocation4 + $0xc0] ss:$8 sps:$4 sm:$0xff]   ;;  %p11416_p5 = scmp.ne.s32.totalorder %s15630_s27, %s11415_s13 }
 0x399   : > { %9825 = vmatprep.subr.msk.bf16.mxu1 %vm3344_vm0, %v10352_v30  ;;  %v12757_v30 = vld [vmem:[#allocation4 + $0x60] ss:$8 sps:$4 sm:$0xff]  }
 0x39a   : > { %4007 = vrot.lane.b32.xlu0 %v10357_v5, %s11565_s9  ;;  %4023 = vrot.lane.b32.xlu1 %v10356_v11, %s11565_s9  ;;  %p11417_p3 = pnand %p11416_p5, %p11828_p7 }
 0x39b   : > { %3086 = vmatpush1.bf16.msra.mxu0 %v10297_v19 }
 0x39c   : > { %3087 = vmatprep.subr.bf16.mxu0 %v10298_v45  ;;  %p11418_p11 = pneg %p11417_p3 }
 0x39e   : > { %4005 = vrot.lane.b32.xlu0 %v10359_v21, %s11565_s9  ;;  %4021 = vrot.lane.b32.xlu1 %v10358_v17, %s11565_s9 }
 0x39f   : > { %3088 = vmatpush2.bf16.msra.mxu0 %v10300_v34 }
 0x3a0   : > { %3089 = vmatprep.subr.bf16.mxu0 %v10301_v42  ;;  %9445 = vmatpush3.bf16.xpose.msra.mxu1 %v3382_v46 }
 0x3a1   : > { %9826 = vmatprep.subr.msk.bf16.mxu1 %vm3344_vm0, %v10354_v49  ;;  %v12769_v49 = vld [vmem:[#allocation4 + $0x50] ss:$8 sps:$4 sm:$0xff]  }
 0x3a2   : > { %4003 = vrot.lane.b32.xlu0 %v10361_v29, %s11565_s9  ;;  %4019 = vrot.lane.b32.xlu1 %v10360_v50, %s11565_s9 }
 0x3a3   : > { %3090 = vmatpush2.bf16.msra.mxu0 %v10303_v33 }
 0x3a4   : > { %3091 = vmatprep.subr.bf16.mxu0 %v10304_v59 }
 0x3a7   : > { %3092 = vmatpush2.bf16.msra.mxu0 %v10306_v37  ;;  %v12745_v37 = vld [vmem:[#allocation4 + $0x70] ss:$8 sps:$4 sm:$0xff]  }
 0x3a8   : > { %3093 = vmatprep.subr.bf16.mxu0 %v10307_v60  ;;  %9447 = vmatpush3.bf16.xpose.msra.mxu1 %v3379_v27  ;;  %v12750_v60 = vld [vmem:[#allocation4 + $0xe0] ss:$8 sps:$4 sm:$0xff]  }
 0x3a9   : > { %9827 = vmatprep.subr.msk.bf16.mxu1 %vm3344_vm0, %v10356_v11  ;;  %v12782_v11 = vld [vmem:[#allocation4 + $0xb0] ss:$8 sps:$4 sm:$0xff]  }
 0x3ab   : > { %3094 = vmatpush2.bf16.msra.mxu0 %v10309_v1 }
 0x3ac   : > { %3095 = vmatprep.subr.bf16.mxu0 %v10310_v58 }
 0x3af   : > { %3096 = vmatpush2.bf16.msra.mxu0 %v10312_v36 }
 0x3b0   : > { %3097 = vmatprep.subr.bf16.mxu0 %v10313_v54  ;;  %9449 = vmatpush3.bf16.xpose.msra.mxu1 %v3376_v6  ;;  %v12778_v6 = vld [vmem:[#allocation4 + $0x40] ss:$8 sps:$4 sm:$0xff]  }
 0x3b1   : > { %9828 = vmatprep.subr.msk.bf16.mxu1 %vm3344_vm0, %v10358_v17  ;;  %v12790_v17 = vld [vmem:[#allocation4 + $0x30] ss:$8 sps:$4 sm:$0xff]  }
 0x3b3   : > { %3098 = vmatpush2.bf16.msra.mxu0 %v10315_v4 }
 0x3b4   : > { %3099 = vmatprep.subr.bf16.mxu0 %v10316_v3 }
 0x3b7   : > { %3100 = vmatpush2.bf16.msra.mxu0 %v10318_v2 }
 0x3b8   : > { %3101 = vmatprep.subr.bf16.mxu0 %v10319_v41  ;;  %9451 = vmatpush3.bf16.xpose.msra.mxu1 %v3373_v12 }
 0x3b9   : > { %9829 = vmatprep.subr.msk.bf16.mxu1 %vm3344_vm0, %v10360_v50 }
 0x3bb   : > { %3102 = vmatpush2.bf16.msra.mxu0 %v10321_v32  ;;  %v12792_v32 = vld [vmem:[#allocation4 + $0xa0] ss:$8 sps:$4 sm:$0xff]  }
 0x3bc   : > { %9470 = vmatprep.subr.bf16.mxu0 %v12725_v25 }
 0x3be   : > { %3104 = vmatmul.mubr.bf16.vlgmr.msra.gmra.mxu0 %v10322_v18 }
 0x3bf   : > { %3113 = vmatprep.mubr.bf16.mxu0 %v10325_v52  ;;  %9471 = vmatpush3.bf16.msra.mxu0 %v12745_v37 }
 0x3c0   : > { %9453 = vmatpush3.bf16.xpose.msra.mxu1 %v3370_v26  ;;  %9472 = vmatprep.subr.bf16.mxu0 %v12750_v60  ;;  %v12820_v26 = vld [vmem:[#allocation4] ss:$8 sps:$4 sm:$0xff]  }
 0x3c3   : > { %9473 = vmatpush3.bf16.msra.mxu0 %v12757_v30 }
 0x3c4   : > { %9474 = vmatprep.subr.bf16.mxu0 %v12761_v44 }
 0x3c6   : > { %3114 = vmatmul.mubr.bf16.gmra.mxu0 %v10327_v51 }
 0x3c7   : > { %3123 = vmatprep.mubr.bf16.mxu0 %v10328_v63  ;;  %9475 = vmatpush3.bf16.msra.mxu0 %v12769_v49  ;;  %v12799_v63 = vld [vmem:[#allocation4 + $0x20] ss:$8 sps:$4 sm:$0xff]  }
 0x3c8   : > { %9476 = vmatprep.subr.bf16.mxu0 %v12771_v43 }
 0x3cb   : > { %9477 = vmatpush3.bf16.msra.mxu0 %v12778_v6 }
 0x3cc   : > { %9478 = vmatprep.subr.bf16.mxu0 %v12782_v11 }
 0x3ce   : > { %3124 = vmatmul.mubr.bf16.gmra.mxu0 %v10330_v53 }
 0x3cf   : > { %3133 = vmatprep.mubr.bf16.mxu0 %v10331_v0  ;;  %9479 = vmatpush3.bf16.msra.mxu0 %v12790_v17  ;;  %v12803_v0 = vld [vmem:[#allocation4 + $0x90] ss:$8 sps:$4 sm:$0xff]  }
 0x3d0   : > { %9480 = vmatprep.subr.bf16.mxu0 %v12792_v32 }
 0x3d3   : > { %9481 = vmatpush3.bf16.msra.mxu0 %v12799_v63 }
 0x3d4   : > { %9482 = vmatprep.subr.bf16.mxu0 %v12803_v0 }
 0x3d6   : > { %3134 = vmatmul.mubr.bf16.gmra.mxu0 %v10333_v28 }
 0x3d7   : > { %3143 = vmatprep.mubr.bf16.mxu0 %v10334_v56 }
 0x3de   : > { %3144 = vmatmul.mubr.bf16.gmra.mxu0 %v10336_v31  ;;  %v12811_v31 = vld [vmem:[#allocation4 + $0x10] ss:$8 sps:$4 sm:$0xff]  }
 0x3df   : > { %3153 = vmatprep.mubr.bf16.mxu0 %v10337_v15  ;;  %9483 = vmatpush3.bf16.msra.mxu0 %v12811_v31 }
 0x3e6   : > { %3154 = vmatmul.mubr.bf16.gmra.mxu0 %v10339_v23  ;;  %v12813_v23 = vld [vmem:[#allocation4 + $0x80] ss:$8 sps:$4 sm:$0xff]  }
 0x3e7   : > { %3163 = vmatprep.mubr.bf16.mxu0 %v10340_v39  ;;  %9484 = vmatprep.subr.bf16.mxu0 %v12813_v23 }
 0x3e8   : > { %9485 = vmatpush3.bf16.msra.mxu0 %v12820_v26 }
 0x3ee   : > { %3164 = vmatmul.mubr.bf16.gmra.mxu0 %v10342_v47 }
 0x3ef   : > { %3173 = vmatprep.mubr.bf16.mxu0 %v10343_v22 }
 0x3f6   : > { %3174 = vmatmul.mubr.bf16.gmra.mxu0 %v10345_v55 }
 0x3f8   : > { %v4018_v24 = vpop.permute.xlu0 %4017  ;;  %v4016_v48 = vpop.permute.xlu1 %4015 }
 0x3f9   : > { %v4081_v45 = vsel %vm3344_vm0, %v4018_v24, 0  ;;  %v4078_v14 = vsel %vm3344_vm0, %v4016_v48, 0  ;;  %v10362_v24 = vld [vmem:[#allocation3 + $0xf4] ss:$8 sps:$4 sm:$0xff]  }
 0x3fc   : > { %v4034_v16 = vpop.permute.xlu0 %4033  ;;  %v4032_v34 = vpop.permute.xlu1 %4031 }
 0x3fd   : > { %9830 = vmatprep.subr.msk.bf16.mxu1 %vm3344_vm0, %v4034_v16 }
 0x400   : > { %v4030_v38 = vpop.permute.xlu1 %4029  ;;  %v4014_v8 = vpop.permute.xlu0 %4013 }
 0x401   : > { %v4075_v58 = vsel %vm3344_vm0, %v4014_v8, 0 }
 0x404   : > { %v4028_v36 = vpop.permute.xlu1 %4027  ;;  %v4012_v21 = vpop.permute.xlu0 %4011 }
 0x405   : > { %v4072_v3 = vsel %vm3344_vm0, %v4012_v21, 0  ;;  %v12854_v21 = vld [vmem:[#allocation3 + $0x44] ss:$8 sps:$4 sm:$0xff]  }
 0x408   : > { %v4026_v12 = vpop.permute.xlu1 %4025  ;;  %v4010_v29 = vpop.permute.xlu0 %4009 }
 0x409   : > { %v4069_v51 = vsel %vm3344_vm0, %v4010_v29, 0  ;;  %v12879_v29 = vld [vmem:[#allocation3 + $0x14] ss:$8 sps:$4 sm:$0xff]  }
 0x40c   : > { %v4024_v53 = vpop.permute.xlu1 %4023  ;;  %v4008_v15 = vpop.permute.xlu0 %4007 }
 0x40d   : > { %v4066_v55 = vsel %vm3344_vm0, %v4008_v15, 0 }
 0x410   : > { %v4022_v16 = vpop.permute.xlu1 %4021 }
 0x47e   : > { %v3105_v57 = vpop.f32.mrf.mxu0 }
 0x480   : > { %v12728_v10 = vpop.f32.mrf.mxu0 }
 0x482   : > { %v3109_v40 = vpop.f32.mrf.mxu0 }
 0x483   : > { %v3184_v13 = vpack.c.bf16 %v3109_v40, %v3105_v57  ;;  %v4006_v40 = vpop.permute.xlu0 %4005 }
 0x484   : > { %v12730_v19 = vpop.f32.mrf.mxu0 }
 0x485   : > { %3987 = vrot.lane.b32.xlu0 %v3184_v13, %s11565_s9  ;;  %9454 = vmatprep.mubr.msk.bf16.mxu1 %vm3344_vm0, %v3184_v13 }
 0x486   : > { %v3115_v42 = vpop.f32.mrf.mxu0  ;;  %9455 = vmatmul.mubr.msk.bf16.vlgmr.msra.gmra.mxu1 %vm3344_vm0, %v3184_v13 }
 0x487   : > { %9535 = vmatpush3.bf16.xpose.msra.mxu1 %v4081_v45 }
 0x488   : > { %v12736_v9 = vpop.f32.mrf.mxu0  ;;  %9831 = vmatprep.subr.msk.bf16.mxu1 %vm3344_vm0, %v4032_v34 }
 0x48a   : > { %v3119_v33 = vpop.f32.mrf.mxu0 }
 0x48b   : > { %v3186_v35 = vpack.c.bf16 %v3119_v33, %v3115_v42  ;;  %v4063_v42 = vsel %vm3344_vm0, %v4006_v40, 0  ;;  %v12833_v33 = vld [vmem:[#allocation3 + $0x74] ss:$8 sps:$4 sm:$0xff]  }
 0x48c   : > { %v12739_v59 = vpop.f32.mrf.mxu0 }
 0x48d   : > { %3989 = vrot.lane.b32.xlu1 %v3186_v35, %s11565_s9  ;;  %9456 = vmatprep.mubr.msk.bf16.mxu1 %vm3344_vm0, %v3186_v35  ;;  %v12907_v15 = vpack.c.bf16 %v12739_v59, %v12736_v9 }
 0x48e   : > { %v3125_v62 = vpop.f32.mrf.mxu0  ;;  %9457 = vmatmul.mubr.msk.bf16.gmra.mxu1 %vm3344_vm0, %v3186_v35  ;;  %v4020_v35 = vpop.permute.xlu1 %4019 }
 0x48f   : > { %9537 = vmatpush3.bf16.xpose.msra.mxu1 %v4078_v14 }
 0x490   : > { %v12747_v61 = vpop.f32.mrf.mxu0  ;;  %9832 = vmatprep.subr.msk.bf16.mxu1 %vm3344_vm0, %v4030_v38 }
 0x492   : > { %v3129_v20 = vpop.f32.mrf.mxu0 }
 0x493   : > { %v3188_v1 = vpack.c.bf16 %v3129_v20, %v3125_v62  ;;  %v12841_v62 = vld [vmem:[#allocation3 + $0x64] ss:$8 sps:$4 sm:$0xff]   ;;  %v4004_v20 = vpop.permute.xlu0 %4003 }
 0x494   : > { %v12754_v7 = vpop.f32.mrf.mxu0 }
 0x495   : > { %3991 = vrot.lane.b32.xlu0 %v3188_v1, %s11565_s9  ;;  %9458 = vmatprep.mubr.msk.bf16.mxu1 %vm3344_vm0, %v3188_v1 }
 0x496   : > { %v3135_v54 = vpop.f32.mrf.mxu0  ;;  %9459 = vmatmul.mubr.msk.bf16.gmra.mxu1 %vm3344_vm0, %v3188_v1 }
 0x497   : > { %9539 = vmatpush3.bf16.xpose.msra.mxu1 %v4075_v58  ;;  %v12846_v58 = vld [vmem:[#allocation3 + $0x54] ss:$8 sps:$4 sm:$0xff]  }
 0x498   : > { %v12766_v5 = vpop.f32.mrf.mxu0  ;;  %9833 = vmatprep.subr.msk.bf16.mxu1 %vm3344_vm0, %v4028_v36  ;;  %v10366_v36 = vld [vmem:[#allocation3 + $0xe4] ss:$8 sps:$4 sm:$0xff]  }
 0x49a   : > { %v3139_v46 = vpop.f32.mrf.mxu0 }
 0x49b   : > { %v3190_v4 = vpack.c.bf16 %v3139_v46, %v3135_v54  ;;  %v4060_v54 = vsel %vm3344_vm0, %v4004_v20, 0  ;;  %v12856_v46 = vld [vmem:[#allocation3 + $0xd4] ss:$8 sps:$4 sm:$0xff]  }
 0x49c   : > { %v12775_v27 = vpop.f32.mrf.mxu0 }
 0x49d   : > { %3993 = vrot.lane.b32.xlu1 %v3190_v4, %s11565_s9  ;;  %9460 = vmatprep.mubr.msk.bf16.mxu1 %vm3344_vm0, %v3190_v4 }
 0x49e   : > { %v3145_v2 = vpop.f32.mrf.mxu0  ;;  %9461 = vmatmul.mubr.msk.bf16.gmra.mxu1 %vm3344_vm0, %v3190_v4  ;;  %v12863_v4 = vld [vmem:[#allocation3 + $0x34] ss:$8 sps:$4 sm:$0xff]  }
 0x49f   : > { %9541 = vmatpush3.bf16.xpose.msra.mxu1 %v4072_v3  ;;  %v12865_v3 = vld [vmem:[#allocation3 + $0xc4] ss:$8 sps:$4 sm:$0xff]  }
 0x4a0   : > { %v12787_v41 = vpop.f32.mrf.mxu0  ;;  %9834 = vmatprep.subr.msk.bf16.mxu1 %vm3344_vm0, %v4026_v12  ;;  %v12871_v12 = vld [vmem:[#allocation3 + $0x24] ss:$8 sps:$4 sm:$0xff]  }
 0x4a2   : > { %v3149_v50 = vpop.f32.mrf.mxu0 }
 0x4a3   : > { %v3192_v18 = vpack.c.bf16 %v3149_v50, %v3145_v2  ;;  %v12873_v2 = vld [vmem:[#allocation3 + $0xb4] ss:$8 sps:$4 sm:$0xff]   ;;  %v12881_v50 = vld [vmem:[#allocation3 + $0xa4] ss:$8 sps:$4 sm:$0xff]  }
 0x4a4   : > { %v12796_v52 = vpop.f32.mrf.mxu0 }
 0x4a5   : > { %3995 = vrot.lane.b32.xlu0 %v3192_v18, %s11565_s9  ;;  %9462 = vmatprep.mubr.msk.bf16.mxu1 %vm3344_vm0, %v3192_v18 }
 0x4a6   : > { %v3155_v28 = vpop.f32.mrf.mxu0  ;;  %9463 = vmatmul.mubr.msk.bf16.gmra.mxu1 %vm3344_vm0, %v3192_v18  ;;  %v12887_v18 = vld [vmem:[#allocation3 + $0x4] ss:$8 sps:$4 sm:$0xff]  }
 0x4a7   : > { %9543 = vmatpush3.bf16.xpose.msra.mxu1 %v4069_v51  ;;  %v12889_v51 = vld [vmem:[#allocation3 + $0x94] ss:$8 sps:$4 sm:$0xff]  }
 0x4a8   : > { %v12808_v56 = vpop.f32.mrf.mxu0  ;;  %9835 = vmatprep.subr.msk.bf16.mxu1 %vm3344_vm0, %v4024_v53  ;;  %v12895_v53 = vld [vmem:[#allocation3 + $0x84] ss:$8 sps:$4 sm:$0xff]  }
 0x4aa   : > { %v3159_v39 = vpop.f32.mrf.mxu0 }
 0x4ab   : > { %v3194_v47 = vpack.c.bf16 %v3159_v39, %v3155_v28  ;;  %v12899_v28 = vpack.c.bf16 %v12730_v19, %v12728_v10  ;;  %v12911_v39 = vpack.c.bf16 %v12754_v7, %v12747_v61  ;;  %v12919_v10 = vpack.c.bf16 %v12775_v27, %v12766_v5  ;;  %v10400_v7 = vld [vmem:[#allocation4 + $0xb4] ss:$8 sps:$4 sm:$0xff]  }
 0x4ac   : > { %v12817_v22 = vpop.f32.mrf.mxu0  ;;  %v12923_v19 = vpack.c.bf16 %v12796_v52, %v12787_v41  ;;  %v4811_v61 = vsel %vm3344_vm0, %v12833_v33, 0  ;;  %v10402_v5 = vld [vmem:[#allocation4 + $0x34] ss:$8 sps:$4 sm:$0xff]   ;;  %v10397_v52 = vld [vmem:[#allocation4 + $0x64] ss:$8 sps:$4 sm:$0xff]  }
 0x4ad   : > { %3997 = vrot.lane.b32.xlu1 %v3194_v47, %s11565_s9  ;;  %9464 = vmatprep.mubr.msk.bf16.mxu1 %vm3344_vm0, %v3194_v47  ;;  %v12931_v9 = vpack.c.bf16 %v12817_v22, %v12808_v56  ;;  %v10399_v56 = vld [vmem:[#allocation4 + $0xd4] ss:$8 sps:$4 sm:$0xff]  }
 0x4ae   : > { %v3165_v57 = vpop.f32.mrf.mxu0  ;;  %9465 = vmatmul.mubr.msk.bf16.gmra.mxu1 %vm3344_vm0, %v3194_v47  ;;  %v4793_v47 = vsel %vm3344_vm0, %v12879_v29, 0 }
 0x4af   : > { %9545 = vmatpush3.bf16.xpose.msra.mxu1 %v4066_v55  ;;  %v10403_v55 = vld [vmem:[#allocation4 + $0x44] ss:$8 sps:$4 sm:$0xff]  }
 0x4b0   : > { %v12826_v48 = vpop.f32.mrf.mxu0  ;;  %9836 = vmatprep.subr.msk.bf16.mxu1 %vm3344_vm0, %v4022_v16  ;;  %v4790_v16 = vsel %vm3344_vm0, %v12887_v18, 0 }
 0x4b1   : > { %5453 = vrot.lane.b32.xlu1 %v10362_v24, %s11565_s9 }
 0x4b2   : > { %v3169_v13 = vpop.f32.mrf.mxu0 }
 0x4b3   : > { %v3196_v45 = vpack.c.bf16 %v3169_v13, %v3165_v57 }
 0x4b4   : > { %v3171_v34 = vpop.f32.mrf.mxu0 }
 0x4b5   : > { %3999 = vrot.lane.b32.xlu0 %v3196_v45, %s11565_s9  ;;  %9466 = vmatprep.mubr.msk.bf16.mxu1 %vm3344_vm0, %v3196_v45  ;;  %v12934_v59 = vpack.c.bf16 %v3171_v34, %v12826_v48 }
 0x4b6   : > { %v3175_v14 = vpop.f32.mrf.mxu0  ;;  %9467 = vmatmul.mubr.msk.bf16.gmra.mxu1 %vm3344_vm0, %v3196_v45 }
 0x4b7   : > { %9547 = vmatpush3.bf16.xpose.msra.mxu1 %v4063_v42 }
 0x4b8   : > { %v12836_v38 = vpop.f32.mrf.mxu0  ;;  %9837 = vmatprep.subr.msk.bf16.mxu1 %vm3344_vm0, %v4020_v35 }
 0x4b9   : > { %5437 = vrot.lane.b32.xlu0 %v12833_v33, %s11565_s9 }
 0x4ba   : > { %v3179_v8 = vpop.f32.mrf.mxu0 }
 0x4bb   : > { %v3198_v1 = vpack.c.bf16 %v3179_v8, %v3175_v14 }
 0x4bc   : > { %v3181_v57 = vpop.f32.mrf.mxu0 }
 0x4bd   : > { %5435 = vrot.lane.b32.xlu0 %v12841_v62, %s11565_s9  ;;  %4001 = vrot.lane.b32.xlu1 %v3198_v1, %s11565_s9  ;;  %v13031_v48 = vpack.c.bf16 %v3181_v57, %v12836_v38 }
 0x4be   : > { %9468 = vmatprep.mubr.msk.bf16.mxu1 %vm3344_vm0, %v3198_v1 }
 0x4bf   : > { %9469 = vmatmul.mubr.msk.bf16.gmra.mxu1 %vm3344_vm0, %v3198_v1 }
 0x4c0   : > { %9549 = vmatpush3.bf16.xpose.msra.mxu1 %v4060_v54 }
 0x4c1   : > { %5433 = vrot.lane.b32.xlu0 %v12846_v58, %s11565_s9  ;;  %5451 = vrot.lane.b32.xlu1 %v10366_v36, %s11565_s9 }
 0x4c2   : > { %9838 = vmatprep.subr.msk.bf16.mxu1 %vm3344_vm0, %v10362_v24 }
 0x4c5   : > { %5431 = vrot.lane.b32.xlu0 %v12854_v21, %s11565_s9  ;;  %5449 = vrot.lane.b32.xlu1 %v12856_v46, %s11565_s9 }
 0x4c9   : > { %5429 = vrot.lane.b32.xlu0 %v12863_v4, %s11565_s9  ;;  %5447 = vrot.lane.b32.xlu1 %v12865_v3, %s11565_s9 }
 0x4cd   : > { %5427 = vrot.lane.b32.xlu0 %v12871_v12, %s11565_s9  ;;  %5445 = vrot.lane.b32.xlu1 %v12873_v2, %s11565_s9 }
 0x4d1   : > { %5425 = vrot.lane.b32.xlu0 %v12879_v29, %s11565_s9  ;;  %5443 = vrot.lane.b32.xlu1 %v12881_v50, %s11565_s9 }
 0x4d5   : > { %5423 = vrot.lane.b32.xlu0 %v12887_v18, %s11565_s9  ;;  %5441 = vrot.lane.b32.xlu1 %v12889_v51, %s11565_s9 }
 0x4d9   : > { %5407 = vrot.lane.b32.xlu0 %v12899_v28, %s11565_s9  ;;  %5439 = vrot.lane.b32.xlu1 %v12895_v53, %s11565_s9 }
 0x4dd   : > { %5411 = vrot.lane.b32.xlu0 %v12911_v39, %s11565_s9  ;;  %5409 = vrot.lane.b32.xlu1 %v12907_v15, %s11565_s9 }
 0x4e1   : > { %5415 = vrot.lane.b32.xlu0 %v12923_v19, %s11565_s9  ;;  %5413 = vrot.lane.b32.xlu1 %v12919_v10, %s11565_s9 }
 0x4e5   : > { %5419 = vrot.lane.b32.xlu0 %v12934_v59, %s11565_s9  ;;  %5417 = vrot.lane.b32.xlu1 %v12931_v9, %s11565_s9 }
 0x4e9   : > { %4506 = vrot.lane.b32.xlu1 %v12725_v25, %s11565_s9  ;;  %4490 = vrot.lane.b32.xlu0 %v12745_v37, %s11565_s9  ;;  %v10396_v25 = vld [vmem:[#allocation4 + $0x74] ss:$8 sps:$4 sm:$0xff]  }
 0x4ed   : > { %4504 = vrot.lane.b32.xlu1 %v12750_v60, %s11565_s9  ;;  %4486 = vrot.lane.b32.xlu0 %v12769_v49, %s11565_s9  ;;  %v10398_v60 = vld [vmem:[#allocation4 + $0x54] ss:$8 sps:$4 sm:$0xff]  }
 0x4f1   : > { %4488 = vrot.lane.b32.xlu1 %v12757_v30, %s11565_s9  ;;  %4482 = vrot.lane.b32.xlu0 %v12790_v17, %s11565_s9  ;;  %v4799_v17 = vsel %vm3344_vm0, %v12863_v4, 0 }
 0x4f5   : > { %4502 = vrot.lane.b32.xlu1 %v12761_v44, %s11565_s9  ;;  %4478 = vrot.lane.b32.xlu0 %v12811_v31, %s11565_s9  ;;  %v4808_v44 = vsel %vm3344_vm0, %v12841_v62, 0  ;;  %v10401_v31 = vld [vmem:[#allocation4 + $0xc4] ss:$8 sps:$4 sm:$0xff]  }
 0x4f7   : > { %v3988_v37 = vpop.permute.xlu0 %3987 }
 0x4f8   : > { %9550 = vmatprep.mubr.msk.bf16.mxu1 %vm3344_vm0, %v3988_v37 }
 0x4f9   : > { %4500 = vrot.lane.b32.xlu1 %v12771_v43, %s11565_s9  ;;  %9551 = vmatmul.mubr.msk.bf16.vlgmr.msra.gmra.mxu1 %vm3344_vm0, %v3988_v37  ;;  %v4805_v43 = vsel %vm3344_vm0, %v12846_v58, 0 }
 0x4fa   : > { %9631 = vmatpush3.bf16.xpose.msra.mxu1 %v4811_v61  ;;  %5910 = vrot.lane.b32.xlu0 %v10396_v25, %s11565_s9 }
 0x4fb   : > { %9839 = vmatprep.subr.msk.bf16.mxu1 %vm3344_vm0, %v10366_v36 }
 0x4fd   : > { %4484 = vrot.lane.b32.xlu1 %v12778_v6, %s11565_s9  ;;  %v4802_v6 = vsel %vm3344_vm0, %v12854_v21, 0 }
 0x4fe   : > { %5906 = vrot.lane.b32.xlu0 %v10398_v60, %s11565_s9 }
 0x4ff   : > { %v3990_v30 = vpop.permute.xlu1 %3989 }
 0x500   : > { %9552 = vmatprep.mubr.msk.bf16.mxu1 %vm3344_vm0, %v3990_v30 }
 0x501   : > { %4498 = vrot.lane.b32.xlu1 %v12782_v11, %s11565_s9  ;;  %9553 = vmatmul.mubr.msk.bf16.gmra.mxu1 %vm3344_vm0, %v3990_v30  ;;  %v10393_v11 = vld [vmem:[#allocation4 + $0xf4] ss:$8 sps:$4 sm:$0xff]  }
 0x502   : > { %9633 = vmatpush3.bf16.xpose.msra.mxu1 %v4808_v44  ;;  %5918 = vrot.lane.b32.xlu0 %v10400_v7, %s11565_s9 }
 0x503   : > { %9840 = vmatprep.subr.msk.bf16.mxu1 %vm3344_vm0, %v12856_v46 }
 0x505   : > { %4496 = vrot.lane.b32.xlu1 %v12792_v32, %s11565_s9  ;;  %v10395_v32 = vld [vmem:[#allocation4 + $0xe4] ss:$8 sps:$4 sm:$0xff]  }
 0x506   : > { %5902 = vrot.lane.b32.xlu0 %v10402_v5, %s11565_s9 }
 0x507   : > { %v3992_v49 = vpop.permute.xlu0 %3991 }
 0x508   : > { %9554 = vmatprep.mubr.msk.bf16.mxu1 %vm3344_vm0, %v3992_v49 }
 0x509   : > { %4480 = vrot.lane.b32.xlu1 %v12799_v63, %s11565_s9  ;;  %9555 = vmatmul.mubr.msk.bf16.gmra.mxu1 %vm3344_vm0, %v3992_v49 }
 0x50a   : > { %9635 = vmatpush3.bf16.xpose.msra.mxu1 %v4805_v43 }
 0x50b   : > { %9841 = vmatprep.subr.msk.bf16.mxu1 %vm3344_vm0, %v12865_v3 }
 0x50d   : > { %4494 = vrot.lane.b32.xlu1 %v12803_v0, %s11565_s9  ;;  %v4796_v0 = vsel %vm3344_vm0, %v12871_v12, 0 }
 0x50f   : > { %v3994_v27 = vpop.permute.xlu1 %3993 }
 0x510   : > { %9556 = vmatprep.mubr.msk.bf16.mxu1 %vm3344_vm0, %v3994_v27 }
 0x511   : > { %4492 = vrot.lane.b32.xlu1 %v12813_v23, %s11565_s9  ;;  %9557 = vmatmul.mubr.msk.bf16.gmra.mxu1 %vm3344_vm0, %v3994_v27 }
 0x512   : > { %9637 = vmatpush3.bf16.xpose.msra.mxu1 %v4802_v6 }
 0x513   : > { %9842 = vmatprep.subr.msk.bf16.mxu1 %vm3344_vm0, %v12873_v2 }
 0x515   : > { %4476 = vrot.lane.b32.xlu1 %v12820_v26, %s11565_s9  ;;  %v10404_v26 = vld [vmem:[#allocation4 + $0xa4] ss:$8 sps:$4 sm:$0xff]  }
 0x517   : > { %v3996_v41 = vpop.permute.xlu0 %3995 }
 0x518   : > { %9558 = vmatprep.mubr.msk.bf16.mxu1 %vm3344_vm0, %v3996_v41 }
 0x519   : > { %5926 = vrot.lane.b32.xlu1 %v10393_v11, %s11565_s9  ;;  %9559 = vmatmul.mubr.msk.bf16.gmra.mxu1 %vm3344_vm0, %v3996_v41 }
 0x51a   : > { %9639 = vmatpush3.bf16.xpose.msra.mxu1 %v4799_v17 }
 0x51b   : > { %9843 = vmatprep.subr.msk.bf16.mxu1 %vm3344_vm0, %v12881_v50 }
 0x51d   : > { %5924 = vrot.lane.b32.xlu1 %v10395_v32, %s11565_s9 }
 0x51f   : > { %v3998_v63 = vpop.permute.xlu1 %3997 }
 0x520   : > { %9560 = vmatprep.mubr.msk.bf16.mxu1 %vm3344_vm0, %v3998_v63 }
 0x521   : > { %5908 = vrot.lane.b32.xlu1 %v10397_v52, %s11565_s9  ;;  %9561 = vmatmul.mubr.msk.bf16.gmra.mxu1 %vm3344_vm0, %v3998_v63 }
 0x522   : > { %9641 = vmatpush3.bf16.xpose.msra.mxu1 %v4796_v0 }
 0x523   : > { %9844 = vmatprep.subr.msk.bf16.mxu1 %vm3344_vm0, %v12889_v51  ;;  %v5454_v22 = vpop.permute.xlu1 %5453 }
 0x525   : > { %5922 = vrot.lane.b32.xlu1 %v10399_v56, %s11565_s9 }
 0x527   : > { %v4000_v23 = vpop.permute.xlu0 %3999 }
 0x528   : > { %9562 = vmatprep.mubr.msk.bf16.mxu1 %vm3344_vm0, %v4000_v23 }
 0x529   : > { %5920 = vrot.lane.b32.xlu1 %v10401_v31, %s11565_s9  ;;  %9563 = vmatmul.mubr.msk.bf16.gmra.mxu1 %vm3344_vm0, %v4000_v23 }
 0x52a   : > { %9643 = vmatpush3.bf16.xpose.msra.mxu1 %v4793_v47 }
 0x52b   : > { %9845 = vmatprep.subr.msk.bf16.mxu1 %vm3344_vm0, %v12895_v53  ;;  %v5438_v13 = vpop.permute.xlu0 %5437 }
 0x52c   : > { %v5501_v45 = vsel %vm3344_vm0, %v5438_v13, 0 }
 0x52d   : > { %5904 = vrot.lane.b32.xlu1 %v10403_v55, %s11565_s9 }
 0x52f   : > { %v4002_v24 = vpop.permute.xlu1 %4001  ;;  %v5436_v33 = vpop.permute.xlu0 %5435 }
 0x530   : > { %9564 = vmatprep.mubr.msk.bf16.mxu1 %vm3344_vm0, %v4002_v24  ;;  %v5498_v35 = vsel %vm3344_vm0, %v5436_v33, 0 }
 0x531   : > { %5916 = vrot.lane.b32.xlu1 %v10404_v26, %s11565_s9  ;;  %9565 = vmatmul.mubr.msk.bf16.gmra.mxu1 %vm3344_vm0, %v4002_v24 }
 0x532   : > { %9645 = vmatpush3.bf16.xpose.msra.mxu1 %v4790_v16  ;;  %9646 = vmatprep.mubr.msk.bf16.mxu1 %vm3344_vm0, %v12899_v28 }
 0x533   : > { %9846 = vmatprep.subr.msk.bf16.mxu1 %vm3344_vm0, %v5454_v22  ;;  %v5452_v40 = vpop.permute.xlu1 %5451  ;;  %v5434_v62 = vpop.permute.xlu0 %5433 }
 0x534   : > { %v5495_v20 = vsel %vm3344_vm0, %v5434_v62, 0 }
 0x535   : > { %5421 = vrot.lane.b32.xlu1 %v13031_v48, %s11565_s9 }
 0x537   : > { %v5450_v34 = vpop.permute.xlu1 %5449  ;;  %v5432_v4 = vpop.permute.xlu0 %5431 }
 0x538   : > { %v5492_v12 = vsel %vm3344_vm0, %v5432_v4, 0 }
 0x539   : > { %9647 = vmatmul.mubr.msk.bf16.vlgmr.msra.gmra.mxu1 %vm3344_vm0, %v12899_v28 }
 0x53a   : > { %9727 = vmatpush3.bf16.xpose.msra.mxu1 %v5501_v45  ;;  %9648 = vmatprep.mubr.msk.bf16.mxu1 %vm3344_vm0, %v12907_v15 }
 0x53b   : > { %9847 = vmatprep.subr.msk.bf16.mxu1 %vm3344_vm0, %v5452_v40  ;;  %v5448_v42 = vpop.permute.xlu1 %5447 }
 0x53f   : > { %v5446_v14 = vpop.permute.xlu1 %5445 }
 0x541   : > { %9649 = vmatmul.mubr.msk.bf16.gmra.mxu1 %vm3344_vm0, %v12907_v15  ;;  %v5430_v15 = vpop.permute.xlu0 %5429 }
 0x542   : > { %9729 = vmatpush3.bf16.xpose.msra.mxu1 %v5498_v35  ;;  %9650 = vmatprep.mubr.msk.bf16.mxu1 %vm3344_vm0, %v12911_v39 }
 0x543   : > { %9848 = vmatprep.subr.msk.bf16.mxu1 %vm3344_vm0, %v5450_v34  ;;  %v5444_v38 = vpop.permute.xlu1 %5443 }
 0x545   : > { %v5428_v5 = vpop.permute.xlu0 %5427 }
 0x546   : > { %v13048_v8 = vpop.f32.mrf.mxu1  ;;  %v5486_v43 = vsel %vm3344_vm0, %v5428_v5, 0 }
 0x547   : > { %v5442_v1 = vpop.permute.xlu1 %5441 }
 0x548   : > { %v13051_v58 = vpop.f32.mrf.mxu1 }
 0x549   : > { %9651 = vmatmul.mubr.msk.bf16.gmra.mxu1 %vm3344_vm0, %v12911_v39  ;;  %v3530_v36 = vmax.f32 %v13048_v8, %v13051_v58  ;;  %v5426_v52 = vpop.permute.xlu0 %5425 }
 0x54a   : > { %9731 = vmatpush3.bf16.xpose.msra.mxu1 %v5495_v20  ;;  %v13057_v54 = vpop.f32.mrf.mxu1  ;;  %9652 = vmatprep.mubr.msk.bf16.mxu1 %vm3344_vm0, %v12919_v10  ;;  %v5483_v0 = vsel %vm3344_vm0, %v5426_v52, 0 }
 0x54b   : > { %9849 = vmatprep.subr.msk.bf16.mxu1 %vm3344_vm0, %v5448_v42  ;;  %3531 = vmax.xlane.f32.xlu0 %v3530_v36  ;;  %v13062_v21 = vpop.permute.xlu1 %5439 }
 0x54c   : > { %v13064_v46 = vpop.f32.mrf.mxu1 }
 0x54d   : > { %v3533_v37 = vmax.f32 %v13057_v54, %v13064_v46  ;;  %v5424_v22 = vpop.permute.xlu0 %5423 }
 0x54e   : > { %v13066_v3 = vpop.f32.mrf.mxu1  ;;  %v5480_v16 = vsel %vm3344_vm0, %v5424_v22, 0 }
 0x54f   : > { %v13069_v2 = vpop.permute.xlu1 %5409 }
 0x550   : > { %v13071_v29 = vpop.f32.mrf.mxu1 }
 0x551   : > { %9653 = vmatmul.mubr.msk.bf16.gmra.mxu1 %vm3344_vm0, %v12919_v10  ;;  %v3536_v50 = vmax.f32 %v13066_v3, %v13071_v29  ;;  %v5489_v10 = vsel %vm3344_vm0, %v5430_v15, 0  ;;  %v5408_v13 = vpop.permute.xlu0 %5407 }
 0x552   : > { %9733 = vmatpush3.bf16.xpose.msra.mxu1 %v5492_v12  ;;  %v13077_v18 = vpop.f32.mrf.mxu1  ;;  %9654 = vmatprep.mubr.msk.bf16.mxu1 %vm3344_vm0, %v12923_v19 }
 0x553   : > { %9850 = vmatprep.subr.msk.bf16.mxu1 %vm3344_vm0, %v5446_v14  ;;  %3537 = vmax.xlane.f32.xlu0 %v3536_v50  ;;  %v13082_v51 = vpop.permute.xlu1 %5413 }
 0x554   : > { %v13084_v53 = vpop.f32.mrf.mxu1 }
 0x555   : > { %v3539_v28 = vmax.f32 %v13077_v18, %v13084_v53  ;;  %v5412_v50 = vpop.permute.xlu0 %5411 }
 0x556   : > { %v13088_v39 = vpop.f32.mrf.mxu1 }
 0x557   : > { %3540 = vmax.xlane.f32.xlu0 %v3539_v28  ;;  %v13091_v25 = vpop.permute.xlu1 %5417 }
 0x558   : > { %v13095_v61 = vpop.f32.mrf.mxu1 }
 0x559   : > { %9655 = vmatmul.mubr.msk.bf16.gmra.mxu1 %vm3344_vm0, %v12923_v19  ;;  %3534 = vmax.xlane.f32.xlu1 %v3533_v37  ;;  %v3542_v30 = vmax.f32 %v13088_v39, %v13095_v61 }
 0x55a   : > { %9735 = vmatpush3.bf16.xpose.msra.mxu1 %v5489_v10  ;;  %v13099_v60 = vpop.f32.mrf.mxu1  ;;  %9656 = vmatprep.mubr.msk.bf16.mxu1 %vm3344_vm0, %v12931_v9 }
 0x55b   : > { %9851 = vmatprep.subr.msk.bf16.mxu1 %vm3344_vm0, %v5444_v38  ;;  %v4507_v7 = vpop.permute.xlu1 %4506 }
 0x55c   : > { %v13106_v44 = vpop.f32.mrf.mxu1  ;;  %9566 = vmatprep.subr.bf16.mxu0 %v4507_v7 }
 0x55d   : > { %3543 = vmax.xlane.f32.xlu1 %v3542_v30  ;;  %v3545_v19 = vmax.f32 %v13099_v60, %v13106_v44 }
 0x55e   : > { %v13110_v49 = vpop.f32.mrf.mxu1 }
 0x55f   : > { %3546 = vmax.xlane.f32.xlu0 %v3545_v19  ;;  %v13113_v27 = vpop.permute.xlu1 %4504 }
 0x560   : > { %15983 = vst [vmem:[#allocation52_spill] sm:$0xff] %v13113_v27  ;;  %v13115_v6 = vpop.f32.mrf.mxu1 }
 0x561   : > { %9657 = vmatmul.mubr.msk.bf16.gmra.mxu1 %vm3344_vm0, %v12931_v9  ;;  %v3548_v11 = vmax.f32 %v13110_v49, %v13115_v6 }
 0x562   : > { %9737 = vmatpush3.bf16.xpose.msra.mxu1 %v5486_v43  ;;  %v13121_v41 = vpop.f32.mrf.mxu1  ;;  %9658 = vmatprep.mubr.msk.bf16.mxu1 %vm3344_vm0, %v12934_v59  ;;  %v5416_v43 = vpop.permute.xlu0 %5415 }
 0x563   : > { %9852 = vmatprep.subr.msk.bf16.mxu1 %vm3344_vm0, %v5442_v1  ;;  %v13126_v17 = vpop.permute.xlu1 %4488  ;;  %3549 = vmax.xlane.f32.xlu1 %v3548_v11 }
 0x564   : > { %15984 = vst [vmem:[#allocation53_spill] sm:$0xff] %v13126_v17  ;;  %v13128_v32 = vpop.f32.mrf.mxu1 }
 0x565   : > { %v3551_v9 = vmax.f32 %v13121_v41, %v13128_v32 }
 0x566   : > { %v13132_v63 = vpop.f32.mrf.mxu1 }
 0x567   : > { %3552 = vmax.xlane.f32.xlu0 %v3551_v9  ;;  %v13135_v56 = vpop.permute.xlu1 %4502 }
 0x568   : > { %15985 = vst [vmem:[#allocation54_spill] sm:$0xff] %v13135_v56  ;;  %v13137_v31 = vpop.f32.mrf.mxu1 }
 0x569   : > { %9659 = vmatmul.mubr.msk.bf16.gmra.mxu1 %vm3344_vm0, %v12934_v59  ;;  %v3554_v23 = vmax.f32 %v13132_v63, %v13137_v31 }
 0x56a   : > { %9739 = vmatpush3.bf16.xpose.msra.mxu1 %v5483_v0  ;;  %v13143_v47 = vpop.f32.mrf.mxu1  ;;  %9660 = vmatprep.mubr.msk.bf16.mxu1 %vm3344_vm0, %v13031_v48 }
 0x56b   : > { %9853 = vmatprep.subr.msk.bf16.mxu1 %vm3344_vm0, %v13062_v21  ;;  %v13149_v55 = vpop.permute.xlu1 %4500  ;;  %3555 = vmax.xlane.f32.xlu1 %v3554_v23  ;;  %v5420_v23 = vpop.permute.xlu0 %5419 }
 0x56c   : > { %15986 = vst [vmem:[#allocation55_spill] sm:$0xff] %v13149_v55  ;;  %v13151_v26 = vpop.f32.mrf.mxu1 }
 0x56d   : > { %v3557_v59 = vmax.f32 %v13143_v47, %v13151_v26 }
 0x56e   : > { %v13155_v24 = vpop.f32.mrf.mxu1 }
 0x56f   : > { %3558 = vmax.xlane.f32.xlu0 %v3557_v59  ;;  %v13158_v57 = vpop.permute.xlu1 %4484  ;;  %v13241_v22 = vpop.permute.xlu0 %4490 }
 0x570   : > { %15987 = vst [vmem:[#allocation56_spill] sm:$0xff] %v13158_v57  ;;  %v13160_v40 = vpop.f32.mrf.mxu1  ;;  %16001 = vst [vmem:[#allocation70_spill] sm:$0xff] %v13241_v22 }
 0x571   : > { %9661 = vmatmul.mubr.msk.bf16.gmra.mxu1 %vm3344_vm0, %v13031_v48  ;;  %v3560_v45 = vmax.f32 %v13155_v24, %v13160_v40 }
 0x572   : > { %v13166_v34 = vpop.f32.mrf.mxu1  ;;  %9741 = vmatpush3.bf16.xpose.msra.mxu1 %v5480_v16  ;;  %9742 = vmatprep.mubr.msk.bf16.mxu1 %vm3344_vm0, %v5408_v13 }
 0x573   : > { %v13169_v42 = vpop.permute.xlu1 %4498  ;;  %3561 = vmax.xlane.f32.xlu1 %v3560_v45  ;;  %v13245_v16 = vpop.permute.xlu0 %4486 }
 0x574   : > { %15988 = vst [vmem:[#allocation57_spill] sm:$0xff] %v13169_v42  ;;  %v13171_v33 = vpop.f32.mrf.mxu1  ;;  %16002 = vst [vmem:[#allocation71_spill] sm:$0xff] %v13245_v16 }
 0x575   : > { %v3563_v35 = vmax.f32 %v13166_v34, %v13171_v33 }
 0x576   : > { %v13175_v14 = vpop.f32.mrf.mxu1 }
 0x577   : > { %3564 = vmax.xlane.f32.xlu0 %v3563_v35  ;;  %v13177_v48 = vpop.permute.xlu1 %4496 }
 0x578   : > { %15989 = vst [vmem:[#allocation58_spill] sm:$0xff] %v13177_v48  ;;  %v13179_v38 = vpop.f32.mrf.mxu1 }
 0x579   : > { %9743 = vmatmul.mubr.msk.bf16.vlgmr.msra.gmra.mxu1 %vm3344_vm0, %v5408_v13  ;;  %v3566_v62 = vmax.f32 %v13175_v14, %v13179_v38  ;;  %v13248_v13 = vpop.permute.xlu0 %4482 }
 0x57a   : > { %v13184_v20 = vpop.f32.mrf.mxu1  ;;  %9744 = vmatprep.mubr.msk.bf16.mxu1 %vm3344_vm0, %v13069_v2  ;;  %16003 = vst [vmem:[#allocation72_spill] sm:$0xff] %v13248_v13 }
 0x57b   : > { %v13188_v1 = vpop.permute.xlu1 %4480  ;;  %3567 = vmax.xlane.f32.xlu1 %v3566_v62 }
 0x57c   : > { %15990 = vst [vmem:[#allocation59_spill] sm:$0xff] %v13188_v1  ;;  %v13190_v36 = vpop.f32.mrf.mxu1 }
 0x57d   : > { %v3569_v21 = vmax.f32 %v13184_v20, %v13190_v36  ;;  %v13250_v45 = vpop.permute.xlu0 %4478 }
 0x57e   : > { %16004 = vst [vmem:[#allocation73_spill] sm:$0xff] %v13250_v45 }
 0x57f   : > { %v13194_v4 = vpop.f32.mrf.mxu1  ;;  %3570 = vmax.xlane.f32.xlu0 %v3569_v21  ;;  %v13196_v12 = vpop.permute.xlu1 %4494 }
 0x580   : > { %15991 = vst [vmem:[#allocation60_spill] sm:$0xff] %v13196_v12 }
 0x581   : > { %v13198_v28 = vpop.f32.mrf.mxu1  ;;  %9745 = vmatmul.mubr.msk.bf16.gmra.mxu1 %vm3344_vm0, %v13069_v2 }
 0x582   : > { %v3572_v15 = vmax.f32 %v13194_v4, %v13198_v28  ;;  %9746 = vmatprep.mubr.msk.bf16.mxu1 %vm3344_vm0, %v5412_v50 }
 0x583   : > { %v13205_v10 = vpop.f32.mrf.mxu1  ;;  %v13207_v37 = vpop.permute.xlu1 %4492 }
 0x584   : > { %15992 = vst [vmem:[#allocation61_spill] sm:$0xff] %v13207_v37  ;;  %3573 = vmax.xlane.f32.xlu1 %v3572_v15 }
 0x585   : > { %v13209_v7 = vpop.f32.mrf.mxu1 }
 0x586   : > { %v3575_v30 = vmax.f32 %v13205_v10, %v13209_v7 }
 0x587   : > { %v13213_v19 = vpop.permute.xlu1 %4476 }
 0x588   : > { %15993 = vst [vmem:[#allocation62_spill] sm:$0xff] %v13213_v19  ;;  %3576 = vmax.xlane.f32.xlu0 %v3575_v30 }
 0x589   : > { %9747 = vmatmul.mubr.msk.bf16.gmra.mxu1 %vm3344_vm0, %v5412_v50  ;;  %v13260_v50 = vpop.permute.xlu0 %5910 }
 0x58a   : > { %9748 = vmatprep.mubr.msk.bf16.mxu1 %vm3344_vm0, %v13082_v51  ;;  %16005 = vst [vmem:[#allocation74_spill] sm:$0xff] %v13260_v50 }
 0x58b   : > { %v13218_v2 = vpop.permute.xlu1 %5926 }
 0x58c   : > { %15994 = vst [vmem:[#allocation63_spill] sm:$0xff] %v13218_v2 }
 0x58f   : > { %v13220_v5 = vpop.permute.xlu1 %5924 }
 0x590   : > { %15995 = vst [vmem:[#allocation64_spill] sm:$0xff] %v13220_v5 }
 0x591   : > { %9749 = vmatmul.mubr.msk.bf16.gmra.mxu1 %vm3344_vm0, %v13082_v51 }
 0x592   : > { %9750 = vmatprep.mubr.msk.bf16.mxu1 %vm3344_vm0, %v5416_v43 }
 0x593   : > { %v13225_v11 = vpop.permute.xlu1 %5908 }
 0x594   : > { %15996 = vst [vmem:[#allocation65_spill] sm:$0xff] %v13225_v11 }
 0x597   : > { %v13227_v52 = vpop.permute.xlu1 %5922 }
 0x598   : > { %15997 = vst [vmem:[#allocation66_spill] sm:$0xff] %v13227_v52 }
 0x599   : > { %9751 = vmatmul.mubr.msk.bf16.gmra.mxu1 %vm3344_vm0, %v5416_v43 }
 0x59a   : > { %9752 = vmatprep.mubr.msk.bf16.mxu1 %vm3344_vm0, %v13091_v25 }
 0x59b   : > { %v13232_v9 = vpop.permute.xlu1 %5920 }
 0x59c   : > { %15998 = vst [vmem:[#allocation67_spill] sm:$0xff] %v13232_v9 }
 0x59f   : > { %v13234_v0 = vpop.permute.xlu1 %5904 }
 0x5a0   : > { %15999 = vst [vmem:[#allocation68_spill] sm:$0xff] %v13234_v0 }
 0x5a1   : > { %9753 = vmatmul.mubr.msk.bf16.gmra.mxu1 %vm3344_vm0, %v13091_v25 }
 0x5a2   : > { %9754 = vmatprep.mubr.msk.bf16.mxu1 %vm3344_vm0, %v5420_v23 }
 0x5a3   : > { %v13239_v51 = vpop.permute.xlu1 %5916 }
 0x5a4   : > { %16000 = vst [vmem:[#allocation69_spill] sm:$0xff] %v13239_v51 }
 0x5a7   : > { %v5422_v59 = vpop.permute.xlu1 %5421 }
 0x5a9   : > { %9755 = vmatmul.mubr.msk.bf16.gmra.mxu1 %vm3344_vm0, %v5420_v23 }
 0x5aa   : > { %9756 = vmatprep.mubr.msk.bf16.mxu1 %vm3344_vm0, %v5422_v59 }
 0x5b1   : > { %9757 = vmatmul.mubr.msk.bf16.gmra.mxu1 %vm3344_vm0, %v5422_v59  ;;  %v13270_v59 = vpop.permute.xlu0 %5906 }
 0x5b2   : > { %16006 = vst [vmem:[#allocation75_spill] sm:$0xff] %v13270_v59 }
 0x5b5   : > { %v13282_v11 = vpop.permute.xlu0 %5918 }
 0x5b6   : > { %16007 = vst [vmem:[#allocation76_spill] sm:$0xff] %v13282_v11 }
 0x5b9   : > { %v13252_v25 = vpop.f32.mrf.mxu1 }
 0x5bb   : > { %v13254_v35 = vpop.f32.mrf.mxu1 }
 0x5bc   : > { %v4220_v62 = vmax.f32 %v13252_v25, %v13254_v35 }
 0x5bd   : > { %v13258_v21 = vpop.f32.mrf.mxu1 }
 0x5be   : > { %4221 = vmax.xlane.f32.xlu1 %v4220_v62 }
 0x5bf   : > { %v13262_v15 = vpop.f32.mrf.mxu1 }
 0x5c0   : > { %v4223_v30 = vmax.f32 %v13258_v21, %v13262_v15 }
 0x5c1   : > { %v13266_v43 = vpop.f32.mrf.mxu1 }
 0x5c2   : > { %4224 = vmax.xlane.f32.xlu0 %v4223_v30 }
 0x5c3   : > { %v13268_v23 = vpop.f32.mrf.mxu1 }
 0x5c4   : > { %v4226_v51 = vmax.f32 %v13266_v43, %v13268_v23 }
 0x5c5   : > { %v13274_v0 = vpop.f32.mrf.mxu1 }
 0x5c6   : > { %4227 = vmax.xlane.f32.xlu1 %v4226_v51  ;;  %v13292_v51 = vpop.permute.xlu0 %5902 }
 0x5c7   : > { %v13276_v9 = vpop.f32.mrf.mxu1  ;;  %16008 = vst [vmem:[#allocation77_spill] sm:$0xff] %v13292_v51 }
 0x5c8   : > { %v4229_v62 = vmax.f32 %v13274_v0, %v13276_v9 }
 0x5c9   : > { %v13280_v52 = vpop.f32.mrf.mxu1 }
 0x5ca   : > { %4230 = vmax.xlane.f32.xlu0 %v4229_v62 }
 0x5cb   : > { %v13284_v30 = vpop.f32.mrf.mxu1 }
 0x5cc   : > { %v4232_v59 = vmax.f32 %v13280_v52, %v13284_v30 }
 0x5cd   : > { %v13288_v5 = vpop.f32.mrf.mxu1 }
 0x5ce   : > { %4233 = vmax.xlane.f32.xlu1 %v4232_v59 }
 0x5cf   : > { %v13290_v50 = vpop.f32.mrf.mxu1 }
 0x5d0   : > { %v4235_v2 = vmax.f32 %v13288_v5, %v13290_v50 }
 0x5d1   : > { %v13296_v19 = vpop.f32.mrf.mxu1 }
 0x5d2   : > { %4236 = vmax.xlane.f32.xlu0 %v4235_v2 }
 0x5d3   : > { %v13298_v11 = vpop.f32.mrf.mxu1 }
 0x5d4   : > { %v4238_v62 = vmax.f32 %v13296_v19, %v13298_v11  ;;  %v3532_v37 = vpop.xlane.xlu0 %3531 }
 0x5d5   : > { %v3578_v45 = vsub.f32 %v13048_v8, %v3532_v37  ;;  %v3579_v59 = vsub.f32 %v13051_v58, %v3532_v37  ;;  %v13304_v12 = vpop.f32.mrf.mxu1 }
 0x5d6   : > { %4239 = vmax.xlane.f32.xlu1 %v4238_v62 }
 0x5d7   : > { %v3610_v51 = vmul.f32 1.442695, %v3578_v45  ;;  %v3612_v1 = vmul.f32 1.442695, %v3579_v59  ;;  %v13306_v48 = vpop.f32.mrf.mxu1 }
 0x5d8   : > { %v4241_v2 = vmax.f32 %v13304_v12, %v13306_v48 }
 0x5d9   : > { %10650 = vpow2.f32 %v3610_v51  ;;  %v13310_v13 = vpop.f32.mrf.mxu1 }
 0x5da   : > { %10652 = vpow2.f32 %v3612_v1  ;;  %4242 = vmax.xlane.f32.xlu0 %v4241_v2 }
 0x5db   : > { %v13312_v42 = vpop.f32.mrf.mxu1 }
 0x5dc   : > { %v4244_v8 = vmax.f32 %v13310_v13, %v13312_v42  ;;  %v3538_v58 = vpop.xlane.xlu0 %3537 }
 0x5dd   : > { %v3582_v37 = vsub.f32 %v13066_v3, %v3538_v58  ;;  %v3583_v45 = vsub.f32 %v13071_v29, %v3538_v58  ;;  %v13318_v62 = vpop.f32.mrf.mxu1 }
 0x5de   : > { %4245 = vmax.xlane.f32.xlu1 %v4244_v8 }
 0x5df   : > { %v3618_v59 = vmul.f32 1.442695, %v3582_v37  ;;  %v3620_v57 = vmul.f32 1.442695, %v3583_v45  ;;  %v13320_v51 = vpop.f32.mrf.mxu1 }
 0x5e0   : > { %v4247_v1 = vmax.f32 %v13318_v62, %v13320_v51  ;;  %v3541_v55 = vpop.xlane.xlu0 %3540 }
 0x5e1   : > { %10654 = vpow2.f32 %v3618_v59  ;;  %v13324_v2 = vpop.f32.mrf.mxu1  ;;  %v3584_v37 = vsub.f32 %v13077_v18, %v3541_v55 }
 0x5e2   : > { %10656 = vpow2.f32 %v3620_v57  ;;  %4248 = vmax.xlane.f32.xlu0 %v4247_v1  ;;  %v3535_v16 = vpop.xlane.xlu1 %3534  ;;  %v3585_v57 = vsub.f32 %v13084_v53, %v3541_v55 }
 0x5e3   : > { %v3580_v3 = vsub.f32 %v13057_v54, %v3535_v16  ;;  %v3581_v29 = vsub.f32 %v13064_v46, %v3535_v16  ;;  %v13328_v58 = vpop.f32.mrf.mxu1 }
 0x5e4   : > { %v4250_v8 = vmax.f32 %v13324_v2, %v13328_v58  ;;  %v3624_v22 = vmul.f32 1.442695, %v3585_v57 }
 0x5e5   : > { %v3614_v45 = vmul.f32 1.442695, %v3580_v3  ;;  %v3616_v56 = vmul.f32 1.442695, %v3581_v29  ;;  %v13333_v59 = vpop.f32.mrf.mxu1  ;;  %v3622_v29 = vmul.f32 1.442695, %v3584_v37 }
 0x5e6   : > { %v13335_v17 = vpop.eup %10650  ;;  %4251 = vmax.xlane.f32.xlu1 %v4250_v8  ;;  %v3544_v1 = vpop.xlane.xlu1 %3543 }
 0x5e7   : > { %16009 = vst [vmem:[#allocation78_spill] sm:$0xff] %v13335_v17  ;;  %v13338_v54 = vpop.eup %10652  ;;  %10658 = vpow2.f32 %v3614_v45  ;;  %v3586_v46 = vsub.f32 %v13088_v39, %v3544_v1  ;;  %v3587_v16 = vsub.f32 %v13095_v61, %v3544_v1  ;;  %v13342_v27 = vpop.f32.mrf.mxu1 }
 0x5e8   : > { %16010 = vst [vmem:[#allocation79_spill] sm:$0xff] %v13338_v54  ;;  %10660 = vpow2.f32 %v3616_v56  ;;  %v4253_v18 = vmax.f32 %v13333_v59, %v13342_v27  ;;  %v3674_v3 = vadd.f32 %v13338_v54, %v13335_v17  ;;  %v3547_v45 = vpop.xlane.xlu0 %3546 }
 0x5e9   : > { %v3626_v53 = vmul.f32 1.442695, %v3586_v46  ;;  %v3628_v55 = vmul.f32 1.442695, %v3587_v16  ;;  %v13348_v8 = vpop.f32.mrf.mxu1  ;;  %v3588_v1 = vsub.f32 %v13099_v60, %v3547_v45 }
 0x5ea   : > { %4254 = vmax.xlane.f32.xlu0 %v4253_v18  ;;  %3675 = vadd.xlane.f32.xlu1 %v3674_v3  ;;  %v3589_v18 = vsub.f32 %v13106_v44, %v3547_v45 }
 0x5eb   : > { %10662 = vpow2.f32 %v3626_v53  ;;  %v13350_v39 = vpop.f32.mrf.mxu1 }
 0x5ec   : > { %10664 = vpow2.f32 %v3628_v55  ;;  %v4256_v61 = vmax.f32 %v13348_v8, %v13350_v39  ;;  %v3550_v56 = vpop.xlane.xlu1 %3549 }
 0x5ed   : > { %10666 = vpow2.f32 %v3622_v29  ;;  %v3590_v37 = vsub.f32 %v13110_v49, %v3550_v56  ;;  %v3591_v46 = vsub.f32 %v13115_v6, %v3550_v56  ;;  %v13357_v16 = vpop.f32.mrf.mxu1  ;;  %v3630_v49 = vmul.f32 1.442695, %v3588_v1 }
 0x5ee   : > { %v13359_v57 = vpop.eup %10654  ;;  %10668 = vpow2.f32 %v3624_v22  ;;  %4257 = vmax.xlane.f32.xlu1 %v4256_v61  ;;  %v3632_v56 = vmul.f32 1.442695, %v3589_v18 }
 0x5ef   : > { %16011 = vst [vmem:[#allocation80_spill] sm:$0xff] %v13359_v57  ;;  %v13362_v3 = vpop.eup %10656  ;;  %v3634_v53 = vmul.f32 1.442695, %v3590_v37  ;;  %v3636_v55 = vmul.f32 1.442695, %v3591_v46  ;;  %v13364_v17 = vpop.f32.mrf.mxu1 }
 0x5f0   : > { %16012 = vst [vmem:[#allocation81_spill] sm:$0xff] %v13362_v3  ;;  %v3680_v60 = vadd.f32 %v13362_v3, %v13359_v57  ;;  %v3553_v6 = vpop.xlane.xlu0 %3552 }
 0x5f1   : > { %10670 = vpow2.f32 %v3634_v53  ;;  %v13368_v29 = vpop.f32.mrf.mxu1  ;;  %v3592_v45 = vsub.f32 %v13121_v41, %v3553_v6  ;;  %v3593_v1 = vsub.f32 %v13128_v32, %v3553_v6 }
 0x5f2   : > { %10672 = vpow2.f32 %v3636_v55  ;;  %3681 = vadd.xlane.f32.xlu1 %v3680_v60 }
 0x5f3   : > { %v13370_v22 = vpop.f32.mrf.mxu1  ;;  %10674 = vpow2.f32 %v3630_v49  ;;  %v3638_v49 = vmul.f32 1.442695, %v3592_v45 }
 0x5f4   : > { %v13372_v44 = vpop.eup %10658  ;;  %v4262_v61 = vmax.f32 %v13368_v29, %v13370_v22  ;;  %v3556_v37 = vpop.xlane.xlu1 %3555  ;;  %10676 = vpow2.f32 %v3632_v56 }
 0x5f5   : > { %16013 = vst [vmem:[#allocation82_spill] sm:$0xff] %v13372_v44  ;;  %v13377_v46 = vpop.eup %10660  ;;  %v3594_v53 = vsub.f32 %v13132_v63, %v3556_v37  ;;  %v3595_v18 = vsub.f32 %v13137_v31, %v3556_v37  ;;  %v13382_v55 = vpop.f32.mrf.mxu1  ;;  %v3640_v63 = vmul.f32 1.442695, %v3593_v1 }
 0x5f6   : > { %16014 = vst [vmem:[#allocation83_spill] sm:$0xff] %v13382_v55  ;;  %4263 = vmax.xlane.f32.xlu1 %v4262_v61  ;;  %v3677_v41 = vadd.f32 %v13377_v46, %v13372_v44  ;;  %v4259_v61 = vmax.f32 %v13357_v16, %v13364_v17 }
 0x5f7   : > { %v3642_v60 = vmul.f32 1.442695, %v3594_v53  ;;  %v3644_v57 = vmul.f32 1.442695, %v3595_v18  ;;  %v13386_v3 = vpop.f32.mrf.mxu1 }
 0x5f8   : > { %16015 = vst [vmem:[#allocation84_spill] sm:$0xff] %v13386_v3  ;;  %v13388_v54 = vpop.eup %10662  ;;  %3678 = vadd.xlane.f32.xlu0 %v3677_v41  ;;  %v3559_v56 = vpop.xlane.xlu0 %3558 }
 0x5f9   : > { %16016 = vst [vmem:[#allocation85_spill] sm:$0xff] %v13388_v54  ;;  %v13390_v32 = vpop.eup %10664  ;;  %10678 = vpow2.f32 %v3642_v60  ;;  %v13392_v31 = vpop.f32.mrf.mxu1 }
 0x5fa   : > { %16017 = vst [vmem:[#allocation86_spill] sm:$0xff] %v13390_v32  ;;  %16018 = vst [vmem:[#allocation87_spill] sm:$0xff] %v13392_v31  ;;  %v13394_v6 = vpop.eup %10666  ;;  %10680 = vpow2.f32 %v3644_v57  ;;  %v3686_v37 = vadd.f32 %v13390_v32, %v13388_v54  ;;  %v3596_v57 = vsub.f32 %v13143_v47, %v3559_v56  ;;  %v3597_v32 = vsub.f32 %v13151_v26, %v3559_v56 }
 0x5fb   : > { %v13400_v53 = vpop.eup %10668  ;;  %v13402_v45 = vpop.f32.mrf.mxu1  ;;  %10682 = vpow2.f32 %v3638_v49  ;;  %v4265_v26 = vmax.f32 %v13382_v55, %v13386_v3 }
 0x5fc   : > { %16019 = vst [vmem:[#allocation88_spill] sm:$0xff] %v13402_v45  ;;  %v4950_v1 = vmax.f32 %v13392_v31, %v13402_v45  ;;  %4260 = vmax.xlane.f32.xlu0 %v4259_v61  ;;  %3687 = vadd.xlane.f32.xlu1 %v3686_v37  ;;  %v3562_v18 = vpop.xlane.xlu1 %3561  ;;  %10684 = vpow2.f32 %v3640_v63  ;;  %v3683_v49 = vadd.f32 %v13400_v53, %v13394_v6  ;;  %v3646_v47 = vmul.f32 1.442695, %v3596_v57 }
 0x5fd   : > { %v3598_v41 = vsub.f32 %v13155_v24, %v3562_v18  ;;  %v3599_v60 = vsub.f32 %v13160_v40, %v3562_v18  ;;  %v13409_v44 = vpop.f32.mrf.mxu1  ;;  %v3648_v56 = vmul.f32 1.442695, %v3597_v32 }
 0x5fe   : > { %16020 = vst [vmem:[#allocation89_spill] sm:$0xff] %v13409_v44  ;;  %v13411_v54 = vpop.eup %10670 }
 0x5ff   : > { %v13416_v45 = vpop.eup %10672  ;;  %v3650_v61 = vmul.f32 1.442695, %v3598_v41  ;;  %v3652_v37 = vmul.f32 1.442695, %v3599_v60  ;;  %v13418_v63 = vpop.f32.mrf.mxu1 }
 0x600   : > { %16021 = vst [vmem:[#allocation90_spill] sm:$0xff] %v13418_v63  ;;  %3684 = vadd.xlane.f32.xlu0 %v3683_v49  ;;  %4951 = vmax.xlane.f32.xlu1 %v4950_v1  ;;  %v13422_v40 = vpop.eup %10674  ;;  %v3565_v18 = vpop.xlane.xlu0 %3564  ;;  %v3692_v41 = vadd.f32 %v13416_v45, %v13411_v54 }
 0x601   : > { %10686 = vpow2.f32 %v3650_v61  ;;  %v13420_v24 = vpop.f32.mrf.mxu1  ;;  %v13428_v60 = vpop.eup %10676  ;;  %v3600_v49 = vsub.f32 %v13166_v34, %v3565_v18  ;;  %v3601_v55 = vsub.f32 %v13171_v33, %v3565_v18  ;;  %v4953_v33 = vmax.f32 %v13409_v44, %v13418_v63 }
 0x602   : > { %16022 = vst [vmem:[#allocation91_spill] sm:$0xff] %v13420_v24  ;;  %10688 = vpow2.f32 %v3652_v37 }
 0x603   : > { %v13430_v31 = vpop.f32.mrf.mxu1  ;;  %10690 = vpow2.f32 %v3646_v47  ;;  %v3656_v18 = vmul.f32 1.442695, %v3601_v55 }
 0x604   : > { %16023 = vst [vmem:[#allocation92_spill] sm:$0xff] %v13430_v31  ;;  %v4956_v1 = vmax.f32 %v13420_v24, %v13430_v31  ;;  %4266 = vmax.xlane.f32.xlu0 %v4265_v26  ;;  %3693 = vadd.xlane.f32.xlu1 %v3692_v41  ;;  %v3568_v57 = vpop.xlane.xlu1 %3567  ;;  %10692 = vpow2.f32 %v3648_v56  ;;  %v3689_v31 = vadd.f32 %v13428_v60, %v13422_v40 }
 0x605   : > { %v3602_v32 = vsub.f32 %v13175_v14, %v3568_v57  ;;  %v3603_v61 = vsub.f32 %v13179_v38, %v3568_v57  ;;  %v13437_v37 = vpop.f32.mrf.mxu1  ;;  %v3654_v14 = vmul.f32 1.442695, %v3600_v49 }
 0x606   : > { %v13439_v3 = vpop.eup %10678 }
 0x607   : > { %16024 = vst [vmem:[#allocation93_spill] sm:$0xff] %v13439_v3  ;;  %v13444_v26 = vpop.eup %10680  ;;  %v3658_v41 = vmul.f32 1.442695, %v3602_v32  ;;  %v3660_v47 = vmul.f32 1.442695, %v3603_v61  ;;  %v13446_v24 = vpop.f32.mrf.mxu1 }
 0x608   : > { %16025 = vst [vmem:[#allocation94_spill] sm:$0xff] %v13444_v26  ;;  %3690 = vadd.xlane.f32.xlu0 %v3689_v31  ;;  %4957 = vmax.xlane.f32.xlu1 %v4956_v1  ;;  %v13448_v34 = vpop.eup %10682  ;;  %v3571_v57 = vpop.xlane.xlu0 %3570  ;;  %v3698_v32 = vadd.f32 %v13444_v26, %v13439_v3 }
 0x609   : > { %10694 = vpow2.f32 %v3658_v41  ;;  %v13450_v38 = vpop.f32.mrf.mxu1  ;;  %v13452_v56 = vpop.eup %10684  ;;  %v3604_v1 = vsub.f32 %v13184_v20, %v3571_v57  ;;  %v3605_v3 = vsub.f32 %v13190_v36, %v3571_v57  ;;  %v4959_v36 = vmax.f32 %v13437_v37, %v13446_v24 }
 0x60a   : > { %16026 = vst [vmem:[#allocation95_spill] sm:$0xff] %v13450_v38  ;;  %10696 = vpow2.f32 %v3660_v47  ;;  %v3695_v55 = vadd.f32 %v13452_v56, %v13448_v34 }
 0x60b   : > { %v13458_v61 = vpop.f32.mrf.mxu1  ;;  %10698 = vpow2.f32 %v3654_v14 }
 0x60c   : > { %16027 = vst [vmem:[#allocation96_spill] sm:$0xff] %v13458_v61  ;;  %v4962_v31 = vmax.f32 %v13450_v38, %v13458_v61  ;;  %4954 = vmax.xlane.f32.xlu0 %v4953_v33  ;;  %3699 = vadd.xlane.f32.xlu1 %v3698_v32  ;;  %10700 = vpow2.f32 %v3656_v18  ;;  %v3662_v38 = vmul.f32 1.442695, %v3604_v1  ;;  %v3664_v18 = vmul.f32 1.442695, %v3605_v3 }
 0x60d   : > { %v3574_v49 = vpop.xlane.xlu1 %3573  ;;  %v13463_v41 = vpop.f32.mrf.mxu1 }
 0x60e   : > { %16028 = vst [vmem:[#allocation97_spill] sm:$0xff] %v13463_v41  ;;  %v13467_v47 = vpop.eup %10686  ;;  %v3606_v63 = vsub.f32 %v13194_v4, %v3574_v49  ;;  %v3607_v61 = vsub.f32 %v13198_v28, %v3574_v49 }
 0x60f   : > { %v13472_v33 = vpop.eup %10688  ;;  %v13474_v14 = vpop.f32.mrf.mxu1 }
 0x610   : > { %16029 = vst [vmem:[#allocation98_spill] sm:$0xff] %v13474_v14  ;;  %v3666_v20 = vmul.f32 1.442695, %v3606_v63  ;;  %v3668_v32 = vmul.f32 1.442695, %v3607_v61  ;;  %3696 = vadd.xlane.f32.xlu0 %v3695_v55  ;;  %4963 = vmax.xlane.f32.xlu1 %v4962_v31  ;;  %v13478_v44 = vpop.eup %10690  ;;  %v3704_v28 = vadd.f32 %v13472_v33, %v13467_v47 }
 0x611   : > { %v13476_v26 = vpop.f32.mrf.mxu1  ;;  %v3577_v4 = vpop.xlane.xlu0 %3576 }
 0x612   : > { %10702 = vpow2.f32 %v3666_v20  ;;  %v13484_v57 = vpop.eup %10692  ;;  %v3608_v31 = vsub.f32 %v13205_v10, %v3577_v4  ;;  %v3609_v49 = vsub.f32 %v13209_v7, %v3577_v4 }
 0x613   : > { %10704 = vpow2.f32 %v3668_v32  ;;  %v13486_v63 = vpop.f32.mrf.mxu1  ;;  %v3701_v55 = vadd.f32 %v13484_v57, %v13478_v44 }
 0x614   : > { %16030 = vst [vmem:[#allocation99_spill] sm:$0xff] %v13486_v63  ;;  %v4968_v61 = vmax.f32 %v13476_v26, %v13486_v63  ;;  %4960 = vmax.xlane.f32.xlu0 %v4959_v36  ;;  %3705 = vadd.xlane.f32.xlu1 %v3704_v28  ;;  %10706 = vpow2.f32 %v3662_v38  ;;  %v3670_v36 = vmul.f32 1.442695, %v3608_v31  ;;  %v4965_v28 = vmax.f32 %v13463_v41, %v13474_v14 }
 0x615   : > { %v13491_v1 = vpop.f32.mrf.mxu1  ;;  %10708 = vpow2.f32 %v3664_v18  ;;  %v3672_v18 = vmul.f32 1.442695, %v3609_v49 }
 0x616   : > { %16031 = vst [vmem:[#allocation100_spill] sm:$0xff] %v13491_v1  ;;  %v13493_v3 = vpop.eup %10694  ;;  %10710 = vpow2.f32 %v3670_v36 }
 0x617   : > { %16032 = vst [vmem:[#allocation101_spill] sm:$0xff] %v13493_v3  ;;  %v13498_v20 = vpop.eup %10696  ;;  %v13500_v32 = vpop.f32.mrf.mxu1  ;;  %10712 = vpow2.f32 %v3672_v18 }
 0x618   : > { %16033 = vst [vmem:[#allocation102_spill] sm:$0xff] %v13498_v20  ;;  %16034 = vst [vmem:[#allocation103_spill] sm:$0xff] %v13500_v32  ;;  %3702 = vadd.xlane.f32.xlu0 %v3701_v55  ;;  %4969 = vmax.xlane.f32.xlu1 %v4968_v61  ;;  %v13504_v10 = vpop.eup %10698  ;;  %v3710_v7 = vadd.f32 %v13498_v20, %v13493_v3  ;;  %v4971_v36 = vmax.f32 %v13491_v1, %v13500_v32 }
 0x619   : > { %v13502_v38 = vpop.f32.mrf.mxu1  ;;  %v13510_v4 = vpop.eup %10700 }
 0x61a   : > { %16035 = vst [vmem:[#allocation104_spill] sm:$0xff] %v13502_v38  ;;  %v3707_v31 = vadd.f32 %v13510_v4, %v13504_v10 }
 0x61b   : > { %v13512_v63 = vpop.f32.mrf.mxu1 }
 0x61c   : > { %16036 = vst [vmem:[#allocation105_spill] sm:$0xff] %v13512_v63  ;;  %v4974_v55 = vmax.f32 %v13502_v38, %v13512_v63  ;;  %4966 = vmax.xlane.f32.xlu0 %v4965_v28  ;;  %3711 = vadd.xlane.f32.xlu1 %v3710_v7 }
 0x61d   : > { %v13516_v61 = vpop.f32.mrf.mxu1 }
 0x61e   : > { %16037 = vst [vmem:[#allocation106_spill] sm:$0xff] %v13516_v61 }
 0x61f   : > { %v13520_v49 = vpop.eup %10702  ;;  %v13522_v14 = vpop.f32.mrf.mxu1 }
 0x620   : > { %16038 = vst [vmem:[#allocation107_spill] sm:$0xff] %v13520_v49  ;;  %16039 = vst [vmem:[#allocation108_spill] sm:$0xff] %v13522_v14  ;;  %v13524_v3 = vpop.eup %10704  ;;  %3708 = vadd.xlane.f32.xlu0 %v3707_v31  ;;  %4975 = vmax.xlane.f32.xlu1 %v4974_v55 }
 0x621   : > { %16040 = vst [vmem:[#allocation109_spill] sm:$0xff] %v13524_v3  ;;  %v13526_v20 = vpop.f32.mrf.mxu1  ;;  %v13528_v63 = vpop.eup %10706  ;;  %v3716_v28 = vadd.f32 %v13524_v3, %v13520_v49  ;;  %v4977_v3 = vmax.f32 %v13516_v61, %v13522_v14 }
 0x622   : > { %16041 = vst [vmem:[#allocation110_spill] sm:$0xff] %v13528_v63  ;;  %v13534_v18 = vpop.eup %10708 }
 0x623   : > { %v13536_v7 = vpop.f32.mrf.mxu1  ;;  %v3713_v31 = vadd.f32 %v13534_v18, %v13528_v63  ;;  %v13548_v49 = vpop.eup %10710 }
 0x624   : > { %16042 = vst [vmem:[#allocation111_spill] sm:$0xff] %v13536_v7  ;;  %v4980_v38 = vmax.f32 %v13526_v20, %v13536_v7  ;;  %4972 = vmax.xlane.f32.xlu0 %v4971_v36  ;;  %3717 = vadd.xlane.f32.xlu1 %v3716_v28  ;;  %16045 = vst [vmem:[#allocation114_spill] sm:$0xff] %v13548_v49  ;;  %v13552_v1 = vpop.eup %10712 }
 0x625   : > { %v13540_v55 = vpop.f32.mrf.mxu1  ;;  %16046 = vst [vmem:[#allocation115_spill] sm:$0xff] %v13552_v1 }
 0x626   : > { %16043 = vst [vmem:[#allocation112_spill] sm:$0xff] %v13540_v55 }
 0x627   : > { %v13544_v41 = vpop.f32.mrf.mxu1 }
 0x628   : > { %16044 = vst [vmem:[#allocation113_spill] sm:$0xff] %v13544_v41  ;;  %3714 = vadd.xlane.f32.xlu0 %v3713_v31  ;;  %4981 = vmax.xlane.f32.xlu1 %v4980_v38  ;;  %v3719_v38 = vadd.f32 %v13552_v1, %v13548_v49  ;;  %v4983_v14 = vmax.f32 %v13540_v55, %v13544_v41 }
 0x629   : > { %v13546_v32 = vpop.f32.mrf.mxu1 }
 0x62b   : > { %v13554_v36 = vpop.f32.mrf.mxu1 }
 0x62c   : > { %16047 = vst [vmem:[#allocation116_spill] sm:$0xff] %v13554_v36  ;;  %v4986_v28 = vmax.f32 %v13546_v32, %v13554_v36  ;;  %4978 = vmax.xlane.f32.xlu0 %v4977_v3 }
 0x62d   : > { %v13558_v7 = vpop.f32.mrf.mxu1 }
 0x62e   : > { %16048 = vst [vmem:[#allocation117_spill] sm:$0xff] %v13558_v7  ;;  %4987 = vmax.xlane.f32.xlu1 %v4986_v28 }
 0x62f   : > { %v13562_v31 = vpop.f32.mrf.mxu1 }
 0x630   : > { %16049 = vst [vmem:[#allocation118_spill] sm:$0xff] %v13562_v31  ;;  %3720 = vadd.xlane.f32.xlu0 %v3719_v38  ;;  %v4989_v28 = vmax.f32 %v13558_v7, %v13562_v31 }
 0x631   : > { %v13564_v63 = vpop.f32.mrf.mxu1 }
 0x632   : > { %16050 = vst [vmem:[#allocation119_spill] sm:$0xff] %v13564_v63 }
 0x633   : > { %v13568_v61 = vpop.f32.mrf.mxu1 }
 0x634   : > { %16051 = vst [vmem:[#allocation120_spill] sm:$0xff] %v13568_v61  ;;  %4984 = vmax.xlane.f32.xlu0 %v4983_v14  ;;  %v4992_v3 = vmax.f32 %v13564_v63, %v13568_v61 }
 0x635   : > { %v13572_v36 = vpop.f32.mrf.mxu1 }
 0x636   : > { %16052 = vst [vmem:[#allocation121_spill] sm:$0xff] %v13572_v36  ;;  %4993 = vmax.xlane.f32.xlu1 %v4992_v3 }
 0x637   : > { %v13576_v49 = vpop.f32.mrf.mxu1 }
 0x638   : > { %16053 = vst [vmem:[#allocation122_spill] sm:$0xff] %v13576_v49  ;;  %4990 = vmax.xlane.f32.xlu0 %v4989_v28  ;;  %v4995_v38 = vmax.f32 %v13572_v36, %v13576_v49 }
 0x639   : > { %v13580_v1 = vpop.f32.mrf.mxu1 }
 0x63a   : > { %16054 = vst [vmem:[#allocation123_spill] sm:$0xff] %v13580_v1 }
 0x63b   : > { %v13582_v41 = vpop.f32.mrf.mxu1 }
 0x63c   : > { %16055 = vst [vmem:[#allocation124_spill] sm:$0xff] %v13582_v41  ;;  %v5640_v14 = vmax.f32 %v13580_v1, %v13582_v41  ;;  %4996 = vmax.xlane.f32.xlu0 %v4995_v38 }
 0x63d   : > { %v13586_v61 = vpop.f32.mrf.mxu1 }
 0x63e   : > { %16056 = vst [vmem:[#allocation125_spill] sm:$0xff] %v13586_v61  ;;  %5641 = vmax.xlane.f32.xlu1 %v5640_v14 }
 0x63f   : > { %v13588_v63 = vpop.f32.mrf.mxu1 }
 0x640   : > { %16057 = vst [vmem:[#allocation126_spill] sm:$0xff] %v13588_v63  ;;  %v5643_v3 = vmax.f32 %v13586_v61, %v13588_v63 }
 0x641   : > { %v13592_v28 = vpop.f32.mrf.mxu1 }
 0x642   : > { %16058 = vst [vmem:[#allocation127_spill] sm:$0xff] %v13592_v28  ;;  %5644 = vmax.xlane.f32.xlu0 %v5643_v3 }
 0x643   : > { %v13594_v49 = vpop.f32.mrf.mxu1 }
 0x644   : > { %16059 = vst [vmem:[#allocation128_spill] sm:$0xff] %v13594_v49  ;;  %v5646_v36 = vmax.f32 %v13592_v28, %v13594_v49 }
 0x645   : > { %v13598_v31 = vpop.f32.mrf.mxu1 }
 0x646   : > { %5647 = vmax.xlane.f32.xlu1 %v5646_v36 }
 0x647   : > { %v4222_v38 = vpop.xlane.xlu1 %4221  ;;  %v13600_v41 = vpop.f32.mrf.mxu1 }
 0x648   : > { %16060 = vst [vmem:[#allocation129_spill] sm:$0xff] %v13600_v41  ;;  %v4268_v14 = vsub.f32 %v13252_v25, %v4222_v38  ;;  %v4269_v1 = vsub.f32 %v13254_v35, %v4222_v38  ;;  %v5649_v63 = vmax.f32 %v13598_v31, %v13600_v41 }
 0x649   : > { %v13606_v61 = vpop.f32.mrf.mxu1 }
 0x64a   : > { %v4300_v3 = vmul.f32 1.442695, %v4268_v14  ;;  %v4302_v7 = vmul.f32 1.442695, %v4269_v1  ;;  %5650 = vmax.xlane.f32.xlu0 %v5649_v63 }
 0x64b   : > { %v4225_v55 = vpop.xlane.xlu0 %4224  ;;  %v13608_v49 = vpop.f32.mrf.mxu1 }
 0x64c   : > { %10714 = vpow2.f32 %v4300_v3  ;;  %v4270_v36 = vsub.f32 %v13258_v21, %v4225_v55  ;;  %v4271_v28 = vsub.f32 %v13262_v15, %v4225_v55  ;;  %v5652_v25 = vmax.f32 %v13606_v61, %v13608_v49 }
 0x64d   : > { %10716 = vpow2.f32 %v4302_v7  ;;  %v13614_v35 = vpop.f32.mrf.mxu1 }
 0x64e   : > { %16061 = vst [vmem:[#allocation130_spill] sm:$0xff] %v13614_v35  ;;  %v4304_v38 = vmul.f32 1.442695, %v4270_v36  ;;  %v4306_v41 = vmul.f32 1.442695, %v4271_v28  ;;  %5653 = vmax.xlane.f32.xlu1 %v5652_v25 }
 0x64f   : > { %v4228_v14 = vpop.xlane.xlu1 %4227  ;;  %v13616_v1 = vpop.f32.mrf.mxu1 }
 0x650   : > { %16062 = vst [vmem:[#allocation131_spill] sm:$0xff] %v13616_v1  ;;  %10718 = vpow2.f32 %v4304_v38  ;;  %v4272_v63 = vsub.f32 %v13266_v43, %v4228_v14  ;;  %v4273_v3 = vsub.f32 %v13268_v23, %v4228_v14  ;;  %v5655_v21 = vmax.f32 %v13614_v35, %v13616_v1 }
 0x651   : > { %10720 = vpow2.f32 %v4306_v41  ;;  %v13622_v15 = vpop.f32.mrf.mxu1 }
 0x652   : > { %5656 = vmax.xlane.f32.xlu0 %v5655_v21  ;;  %v4308_v7 = vmul.f32 1.442695, %v4272_v63  ;;  %v4310_v28 = vmul.f32 1.442695, %v4273_v3 }
 0x653   : > { %v4231_v55 = vpop.xlane.xlu0 %4230  ;;  %v13624_v36 = vpop.f32.mrf.mxu1 }
 0x654   : > { %v4274_v25 = vsub.f32 %v13274_v0, %v4231_v55  ;;  %v4275_v38 = vsub.f32 %v13276_v9, %v4231_v55  ;;  %v5658_v43 = vmax.f32 %v13622_v15, %v13624_v36  ;;  %10722 = vpow2.f32 %v4308_v7 }
 0x655   : > { %v13630_v23 = vpop.f32.mrf.mxu1  ;;  %10724 = vpow2.f32 %v4310_v28 }
 0x656   : > { %16063 = vst [vmem:[#allocation132_spill] sm:$0xff] %v13630_v23  ;;  %5659 = vmax.xlane.f32.xlu1 %v5658_v43  ;;  %v4312_v41 = vmul.f32 1.442695, %v4274_v25  ;;  %v4314_v63 = vmul.f32 1.442695, %v4275_v38 }
 0x657   : > { %v13632_v14 = vpop.f32.mrf.mxu1  ;;  %v4234_v21 = vpop.xlane.xlu1 %4233 }
 0x658   : > { %16064 = vst [vmem:[#allocation133_spill] sm:$0xff] %v13632_v14  ;;  %v5661_v3 = vmax.f32 %v13630_v23, %v13632_v14  ;;  %10726 = vpow2.f32 %v4312_v41  ;;  %v4276_v55 = vsub.f32 %v13280_v52, %v4234_v21  ;;  %v4277_v28 = vsub.f32 %v13284_v30, %v4234_v21 }
 0x659   : > { %v13636_v1 = vpop.eup %10714  ;;  %v13638_v0 = vpop.f32.mrf.mxu1  ;;  %10728 = vpow2.f32 %v4314_v63 }
 0x65a   : > { %16065 = vst [vmem:[#allocation134_spill] sm:$0xff] %v13636_v1  ;;  %16066 = vst [vmem:[#allocation135_spill] sm:$0xff] %v13638_v0  ;;  %v13640_v9 = vpop.eup %10716  ;;  %5662 = vmax.xlane.f32.xlu0 %v5661_v3  ;;  %v4316_v52 = vmul.f32 1.442695, %v4276_v55  ;;  %v4318_v30 = vmul.f32 1.442695, %v4277_v28 }
 0x65b   : > { %16067 = vst [vmem:[#allocation136_spill] sm:$0xff] %v13640_v9  ;;  %v13643_v7 = vpop.f32.mrf.mxu1  ;;  %v4237_v25 = vpop.xlane.xlu0 %4236  ;;  %v4364_v43 = vadd.f32 %v13640_v9, %v13636_v1 }
 0x65c   : > { %16068 = vst [vmem:[#allocation137_spill] sm:$0xff] %v13643_v7  ;;  %v5664_v38 = vmax.f32 %v13638_v0, %v13643_v7  ;;  %v4278_v41 = vsub.f32 %v13288_v5, %v4237_v25  ;;  %v4279_v21 = vsub.f32 %v13290_v50, %v4237_v25  ;;  %10730 = vpow2.f32 %v4316_v52 }
 0x65d   : > { %v13650_v14 = vpop.eup %10718  ;;  %v13652_v23 = vpop.f32.mrf.mxu1  ;;  %10732 = vpow2.f32 %v4318_v30 }
 0x65e   : > { %16069 = vst [vmem:[#allocation138_spill] sm:$0xff] %v13652_v23  ;;  %v13654_v3 = vpop.eup %10720  ;;  %5665 = vmax.xlane.f32.xlu1 %v5664_v38  ;;  %4365 = vadd.xlane.f32.xlu0 %v4364_v43  ;;  %v4320_v1 = vmul.f32 1.442695, %v4278_v41  ;;  %v4322_v5 = vmul.f32 1.442695, %v4279_v21 }
 0x65f   : > { %v13657_v63 = vpop.f32.mrf.mxu1  ;;  %v4367_v7 = vadd.f32 %v13654_v3, %v13650_v14  ;;  %v4240_v9 = vpop.xlane.xlu1 %4239 }
 0x660   : > { %16070 = vst [vmem:[#allocation139_spill] sm:$0xff] %v13657_v63  ;;  %v5667_v55 = vmax.f32 %v13652_v23, %v13657_v63  ;;  %10734 = vpow2.f32 %v4320_v1  ;;  %v4280_v43 = vsub.f32 %v13296_v19, %v4240_v9  ;;  %v4281_v52 = vsub.f32 %v13298_v11, %v4240_v9 }
 0x661   : > { %v13662_v0 = vpop.f32.mrf.mxu1  ;;  %v13666_v38 = vpop.eup %10722  ;;  %10736 = vpow2.f32 %v4322_v5 }
 0x662   : > { %16071 = vst [vmem:[#allocation140_spill] sm:$0xff] %v13662_v0  ;;  %4368 = vadd.xlane.f32.xlu0 %v4367_v7  ;;  %16073 = vst [vmem:[#allocation142_spill] sm:$0xff] %v13666_v38  ;;  %v13672_v28 = vpop.eup %10724 }
 0x663   : > { %v13664_v35 = vpop.f32.mrf.mxu1  ;;  %v4243_v7 = vpop.xlane.xlu0 %4242  ;;  %v4370_v63 = vadd.f32 %v13672_v28, %v13666_v38 }
 0x664   : > { %16072 = vst [vmem:[#allocation141_spill] sm:$0xff] %v13664_v35  ;;  %v5670_v50 = vmax.f32 %v13662_v0, %v13664_v35  ;;  %v4282_v19 = vsub.f32 %v13304_v12, %v4243_v7  ;;  %v4283_v23 = vsub.f32 %v13306_v48, %v4243_v7 }
 0x665   : > { %v13674_v25 = vpop.f32.mrf.mxu1  ;;  %v13680_v21 = vpop.eup %10726 }
 0x666   : > { %16074 = vst [vmem:[#allocation143_spill] sm:$0xff] %v13674_v25  ;;  %5671 = vmax.xlane.f32.xlu1 %v5670_v50  ;;  %5668 = vmax.xlane.f32.xlu0 %v5667_v55  ;;  %v13686_v50 = vpop.eup %10728  ;;  %v4324_v55 = vmul.f32 1.442695, %v4280_v43  ;;  %v4328_v12 = vmul.f32 1.442695, %v4282_v19 }
 0x667   : > { %v4246_v41 = vpop.xlane.xlu1 %4245  ;;  %v13678_v30 = vpop.f32.mrf.mxu1 }
 0x668   : > { %16075 = vst [vmem:[#allocation144_spill] sm:$0xff] %v13678_v30  ;;  %v4284_v35 = vsub.f32 %v13310_v13, %v4246_v41  ;;  %v4285_v0 = vsub.f32 %v13312_v42, %v4246_v41  ;;  %v4326_v13 = vmul.f32 1.442695, %v4281_v52  ;;  %v4373_v41 = vadd.f32 %v13686_v50, %v13680_v21 }
 0x669   : > { %v13688_v1 = vpop.f32.mrf.mxu1  ;;  %v13702_v7 = vpop.eup %10730  ;;  %v5673_v43 = vmax.f32 %v13674_v25, %v13678_v30 }
 0x66a   : > { %v4332_v11 = vmul.f32 1.442695, %v4284_v35  ;;  %v4334_v9 = vmul.f32 1.442695, %v4285_v0  ;;  %4371 = vadd.xlane.f32.xlu0 %v4370_v63  ;;  %v4330_v0 = vmul.f32 1.442695, %v4283_v23 }
 0x66b   : > { %v13692_v5 = vpop.f32.mrf.mxu1  ;;  %v4249_v35 = vpop.xlane.xlu0 %4248 }
 0x66c   : > { %16076 = vst [vmem:[#allocation145_spill] sm:$0xff] %v13692_v5  ;;  %10738 = vpow2.f32 %v4332_v11  ;;  %v5676_v42 = vmax.f32 %v13688_v1, %v13692_v5  ;;  %v4286_v23 = vsub.f32 %v13318_v62, %v4249_v35 }
 0x66d   : > { %10740 = vpow2.f32 %v4334_v9  ;;  %v13698_v38 = vpop.f32.mrf.mxu1  ;;  %v13708_v9 = vpop.eup %10732 }
 0x66e   : > { %16077 = vst [vmem:[#allocation146_spill] sm:$0xff] %v13698_v38  ;;  %5677 = vmax.xlane.f32.xlu1 %v5676_v42  ;;  %4374 = vadd.xlane.f32.xlu0 %v4373_v41  ;;  %10742 = vpow2.f32 %v4324_v55  ;;  %v13714_v5 = vpop.eup %10734 }
 0x66f   : > { %v4252_v48 = vpop.xlane.xlu1 %4251  ;;  %v13700_v63 = vpop.f32.mrf.mxu1  ;;  %10744 = vpow2.f32 %v4326_v13  ;;  %v4287_v13 = vsub.f32 %v13320_v51, %v4249_v35 }
 0x670   : > { %16078 = vst [vmem:[#allocation147_spill] sm:$0xff] %v13700_v63  ;;  %v4288_v52 = vsub.f32 %v13324_v2, %v4252_v48  ;;  %v4289_v11 = vsub.f32 %v13328_v58, %v4252_v48  ;;  %10746 = vpow2.f32 %v4328_v12  ;;  %v4376_v58 = vadd.f32 %v13708_v9, %v13702_v7  ;;  %v13720_v48 = vpop.eup %10736 }
 0x671   : > { %v13710_v19 = vpop.f32.mrf.mxu1  ;;  %10748 = vpow2.f32 %v4330_v0  ;;  %v4336_v12 = vmul.f32 1.442695, %v4286_v23  ;;  %v4338_v0 = vmul.f32 1.442695, %v4287_v13 }
 0x672   : > { %v4340_v55 = vmul.f32 1.442695, %v4288_v52  ;;  %v4342_v42 = vmul.f32 1.442695, %v4289_v11  ;;  %5674 = vmax.xlane.f32.xlu0 %v5673_v43 }
 0x673   : > { %v3676_v41 = vpop.xlane.xlu1 %3675  ;;  %v4255_v2 = vpop.xlane.xlu0 %4254 }
 0x674   : > { %10750 = vpow2.f32 %v4340_v55  ;;  %v13716_v30 = vpop.f32.mrf.mxu1  ;;  %v4290_v51 = vsub.f32 %v13333_v59, %v4255_v2  ;;  %v4291_v43 = vsub.f32 %v13342_v27, %v4255_v2  ;;  %v4379_v55 = vadd.f32 %v13720_v48, %v13714_v5 }
 0x675   : > { %10752 = vpow2.f32 %v4342_v42  ;;  %v5682_v62 = vmax.f32 %v13710_v19, %v13716_v30 }
 0x676   : > { %4377 = vadd.xlane.f32.xlu0 %v4376_v58  ;;  %10754 = vpow2.f32 %v4336_v12  ;;  %v4344_v59 = vmul.f32 1.442695, %v4290_v51  ;;  %v4346_v2 = vmul.f32 1.442695, %v4291_v43 }
 0x677   : > { %5683 = vmax.xlane.f32.xlu1 %v5682_v62  ;;  %v4258_v35 = vpop.xlane.xlu1 %4257  ;;  %10756 = vpow2.f32 %v4338_v0 }
 0x678   : > { %v4292_v52 = vsub.f32 %v13348_v8, %v4258_v35  ;;  %v4293_v11 = vsub.f32 %v13350_v39, %v4258_v35  ;;  %v5679_v39 = vmax.f32 %v13698_v38, %v13700_v63  ;;  %v13746_v35 = vpop.f32.mrf.mxu1  ;;  %v16094_v38 = vld [vmem:[#allocation78_spill] sm:$0xff] }
 0x679   : > { %v13730_v42 = vpop.eup %10738  ;;  %16082 = vst [vmem:[#allocation151_spill] sm:$0xff] %v13746_v35 }
 0x67a   : > { %16079 = vst [vmem:[#allocation148_spill] sm:$0xff] %v13730_v42  ;;  %v13732_v25 = vpop.eup %10740  ;;  %v4348_v23 = vmul.f32 1.442695, %v4292_v52  ;;  %v4350_v13 = vmul.f32 1.442695, %v4293_v11  ;;  %4380 = vadd.xlane.f32.xlu0 %v4379_v55 }
 0x67b   : > { %16080 = vst [vmem:[#allocation149_spill] sm:$0xff] %v13732_v25  ;;  %v3682_v58 = vpop.xlane.xlu1 %3681  ;;  %v4388_v27 = vadd.f32 %v13732_v25, %v13730_v42  ;;  %v13736_v8 = vpop.eup %10742  ;;  %v16095_v42 = vld [vmem:[#allocation82_spill] sm:$0xff] }
 0x67c   : > { %10758 = vpow2.f32 %v4348_v23  ;;  %v13740_v62 = vpop.eup %10744 }
 0x67d   : > { %10760 = vpow2.f32 %v4350_v13  ;;  %4389 = vadd.xlane.f32.xlu1 %v4388_v27  ;;  %v13742_v12 = vpop.eup %10746  ;;  %v4382_v11 = vadd.f32 %v13740_v62, %v13736_v8 }
 0x67e   : > { %10762 = vrcp.f32 %v3676_v41  ;;  %5680 = vmax.xlane.f32.xlu0 %v5679_v39  ;;  %16081 = vst [vmem:[#allocation150_spill] sm:$0xff] %v13742_v12  ;;  %v13744_v51 = vpop.eup %10748  ;;  %v13758_v39 = vpop.f32.mrf.mxu1 }
 0x67f   : > { %10764 = vpow2.f32 %v4344_v59  ;;  %v4264_v0 = vpop.xlane.xlu1 %4263  ;;  %16085 = vst [vmem:[#allocation154_spill] sm:$0xff] %v13758_v39 }
 0x680   : > { %10766 = vpow2.f32 %v4346_v2  ;;  %v4296_v52 = vsub.f32 %v13368_v29, %v4264_v0  ;;  %v4297_v43 = vsub.f32 %v13370_v22, %v4264_v0  ;;  %v4385_v29 = vadd.f32 %v13744_v51, %v13742_v12 }
 0x681   : > { %v13752_v55 = vpop.eup %10750  ;;  %v3679_v41 = vpop.xlane.xlu0 %3678 }
 0x682   : > { %16083 = vst [vmem:[#allocation152_spill] sm:$0xff] %v13752_v55  ;;  %v13754_v23 = vpop.eup %10752  ;;  %v4356_v13 = vmul.f32 1.442695, %v4296_v52  ;;  %v4358_v59 = vmul.f32 1.442695, %v4297_v43  ;;  %10768 = vrcp.f32 %v3679_v41  ;;  %4383 = vadd.xlane.f32.xlu0 %v4382_v11  ;;  %v5685_v41 = vmax.f32 %v13746_v35, %v13758_v39 }
 0x683   : > { %16084 = vst [vmem:[#allocation153_spill] sm:$0xff] %v13754_v23  ;;  %v4394_v27 = vadd.f32 %v13754_v23, %v13752_v55  ;;  %v13764_v43 = vpop.eup %10754 }
 0x684   : > { %10770 = vpow2.f32 %v4356_v13  ;;  %16086 = vst [vmem:[#allocation155_spill] sm:$0xff] %v13764_v43  ;;  %v13766_v11 = vpop.eup %10756 }
 0x685   : > { %10772 = vpow2.f32 %v4358_v59  ;;  %v4261_v22 = vpop.xlane.xlu0 %4260  ;;  %v3688_v2 = vpop.xlane.xlu1 %3687  ;;  %4395 = vadd.xlane.f32.xlu1 %v4394_v27  ;;  %16087 = vst [vmem:[#allocation156_spill] sm:$0xff] %v13766_v11 }
 0x686   : > { %v4294_v0 = vsub.f32 %v13357_v16, %v4261_v22  ;;  %v4295_v52 = vsub.f32 %v13364_v17, %v4261_v22  ;;  %4386 = vadd.xlane.f32.xlu0 %v4385_v29  ;;  %10774 = vrcp.f32 %v3682_v58  ;;  %v4391_v22 = vadd.f32 %v13766_v11, %v13764_v43 }
 0x688   : > { %v4352_v13 = vmul.f32 1.442695, %v4294_v0  ;;  %v4354_v55 = vmul.f32 1.442695, %v4295_v52 }
 0x689   : > { %v13770_v63 = vpop.eup %10758  ;;  %v3685_v59 = vpop.xlane.xlu0 %3684 }
 0x68a   : > { %16088 = vst [vmem:[#allocation157_spill] sm:$0xff] %v13770_v63  ;;  %v13772_v23 = vpop.xlane.xlu1 %4951  ;;  %v13774_v27 = vpop.eup %10760  ;;  %10776 = vpow2.f32 %v4352_v13  ;;  %5686 = vmax.xlane.f32.xlu0 %v5685_v41  ;;  %v16092_v41 = vld [vmem:[#allocation79_spill] sm:$0xff] }
 0x68b   : > { %16089 = vst [vmem:[#allocation158_spill] sm:$0xff] %v13774_v27  ;;  %v10763_v17 = vpop.eup %10762  ;;  %10778 = vpow2.f32 %v4354_v55  ;;  %v4400_v16 = vadd.f32 %v13774_v27, %v13770_v63 }
 0x68c   : > { %v13778_v29 = vpop.eup %10764  ;;  %10780 = vrcp.f32 %v3685_v59  ;;  %v3739_v39 = vmul.f32 %v10763_v17, %v16092_v41  ;;  %v3738_v43 = vmul.f32 %v10763_v17, %v16094_v38  ;;  %v16097_v38 = vld [vmem:[#allocation70_spill] sm:$0xff]  ;;  %v16099_v17 = vld [vmem:[#allocation52_spill] sm:$0xff] }
 0x68d   : > { %16090 = vst [vmem:[#allocation159_spill] sm:$0xff] %v13778_v29  ;;  %v13782_v0 = vpop.eup %10766  ;;  %v13784_v58 = vpop.xlane.xlu0 %4266  ;;  %4401 = vadd.xlane.f32.xlu1 %v4400_v16  ;;  %10782 = vrcp.f32 %v3688_v2 }
 0x68e   : > { %16091 = vst [vmem:[#allocation160_spill] sm:$0xff] %v13782_v0  ;;  %v3694_v52 = vpop.xlane.xlu1 %3693  ;;  %4392 = vadd.xlane.f32.xlu0 %v4391_v22  ;;  %v4397_v55 = vadd.f32 %v13782_v0, %v13778_v29 }
 0x68f   : > { %v10769_v13 = vpop.eup %10768 }
 0x690   : > { %v3741_v63 = vmul.f32 %v10769_v13, %v13377_v46  ;;  %v3740_v11 = vmul.f32 %v10769_v13, %v16095_v42  ;;  %v16102_v13 = vld [vmem:[#allocation81_spill] sm:$0xff] }
 0x691   : > { %v13790_v27 = vpop.eup %10770  ;;  %v3691_v59 = vpop.xlane.xlu0 %3690 }
 0x692   : > { %16093 = vst [vmem:[#allocation79_spill] sm:$0xff] %v13790_v27  ;;  %v13792_v35 = vpop.xlane.xlu1 %4957  ;;  %v13796_v25 = vpop.eup %10772  ;;  %4398 = vadd.xlane.f32.xlu0 %v4397_v55  ;;  %v3771_v16 = vpack.c.bf16 %v3741_v63, %v3739_v39  ;;  %v3770_v22 = vpack.c.bf16 %v3740_v11, %v3738_v43  ;;  %10784 = vrcp.f32 %v3691_v59  ;;  %v16101_v11 = vld [vmem:[#allocation53_spill] sm:$0xff] }
 0x693   : > { %16096 = vst [vmem:[#allocation78_spill] sm:$0xff] %v13796_v25  ;;  %v4406_v41 = vadd.f32 %v13796_v25, %v13790_v27  ;;  %v10775_v0 = vpop.eup %10774  ;;  %10786 = vrcp.f32 %v3694_v52 }
 0x694   : > { %3914 = vmatprep.mubr.bf16.mxu0 %v3771_v16  ;;  %v3743_v55 = vmul.f32 %v10775_v0, %v16102_v13 }
 0x695   : > { %v13800_v46 = vpop.xlane.xlu0 %4954  ;;  %3915 = vmatmul.mubr.bf16.vlgmr.msra.gmra.mxu0 %v3770_v22  ;;  %4407 = vadd.xlane.f32.xlu1 %v4406_v41  ;;  %v16103_v22 = vld [vmem:[#allocation54_spill] sm:$0xff]  ;;  %v16104_v41 = vld [vmem:[#allocation80_spill] sm:$0xff] }
 0x696   : > { %v3700_v29 = vpop.xlane.xlu1 %3699  ;;  %9567 = vmatpush3.bf16.msra.mxu0 %v16097_v38  ;;  %v3742_v38 = vmul.f32 %v10775_v0, %v16104_v41  ;;  %v16108_v0 = vld [vmem:[#allocation86_spill] sm:$0xff] }
 0x697   : > { %v13803_v42 = vpop.eup %10776  ;;  %9568 = vmatprep.subr.bf16.mxu0 %v16099_v17 }
 0x698   : > { %16098 = vst [vmem:[#allocation82_spill] sm:$0xff] %v13803_v42  ;;  %v13806_v2 = vpop.eup %10778 }
 0x699   : > { %16100 = vst [vmem:[#allocation70_spill] sm:$0xff] %v13806_v2  ;;  %v10781_v63 = vpop.eup %10780  ;;  %v3697_v39 = vpop.xlane.xlu0 %3696  ;;  %v4403_v43 = vadd.f32 %v13806_v2, %v13803_v42 }
 0x69a   : > { %9569 = vmatpush3.bf16.msra.mxu0 %v16101_v11  ;;  %v3745_v59 = vmul.f32 %v10781_v63, %v13400_v53  ;;  %v13813_v16 = vpop.xlane.xlu1 %4963  ;;  %v3744_v17 = vmul.f32 %v10781_v63, %v13394_v6  ;;  %10788 = vrcp.f32 %v3697_v39  ;;  %v16105_v11 = vld [vmem:[#allocation71_spill] sm:$0xff]  ;;  %v10783_v13 = vpop.eup %10782  ;;  %v16109_v39 = vld [vmem:[#allocation57_spill] sm:$0xff] }
 0x69b   : > { %9570 = vmatprep.subr.bf16.mxu0 %v16103_v22  ;;  %4404 = vadd.xlane.f32.xlu0 %v4403_v43  ;;  %v16106_v53 = vld [vmem:[#allocation55_spill] sm:$0xff]  ;;  %10790 = vrcp.f32 %v3700_v29  ;;  %v16107_v43 = vld [vmem:[#allocation56_spill] sm:$0xff]  ;;  %v3747_v6 = vmul.f32 %v10783_v13, %v16108_v0 }
 0x69c   : > { %v3773_v27 = vpack.c.bf16 %v3745_v59, %v3743_v55  ;;  %v3772_v52 = vpack.c.bf16 %v3744_v17, %v3742_v38  ;;  %v16110_v55 = vld [vmem:[#allocation85_spill] sm:$0xff]  ;;  %v16111_v29 = vld [vmem:[#allocation72_spill] sm:$0xff] }
 0x69d   : > { %v13818_v25 = vpop.xlane.xlu0 %4960  ;;  %v13828_v38 = vld [vmem:[#allocation4 + $0x24] ss:$8 sps:$4 sm:$0xff]  }
 0x69e   : > { %3922 = vmatprep.mubr.bf16.mxu0 %v3773_v27  ;;  %9571 = vmatpush3.bf16.msra.mxu0 %v16105_v11  ;;  %v3706_v2 = vpop.xlane.xlu1 %3705  ;;  %v3746_v27 = vmul.f32 %v10783_v13, %v16110_v55 }
 0x69f   : > { %3923 = vmatmul.mubr.bf16.gmra.mxu0 %v3772_v52  ;;  %9572 = vmatprep.subr.bf16.mxu0 %v16106_v53  ;;  %v10785_v42 = vpop.eup %10784 }
 0x6a0   : > { %v3749_v63 = vmul.f32 %v10785_v42, %v13428_v60  ;;  %v3748_v59 = vmul.f32 %v10785_v42, %v13422_v40  ;;  %v10787_v11 = vpop.eup %10786  ;;  %v16112_v60 = vld [vmem:[#allocation58_spill] sm:$0xff]  ;;  %v16113_v42 = vld [vmem:[#allocation87_spill] sm:$0xff] }
 0x6a1   : > { %v3703_v22 = vpop.xlane.xlu0 %3702  ;;  %v4998_v13 = vsub.f32 %v16113_v42, %v13772_v23  ;;  %v3751_v0 = vmul.f32 %v10787_v11, %v13416_v45 }
 0x6a2   : > { %9573 = vmatpush3.bf16.msra.mxu0 %v16107_v43  ;;  %10792 = vrcp.f32 %v3703_v22  ;;  %v3775_v41 = vpack.c.bf16 %v3749_v63, %v3747_v6  ;;  %v3774_v52 = vpack.c.bf16 %v3748_v59, %v3746_v27  ;;  %v13833_v53 = vpop.xlane.xlu1 %4969  ;;  %v16114_v43 = vld [vmem:[#allocation59_spill] sm:$0xff]  ;;  %v16115_v63 = vld [vmem:[#allocation60_spill] sm:$0xff] }
 0x6a3   : > { %9574 = vmatprep.subr.bf16.mxu0 %v16109_v39  ;;  %10794 = vrcp.f32 %v3706_v2  ;;  %v3750_v39 = vmul.f32 %v10787_v11, %v13411_v54  ;;  %v16116_v59 = vld [vmem:[#allocation88_spill] sm:$0xff]  ;;  %v16117_v2 = vld [vmem:[#allocation83_spill] sm:$0xff] }
 0x6a4   : > { %3930 = vmatprep.mubr.bf16.mxu0 %v3775_v41  ;;  %v4999_v41 = vsub.f32 %v16116_v59, %v13772_v23  ;;  %v16121_v23 = vld [vmem:[#allocation91_spill] sm:$0xff] }
 0x6a5   : > { %v13830_v17 = vpop.xlane.xlu0 %4966 }
 0x6a6   : > { %9575 = vmatpush3.bf16.msra.mxu0 %v16111_v29  ;;  %5900 = vrot.lane.b32.xlu1 %v13828_v38, %s11565_s9  ;;  %v4298_v29 = vsub.f32 %v16117_v2, %v13784_v58  ;;  %v16124_v2 = vld [vmem:[#allocation62_spill] sm:$0xff] }
 0x6a7   : > { %3931 = vmatmul.mubr.bf16.gmra.mxu0 %v3774_v52  ;;  %9576 = vmatprep.subr.bf16.mxu0 %v16112_v60  ;;  %v10789_v40 = vpop.eup %10788  ;;  %v5030_v52 = vmul.f32 1.442695, %v4998_v13  ;;  %v3712_v60 = vpop.xlane.xlu1 %3711  ;;  %v5002_v13 = vsub.f32 %v16121_v23, %v13792_v35 }
 0x6a8   : > { %v3753_v6 = vmul.f32 %v10789_v40, %v13452_v56  ;;  %v3752_v55 = vmul.f32 %v10789_v40, %v13448_v34  ;;  %v13852_v56 = vld [vmem:[#allocation4 + $0x94] ss:$8 sps:$4 sm:$0xff]   ;;  %v16119_v34 = vld [vmem:[#allocation73_spill] sm:$0xff]  ;;  %v10791_v11 = vpop.eup %10790 }
 0x6a9   : > { %v3709_v22 = vpop.xlane.xlu0 %3708  ;;  %v16120_v40 = vld [vmem:[#allocation61_spill] sm:$0xff] }
 0x6aa   : > { %9577 = vmatpush3.bf16.msra.mxu0 %v16114_v43  ;;  %10796 = vrcp.f32 %v3709_v22  ;;  %v3777_v27 = vpack.c.bf16 %v3753_v6, %v3751_v0  ;;  %v3776_v45 = vpack.c.bf16 %v3752_v55, %v3750_v39  ;;  %v16118_v43 = vld [vmem:[#allocation84_spill] sm:$0xff]  ;;  %v5032_v0 = vmul.f32 1.442695, %v4999_v41  ;;  %v16126_v41 = vld [vmem:[#allocation90_spill] sm:$0xff] }
 0x6ab   : > { %9578 = vmatprep.subr.bf16.mxu0 %v16115_v63  ;;  %v4299_v54 = vsub.f32 %v16118_v43, %v13784_v58  ;;  %10798 = vpow2.f32 %v5030_v52  ;;  %v4360_v6 = vmul.f32 1.442695, %v4298_v29  ;;  %v16122_v63 = vld [vmem:[#allocation92_spill] sm:$0xff]  ;;  %v5001_v52 = vsub.f32 %v16126_v41, %v13800_v46  ;;  %v13871_v29 = vpop.xlane.xlu1 %4975 }
 0x6ac   : > { %3938 = vmatprep.mubr.bf16.mxu0 %v3777_v27  ;;  %v5003_v39 = vsub.f32 %v16122_v63, %v13792_v35  ;;  %v16123_v27 = vld [vmem:[#allocation89_spill] sm:$0xff]  ;;  %10800 = vrcp.f32 %v3712_v60  ;;  %v5038_v63 = vmul.f32 1.442695, %v5002_v13  ;;  %v5004_v13 = vsub.f32 %v13437_v37, %v13818_v25 }
 0x6ad   : > { %v13850_v42 = vpop.xlane.xlu0 %4972  ;;  %v4362_v55 = vmul.f32 1.442695, %v4299_v54  ;;  %v5000_v59 = vsub.f32 %v16123_v27, %v13800_v46  ;;  %v16127_v35 = vld [vmem:[#allocation93_spill] sm:$0xff]  ;;  %v11194_v54 = vld [vmem:[#allocation4 + $0xf4] ss:$8 sps:$4 sm:$0xff]  }
 0x6ae   : > { %9579 = vmatpush3.bf16.msra.mxu0 %v16119_v34  ;;  %v5042_v37 = vmul.f32 1.442695, %v5004_v13 }
 0x6af   : > { %3939 = vmatmul.mubr.bf16.gmra.mxu0 %v3776_v45  ;;  %9580 = vmatprep.subr.bf16.mxu0 %v16120_v40  ;;  %v10793_v22 = vpop.eup %10792  ;;  %v16125_v45 = vld [vmem:[#allocation94_spill] sm:$0xff]  ;;  %v3754_v40 = vmul.f32 %v10791_v11, %v16127_v35  ;;  %v5034_v60 = vmul.f32 1.442695, %v5000_v59  ;;  %v5010_v35 = vsub.f32 %v13476_v26, %v13833_v53 }
 0x6b0   : > { %v3755_v43 = vmul.f32 %v10791_v11, %v16125_v45  ;;  %v3757_v34 = vmul.f32 %v10793_v22, %v13484_v57  ;;  %v3756_v23 = vmul.f32 %v10793_v22, %v13478_v44  ;;  %v16128_v45 = vld [vmem:[#allocation95_spill] sm:$0xff]  ;;  %v10795_v41 = vpop.eup %10794  ;;  %v5036_v11 = vmul.f32 1.442695, %v5001_v52  ;;  %v16129_v44 = vld [vmem:[#allocation96_spill] sm:$0xff] }
 0x6b1   : > { %5914 = vrot.lane.b32.xlu0 %v13852_v56, %s11565_s9  ;;  %v3715_v58 = vpop.xlane.xlu0 %3714  ;;  %v5006_v57 = vsub.f32 %v16128_v45, %v13813_v16  ;;  %v5007_v22 = vsub.f32 %v16129_v44, %v13813_v16  ;;  %v3759_v59 = vmul.f32 %v10795_v41, %v13472_v33  ;;  %v16134_v45 = vld [vmem:[#allocation104_spill] sm:$0xff] }
 0x6b2   : > { %9581 = vmatpush3.bf16.msra.mxu0 %v16124_v2  ;;  %10802 = vrcp.f32 %v3715_v58  ;;  %v3779_v27 = vpack.c.bf16 %v3757_v34, %v3755_v43  ;;  %v5040_v2 = vmul.f32 1.442695, %v5003_v39  ;;  %v3778_v46 = vpack.c.bf16 %v3756_v23, %v3754_v40 }
 0x6b3   : > { %9662 = vmatprep.subr.bf16.mxu0 %v11194_v54  ;;  %10804 = vpow2.f32 %v5032_v0  ;;  %v5046_v39 = vmul.f32 1.442695, %v5006_v57  ;;  %v5005_v58 = vsub.f32 %v13446_v24, %v13818_v25  ;;  %v5048_v43 = vmul.f32 1.442695, %v5007_v22  ;;  %v16130_v25 = vld [vmem:[#allocation99_spill] sm:$0xff]  ;;  %v16132_v54 = vld [vmem:[#allocation97_spill] sm:$0xff] }
 0x6b4   : > { %10806 = vpow2.f32 %v4360_v6  ;;  %3946 = vmatprep.mubr.bf16.mxu0 %v3779_v27  ;;  %v3718_v6 = vpop.xlane.xlu1 %3717  ;;  %v3758_v34 = vmul.f32 %v10795_v41, %v13467_v47  ;;  %v5011_v33 = vsub.f32 %v16130_v25, %v13833_v53  ;;  %v16133_v47 = vld [vmem:[#allocation98_spill] sm:$0xff]  ;;  %v5014_v53 = vsub.f32 %v16134_v45, %v13871_v29  ;;  %v16137_v22 = vld [vmem:[#allocation100_spill] sm:$0xff] }
 0x6b5   : > { %v13877_v12 = vpop.xlane.xlu0 %4978  ;;  %10808 = vpow2.f32 %v4362_v55  ;;  %v5044_v24 = vmul.f32 1.442695, %v5005_v58  ;;  %v5012_v13 = vsub.f32 %v16137_v22, %v13850_v42 }
 0x6b6   : > { %10810 = vpow2.f32 %v5038_v63  ;;  %v5008_v63 = vsub.f32 %v16132_v54, %v13830_v17 }
 0x6b7   : > { %3947 = vmatmul.mubr.bf16.gmra.mxu0 %v3778_v46  ;;  %v10797_v0 = vpop.eup %10796  ;;  %10812 = vpow2.f32 %v5040_v2  ;;  %v5054_v2 = vmul.f32 1.442695, %v5010_v35  ;;  %v5056_v46 = vmul.f32 1.442695, %v5011_v33  ;;  %v5058_v33 = vmul.f32 1.442695, %v5012_v13 }
 0x6b8   : > { %10814 = vpow2.f32 %v5034_v60  ;;  %v3761_v55 = vmul.f32 %v10797_v0, %v13510_v4  ;;  %v3760_v52 = vmul.f32 %v10797_v0, %v13504_v10  ;;  %v13893_v4 = vpop.eup %10798  ;;  %v5009_v10 = vsub.f32 %v16133_v47, %v13830_v17  ;;  %v4982_v26 = vpop.xlane.xlu1 %4981  ;;  %v16135_v60 = vld [vmem:[#allocation105_spill] sm:$0xff] }
 0x6b9   : > { %10816 = vpow2.f32 %v5036_v11  ;;  %v3721_v16 = vpop.xlane.xlu0 %3720  ;;  %16131 = vst [vmem:[#allocation52_spill] sm:$0xff] %v13893_v4  ;;  %v10801_v27 = vpop.eup %10800  ;;  %v5015_v41 = vsub.f32 %v16135_v60, %v13871_v29  ;;  %v5050_v17 = vmul.f32 1.442695, %v5008_v63  ;;  %v5018_v0 = vsub.f32 %v13526_v20, %v4982_v26  ;;  %v16144_v63 = vld [vmem:[#allocation103_spill] sm:$0xff] }
 0x6ba   : > { %10818 = vrcp.f32 %v3718_v6  ;;  %v3781_v40 = vpack.c.bf16 %v3761_v55, %v3759_v59  ;;  %v3780_v23 = vpack.c.bf16 %v3760_v52, %v3758_v34  ;;  %v5052_v44 = vmul.f32 1.442695, %v5009_v10  ;;  %v16138_v6 = vld [vmem:[#allocation102_spill] sm:$0xff] }
 0x6bb   : > { %10820 = vpow2.f32 %v5046_v39  ;;  %v3763_v59 = vmul.f32 %v10801_v27, %v16138_v6  ;;  %v16140_v34 = vld [vmem:[#allocation110_spill] sm:$0xff]  ;;  %v5013_v47 = vsub.f32 %v16144_v63, %v13850_v42  ;;  %v5070_v10 = vmul.f32 1.442695, %v5018_v0  ;;  %v16147_v0 = vld [vmem:[#allocation108_spill] sm:$0xff]  ;;  %v16152_v63 = vld [vmem:[#allocation107_spill] sm:$0xff] }
 0x6bc   : > { %10822 = vrcp.f32 %v3721_v16  ;;  %3954 = vmatprep.mubr.bf16.mxu0 %v3781_v40  ;;  %v4988_v58 = vpop.xlane.xlu1 %4987  ;;  %v5064_v40 = vmul.f32 1.442695, %v5015_v41  ;;  %v5017_v6 = vsub.f32 %v16147_v0, %v13877_v12  ;;  %v16154_v0 = vld [vmem:[#allocation120_spill] sm:$0xff] }
 0x6bd   : > { %10824 = vpow2.f32 %v5048_v43  ;;  %v16139_v43 = vld [vmem:[#allocation101_spill] sm:$0xff] }
 0x6be   : > { %10826 = vpow2.f32 %v5042_v37  ;;  %v3762_v16 = vmul.f32 %v10801_v27, %v16139_v43  ;;  %v5062_v37 = vmul.f32 1.442695, %v5014_v53  ;;  %v4985_v27 = vpop.xlane.xlu0 %4984  ;;  %v5022_v53 = vsub.f32 %v13546_v32, %v4988_v58 }
 0x6bf   : > { %3955 = vmatmul.mubr.bf16.gmra.mxu0 %v3780_v23  ;;  %v10803_v57 = vpop.eup %10802  ;;  %10828 = vpow2.f32 %v5044_v24  ;;  %v16143_v23 = vld [vmem:[#allocation111_spill] sm:$0xff]  ;;  %v5060_v32 = vmul.f32 1.442695, %v5013_v47 }
 0x6c0   : > { %v13903_v11 = vpop.eup %10804  ;;  %v3765_v55 = vmul.f32 %v10803_v57, %v13534_v18  ;;  %v3764_v29 = vmul.f32 %v10803_v57, %v16140_v34  ;;  %10830 = vpow2.f32 %v5054_v2  ;;  %v5019_v18 = vsub.f32 %v16143_v23, %v4982_v26  ;;  %v4994_v2 = vpop.xlane.xlu1 %4993  ;;  %v16151_v23 = vld [vmem:[#allocation119_spill] sm:$0xff] }
 0x6c1   : > { %16136 = vst [vmem:[#allocation53_spill] sm:$0xff] %v13903_v11  ;;  %v13908_v39 = vpop.eup %10806  ;;  %10832 = vpow2.f32 %v5056_v46  ;;  %v16145_v46 = vld [vmem:[#allocation116_spill] sm:$0xff]  ;;  %v5094_v60 = vadd.f32 %v13903_v11, %v13893_v4  ;;  %v5078_v43 = vmul.f32 1.442695, %v5022_v53  ;;  %v16156_v4 = vld [vmem:[#allocation117_spill] sm:$0xff] }
 0x6c2   : > { %v13914_v52 = vpop.eup %10808  ;;  %v3783_v20 = vpack.c.bf16 %v3765_v55, %v3763_v59  ;;  %v3782_v24 = vpack.c.bf16 %v3764_v29, %v3762_v16  ;;  %10834 = vpow2.f32 %v5050_v17  ;;  %v5023_v26 = vsub.f32 %v16145_v46, %v4988_v58  ;;  %v16146_v17 = vld [vmem:[#allocation106_spill] sm:$0xff]  ;;  %v16148_v16 = vld [vmem:[#allocation112_spill] sm:$0xff]  ;;  %v16149_v29 = vld [vmem:[#allocation109_spill] sm:$0xff] }
 0x6c3   : > { %v13916_v35 = vpop.eup %10810  ;;  %10836 = vpow2.f32 %v5052_v44  ;;  %v5072_v42 = vmul.f32 1.442695, %v5019_v18  ;;  %v5016_v44 = vsub.f32 %v16146_v17, %v13877_v12  ;;  %v4409_v22 = vadd.f32 %v13914_v52, %v13908_v39  ;;  %v4991_v18 = vpop.xlane.xlu0 %4990 }
 0x6c4   : > { %16141 = vst [vmem:[#allocation81_spill] sm:$0xff] %v13916_v35  ;;  %v13918_v25 = vpop.eup %10812  ;;  %3962 = vmatprep.mubr.bf16.mxu0 %v3783_v20  ;;  %10838 = vpow2.f32 %v5062_v37  ;;  %v5020_v34 = vsub.f32 %v16148_v16, %v4985_v27  ;;  %v5026_v12 = vsub.f32 %v16151_v23, %v4994_v2  ;;  %v5024_v11 = vsub.f32 %v16156_v4, %v4991_v18 }
 0x6c5   : > { %16142 = vst [vmem:[#allocation54_spill] sm:$0xff] %v13918_v25  ;;  %v13921_v54 = vpop.eup %10814  ;;  %10840 = vpow2.f32 %v5064_v40  ;;  %v5100_v59 = vadd.f32 %v13918_v25, %v13916_v35  ;;  %v16150_v40 = vld [vmem:[#allocation115_spill] sm:$0xff]  ;;  %v5066_v53 = vmul.f32 1.442695, %v5016_v44 }
 0x6c6   : > { %v13925_v45 = vpop.eup %10816  ;;  %10842 = vpow2.f32 %v5058_v33  ;;  %v5080_v33 = vmul.f32 1.442695, %v5023_v26  ;;  %v5074_v23 = vmul.f32 1.442695, %v5020_v34  ;;  %v16159_v34 = vld [vmem:[#allocation118_spill] sm:$0xff] }
 0x6c7   : > { %3963 = vmatmul.mubr.bf16.gmra.mxu0 %v3782_v24  ;;  %v10819_v57 = vpop.eup %10818  ;;  %10844 = vpow2.f32 %v5070_v10  ;;  %v13939_v58 = vpop.xlane.xlu1 %5641  ;;  %v16153_v10 = vld [vmem:[#allocation114_spill] sm:$0xff] }
 0x6c8   : > { %v13931_v41 = vpop.eup %10820  ;;  %v3767_v37 = vmul.f32 %v10819_v57, %v16149_v29  ;;  %v3766_v47 = vmul.f32 %v10819_v57, %v16152_v63  ;;  %10846 = vpow2.f32 %v5072_v42  ;;  %v5068_v29 = vmul.f32 1.442695, %v5017_v6 }
 0x6c9   : > { %v10823_v13 = vpop.eup %10822  ;;  %10848 = vpow2.f32 %v5060_v32  ;;  %v5086_v42 = vmul.f32 1.442695, %v5026_v12  ;;  %v16158_v32 = vld [vmem:[#allocation128_spill] sm:$0xff] }
 0x6ca   : > { %v13943_v55 = vpop.eup %10824  ;;  %5095 = vadd.xlane.f32.xlu1 %v5094_v60  ;;  %v3769_v20 = vmul.f32 %v10823_v13, %v16150_v40  ;;  %v3768_v46 = vmul.f32 %v10823_v13, %v16153_v10  ;;  %v5027_v60 = vsub.f32 %v16154_v0, %v4994_v2  ;;  %v16155_v40 = vld [vmem:[#allocation113_spill] sm:$0xff]  ;;  %10850 = vpow2.f32 %v5078_v43  ;;  %v16157_v2 = vld [vmem:[#allocation127_spill] sm:$0xff] }
 0x6cb   : > { %v13948_v24 = vpop.eup %10826  ;;  %v5021_v35 = vsub.f32 %v16155_v40, %v4985_v27  ;;  %10852 = vpow2.f32 %v5080_v33  ;;  %v5106_v43 = vadd.f32 %v13943_v55, %v13931_v41  ;;  %v5082_v33 = vmul.f32 1.442695, %v5024_v11  ;;  %v16161_v11 = vld [vmem:[#allocation122_spill] sm:$0xff] }
 0x6cc   : > { %v13953_v17 = vpop.eup %10828  ;;  %v3785_v16 = vpack.c.bf16 %v3769_v20, %v3767_v37  ;;  %v3784_v25 = vpack.c.bf16 %v3768_v46, %v3766_v47  ;;  %10854 = vpow2.f32 %v5066_v53  ;;  %v5088_v27 = vmul.f32 1.442695, %v5027_v60  ;;  %v4997_v20 = vpop.xlane.xlu0 %4996 }
 0x6cd   : > { %v13958_v57 = vpop.eup %10830  ;;  %10856 = vpow2.f32 %v5068_v29  ;;  %v5025_v37 = vsub.f32 %v16159_v34, %v4991_v18  ;;  %v5029_v60 = vsub.f32 %v16161_v11, %v4997_v20  ;;  %v5103_v29 = vadd.f32 %v13953_v17, %v13948_v24  ;;  %v16166_v11 = vld [vmem:[#allocation126_spill] sm:$0xff] }
 0x6ce   : > { %3970 = vmatprep.mubr.bf16.mxu0 %v3785_v16  ;;  %5101 = vadd.xlane.f32.xlu1 %v5100_v59  ;;  %v13961_v13 = vpop.eup %10832  ;;  %v5076_v59 = vmul.f32 1.442695, %v5021_v35  ;;  %10858 = vpow2.f32 %v5074_v23  ;;  %v16160_v35 = vld [vmem:[#allocation121_spill] sm:$0xff] }
 0x6cf   : > { %v5648_v26 = vpop.xlane.xlu1 %5647  ;;  %3971 = vmatmul.mubr.bf16.gmra.mxu0 %v3784_v25  ;;  %v13966_v4 = vpop.eup %10834  ;;  %v5097_v25 = vadd.f32 %v13925_v45, %v13921_v54  ;;  %10860 = vpow2.f32 %v5086_v42  ;;  %v5028_v10 = vsub.f32 %v16160_v35, %v4997_v20  ;;  %v5112_v46 = vadd.f32 %v13961_v13, %v13958_v57 }
 0x6d0   : > { %4410 = vadd.xlane.f32.xlu0 %v4409_v22  ;;  %v5692_v44 = vsub.f32 %v16157_v2, %v5648_v26  ;;  %v5693_v6 = vsub.f32 %v16158_v32, %v5648_v26  ;;  %v13971_v22 = vpop.eup %10836  ;;  %10862 = vpow2.f32 %v5088_v27  ;;  %v5084_v0 = vmul.f32 1.442695, %v5025_v37  ;;  %v5645_v16 = vpop.xlane.xlu0 %5644  ;;  %v16162_v2 = vld [vmem:[#allocation123_spill] sm:$0xff] }
 0x6d1   : > { %v13973_v12 = vpop.eup %10838  ;;  %10864 = vpow2.f32 %v5076_v59  ;;  %v5090_v32 = vmul.f32 1.442695, %v5028_v10  ;;  %v5092_v34 = vmul.f32 1.442695, %v5029_v60  ;;  %v5109_v20 = vadd.f32 %v13971_v22, %v13966_v4  ;;  %v16165_v10 = vld [vmem:[#allocation125_spill] sm:$0xff] }
 0x6d2   : > { %5107 = vadd.xlane.f32.xlu1 %v5106_v43  ;;  %v5728_v63 = vmul.f32 1.442695, %v5692_v44  ;;  %v13975_v47 = vpop.eup %10840  ;;  %v5730_v18 = vmul.f32 1.442695, %v5693_v6  ;;  %10866 = vpow2.f32 %v5082_v33  ;;  %v5688_v44 = vsub.f32 %v16162_v2, %v13939_v58 }
 0x6d3   : > { %v13980_v53 = vpop.eup %10842  ;;  %v5118_v27 = vadd.f32 %v13975_v47, %v13973_v12  ;;  %v5691_v60 = vsub.f32 %v16166_v11, %v5645_v16 }
 0x6d4   : > { %5098 = vadd.xlane.f32.xlu0 %v5097_v25  ;;  %v13985_v26 = vpop.eup %10844  ;;  %10868 = vpow2.f32 %v5728_v63  ;;  %v5720_v63 = vmul.f32 1.442695, %v5688_v44 }
 0x6d5   : > { %10870 = vpow2.f32 %v5730_v18  ;;  %v13993_v59 = vpop.eup %10846  ;;  %v5690_v18 = vsub.f32 %v16165_v10, %v5645_v16 }
 0x6d6   : > { %5113 = vadd.xlane.f32.xlu1 %v5112_v46  ;;  %10872 = vpow2.f32 %v5084_v0  ;;  %v13999_v25 = vpop.eup %10848 }
 0x6d7   : > { %v5654_v40 = vpop.xlane.xlu1 %5653  ;;  %v14001_v33 = vpop.eup %10850 }
 0x6d8   : > { %v5696_v23 = vsub.f32 %v13606_v61, %v5654_v40  ;;  %v5697_v42 = vsub.f32 %v13608_v49, %v5654_v40  ;;  %5104 = vadd.xlane.f32.xlu0 %v5103_v29  ;;  %v16163_v61 = vld [vmem:[#allocation124_spill] sm:$0xff]  ;;  %v5651_v49 = vpop.xlane.xlu0 %5650  ;;  %16164 = vst [vmem:[#allocation80_spill] sm:$0xff] %v14001_v33  ;;  %v14003_v35 = vpop.eup %10852  ;;  %v5115_v40 = vadd.f32 %v13999_v25, %v13980_v53 }
 0x6d9   : > { %v5689_v37 = vsub.f32 %v16163_v61, %v13939_v58  ;;  %v5124_v58 = vadd.f32 %v13993_v59, %v13985_v26  ;;  %v14008_v46 = vpop.eup %10854 }
 0x6da   : > { %v5736_v6 = vmul.f32 1.442695, %v5696_v23  ;;  %v5738_v43 = vmul.f32 1.442695, %v5697_v42  ;;  %5119 = vadd.xlane.f32.xlu1 %v5118_v27  ;;  %v14013_v42 = vpop.eup %10856 }
 0x6db   : > { %v5722_v0 = vmul.f32 1.442695, %v5689_v37  ;;  %v14017_v27 = vpop.eup %10858 }
 0x6dc   : > { %10874 = vpow2.f32 %v5736_v6  ;;  %5110 = vadd.xlane.f32.xlu0 %v5109_v20  ;;  %v5657_v29 = vpop.xlane.xlu0 %5656  ;;  %v14021_v16 = vpop.eup %10860  ;;  %v5724_v6 = vmul.f32 1.442695, %v5690_v18  ;;  %v16169_v20 = vld [vmem:[#allocation129_spill] sm:$0xff]  ;;  %v16170_v18 = vld [vmem:[#allocation130_spill] sm:$0xff] }
 0x6dd   : > { %10876 = vpow2.f32 %v5738_v43  ;;  %16167 = vst [vmem:[#allocation71_spill] sm:$0xff] %v14021_v16  ;;  %v5694_v43 = vsub.f32 %v13598_v31, %v5651_v49  ;;  %v14024_v37 = vpop.eup %10862  ;;  %v5698_v31 = vsub.f32 %v16170_v18, %v5657_v29 }
 0x6de   : > { %10878 = vpow2.f32 %v5090_v32  ;;  %5125 = vadd.xlane.f32.xlu1 %v5124_v58  ;;  %v5130_v32 = vadd.f32 %v14003_v35, %v14001_v33  ;;  %16168 = vst [vmem:[#allocation55_spill] sm:$0xff] %v14024_v37  ;;  %v14029_v58 = vpop.eup %10864 }
 0x6df   : > { %10880 = vpow2.f32 %v5092_v34  ;;  %v5660_v23 = vpop.xlane.xlu1 %5659  ;;  %v14031_v11 = vpop.eup %10866 }
 0x6e0   : > { %v5700_v2 = vsub.f32 %v13622_v15, %v5660_v23  ;;  %v5701_v44 = vsub.f32 %v13624_v36, %v5660_v23  ;;  %10882 = vpow2.f32 %v5720_v63  ;;  %5116 = vadd.xlane.f32.xlu0 %v5115_v40  ;;  %v5726_v15 = vmul.f32 1.442695, %v5691_v60 }
 0x6e1   : > { %10884 = vpow2.f32 %v5722_v0  ;;  %v5695_v36 = vsub.f32 %v16169_v20, %v5651_v49  ;;  %v5121_v63 = vadd.f32 %v14013_v42, %v14008_v46  ;;  %v14034_v40 = vpop.eup %10868  ;;  %v5732_v0 = vmul.f32 1.442695, %v5694_v43 }
 0x6e2   : > { %v5744_v34 = vmul.f32 1.442695, %v5700_v2  ;;  %v5746_v61 = vmul.f32 1.442695, %v5701_v44  ;;  %5131 = vadd.xlane.f32.xlu1 %v5130_v32  ;;  %16171 = vst [vmem:[#allocation56_spill] sm:$0xff] %v14034_v40  ;;  %v5136_v49 = vadd.f32 %v14024_v37, %v14021_v16  ;;  %v14038_v60 = vpop.eup %10870  ;;  %v16173_v2 = vld [vmem:[#allocation131_spill] sm:$0xff]  ;;  %v5127_v32 = vadd.f32 %v14029_v58, %v14017_v27 }
 0x6e3   : > { %v5663_v10 = vpop.xlane.xlu0 %5662  ;;  %16172 = vst [vmem:[#allocation86_spill] sm:$0xff] %v14038_v60  ;;  %v5734_v23 = vmul.f32 1.442695, %v5695_v36  ;;  %v5699_v44 = vsub.f32 %v16173_v2, %v5657_v29  ;;  %v14043_v20 = vpop.eup %10872  ;;  %v16178_v2 = vld [vmem:[#allocation133_spill] sm:$0xff] }
 0x6e4   : > { %10886 = vpow2.f32 %v5744_v34  ;;  %5122 = vadd.xlane.f32.xlu0 %v5121_v63  ;;  %v16176_v63 = vld [vmem:[#allocation132_spill] sm:$0xff]  ;;  %v5703_v16 = vsub.f32 %v16178_v2, %v5663_v10 }
 0x6e5   : > { %10888 = vpow2.f32 %v5746_v61  ;;  %v5702_v18 = vsub.f32 %v16176_v63, %v5663_v10  ;;  %v5742_v36 = vmul.f32 1.442695, %v5699_v44 }
 0x6e6   : > { %10890 = vpow2.f32 %v5724_v6  ;;  %5137 = vadd.xlane.f32.xlu1 %v5136_v49  ;;  %v5740_v6 = vmul.f32 1.442695, %v5698_v31  ;;  %v5133_v49 = vadd.f32 %v14043_v20, %v14031_v11 }
 0x6e7   : > { %10892 = vpow2.f32 %v5726_v15  ;;  %v4366_v34 = vpop.xlane.xlu0 %4365  ;;  %v5790_v15 = vadd.f32 %v14038_v60, %v14034_v40  ;;  %v5748_v63 = vmul.f32 1.442695, %v5702_v18 }
 0x6e8   : > { %5128 = vadd.xlane.f32.xlu0 %v5127_v32  ;;  %10894 = vpow2.f32 %v5732_v0 }
 0x6e9   : > { %v14045_v61 = vpop.eup %10874  ;;  %10896 = vpow2.f32 %v5734_v23  ;;  %v5750_v23 = vmul.f32 1.442695, %v5703_v16 }
 0x6ea   : > { %16174 = vst [vmem:[#allocation57_spill] sm:$0xff] %v14045_v61  ;;  %v14047_v43 = vpop.eup %10876  ;;  %10898 = vrcp.f32 %v4366_v34  ;;  %5791 = vadd.xlane.f32.xlu1 %v5790_v15 }
 0x6eb   : > { %16175 = vst [vmem:[#allocation85_spill] sm:$0xff] %v14047_v43  ;;  %v14052_v29 = vpop.eup %10878  ;;  %v4369_v37 = vpop.xlane.xlu0 %4368  ;;  %v5796_v0 = vadd.f32 %v14047_v43, %v14045_v61  ;;  %10900 = vpow2.f32 %v5740_v6 }
 0x6ec   : > { %16177 = vst [vmem:[#allocation72_spill] sm:$0xff] %v14052_v29  ;;  %v14057_v31 = vpop.eup %10880  ;;  %5134 = vadd.xlane.f32.xlu0 %v5133_v49  ;;  %10902 = vrcp.f32 %v4369_v37 }
 0x6ed   : > { %v14061_v32 = vpop.eup %10882  ;;  %10904 = vpow2.f32 %v5742_v36  ;;  %v5139_v10 = vadd.f32 %v14057_v31, %v14052_v29 }
 0x6ee   : > { %16179 = vst [vmem:[#allocation58_spill] sm:$0xff] %v14061_v32  ;;  %v14067_v2 = vpop.eup %10884  ;;  %5797 = vadd.xlane.f32.xlu1 %v5796_v0  ;;  %10906 = vpow2.f32 %v5748_v63 }
 0x6ef   : > { %v14065_v44 = vpop.xlane.xlu0 %5668  ;;  %16180 = vst [vmem:[#allocation87_spill] sm:$0xff] %v14067_v2  ;;  %10908 = vpow2.f32 %v5750_v23  ;;  %v5784_v16 = vadd.f32 %v14067_v2, %v14061_v32  ;;  %v16190_v32 = vld [vmem:[#allocation134_spill] sm:$0xff] }
 0x6f0   : > { %5140 = vadd.xlane.f32.xlu0 %v5139_v10 }
 0x6f1   : > { %v14069_v34 = vpop.eup %10886 }
 0x6f2   : > { %16181 = vst [vmem:[#allocation59_spill] sm:$0xff] %v14069_v34  ;;  %v14071_v15 = vpop.eup %10888 }
 0x6f3   : > { %16182 = vst [vmem:[#allocation60_spill] sm:$0xff] %v14071_v15  ;;  %v14073_v6 = vpop.eup %10890  ;;  %v4372_v37 = vpop.xlane.xlu0 %4371  ;;  %v5802_v18 = vadd.f32 %v14071_v15, %v14069_v34  ;;  %v16189_v15 = vld [vmem:[#allocation136_spill] sm:$0xff] }
 0x6f4   : > { %16183 = vst [vmem:[#allocation88_spill] sm:$0xff] %v14073_v6  ;;  %v14079_v36 = vpop.eup %10892  ;;  %5785 = vadd.xlane.f32.xlu0 %v5784_v16  ;;  %10910 = vrcp.f32 %v4372_v37 }
 0x6f5   : > { %16184 = vst [vmem:[#allocation83_spill] sm:$0xff] %v14079_v36  ;;  %5803 = vadd.xlane.f32.xlu1 %v5802_v18  ;;  %v14081_v49 = vpop.eup %10894  ;;  %v5787_v0 = vadd.f32 %v14079_v36, %v14073_v6 }
 0x6f6   : > { %16185 = vst [vmem:[#allocation84_spill] sm:$0xff] %v14081_v49  ;;  %v14085_v10 = vpop.eup %10896 }
 0x6f7   : > { %v4375_v63 = vpop.xlane.xlu0 %4374  ;;  %16186 = vst [vmem:[#allocation73_spill] sm:$0xff] %v14085_v10  ;;  %v10899_v23 = vpop.eup %10898  ;;  %v5793_v34 = vadd.f32 %v14085_v10, %v14081_v49 }
 0x6f8   : > { %5788 = vadd.xlane.f32.xlu0 %v5787_v0  ;;  %10912 = vrcp.f32 %v4375_v63  ;;  %v14087_v61 = vpop.eup %10900  ;;  %v4429_v40 = vmul.f32 %v10899_v23, %v16189_v15  ;;  %v4428_v37 = vmul.f32 %v10899_v23, %v16190_v32  ;;  %v14105_v15 = vpop.xlane.xlu1 %5665  ;;  %v14107_v32 = vld [vmem:[#allocation4 + $0x84] ss:$8 sps:$4 sm:$0xff]  }
 0x6f9   : > { %16187 = vst [vmem:[#allocation61_spill] sm:$0xff] %v14087_v61  ;;  %v10903_v43 = vpop.eup %10902 }
 0x6fa   : > { %v14093_v18 = vpop.eup %10904  ;;  %v4431_v60 = vmul.f32 %v10903_v43, %v13654_v3  ;;  %v4430_v0 = vmul.f32 %v10903_v43, %v13650_v14  ;;  %v11195_v3 = vld [vmem:[#allocation4 + $0x74] ss:$8 sps:$4 sm:$0xff]  }
 0x6fb   : > { %v14091_v16 = vpop.xlane.xlu0 %5674  ;;  %16188 = vst [vmem:[#allocation91_spill] sm:$0xff] %v14093_v18  ;;  %v14099_v6 = vpop.eup %10906  ;;  %v5799_v2 = vadd.f32 %v14093_v18, %v14087_v61  ;;  %v11201_v18 = vld [vmem:[#allocation4 + $0x44] ss:$8 sps:$4 sm:$0xff]  }
 0x6fc   : > { %5794 = vadd.xlane.f32.xlu0 %v5793_v34  ;;  %v4461_v63 = vpack.c.bf16 %v4431_v60, %v4429_v40  ;;  %16191 = vst [vmem:[#allocation92_spill] sm:$0xff] %v14099_v6  ;;  %v4460_v49 = vpack.c.bf16 %v4430_v0, %v4428_v37  ;;  %v14103_v36 = vpop.eup %10908  ;;  %v11196_v40 = vld [vmem:[#allocation4 + $0xe4] ss:$8 sps:$4 sm:$0xff]   ;;  %v14111_v23 = vpop.xlane.xlu1 %5671 }
 0x6fd   : > { %16192 = vst [vmem:[#allocation89_spill] sm:$0xff] %v14103_v36  ;;  %v5805_v14 = vadd.f32 %v14103_v36, %v14099_v6  ;;  %v11199_v36 = vld [vmem:[#allocation4 + $0x54] ss:$8 sps:$4 sm:$0xff]  }
 0x6fe   : > { %4556 = vmatprep.mubr.bf16.mxu0 %v4461_v63 }
 0x6ff   : > { %v4378_v10 = vpop.xlane.xlu0 %4377  ;;  %4557 = vmatmul.mubr.bf16.vlgmr.msra.gmra.mxu0 %v4460_v49  ;;  %v14115_v49 = vld [vmem:[#allocation4 + $0x4] ss:$8 sps:$4 sm:$0xff]  }
 0x700   : > { %5800 = vadd.xlane.f32.xlu0 %v5799_v2  ;;  %9663 = vmatpush3.bf16.msra.mxu0 %v11195_v3  ;;  %10914 = vrcp.f32 %v4378_v10  ;;  %v11197_v2 = vld [vmem:[#allocation4 + $0x64] ss:$8 sps:$4 sm:$0xff]   ;;  %v11198_v10 = vld [vmem:[#allocation4 + $0xd4] ss:$8 sps:$4 sm:$0xff]  }
 0x701   : > { %9664 = vmatprep.subr.bf16.mxu0 %v11196_v40  ;;  %v10911_v43 = vpop.eup %10910  ;;  %v16193_v3 = vld [vmem:[#allocation142_spill] sm:$0xff] }
 0x702   : > { %v4433_v0 = vmul.f32 %v10911_v43, %v13672_v28 }
 0x703   : > { %v4381_v60 = vpop.xlane.xlu0 %4380 }
 0x704   : > { %10916 = vrcp.f32 %v4381_v60  ;;  %5806 = vadd.xlane.f32.xlu0 %v5805_v14  ;;  %9665 = vmatpush3.bf16.msra.mxu0 %v11197_v2  ;;  %v4432_v14 = vmul.f32 %v10911_v43, %v16193_v3  ;;  %v5678_v2 = vpop.xlane.xlu1 %5677  ;;  %v11203_v3 = vld [vmem:[#allocation4 + $0x34] ss:$8 sps:$4 sm:$0xff]  }
 0x705   : > { %v10913_v34 = vpop.eup %10912  ;;  %9666 = vmatprep.subr.bf16.mxu0 %v11198_v10  ;;  %v11200_v10 = vld [vmem:[#allocation4 + $0xc4] ss:$8 sps:$4 sm:$0xff]  }
 0x706   : > { %5912 = vrot.lane.b32.xlu1 %v14107_v32, %s11565_s9  ;;  %v4435_v63 = vmul.f32 %v10913_v34, %v13686_v50  ;;  %v4434_v40 = vmul.f32 %v10913_v34, %v13680_v21  ;;  %v16194_v21 = vld [vmem:[#allocation138_spill] sm:$0xff] }
 0x707   : > { %v14117_v37 = vpop.xlane.xlu0 %5680  ;;  %v5706_v43 = vsub.f32 %v16194_v21, %v14065_v44  ;;  %v11202_v34 = vld [vmem:[#allocation4 + $0xb4] ss:$8 sps:$4 sm:$0xff]   ;;  %v11204_v21 = vld [vmem:[#allocation4 + $0xa4] ss:$8 sps:$4 sm:$0xff]  }
 0x708   : > { %v4463_v60 = vpack.c.bf16 %v4435_v63, %v4433_v0  ;;  %v4462_v6 = vpack.c.bf16 %v4434_v40, %v4432_v14  ;;  %9667 = vmatpush3.bf16.msra.mxu0 %v11199_v36  ;;  %v5684_v28 = vpop.xlane.xlu1 %5683 }
 0x709   : > { %9668 = vmatprep.subr.bf16.mxu0 %v11200_v10  ;;  %v5756_v10 = vmul.f32 1.442695, %v5706_v43  ;;  %v5716_v43 = vsub.f32 %v13710_v19, %v5684_v28 }
 0x70a   : > { %5896 = vrot.lane.b32.xlu1 %v14115_v49, %s11565_s9  ;;  %4564 = vmatprep.mubr.bf16.mxu0 %v4463_v60 }
 0x70b   : > { %v4384_v61 = vpop.xlane.xlu0 %4383  ;;  %4565 = vmatmul.mubr.bf16.gmra.mxu0 %v4462_v6  ;;  %v5776_v19 = vmul.f32 1.442695, %v5716_v43 }
 0x70c   : > { %9669 = vmatpush3.bf16.msra.mxu0 %v11201_v18  ;;  %10918 = vrcp.f32 %v4384_v61  ;;  %v4390_v63 = vpop.xlane.xlu1 %4389  ;;  %v16195_v18 = vld [vmem:[#allocation139_spill] sm:$0xff] }
 0x70d   : > { %v10915_v50 = vpop.eup %10914  ;;  %9670 = vmatprep.subr.bf16.mxu0 %v11202_v34  ;;  %v5707_v60 = vsub.f32 %v16195_v18, %v14065_v44  ;;  %v16196_v44 = vld [vmem:[#allocation145_spill] sm:$0xff] }
 0x70e   : > { %v4437_v14 = vmul.f32 %v10915_v50, %v13708_v9  ;;  %v4436_v40 = vmul.f32 %v10915_v50, %v13702_v7  ;;  %v10409_v9 = vld [vmem:[#allocation4 + $0x14] ss:$8 sps:$4 sm:$0xff]   ;;  %v5712_v7 = vsub.f32 %v13688_v1, %v5678_v2  ;;  %v5713_v50 = vsub.f32 %v16196_v44, %v5678_v2 }
 0x70f   : > { %v4387_v0 = vpop.xlane.xlu0 %4386  ;;  %v16197_v2 = vld [vmem:[#allocation135_spill] sm:$0xff] }
 0x710   : > { %10920 = vrcp.f32 %v4387_v0  ;;  %9671 = vmatpush3.bf16.msra.mxu0 %v11203_v3  ;;  %v4396_v33 = vpop.xlane.xlu1 %4395  ;;  %v5770_v3 = vmul.f32 1.442695, %v5713_v50 }
 0x711   : > { %v10917_v36 = vpop.eup %10916  ;;  %9672 = vmatprep.subr.bf16.mxu0 %v11204_v21  ;;  %10922 = vpow2.f32 %v5756_v10 }
 0x712   : > { %v4439_v6 = vmul.f32 %v10917_v36, %v13720_v48  ;;  %v4438_v61 = vmul.f32 %v10917_v36, %v13714_v5  ;;  %v5758_v48 = vmul.f32 1.442695, %v5707_v60  ;;  %10924 = vrcp.f32 %v4390_v63 }
 0x713   : > { %v14133_v34 = vpop.xlane.xlu0 %5686  ;;  %10926 = vrcp.f32 %v4396_v33  ;;  %v5704_v63 = vsub.f32 %v16197_v2, %v14105_v15  ;;  %v16206_v2 = vld [vmem:[#allocation156_spill] sm:$0xff] }
 0x714   : > { %v4465_v0 = vpack.c.bf16 %v4439_v6, %v4437_v14  ;;  %v4464_v29 = vpack.c.bf16 %v4438_v61, %v4436_v40  ;;  %9673 = vmatpush3.bf16.msra.mxu0 %v13828_v38  ;;  %v5768_v38 = vmul.f32 1.442695, %v5712_v7  ;;  %v16198_v40 = vld [vmem:[#allocation150_spill] sm:$0xff]  ;;  %v16199_v61 = vld [vmem:[#allocation137_spill] sm:$0xff] }
 0x715   : > { %9674 = vmatprep.subr.bf16.mxu0 %v13852_v56  ;;  %v5717_v56 = vsub.f32 %v13716_v30, %v5684_v28  ;;  %v5705_v18 = vsub.f32 %v16199_v61, %v14105_v15  ;;  %v16200_v30 = vld [vmem:[#allocation63_spill] sm:$0xff] }
 0x716   : > { %4572 = vmatprep.mubr.bf16.mxu0 %v4465_v0  ;;  %v4402_v60 = vpop.xlane.xlu1 %4401  ;;  %v5752_v0 = vmul.f32 1.442695, %v5704_v63 }
 0x717   : > { %4573 = vmatmul.mubr.bf16.gmra.mxu0 %v4464_v29  ;;  %v4393_v5 = vpop.xlane.xlu0 %4392  ;;  %v5778_v28 = vmul.f32 1.442695, %v5717_v56  ;;  %v16205_v56 = vld [vmem:[#allocation149_spill] sm:$0xff] }
 0x718   : > { %9675 = vmatpush3.bf16.msra.mxu0 %v10409_v9  ;;  %10928 = vrcp.f32 %v4393_v5 }
 0x719   : > { %v10919_v36 = vpop.eup %10918  ;;  %10930 = vpow2.f32 %v5758_v48  ;;  %9676 = vmatprep.subr.bf16.mxu0 %v14107_v32 }
 0x71a   : > { %5898 = vrot.lane.b32.xlu0 %v10409_v9, %s11565_s9  ;;  %v4441_v33 = vmul.f32 %v10919_v36, %v13740_v62  ;;  %v4440_v6 = vmul.f32 %v10919_v36, %v13736_v8  ;;  %v5754_v8 = vmul.f32 1.442695, %v5705_v18  ;;  %v16203_v36 = vld [vmem:[#allocation143_spill] sm:$0xff] }
 0x71b   : > { %v4399_v1 = vpop.xlane.xlu0 %4398 }
 0x71c   : > { %10932 = vrcp.f32 %v4399_v1  ;;  %9677 = vmatpush3.bf16.msra.mxu0 %v14115_v49  ;;  %v16201_v49 = vld [vmem:[#allocation140_spill] sm:$0xff] }
 0x71d   : > { %v10921_v29 = vpop.eup %10920  ;;  %10934 = vpow2.f32 %v5768_v38  ;;  %9758 = vmatprep.subr.bf16.mxu0 %v16200_v30  ;;  %v5708_v62 = vsub.f32 %v16201_v49, %v14111_v23  ;;  %v5710_v38 = vsub.f32 %v16203_v36, %v14091_v16  ;;  %v16204_v1 = vld [vmem:[#allocation144_spill] sm:$0xff]  ;;  %v16215_v36 = vld [vmem:[#allocation159_spill] sm:$0xff] }
 0x71e   : > { %v4443_v14 = vmul.f32 %v10921_v29, %v13744_v51  ;;  %v4442_v32 = vmul.f32 %v10921_v29, %v16198_v40  ;;  %10936 = vpow2.f32 %v5770_v3  ;;  %v16202_v51 = vld [vmem:[#allocation141_spill] sm:$0xff]  ;;  %v14157_v15 = vpop.eup %10922 }
 0x71f   : > { %10938 = vpow2.f32 %v5776_v19  ;;  %v5709_v9 = vsub.f32 %v16202_v51, %v14111_v23  ;;  %v10925_v7 = vpop.eup %10924  ;;  %v5760_v5 = vmul.f32 1.442695, %v5708_v62  ;;  %v5711_v23 = vsub.f32 %v16204_v1, %v14091_v16  ;;  %v16207_v19 = vld [vmem:[#allocation148_spill] sm:$0xff] }
 0x720   : > { %v4467_v10 = vpack.c.bf16 %v4443_v14, %v4441_v33  ;;  %v4466_v21 = vpack.c.bf16 %v4442_v32, %v4440_v6  ;;  %10940 = vrcp.f32 %v4402_v60  ;;  %v10927_v44 = vpop.eup %10926  ;;  %v4445_v29 = vmul.f32 %v10925_v7, %v16205_v56  ;;  %v16208_v14 = vld [vmem:[#allocation155_spill] sm:$0xff]  ;;  %v16209_v32 = vld [vmem:[#allocation146_spill] sm:$0xff]  ;;  %v16211_v16 = vld [vmem:[#allocation160_spill] sm:$0xff] }
 0x721   : > { %10942 = vpow2.f32 %v5778_v28  ;;  %v5762_v43 = vmul.f32 1.442695, %v5709_v9  ;;  %v4444_v33 = vmul.f32 %v10925_v7, %v16207_v19  ;;  %v5714_v61 = vsub.f32 %v16209_v32, %v14117_v37  ;;  %v16210_v28 = vld [vmem:[#allocation153_spill] sm:$0xff]  ;;  %v16218_v32 = vld [vmem:[#allocation158_spill] sm:$0xff] }
 0x722   : > { %4580 = vmatprep.mubr.bf16.mxu0 %v4467_v10  ;;  %v4449_v60 = vmul.f32 %v10927_v44, %v16210_v28  ;;  %v5766_v62 = vmul.f32 1.442695, %v5711_v23  ;;  %v16216_v23 = vld [vmem:[#allocation154_spill] sm:$0xff] }
 0x723   : > { %4581 = vmatmul.mubr.bf16.gmra.mxu0 %v4466_v21  ;;  %v5764_v21 = vmul.f32 1.442695, %v5710_v38  ;;  %v5772_v7 = vmul.f32 1.442695, %v5714_v61  ;;  %v5719_v56 = vsub.f32 %v16216_v23, %v14133_v34 }
 0x724   : > { %v4405_v48 = vpop.xlane.xlu0 %4404 }
 0x725   : > { %10944 = vrcp.f32 %v4405_v48  ;;  %v10929_v50 = vpop.eup %10928 }
 0x726   : > { %10946 = vpow2.f32 %v5752_v0  ;;  %v14163_v3 = vpop.eup %10930  ;;  %v4447_v63 = vmul.f32 %v10929_v50, %v16206_v2  ;;  %v4446_v6 = vmul.f32 %v10929_v50, %v16208_v14  ;;  %v16212_v0 = vld [vmem:[#allocation147_spill] sm:$0xff] }
 0x727   : > { %10948 = vpow2.f32 %v5754_v8  ;;  %v5715_v8 = vsub.f32 %v16212_v0, %v14117_v37  ;;  %v5811_v51 = vadd.f32 %v14163_v3, %v14157_v15  ;;  %v16214_v50 = vld [vmem:[#allocation151_spill] sm:$0xff] }
 0x728   : > { %10950 = vpow2.f32 %v5760_v5  ;;  %v4469_v18 = vpack.c.bf16 %v4447_v63, %v4445_v29  ;;  %v4468_v30 = vpack.c.bf16 %v4446_v6, %v4444_v33  ;;  %v16217_v63 = vld [vmem:[#allocation152_spill] sm:$0xff] }
 0x729   : > { %v10933_v40 = vpop.eup %10932  ;;  %10952 = vpow2.f32 %v5762_v43  ;;  %v5718_v43 = vsub.f32 %v16214_v50, %v14133_v34  ;;  %v5774_v1 = vmul.f32 1.442695, %v5715_v8  ;;  %v4448_v19 = vmul.f32 %v10927_v44, %v16217_v63  ;;  %v16221_v8 = vld [vmem:[#allocation157_spill] sm:$0xff]  ;;  %v4408_v63 = vpop.xlane.xlu1 %4407 }
 0x72a   : > { %v4451_v10 = vmul.f32 %v10933_v40, %v16211_v16  ;;  %v14173_v49 = vpop.eup %10934  ;;  %4588 = vmatprep.mubr.bf16.mxu0 %v4469_v18  ;;  %10954 = vpow2.f32 %v5764_v21  ;;  %v4450_v38 = vmul.f32 %v10933_v40, %v16215_v36  ;;  %v16219_v18 = vld [vmem:[#allocation70_spill] sm:$0xff]  ;;  %v5782_v34 = vmul.f32 1.442695, %v5719_v56 }
 0x72b   : > { %v14179_v48 = vpop.eup %10936  ;;  %4589 = vmatmul.mubr.bf16.gmra.mxu0 %v4468_v30  ;;  %10956 = vpow2.f32 %v5766_v62  ;;  %v5780_v6 = vmul.f32 1.442695, %v5718_v43 }
 0x72c   : > { %v4471_v9 = vpack.c.bf16 %v4451_v10, %v4449_v60  ;;  %v14181_v5 = vpop.eup %10938  ;;  %v5820_v29 = vadd.f32 %v14179_v48, %v14173_v49  ;;  %10958 = vpow2.f32 %v5772_v7  ;;  %v4470_v40 = vpack.c.bf16 %v4450_v38, %v4448_v19  ;;  %v16220_v10 = vld [vmem:[#allocation82_spill] sm:$0xff] }
 0x72d   : > { %16213 = vst [vmem:[#allocation62_spill] sm:$0xff] %v14181_v5  ;;  %v10941_v37 = vpop.eup %10940  ;;  %10960 = vpow2.f32 %v5774_v1  ;;  %v14229_v19 = vpop.permute.xlu1 %5900 }
 0x72e   : > { %5812 = vadd.xlane.f32.xlu1 %v5811_v51  ;;  %4596 = vmatprep.mubr.bf16.mxu0 %v4471_v9  ;;  %v14190_v2 = vpop.eup %10942  ;;  %v4453_v61 = vmul.f32 %v10941_v37, %v16218_v32  ;;  %10962 = vpow2.f32 %v5780_v6  ;;  %v4452_v51 = vmul.f32 %v10941_v37, %v16221_v8 }
 0x72f   : > { %v5826_v60 = vadd.f32 %v14190_v2, %v14181_v5  ;;  %10964 = vpow2.f32 %v5782_v34 }
 0x730   : > { %10966 = vrcp.f32 %v4408_v63 }
 0x732   : > { %v10945_v33 = vpop.eup %10944  ;;  %5821 = vadd.xlane.f32.xlu1 %v5820_v29 }
 0x733   : > { %v14193_v14 = vpop.eup %10946  ;;  %v4455_v30 = vmul.f32 %v10945_v33, %v16219_v18  ;;  %4597 = vmatmul.mubr.bf16.gmra.mxu0 %v4470_v40  ;;  %v4454_v21 = vmul.f32 %v10945_v33, %v16220_v10  ;;  %v14231_v40 = vpop.permute.xlu0 %5914 }
 0x734   : > { %v14197_v28 = vpop.eup %10948 }
 0x735   : > { %v4473_v44 = vpack.c.bf16 %v4455_v30, %v4453_v61  ;;  %v14201_v16 = vpop.eup %10950  ;;  %v5808_v0 = vadd.f32 %v14197_v28, %v14193_v14  ;;  %v4472_v9 = vpack.c.bf16 %v4454_v21, %v4452_v51 }
 0x736   : > { %5827 = vadd.xlane.f32.xlu1 %v5826_v60  ;;  %v14204_v62 = vpop.eup %10952 }
 0x737   : > { %4604 = vmatprep.mubr.bf16.mxu0 %v4473_v44  ;;  %v14209_v7 = vpop.eup %10954  ;;  %v5814_v50 = vadd.f32 %v14204_v62, %v14201_v16 }
 0x738   : > { %v14213_v43 = vpop.eup %10956 }
 0x739   : > { %5809 = vadd.xlane.f32.xlu0 %v5808_v0  ;;  %v14215_v36 = vpop.eup %10958  ;;  %v5817_v38 = vadd.f32 %v14213_v43, %v14209_v7 }
 0x73a   : > { %v14219_v1 = vpop.eup %10960 }
 0x73b   : > { %4605 = vmatmul.mubr.bf16.gmra.mxu0 %v4472_v9  ;;  %v14221_v37 = vpop.eup %10962  ;;  %v5823_v23 = vadd.f32 %v14219_v1, %v14215_v36 }
 0x73c   : > { %v14225_v56 = vpop.eup %10964 }
 0x73d   : > { %5815 = vadd.xlane.f32.xlu0 %v5814_v50  ;;  %v5829_v29 = vadd.f32 %v14225_v56, %v14221_v37 }
 0x741   : > { %5818 = vadd.xlane.f32.xlu0 %v5817_v38  ;;  %v10967_v38 = vpop.eup %10966 }
 0x745   : > { %5824 = vadd.xlane.f32.xlu0 %v5823_v23 }
 0x749   : > { %5830 = vadd.xlane.f32.xlu0 %v5829_v29 }
 0x753   : > { %v5096_v33 = vpop.xlane.xlu1 %5095 }
 0x755   : > { %v9486_v6 = vpop.f32.mrf.mxu0 }
 0x757   : > { %v9487_v32 = vpop.f32.mrf.mxu0  ;;  %v5102_v18 = vpop.xlane.xlu1 %5101 }
 0x758   : > { %v14233_v61 = vadd.f32 %v9487_v32, %v9486_v6 }
 0x759   : > { %v14235_v30 = vpop.f32.mrf.mxu0  ;;  %v4411_v34 = vpop.xlane.xlu0 %4410 }
 0x75a   : > { %16222 = vst [vmem:[#allocation94_spill] sm:$0xff] %v14233_v61  ;;  %16223 = vst [vmem:[#allocation90_spill] sm:$0xff] %v14235_v30  ;;  %10968 = vrcp.f32 %v4411_v34 }
 0x75b   : > { %v14237_v60 = vpop.f32.mrf.mxu0  ;;  %10970 = vrcp.f32 %v5096_v33  ;;  %v5108_v44 = vpop.xlane.xlu1 %5107  ;;  %v16228_v33 = vld [vmem:[#allocation78_spill] sm:$0xff] }
 0x75c   : > { %16224 = vst [vmem:[#allocation93_spill] sm:$0xff] %v14237_v60  ;;  %v4457_v32 = vmul.f32 %v10967_v38, %v16228_v33 }
 0x75d   : > { %v5099_v10 = vpop.xlane.xlu0 %5098 }
 0x75e   : > { %10972 = vrcp.f32 %v5099_v10 }
 0x75f   : > { %v9492_v21 = vpop.f32.mrf.mxu0  ;;  %10974 = vrcp.f32 %v5102_v18  ;;  %v5114_v50 = vpop.xlane.xlu1 %5113  ;;  %v16229_v18 = vld [vmem:[#allocation79_spill] sm:$0xff] }
 0x761   : > { %v9493_v0 = vpop.f32.mrf.mxu0  ;;  %v5105_v51 = vpop.xlane.xlu0 %5104 }
 0x762   : > { %v14239_v8 = vadd.f32 %v9493_v0, %v9492_v21  ;;  %10976 = vrcp.f32 %v5105_v51  ;;  %v4456_v21 = vmul.f32 %v10967_v38, %v16229_v18 }
 0x763   : > { %v14241_v9 = vpop.f32.mrf.mxu0 }
 0x764   : > { %16225 = vst [vmem:[#allocation95_spill] sm:$0xff] %v14239_v8  ;;  %16226 = vst [vmem:[#allocation96_spill] sm:$0xff] %v14241_v9  ;;  %v5120_v8 = vpop.xlane.xlu1 %5119 }
 0x765   : > { %v14243_v23 = vpop.f32.mrf.mxu0  ;;  %v5111_v29 = vpop.xlane.xlu0 %5110 }
 0x766   : > { %16227 = vst [vmem:[#allocation99_spill] sm:$0xff] %v14243_v23  ;;  %10978 = vrcp.f32 %v5111_v29  ;;  %v16233_v29 = vld [vmem:[#allocation53_spill] sm:$0xff] }
 0x767   : > { %v9498_v63 = vpop.f32.mrf.mxu0  ;;  %v10969_v6 = vpop.eup %10968  ;;  %10980 = vrcp.f32 %v5108_v44 }
 0x768   : > { %v4459_v10 = vmul.f32 %v10969_v6, %v13914_v52  ;;  %v4458_v0 = vmul.f32 %v10969_v6, %v13908_v39  ;;  %v10971_v51 = vpop.eup %10970 }
 0x769   : > { %v9499_v34 = vpop.f32.mrf.mxu0  ;;  %v5117_v61 = vpop.xlane.xlu0 %5116  ;;  %v5159_v52 = vmul.f32 %v10971_v51, %v16233_v29 }
 0x76a   : > { %v14249_v9 = vadd.f32 %v9499_v34, %v9498_v63  ;;  %v4475_v60 = vpack.c.bf16 %v4459_v10, %v4457_v32  ;;  %v4474_v30 = vpack.c.bf16 %v4458_v0, %v4456_v21  ;;  %10982 = vrcp.f32 %v5117_v61  ;;  %v16234_v0 = vld [vmem:[#allocation52_spill] sm:$0xff] }
 0x76b   : > { %v14251_v23 = vpop.f32.mrf.mxu0  ;;  %v10973_v5 = vpop.eup %10972  ;;  %v5158_v29 = vmul.f32 %v10971_v51, %v16234_v0  ;;  %10984 = vrcp.f32 %v5114_v50  ;;  %v16237_v51 = vld [vmem:[#allocation64_spill] sm:$0xff] }
 0x76c   : > { %16230 = vst [vmem:[#allocation97_spill] sm:$0xff] %v14249_v9  ;;  %16231 = vst [vmem:[#allocation98_spill] sm:$0xff] %v14251_v23  ;;  %4612 = vmatprep.mubr.bf16.mxu0 %v4475_v60  ;;  %v5161_v38 = vmul.f32 %v10973_v5, %v13925_v45  ;;  %v10975_v6 = vpop.eup %10974  ;;  %v5126_v9 = vpop.xlane.xlu1 %5125  ;;  %v5160_v44 = vmul.f32 %v10973_v5, %v13921_v54 }
 0x76d   : > { %v14253_v33 = vpop.f32.mrf.mxu0  ;;  %4613 = vmatmul.mubr.bf16.gmra.mxu0 %v4474_v30  ;;  %v5123_v39 = vpop.xlane.xlu0 %5122  ;;  %v16235_v30 = vld [vmem:[#allocation54_spill] sm:$0xff] }
 0x76e   : > { %16232 = vst [vmem:[#allocation104_spill] sm:$0xff] %v14253_v33  ;;  %v5191_v63 = vpack.c.bf16 %v5161_v38, %v5159_v52  ;;  %v5163_v33 = vmul.f32 %v10975_v6, %v16235_v30  ;;  %v5190_v52 = vpack.c.bf16 %v5160_v44, %v5158_v29  ;;  %10986 = vrcp.f32 %v5123_v39  ;;  %v16239_v30 = vld [vmem:[#allocation65_spill] sm:$0xff] }
 0x76f   : > { %v9504_v18 = vpop.f32.mrf.mxu0  ;;  %v10977_v34 = vpop.eup %10976  ;;  %10988 = vrcp.f32 %v5120_v8 }
 0x770   : > { %5334 = vmatprep.mubr.bf16.mxu0 %v5191_v63  ;;  %v5165_v10 = vmul.f32 %v10977_v34, %v13953_v17  ;;  %v14267_v5 = vpop.xlane.xlu1 %5131  ;;  %v16236_v17 = vld [vmem:[#allocation74_spill] sm:$0xff]  ;;  %v5164_v50 = vmul.f32 %v10977_v34, %v13948_v24 }
 0x771   : > { %v9505_v32 = vpop.f32.mrf.mxu0  ;;  %v5129_v60 = vpop.xlane.xlu0 %5128  ;;  %v16240_v24 = vld [vmem:[#allocation66_spill] sm:$0xff] }
 0x772   : > { %v14259_v21 = vadd.f32 %v9505_v32, %v9504_v18  ;;  %v5193_v23 = vpack.c.bf16 %v5165_v10, %v5163_v33  ;;  %v16238_v10 = vld [vmem:[#allocation81_spill] sm:$0xff]  ;;  %10990 = vrcp.f32 %v5129_v60 }
 0x773   : > { %v14262_v45 = vpop.f32.mrf.mxu0  ;;  %v10979_v54 = vpop.eup %10978  ;;  %v5162_v29 = vmul.f32 %v10975_v6, %v16238_v10  ;;  %v16241_v6 = vld [vmem:[#allocation75_spill] sm:$0xff]  ;;  %10992 = vrcp.f32 %v5126_v9 }
 0x774   : > { %v10981_v63 = vpop.eup %10980  ;;  %v5169_v44 = vmul.f32 %v10979_v54, %v13971_v22  ;;  %v16242_v10 = vld [vmem:[#allocation67_spill] sm:$0xff] }
 0x775   : > { %v14265_v38 = vpop.f32.mrf.mxu0  ;;  %5335 = vmatmul.mubr.bf16.vlgmr.msra.gmra.mxu0 %v5190_v52  ;;  %v5135_v61 = vpop.xlane.xlu0 %5134  ;;  %v5192_v39 = vpack.c.bf16 %v5164_v50, %v5162_v29 }
 0x776   : > { %9759 = vmatpush3.bf16.msra.mxu0 %v16236_v17  ;;  %5342 = vmatprep.mubr.bf16.mxu0 %v5193_v23  ;;  %v5167_v23 = vmul.f32 %v10981_v63, %v13943_v55  ;;  %v14282_v17 = vpop.xlane.xlu1 %5137  ;;  %v5168_v55 = vmul.f32 %v10979_v54, %v13966_v4  ;;  %10994 = vrcp.f32 %v5135_v61 }
 0x777   : > { %v9510_v18 = vpop.f32.mrf.mxu0  ;;  %9760 = vmatprep.subr.bf16.mxu0 %v16237_v51  ;;  %10996 = vrcp.f32 %v14267_v5 }
 0x778   : > { %v5195_v22 = vpack.c.bf16 %v5169_v44, %v5167_v23 }
 0x779   : > { %v9511_v32 = vpop.f32.mrf.mxu0  ;;  %v14275_v33 = vpop.xlane.xlu0 %5140 }
 0x77a   : > { %v14273_v0 = vadd.f32 %v9511_v32, %v9510_v18  ;;  %9761 = vmatpush3.bf16.msra.mxu0 %v16239_v30  ;;  %v10983_v18 = vpop.eup %10982  ;;  %v14293_v29 = vpop.xlane.xlu1 %5791  ;;  %10998 = vrcp.f32 %v14275_v33 }
 0x77b   : > { %v14279_v52 = vpop.f32.mrf.mxu0  ;;  %9762 = vmatprep.subr.bf16.mxu0 %v16240_v24  ;;  %v10985_v32 = vpop.eup %10984  ;;  %v5173_v50 = vmul.f32 %v10983_v18, %v13999_v25  ;;  %v5166_v24 = vmul.f32 %v10981_v63, %v13931_v41  ;;  %11000 = vrcp.f32 %v14282_v17 }
 0x77c   : > { %v10987_v54 = vpop.eup %10986 }
 0x77d   : > { %v14285_v34 = vpop.f32.mrf.mxu0  ;;  %5343 = vmatmul.mubr.bf16.gmra.mxu0 %v5192_v39  ;;  %v14287_v51 = vpop.xlane.xlu0 %5785  ;;  %v16243_v39 = vld [vmem:[#allocation68_spill] sm:$0xff]  ;;  %v5194_v4 = vpack.c.bf16 %v5168_v55, %v5166_v24  ;;  %v5177_v55 = vmul.f32 %v10987_v54, %v14013_v42 }
 0x77e   : > { %9763 = vmatpush3.bf16.msra.mxu0 %v16241_v6  ;;  %5350 = vmatprep.mubr.bf16.mxu0 %v5195_v22  ;;  %v5171_v6 = vmul.f32 %v10985_v32, %v13961_v13  ;;  %v10989_v41 = vpop.eup %10988  ;;  %v14306_v9 = vpop.xlane.xlu1 %5797  ;;  %v5172_v13 = vmul.f32 %v10983_v18, %v13980_v53 }
 0x77f   : > { %v9516_v8 = vpop.f32.mrf.mxu0  ;;  %9764 = vmatprep.subr.bf16.mxu0 %v16242_v10  ;;  %v16244_v10 = vld [vmem:[#allocation76_spill] sm:$0xff]  ;;  %v10991_v61 = vpop.eup %10990 }
 0x780   : > { %v5197_v25 = vpack.c.bf16 %v5173_v50, %v5171_v6  ;;  %v5170_v50 = vmul.f32 %v10985_v32, %v13958_v57  ;;  %v10993_v5 = vpop.eup %10992  ;;  %v5180_v33 = vmul.f32 %v10991_v61, %v14017_v27 }
 0x781   : > { %v9517_v30 = vpop.f32.mrf.mxu0  ;;  %v5789_v23 = vpop.xlane.xlu0 %5788  ;;  %v5178_v17 = vmul.f32 %v10993_v5, %v13985_v26  ;;  %v16249_v26 = vld [vmem:[#allocation55_spill] sm:$0xff] }
 0x782   : > { %v14295_v44 = vadd.f32 %v9517_v30, %v9516_v8  ;;  %9765 = vmatpush3.bf16.msra.mxu0 %v16243_v39  ;;  %v16245_v30 = vld [vmem:[#allocation77_spill] sm:$0xff]  ;;  %v5196_v53 = vpack.c.bf16 %v5172_v13, %v5170_v50  ;;  %11002 = vrcp.f32 %v5789_v23  ;;  %v16248_v23 = vld [vmem:[#allocation80_spill] sm:$0xff] }
 0x783   : > { %v14299_v22 = vpop.f32.mrf.mxu0  ;;  %9766 = vmatprep.subr.bf16.mxu0 %v16244_v10  ;;  %v16246_v39 = vld [vmem:[#allocation69_spill] sm:$0xff]  ;;  %11004 = vrcp.f32 %v14287_v51 }
 0x785   : > { %v14303_v60 = vpop.f32.mrf.mxu0  ;;  %5351 = vmatmul.mubr.bf16.gmra.mxu0 %v5194_v4  ;;  %v5795_v8 = vpop.xlane.xlu0 %5794  ;;  %v5175_v4 = vmul.f32 %v10989_v41, %v13975_v47 }
 0x786   : > { %9767 = vmatpush3.bf16.msra.mxu0 %v16245_v30  ;;  %5358 = vmatprep.mubr.bf16.mxu0 %v5197_v25  ;;  %v14319_v25 = vpop.xlane.xlu1 %5803  ;;  %11006 = vrcp.f32 %v5795_v8 }
 0x787   : > { %v9522_v63 = vpop.f32.mrf.mxu0  ;;  %9768 = vmatprep.subr.bf16.mxu0 %v16246_v39  ;;  %v5199_v42 = vpack.c.bf16 %v5177_v55, %v5175_v4  ;;  %v5179_v55 = vmul.f32 %v10993_v5, %v13993_v59  ;;  %11008 = vrcp.f32 %v14293_v29 }
 0x789   : > { %v9523_v24 = vpop.f32.mrf.mxu0  ;;  %v14311_v10 = vpop.xlane.xlu0 %5800 }
 0x78a   : > { %v14315_v6 = vadd.f32 %v9523_v24, %v9522_v63  ;;  %9769 = vmatpush3.bf16.msra.mxu0 %v14229_v19  ;;  %v5913_v32 = vpop.permute.xlu1 %5912  ;;  %v5176_v19 = vmul.f32 %v10987_v54, %v14008_v46  ;;  %v5181_v63 = vmul.f32 %v10991_v61, %v14029_v58  ;;  %v10995_v46 = vpop.eup %10994  ;;  %11010 = vrcp.f32 %v14311_v10  ;;  %v16256_v10 = vld [vmem:[#allocation58_spill] sm:$0xff] }
 0x78b   : > { %v14321_v30 = vpop.f32.mrf.mxu0  ;;  %9770 = vmatprep.subr.bf16.mxu0 %v14231_v40  ;;  %v5174_v40 = vmul.f32 %v10989_v41, %v13973_v12  ;;  %v10997_v58 = vpop.eup %10996  ;;  %v5185_v12 = vmul.f32 %v10995_v46, %v14043_v20  ;;  %v5200_v41 = vpack.c.bf16 %v5180_v33, %v5178_v17  ;;  %11012 = vrcp.f32 %v14306_v9  ;;  %v16255_v33 = vld [vmem:[#allocation73_spill] sm:$0xff] }
 0x78c   : > { %v5201_v4 = vpack.c.bf16 %v5181_v63, %v5179_v55  ;;  %v5183_v59 = vmul.f32 %v10997_v58, %v14003_v35  ;;  %v5182_v61 = vmul.f32 %v10997_v58, %v16248_v23  ;;  %v16250_v63 = vld [vmem:[#allocation72_spill] sm:$0xff]  ;;  %v16259_v23 = vld [vmem:[#allocation91_spill] sm:$0xff] }
 0x78d   : > { %v14324_v18 = vpop.f32.mrf.mxu0  ;;  %5359 = vmatmul.mubr.bf16.gmra.mxu0 %v5196_v53  ;;  %v5807_v57 = vpop.xlane.xlu0 %5806  ;;  %v5198_v50 = vpack.c.bf16 %v5176_v19, %v5174_v40  ;;  %v5184_v19 = vmul.f32 %v10995_v46, %v14031_v11  ;;  %v16251_v11 = vld [vmem:[#allocation83_spill] sm:$0xff] }
 0x78e   : > { %5366 = vmatprep.mubr.bf16.mxu0 %v5199_v42  ;;  %v5897_v54 = vpop.permute.xlu1 %5896  ;;  %v5203_v53 = vpack.c.bf16 %v5185_v12, %v5183_v59  ;;  %v10999_v42 = vpop.eup %10998  ;;  %v16252_v40 = vld [vmem:[#allocation71_spill] sm:$0xff]  ;;  %11014 = vrcp.f32 %v5807_v57  ;;  %v16257_v59 = vld [vmem:[#allocation86_spill] sm:$0xff] }
 0x78f   : > { %v9528_v47 = vpop.f32.mrf.mxu0  ;;  %v5189_v27 = vmul.f32 %v10999_v42, %v14057_v31  ;;  %v5202_v51 = vpack.c.bf16 %v5184_v19, %v5182_v61  ;;  %11016 = vrcp.f32 %v14319_v25  ;;  %v16258_v19 = vld [vmem:[#allocation84_spill] sm:$0xff] }
 0x791   : > { %v5899_v39 = vpop.permute.xlu0 %5898  ;;  %v9529_v13 = vpop.f32.mrf.mxu0 }
 0x792   : > { %9771 = vmatpush3.bf16.msra.mxu0 %v5899_v39  ;;  %v14332_v24 = vadd.f32 %v9529_v13, %v9528_v47  ;;  %v5188_v39 = vmul.f32 %v10999_v42, %v16250_v63  ;;  %v16253_v13 = vld [vmem:[#allocation87_spill] sm:$0xff] }
 0x793   : > { %9772 = vmatprep.subr.bf16.mxu0 %v5913_v32  ;;  %v11001_v32 = vpop.eup %11000 }
 0x794   : > { %16247 = vst [vmem:[#allocation105_spill] sm:$0xff] %v14332_v24  ;;  %v5187_v20 = vmul.f32 %v11001_v32, %v16249_v26  ;;  %v11003_v35 = vpop.eup %11002  ;;  %v5186_v31 = vmul.f32 %v11001_v32, %v16252_v40  ;;  %v16260_v26 = vld [vmem:[#allocation56_spill] sm:$0xff] }
 0x795   : > { %5367 = vmatmul.mubr.bf16.gmra.mxu0 %v5198_v50  ;;  %v11005_v47 = vpop.eup %11004  ;;  %v5851_v8 = vmul.f32 %v11003_v35, %v16251_v11 }
 0x796   : > { %5374 = vmatprep.mubr.bf16.mxu0 %v5201_v4  ;;  %9773 = vmatpush3.bf16.msra.mxu0 %v5897_v54  ;;  %v5205_v5 = vpack.c.bf16 %v5189_v27, %v5187_v20  ;;  %v5849_v29 = vmul.f32 %v11005_v47, %v16253_v13  ;;  %v5204_v55 = vpack.c.bf16 %v5188_v39, %v5186_v31  ;;  %v11007_v4 = vpop.eup %11006  ;;  %v16254_v54 = vld [vmem:[#allocation88_spill] sm:$0xff]  ;;  %v14358_v20 = vpop.f32.mrf.mxu0  ;;  %v16263_v13 = vld [vmem:[#allocation89_spill] sm:$0xff] }
 0x797   : > { %v11009_v46 = vpop.eup %11008  ;;  %v5850_v58 = vmul.f32 %v11003_v35, %v16254_v54  ;;  %v5855_v12 = vmul.f32 %v11007_v4, %v16255_v33  ;;  %v5848_v17 = vmul.f32 %v11005_v47, %v16256_v10  ;;  %v5854_v27 = vmul.f32 %v11007_v4, %v16258_v19  ;;  %v16265_v54 = vld [vmem:[#allocation60_spill] sm:$0xff] }
 0x798   : > { %v5881_v50 = vpack.c.bf16 %v5851_v8, %v5849_v29  ;;  %v11011_v42 = vpop.eup %11010  ;;  %v5852_v57 = vmul.f32 %v11009_v46, %v16260_v26  ;;  %v14361_v63 = vpop.f32.mrf.mxu0  ;;  %v16262_v8 = vld [vmem:[#allocation61_spill] sm:$0xff] }
 0x799   : > { %v5880_v9 = vpack.c.bf16 %v5850_v58, %v5848_v17  ;;  %v11013_v32 = vpop.eup %11012  ;;  %v5859_v61 = vmul.f32 %v11011_v42, %v16259_v23  ;;  %v5858_v40 = vmul.f32 %v11011_v42, %v16262_v8 }
 0x79a   : > { %v5882_v35 = vpack.c.bf16 %v5854_v27, %v5852_v57 }
 0x79b   : > { %v11015_v47 = vpop.eup %11014 }
 0x79c   : > { %v11017_v11 = vpop.eup %11016  ;;  %v5863_v29 = vmul.f32 %v11015_v47, %v16263_v13 }
 0x79d   : > { %5375 = vmatmul.mubr.bf16.gmra.mxu0 %v5200_v41  ;;  %v5853_v41 = vmul.f32 %v11009_v46, %v16257_v59  ;;  %v5861_v58 = vmul.f32 %v11017_v11, %v16265_v54 }
 0x79e   : > { %5382 = vmatprep.mubr.bf16.mxu0 %v5203_v53 }
 0x79f   : > { %v5883_v53 = vpack.c.bf16 %v5855_v12, %v5853_v41  ;;  %v5887_v10 = vpack.c.bf16 %v5863_v29, %v5861_v58 }
 0x7a5   : > { %5383 = vmatmul.mubr.bf16.gmra.mxu0 %v5202_v51  ;;  %v16261_v51 = vld [vmem:[#allocation85_spill] sm:$0xff] }
 0x7a6   : > { %5390 = vmatprep.mubr.bf16.mxu0 %v5205_v5  ;;  %v5857_v5 = vmul.f32 %v11013_v32, %v16261_v51 }
 0x7a8   : > { %v5885_v25 = vpack.c.bf16 %v5859_v61, %v5857_v5 }
 0x7ad   : > { %5391 = vmatmul.mubr.bf16.gmra.mxu0 %v5204_v55  ;;  %v16264_v55 = vld [vmem:[#allocation57_spill] sm:$0xff] }
 0x7ae   : > { %5976 = vmatprep.mubr.bf16.mxu0 %v5881_v50  ;;  %v5856_v50 = vmul.f32 %v11013_v32, %v16264_v55  ;;  %v16267_v32 = vld [vmem:[#allocation59_spill] sm:$0xff] }
 0x7af   : > { %v5860_v23 = vmul.f32 %v11017_v11, %v16267_v32 }
 0x7b0   : > { %v5884_v33 = vpack.c.bf16 %v5858_v40, %v5856_v50 }
 0x7b5   : > { %5977 = vmatmul.mubr.bf16.vlgmr.msra.gmra.mxu0 %v5880_v9 }
 0x7b6   : > { %5984 = vmatprep.mubr.bf16.mxu0 %v5883_v53  ;;  %v16266_v53 = vld [vmem:[#allocation92_spill] sm:$0xff] }
 0x7b7   : > { %v5813_v39 = vpop.xlane.xlu1 %5812  ;;  %v5862_v42 = vmul.f32 %v11015_v47, %v16266_v53 }
 0x7b8   : > { %11018 = vrcp.f32 %v5813_v39 }
 0x7b9   : > { %v5886_v57 = vpack.c.bf16 %v5862_v42, %v5860_v23 }
 0x7bb   : > { %v5822_v19 = vpop.xlane.xlu1 %5821 }
 0x7bd   : > { %5985 = vmatmul.mubr.bf16.gmra.mxu0 %v5882_v35 }
 0x7be   : > { %5992 = vmatprep.mubr.bf16.mxu0 %v5885_v25 }
 0x7bf   : > { %v9582_v31 = vpop.f32.mrf.mxu0  ;;  %v5828_v39 = vpop.xlane.xlu1 %5827 }
 0x7c1   : > { %v9583_v46 = vpop.f32.mrf.mxu0 }
 0x7c2   : > { %v5810_v4 = vpop.xlane.xlu0 %5809  ;;  %v9584_v41 = vadd.f32 %v9583_v46, %v9582_v31 }
 0x7c3   : > { %11020 = vrcp.f32 %v5810_v4  ;;  %v9585_v12 = vpop.f32.mrf.mxu0 }
 0x7c5   : > { %5993 = vmatmul.mubr.bf16.gmra.mxu0 %v5884_v33  ;;  %v9586_v59 = vpop.f32.mrf.mxu0  ;;  %v11019_v5 = vpop.eup %11018 }
 0x7c6   : > { %6000 = vmatprep.mubr.bf16.mxu0 %v5887_v10  ;;  %v5816_v17 = vpop.xlane.xlu0 %5815  ;;  %v9587_v9 = vadd.f32 %v9586_v59, %v9585_v12  ;;  %v5867_v31 = vmul.f32 %v11019_v5, %v14163_v3  ;;  %v5866_v29 = vmul.f32 %v11019_v5, %v14157_v15 }
 0x7c7   : > { %11022 = vrcp.f32 %v5816_v17 }
 0x7c8   : > { %v10199_v27 = vpack.i.bf16 %v9587_v9, %v9584_v41 }
 0x7ca   : > { %v5819_v61 = vpop.xlane.xlu0 %5818  ;;  %10200 = vrot.lane.b32.xlu0 %v10199_v27, %s11565_s9 }
 0x7cb   : > { %11024 = vrcp.f32 %v5819_v61  ;;  %v9588_v26 = vpop.f32.mrf.mxu0 }
 0x7cc   : > { %11026 = vrcp.f32 %v5822_v19 }
 0x7cd   : > { %6001 = vmatmul.mubr.bf16.gmra.mxu0 %v5886_v57  ;;  %v9589_v51 = vpop.f32.mrf.mxu0 }
 0x7ce   : > { %v5825_v35 = vpop.xlane.xlu0 %5824  ;;  %v14370_v25 = vadd.f32 %v9589_v51, %v9588_v26 }
 0x7cf   : > { %11028 = vrcp.f32 %v5825_v35  ;;  %v9591_v47 = vpop.f32.mrf.mxu0 }
 0x7d0   : > { %v11021_v8 = vpop.eup %11020  ;;  %11030 = vrcp.f32 %v5828_v39 }
 0x7d1   : > { %v9592_v40 = vpop.f32.mrf.mxu0  ;;  %v5865_v11 = vmul.f32 %v11021_v8, %v14197_v28  ;;  %v5864_v13 = vmul.f32 %v11021_v8, %v14193_v14 }
 0x7d2   : > { %v5831_v55 = vpop.xlane.xlu0 %5830  ;;  %v14376_v50 = vadd.f32 %v9592_v40, %v9591_v47 }
 0x7d3   : > { %11032 = vrcp.f32 %v5831_v55  ;;  %v5889_v4 = vpack.c.bf16 %v5867_v31, %v5865_v11  ;;  %v5888_v46 = vpack.c.bf16 %v5866_v29, %v5864_v13  ;;  %v16268_v11 = vld [vmem:[#allocation62_spill] sm:$0xff] }
 0x7d4   : > { %v11023_v58 = vpop.eup %11022 }
 0x7d5   : > { %6008 = vmatprep.mubr.bf16.mxu0 %v5889_v4  ;;  %v5869_v14 = vmul.f32 %v11023_v58, %v14204_v62  ;;  %v5868_v10 = vmul.f32 %v11023_v58, %v14201_v16 }
 0x7d6   : > { %6009 = vmatmul.mubr.bf16.gmra.mxu0 %v5888_v46 }
 0x7d7   : > { %v9594_v28 = vpop.f32.mrf.mxu0 }
 0x7d8   : > { %v11025_v33 = vpop.eup %11024 }
 0x7d9   : > { %v9595_v3 = vpop.f32.mrf.mxu0  ;;  %v5871_v15 = vmul.f32 %v11025_v33, %v14213_v43  ;;  %v5870_v17 = vmul.f32 %v11025_v33, %v14209_v7  ;;  %v11027_v59 = vpop.eup %11026 }
 0x7da   : > { %v14381_v12 = vadd.f32 %v9595_v3, %v9594_v28  ;;  %v5873_v32 = vmul.f32 %v11027_v59, %v14179_v48  ;;  %v5872_v51 = vmul.f32 %v11027_v59, %v14173_v49 }
 0x7db   : > { %v9597_v41 = vpop.f32.mrf.mxu0  ;;  %v5891_v9 = vpack.c.bf16 %v5871_v15, %v5869_v14  ;;  %v5890_v53 = vpack.c.bf16 %v5870_v17, %v5868_v10 }
 0x7dc   : > { %v11029_v42 = vpop.eup %11028 }
 0x7dd   : > { %v9598_v19 = vpop.f32.mrf.mxu0  ;;  %6016 = vmatprep.mubr.bf16.mxu0 %v5891_v9  ;;  %v5875_v62 = vmul.f32 %v11029_v42, %v14219_v1  ;;  %v11031_v23 = vpop.eup %11030  ;;  %v5874_v61 = vmul.f32 %v11029_v42, %v14215_v36 }
 0x7de   : > { %v14386_v27 = vadd.f32 %v9598_v19, %v9597_v41  ;;  %6017 = vmatmul.mubr.bf16.gmra.mxu0 %v5890_v53  ;;  %v5877_v5 = vmul.f32 %v11031_v23, %v14190_v2 }
 0x7df   : > { %v5893_v43 = vpack.c.bf16 %v5875_v62, %v5873_v32  ;;  %v5892_v48 = vpack.c.bf16 %v5874_v61, %v5872_v51 }
 0x7e0   : > { %v11033_v7 = vpop.eup %11032 }
 0x7e1   : > { %6024 = vmatprep.mubr.bf16.mxu0 %v5893_v43  ;;  %v5879_v26 = vmul.f32 %v11033_v7, %v14225_v56  ;;  %v5878_v40 = vmul.f32 %v11033_v7, %v14221_v37  ;;  %v5876_v56 = vmul.f32 %v11031_v23, %v16268_v11  ;;  %v10418_v11 = vld [vmem:[#allocation14 + $0x54] ss:$8 sps:$4 sm:$0xff]  }
 0x7e3   : > { %v9600_v57 = vpop.f32.mrf.mxu0  ;;  %v5895_v39 = vpack.c.bf16 %v5879_v26, %v5877_v5  ;;  %v5894_v2 = vpack.c.bf16 %v5878_v40, %v5876_v56  ;;  %v10410_v5 = vld [vmem:[#allocation14 + $0x70] ss:$8 sps:$4 sm:$0xff]  }
 0x7e5   : > { %v9601_v35 = vpop.f32.mrf.mxu0 }
 0x7e6   : > { %v14396_v1 = vadd.f32 %v9601_v35, %v9600_v57  ;;  %6025 = vmatmul.mubr.bf16.gmra.mxu0 %v5892_v48  ;;  %v10412_v48 = vld [vmem:[#allocation14 + $0x74] ss:$8 sps:$4 sm:$0xff]  }
 0x7e7   : > { %v9603_v47 = vpop.f32.mrf.mxu0  ;;  %6032 = vmatprep.mubr.bf16.mxu0 %v5895_v39  ;;  %6409 = vmatprep.subr.bf16.mxu1 %v10412_v48 }
 0x7e8   : > { %6410 = vmatpush1.bf16.msra.mxu1 %v10410_v5  ;;  %v10422_v5 = vld [vmem:[#allocation14 + $0x30] ss:$8 sps:$4 sm:$0xff]  }
 0x7e9   : > { %v9604_v8 = vpop.f32.mrf.mxu0 }
 0x7ea   : > { %v14399_v36 = vadd.f32 %v9604_v8, %v9603_v47  ;;  %v10415_v47 = vld [vmem:[#allocation14 + $0x64] ss:$8 sps:$4 sm:$0xff]   ;;  %v10413_v8 = vld [vmem:[#allocation14 + $0x60] ss:$8 sps:$4 sm:$0xff]  }
 0x7eb   : > { %v9606_v31 = vpop.f32.mrf.mxu0  ;;  %6411 = vmatprep.subr.bf16.mxu1 %v10415_v47  ;;  %v10427_v47 = vld [vmem:[#allocation14 + $0x24] ss:$8 sps:$4 sm:$0xff]  }
 0x7ec   : > { %6412 = vmatpush1.bf16.msra.mxu1 %v10413_v8 }
 0x7ed   : > { %v9607_v13 = vpop.f32.mrf.mxu0  ;;  %6413 = vmatprep.subr.bf16.mxu1 %v10418_v11 }
 0x7ee   : > { %6033 = vmatmul.mubr.bf16.gmra.mxu0 %v5894_v2  ;;  %v14404_v29 = vadd.f32 %v9607_v13, %v9606_v31  ;;  %v16269_v2 = vld [vmem:[#allocation90_spill] sm:$0xff]  ;;  %v16270_v13 = vld [vmem:[#allocation93_spill] sm:$0xff] }
 0x7ef   : > { %v9609_v55 = vpop.f32.mrf.mxu0 }
 0x7f1   : > { %v9610_v4 = vpop.f32.mrf.mxu0 }
 0x7f2   : > { %v14406_v46 = vadd.f32 %v9610_v4, %v9609_v55  ;;  %v9491_v55 = vadd.f32 %v16270_v13, %v16269_v2  ;;  %v10430_v2 = vld [vmem:[#allocation14 + $0x14] ss:$8 sps:$4 sm:$0xff]  }
 0x7f3   : > { %v9612_v58 = vpop.f32.mrf.mxu0 }
 0x7f5   : > { %v9613_v28 = vpop.f32.mrf.mxu0 }
 0x7f6   : > { %v14410_v33 = vadd.f32 %v9613_v28, %v9612_v58  ;;  %v10416_v28 = vld [vmem:[#allocation14 + $0x50] ss:$8 sps:$4 sm:$0xff]  }
 0x7f7   : > { %v9615_v3 = vpop.f32.mrf.mxu0  ;;  %6414 = vmatpush1.bf16.msra.mxu1 %v10416_v28 }
 0x7f9   : > { %v9616_v14 = vpop.f32.mrf.mxu0 }
 0x7fa   : > { %v14412_v15 = vadd.f32 %v9616_v14, %v9615_v3  ;;  %v10421_v14 = vld [vmem:[#allocation14 + $0x44] ss:$8 sps:$4 sm:$0xff]  }
 0x7fb   : > { %v9618_v10 = vpop.f32.mrf.mxu0  ;;  %6415 = vmatprep.subr.bf16.mxu1 %v10421_v14  ;;  %v10431_v14 = vld [vmem:[#allocation14] ss:$8 sps:$4 sm:$0xff]  }
 0x7fd   : > { %v9619_v59 = vpop.f32.mrf.mxu0 }
 0x7fe   : > { %v14416_v41 = vadd.f32 %v9619_v59, %v9618_v10  ;;  %v16271_v59 = vld [vmem:[#allocation94_spill] sm:$0xff] }
 0x7ff   : > { %v9621_v9 = vpop.f32.mrf.mxu0 }
 0x801   : > { %v9622_v53 = vpop.f32.mrf.mxu0 }
 0x802   : > { %v14418_v42 = vadd.f32 %v9622_v53, %v9621_v9 }
 0x82d   : > { %v9624_v32 = vpop.f32.mrf.mxu0 }
 0x82f   : > { %v9625_v62 = vpop.f32.mrf.mxu0 }
 0x830   : > { %v14422_v23 = vadd.f32 %v9625_v62, %v9624_v32 }
 0x831   : > { %v9627_v43 = vpop.f32.mrf.mxu0 }
 0x833   : > { %v9628_v7 = vpop.f32.mrf.mxu0 }
 0x834   : > { %v14424_v61 = vadd.f32 %v9628_v7, %v9627_v43  ;;  %v10419_v43 = vld [vmem:[#allocation14 + $0x40] ss:$8 sps:$4 sm:$0xff]  }
 0x835   : > { %v9678_v26 = vpop.f32.mrf.mxu0  ;;  %6416 = vmatpush1.bf16.msra.mxu1 %v10419_v43  ;;  %v10436_v43 = vld [vmem:[#allocation14 + $0xf4] ss:$8 sps:$4 sm:$0xff]  }
 0x837   : > { %v9679_v51 = vpop.f32.mrf.mxu0 }
 0x838   : > { %v14428_v35 = vadd.f32 %v9679_v51, %v9678_v26  ;;  %v10424_v26 = vld [vmem:[#allocation14 + $0x34] ss:$8 sps:$4 sm:$0xff]  }
 0x839   : > { %v14430_v39 = vpop.f32.mrf.mxu0  ;;  %6417 = vmatprep.subr.bf16.mxu1 %v10424_v26 }
 0x83a   : > { %6418 = vmatpush1.bf16.msra.mxu1 %v10422_v5 }
 0x83b   : > { %v14432_v40 = vpop.f32.mrf.mxu0  ;;  %6419 = vmatprep.subr.bf16.mxu1 %v10427_v47 }
 0x83c   : > { %v10201_v31 = vpop.permute.xlu0 %10200 }
 0x83d   : > { %v9684_v56 = vpop.f32.mrf.mxu0  ;;  %v10203_v4 = vunpack.i.h.bf16 %v10201_v31  ;;  %v10202_v58 = vunpack.i.l.bf16 %v10201_v31 }
 0x83f   : > { %v9685_v3 = vpop.f32.mrf.mxu0  ;;  %v14437_v10 = vsel %vm3344_vm0, %v9491_v55, %v10203_v4  ;;  %v14441_v9 = vsel %vm3344_vm0, %v16271_v59, %v10202_v58  ;;  %v10428_v55 = vld [vmem:[#allocation14 + $0x10] ss:$8 sps:$4 sm:$0xff]   ;;  %v10433_v58 = vld [vmem:[#allocation14 + $0x4] ss:$8 sps:$4 sm:$0xff]  }
 0x840   : > { %v14443_v53 = vadd.f32 %v9685_v3, %v9684_v56  ;;  %v10425_v56 = vld [vmem:[#allocation14 + $0x20] ss:$8 sps:$4 sm:$0xff]  }
 0x841   : > { %v14447_v62 = vpop.f32.mrf.mxu0  ;;  %6420 = vmatpush1.bf16.msra.mxu1 %v10425_v56 }
 0x842   : > { %6421 = vmatprep.subr.bf16.mxu1 %v10430_v2  ;;  %v10437_v2 = vld [vmem:[#allocation14 + $0xe0] ss:$8 sps:$4 sm:$0xff]  }
 0x843   : > { %v14449_v7 = vpop.f32.mrf.mxu0 }
 0x845   : > { %v9690_v51 = vpop.f32.mrf.mxu0  ;;  %6422 = vmatpush1.bf16.msra.mxu1 %v10428_v55 }
 0x846   : > { %6423 = vmatprep.subr.bf16.mxu1 %v10433_v58  ;;  %v10440_v58 = vld [vmem:[#allocation14 + $0xd0] ss:$8 sps:$4 sm:$0xff]  }
 0x847   : > { %v9691_v48 = vpop.f32.mrf.mxu0 }
 0x848   : > { %v14451_v8 = vadd.f32 %v9691_v48, %v9690_v51  ;;  %v10434_v51 = vld [vmem:[#allocation14 + $0xf0] ss:$8 sps:$4 sm:$0xff]   ;;  %v10439_v48 = vld [vmem:[#allocation14 + $0xe4] ss:$8 sps:$4 sm:$0xff]  }
 0x849   : > { %v14453_v11 = vpop.f32.mrf.mxu0  ;;  %6424 = vmatpush1.bf16.msra.mxu1 %v10431_v14  ;;  %v10445_v14 = vld [vmem:[#allocation14 + $0xc4] ss:$8 sps:$4 sm:$0xff]  }
 0x84a   : > { %6425 = vmatprep.subr.bf16.mxu1 %v10436_v43 }
 0x84b   : > { %v14455_v31 = vpop.f32.mrf.mxu0 }
 0x84d   : > { %v9696_v13 = vpop.f32.mrf.mxu0  ;;  %6426 = vmatpush2.bf16.msra.mxu1 %v10434_v51  ;;  %v10448_v51 = vld [vmem:[#allocation14 + $0xb4] ss:$8 sps:$4 sm:$0xff]  }
 0x84e   : > { %6427 = vmatprep.subr.bf16.mxu1 %v10439_v48 }
 0x84f   : > { %v9697_v4 = vpop.f32.mrf.mxu0 }
 0x850   : > { %v14457_v28 = vadd.f32 %v9697_v4, %v9696_v13  ;;  %v10442_v4 = vld [vmem:[#allocation14 + $0xd4] ss:$8 sps:$4 sm:$0xff]  }
 0x851   : > { %v14459_v3 = vpop.f32.mrf.mxu0  ;;  %6428 = vmatpush2.bf16.msra.mxu1 %v10437_v2  ;;  %v10451_v2 = vld [vmem:[#allocation14 + $0xa4] ss:$8 sps:$4 sm:$0xff]  }
 0x852   : > { %6429 = vmatprep.subr.bf16.mxu1 %v10442_v4 }
 0x853   : > { %v14461_v59 = vpop.f32.mrf.mxu0 }
 0x855   : > { %v9702_v26 = vpop.f32.mrf.mxu0  ;;  %6430 = vmatpush2.bf16.msra.mxu1 %v10440_v58  ;;  %v10454_v58 = vld [vmem:[#allocation14 + $0x94] ss:$8 sps:$4 sm:$0xff]  }
 0x856   : > { %6431 = vmatprep.subr.bf16.mxu1 %v10445_v14 }
 0x857   : > { %v9703_v5 = vpop.f32.mrf.mxu0 }
 0x858   : > { %v14463_v47 = vadd.f32 %v9703_v5, %v9702_v26  ;;  %v10443_v26 = vld [vmem:[#allocation14 + $0xc0] ss:$8 sps:$4 sm:$0xff]  }
 0x859   : > { %v9705_v56 = vpop.f32.mrf.mxu0  ;;  %6432 = vmatpush2.bf16.msra.mxu1 %v10443_v26 }
 0x85a   : > { %6433 = vmatprep.subr.bf16.mxu1 %v10448_v51 }
 0x85b   : > { %v9706_v13 = vpop.f32.mrf.mxu0 }
 0x85c   : > { %v14465_v55 = vadd.f32 %v9706_v13, %v9705_v56  ;;  %v10446_v56 = vld [vmem:[#allocation14 + $0xb0] ss:$8 sps:$4 sm:$0xff]  }
 0x85d   : > { %v9708_v32 = vpop.f32.mrf.mxu0  ;;  %6434 = vmatpush2.bf16.msra.mxu1 %v10446_v56 }
 0x85e   : > { %6435 = vmatprep.subr.bf16.mxu1 %v10451_v2 }
 0x85f   : > { %v9709_v57 = vpop.f32.mrf.mxu0 }
 0x860   : > { %v14467_v19 = vadd.f32 %v9709_v57, %v9708_v32  ;;  %v10449_v57 = vld [vmem:[#allocation14 + $0xa0] ss:$8 sps:$4 sm:$0xff]  }
 0x861   : > { %v9711_v43 = vpop.f32.mrf.mxu0  ;;  %6436 = vmatpush2.bf16.msra.mxu1 %v10449_v57 }
 0x862   : > { %16272 = vst [vmem:[#allocation100_spill] sm:$0xff] %v14467_v19  ;;  %6437 = vmatprep.subr.bf16.mxu1 %v10454_v58 }
 0x863   : > { %v9712_v5 = vpop.f32.mrf.mxu0 }
 0x864   : > { %v14469_v17 = vadd.f32 %v9712_v5, %v9711_v43  ;;  %v10452_v43 = vld [vmem:[#allocation14 + $0x90] ss:$8 sps:$4 sm:$0xff]  }
 0x865   : > { %v9714_v48 = vpop.f32.mrf.mxu0  ;;  %6438 = vmatpush2.bf16.msra.mxu1 %v10452_v43 }
 0x866   : > { %16273 = vst [vmem:[#allocation102_spill] sm:$0xff] %v14469_v17 }
 0x867   : > { %v9715_v13 = vpop.f32.mrf.mxu0 }
 0x868   : > { %v14471_v37 = vadd.f32 %v9715_v13, %v9714_v48  ;;  %v10455_v48 = vld [vmem:[#allocation14 + $0x80] ss:$8 sps:$4 sm:$0xff]   ;;  %v10457_v13 = vld [vmem:[#allocation14 + $0x84] ss:$8 sps:$4 sm:$0xff]  }
 0x869   : > { %v9717_v4 = vpop.f32.mrf.mxu0  ;;  %6439 = vmatprep.subr.bf16.mxu1 %v10457_v13 }
 0x86a   : > { %16274 = vst [vmem:[#allocation101_spill] sm:$0xff] %v14471_v37  ;;  %6440 = vmatpush2.bf16.msra.mxu1 %v10455_v48 }
 0x86b   : > { %v9718_v32 = vpop.f32.mrf.mxu0 }
 0x86c   : > { %v14473_v49 = vadd.f32 %v9718_v32, %v9717_v4 }
 0x86d   : > { %v9720_v14 = vpop.f32.mrf.mxu0 }
 0x86e   : > { %16275 = vst [vmem:[#allocation110_spill] sm:$0xff] %v14473_v49 }
 0x86f   : > { %v9721_v5 = vpop.f32.mrf.mxu0 }
 0x870   : > { %v14475_v26 = vadd.f32 %v9721_v5, %v9720_v14 }
 0x871   : > { %v9723_v16 = vpop.f32.mrf.mxu0 }
 0x872   : > { %16276 = vst [vmem:[#allocation111_spill] sm:$0xff] %v14475_v26 }
 0x873   : > { %v9724_v51 = vpop.f32.mrf.mxu0 }
 0x874   : > { %v14477_v54 = vadd.f32 %v9724_v51, %v9723_v16 }
 0x875   : > { %v9774_v56 = vpop.f32.mrf.mxu0 }
 0x876   : > { %16277 = vst [vmem:[#allocation103_spill] sm:$0xff] %v14477_v54 }
 0x877   : > { %v9775_v2 = vpop.f32.mrf.mxu0 }
 0x878   : > { %v9776_v49 = vadd.f32 %v9775_v2, %v9774_v56 }
 0x879   : > { %v9777_v4 = vpop.f32.mrf.mxu0 }
 0x87b   : > { %v9778_v32 = vpop.f32.mrf.mxu0 }
 0x87c   : > { %v9779_v57 = vadd.f32 %v9778_v32, %v9777_v4 }
 0x87d   : > { %v9780_v37 = vpop.f32.mrf.mxu0 }
 0x87e   : > { %v10194_v17 = vpack.i.bf16 %v9779_v57, %v9776_v49  ;;  %v16278_v49 = vpack.i.bf16 %v14376_v50, %v14370_v25  ;;  %v16280_v57 = vpack.i.bf16 %v14399_v36, %v14396_v1 }
 0x87f   : > { %v9781_v58 = vpop.f32.mrf.mxu0 }
 0x880   : > { %10195 = vrot.lane.b32.xlu1 %v10194_v17, %s11565_s9  ;;  %v9782_v5 = vadd.f32 %v9781_v58, %v9780_v37  ;;  %v16279_v37 = vpack.i.bf16 %v14386_v27, %v14381_v12  ;;  %v16282_v27 = vpack.i.bf16 %v14412_v15, %v14410_v33 }
 0x881   : > { %v9783_v14 = vpop.f32.mrf.mxu0 }
 0x883   : > { %v9784_v43 = vpop.f32.mrf.mxu0 }
 0x884   : > { %v9785_v26 = vadd.f32 %v9784_v43, %v9783_v14 }
 0x885   : > { %v9786_v19 = vpop.f32.mrf.mxu0 }
 0x886   : > { %v10204_v16 = vpack.i.bf16 %v9785_v26, %v9782_v5  ;;  %v16283_v5 = vpack.i.bf16 %v14418_v42, %v14416_v41 }
 0x887   : > { %v9787_v51 = vpop.f32.mrf.mxu0 }
 0x888   : > { %10205 = vrot.lane.b32.xlu1 %v10204_v16, %s11565_s9  ;;  %v9788_v54 = vadd.f32 %v9787_v51, %v9786_v19 }
 0x889   : > { %v9789_v48 = vpop.f32.mrf.mxu0 }
 0x88b   : > { %v9790_v13 = vpop.f32.mrf.mxu0 }
 0x88c   : > { %v9791_v24 = vadd.f32 %v9790_v13, %v9789_v48  ;;  %10210 = vrot.lane.b32.xlu1 %v16278_v49, %s11565_s9 }
 0x88d   : > { %v9792_v56 = vpop.f32.mrf.mxu0 }
 0x88e   : > { %v10214_v17 = vpack.i.bf16 %v9791_v24, %v9788_v54  ;;  %v16281_v24 = vpack.i.bf16 %v14406_v46, %v14404_v29  ;;  %v16284_v46 = vpack.i.bf16 %v14424_v61, %v14422_v23 }
 0x88f   : > { %v9793_v2 = vpop.f32.mrf.mxu0 }
 0x890   : > { %10215 = vrot.lane.b32.xlu0 %v10214_v17, %s11565_s9  ;;  %10220 = vrot.lane.b32.xlu1 %v16279_v37, %s11565_s9  ;;  %v9794_v32 = vadd.f32 %v9793_v2, %v9792_v56 }
 0x891   : > { %v9795_v26 = vpop.f32.mrf.mxu0 }
 0x893   : > { %v9796_v4 = vpop.f32.mrf.mxu0 }
 0x894   : > { %v9797_v19 = vadd.f32 %v9796_v4, %v9795_v26  ;;  %10230 = vrot.lane.b32.xlu1 %v16280_v57, %s11565_s9 }
 0x896   : > { %v10224_v25 = vpack.i.bf16 %v9797_v19, %v9794_v32  ;;  %v9798_v50 = vpop.f32.mrf.mxu0 }
 0x898   : > { %10225 = vrot.lane.b32.xlu0 %v10224_v25, %s11565_s9  ;;  %10240 = vrot.lane.b32.xlu1 %v16281_v24, %s11565_s9  ;;  %v9799_v54 = vpop.f32.mrf.mxu0  ;;  %v9683_v25 = vadd.f32 %v14432_v40, %v14430_v39 }
 0x899   : > { %v9800_v14 = vadd.f32 %v9799_v54, %v9798_v50 }
 0x89a   : > { %v9801_v12 = vpop.f32.mrf.mxu0 }
 0x89c   : > { %10250 = vrot.lane.b32.xlu1 %v16282_v27, %s11565_s9  ;;  %v9802_v58 = vpop.f32.mrf.mxu0 }
 0x89d   : > { %v9803_v1 = vadd.f32 %v9802_v58, %v9801_v12  ;;  %v16285_v58 = vpack.c.bf16 %v14437_v10, %v14441_v9  ;;  %v16288_v9 = vld [vmem:[#allocation95_spill] sm:$0xff] }
 0x89e   : > { %v9804_v36 = vpop.f32.mrf.mxu0 }
 0x89f   : > { %v10234_v43 = vpack.i.bf16 %v9803_v1, %v9800_v14  ;;  %v9689_v1 = vadd.f32 %v14449_v7, %v14447_v62  ;;  %v16289_v7 = vld [vmem:[#allocation98_spill] sm:$0xff] }
 0x8a0   : > { %10260 = vrot.lane.b32.xlu1 %v16283_v5, %s11565_s9  ;;  %v9805_v16 = vpop.f32.mrf.mxu0 }
 0x8a1   : > { %10235 = vrot.lane.b32.xlu0 %v10234_v43, %s11565_s9  ;;  %v9806_v15 = vadd.f32 %v9805_v16, %v9804_v36  ;;  %v16286_v16 = vld [vmem:[#allocation96_spill] sm:$0xff] }
 0x8a2   : > { %v9807_v29 = vpop.f32.mrf.mxu0 }
 0x8a4   : > { %10270 = vrot.lane.b32.xlu1 %v16284_v46, %s11565_s9  ;;  %v9808_v33 = vpop.f32.mrf.mxu0 }
 0x8a5   : > { %v9809_v51 = vadd.f32 %v9808_v33, %v9807_v29  ;;  %v16287_v29 = vld [vmem:[#allocation99_spill] sm:$0xff] }
 0x8a6   : > { %v9810_v48 = vpop.f32.mrf.mxu0  ;;  %v9497_v46 = vadd.f32 %v16287_v29, %v16286_v16 }
 0x8a7   : > { %v10244_v13 = vpack.i.bf16 %v9809_v51, %v9806_v15  ;;  %v16290_v51 = vld [vmem:[#allocation104_spill] sm:$0xff] }
 0x8a8   : > { %v9811_v49 = vpop.f32.mrf.mxu0 }
 0x8a9   : > { %10245 = vrot.lane.b32.xlu0 %v10244_v13, %s11565_s9  ;;  %v9812_v42 = vadd.f32 %v9811_v49, %v9810_v48  ;;  %v9503_v48 = vadd.f32 %v16290_v51, %v16289_v7 }
 0x8aa   : > { %v9813_v56 = vpop.f32.mrf.mxu0 }
 0x8ac   : > { %v9814_v41 = vpop.f32.mrf.mxu0 }
 0x8ad   : > { %v9815_v17 = vadd.f32 %v9814_v41, %v9813_v56 }
 0x8ae   : > { %v9816_v2 = vpop.f32.mrf.mxu0 }
 0x8af   : > { %v10254_v37 = vpack.i.bf16 %v9815_v17, %v9812_v42 }
 0x8b0   : > { %v9817_v26 = vpop.f32.mrf.mxu0 }
 0x8b1   : > { %10255 = vrot.lane.b32.xlu0 %v10254_v37, %s11565_s9  ;;  %v9818_v61 = vadd.f32 %v9817_v26, %v9816_v2  ;;  %v16291_v26 = vld [vmem:[#allocation97_spill] sm:$0xff] }
 0x8b2   : > { %v9819_v4 = vpop.f32.mrf.mxu0 }
 0x8b4   : > { %v9820_v23 = vpop.f32.mrf.mxu0 }
 0x8b5   : > { %v9821_v32 = vadd.f32 %v9820_v23, %v9819_v4 }
 0x8b7   : > { %v10264_v19 = vpack.i.bf16 %v9821_v32, %v9818_v61 }
 0x8b9   : > { %10265 = vrot.lane.b32.xlu0 %v10264_v19, %s11565_s9  ;;  %v9509_v19 = vadd.f32 %v14265_v38, %v14262_v45  ;;  %s16331_s9 = sld [smem:[#allocation171_spill]] }
 0x8f2   : > { %v10196_v57 = vpop.permute.xlu1 %10195 }
 0x8f3   : > { %v10198_v50 = vunpack.i.h.bf16 %v10196_v57  ;;  %v10197_v24 = vunpack.i.l.bf16 %v10196_v57 }
 0x8f5   : > { %v6185_v54 = vsel %vm3344_vm0, %v14428_v35, %v10197_v24  ;;  %v6186_v12 = vsel %vm3344_vm0, %v9683_v25, %v10198_v50 }
 0x8f6   : > { %v6202_v27 = vpack.c.bf16 %v6186_v12, %v6185_v54  ;;  %v9515_v54 = vadd.f32 %v14285_v34, %v14279_v52 }
 0x8f8   : > { %6441 = vmatprep.mubr.bf16.mxu1 %v6202_v27 }
 0x8f9   : > { %6442 = vmatmul.mubr.bf16.vlgmr.msra.gmra.mxu1 %v16285_v58 }
 0x8fa   : > { %v10206_v14 = vpop.permute.xlu1 %10205 }
 0x8fb   : > { %v10208_v36 = vunpack.i.h.bf16 %v10206_v14  ;;  %v10207_v43 = vunpack.i.l.bf16 %v10206_v14 }
 0x8fd   : > { %v6187_v39 = vsel %vm3344_vm0, %v14443_v53, %v10207_v43  ;;  %v6188_v40 = vsel %vm3344_vm0, %v9689_v1, %v10208_v36  ;;  %v9695_v53 = vadd.f32 %v14455_v31, %v14453_v11 }
 0x8fe   : > { %v10211_v35 = vpop.permute.xlu1 %10210  ;;  %v6204_v5 = vpack.c.bf16 %v6188_v40, %v6187_v39  ;;  %v9521_v39 = vadd.f32 %v14303_v60, %v14299_v22 }
 0x8ff   : > { %v10213_v33 = vunpack.i.h.bf16 %v10211_v35  ;;  %v10212_v15 = vunpack.i.l.bf16 %v10211_v35 }
 0x900   : > { %6451 = vmatprep.mubr.bf16.mxu1 %v6204_v5 }
 0x901   : > { %v6172_v10 = vsel %vm3344_vm0, %v9497_v46, %v10213_v33  ;;  %v6171_v62 = vsel %vm3344_vm0, %v16288_v9, %v10212_v15 }
 0x902   : > { %v6203_v13 = vpack.c.bf16 %v6172_v10, %v6171_v62  ;;  %v10221_v49 = vpop.permute.xlu1 %10220  ;;  %v10216_v56 = vpop.permute.xlu0 %10215 }
 0x903   : > { %v10223_v41 = vunpack.i.h.bf16 %v10221_v49  ;;  %v10222_v42 = vunpack.i.l.bf16 %v10221_v49  ;;  %v10218_v17 = vunpack.i.h.bf16 %v10216_v56  ;;  %v10217_v2 = vunpack.i.l.bf16 %v10216_v56  ;;  %v16292_v49 = vld [vmem:[#allocation105_spill] sm:$0xff] }
 0x904   : > { %6452 = vmatmul.mubr.bf16.gmra.mxu1 %v6203_v13 }
 0x905   : > { %v6174_v37 = vsel %vm3344_vm0, %v9503_v48, %v10223_v41  ;;  %v6173_v4 = vsel %vm3344_vm0, %v16291_v26, %v10222_v42  ;;  %v6189_v23 = vsel %vm3344_vm0, %v14451_v8, %v10217_v2  ;;  %v6190_v61 = vsel %vm3344_vm0, %v9695_v53, %v10218_v17  ;;  %v16294_v2 = vld [vmem:[#allocation102_spill] sm:$0xff] }
 0x906   : > { %v6205_v32 = vpack.c.bf16 %v6174_v37, %v6173_v4  ;;  %v10231_v11 = vpop.permute.xlu1 %10230  ;;  %v6206_v31 = vpack.c.bf16 %v6190_v61, %v6189_v23  ;;  %v9701_v8 = vadd.f32 %v14461_v59, %v14459_v3  ;;  %v16295_v23 = vld [vmem:[#allocation101_spill] sm:$0xff] }
 0x907   : > { %v10233_v57 = vunpack.i.h.bf16 %v10231_v11  ;;  %v10232_v25 = vunpack.i.l.bf16 %v10231_v11 }
 0x908   : > { %6461 = vmatprep.mubr.bf16.mxu1 %v6206_v31 }
 0x909   : > { %v6176_v50 = vsel %vm3344_vm0, %v9509_v19, %v10233_v57  ;;  %v6175_v24 = vsel %vm3344_vm0, %v14259_v21, %v10232_v25 }
 0x90a   : > { %v6207_v12 = vpack.c.bf16 %v6176_v50, %v6175_v24  ;;  %v10241_v27 = vpop.permute.xlu1 %10240  ;;  %v10226_v58 = vpop.permute.xlu0 %10225  ;;  %v16297_v50 = vld [vmem:[#allocation111_spill] sm:$0xff] }
 0x90b   : > { %v10243_v14 = vunpack.i.h.bf16 %v10241_v27  ;;  %v10242_v1 = vunpack.i.l.bf16 %v10241_v27  ;;  %v10228_v45 = vunpack.i.h.bf16 %v10226_v58  ;;  %v10227_v38 = vunpack.i.l.bf16 %v10226_v58 }
 0x90c   : > { %6462 = vmatmul.mubr.bf16.gmra.mxu1 %v6205_v32  ;;  %v16296_v32 = vld [vmem:[#allocation110_spill] sm:$0xff]  ;;  %v6590_v27 = vlaneseq }
 0x90d   : > { %v6178_v36 = vsel %vm3344_vm0, %v9515_v54, %v10243_v14  ;;  %v6177_v43 = vsel %vm3344_vm0, %v14273_v0, %v10242_v1  ;;  %v6191_v21 = vsel %vm3344_vm0, %v14457_v28, %v10227_v38  ;;  %v6192_v52 = vsel %vm3344_vm0, %v9701_v8, %v10228_v45  ;;  %v16298_v54 = vld [vmem:[#allocation103_spill] sm:$0xff] }
 0x90e   : > { %v6209_v34 = vpack.c.bf16 %v6178_v36, %v6177_v43  ;;  %v10251_v3 = vpop.permute.xlu1 %10250  ;;  %v6208_v59 = vpack.c.bf16 %v6192_v52, %v6191_v21  ;;  %v9527_v28 = vadd.f32 %v14324_v18, %v14321_v30  ;;  %v9533_v30 = vadd.f32 %v14361_v63, %v14358_v20  ;;  %v6524_v45 = vld [vmem:[%s14594_s6] sm:$0xff]  ;;  %v6525_v43 = vld [vmem:[%s14594_s6 + $0x8] sm:$0xff] }
 0x90f   : > { %v10253_v40 = vunpack.i.h.bf16 %v10251_v3  ;;  %v10252_v35 = vunpack.i.l.bf16 %v10251_v3  ;;  %v14591_v58 = vshrl.u32 %v6590_v27, 7  ;;  %v6588_v38 = vld [vmem:[%s16299_s4] sm:$0x3]  ;;  %s9334_s4 = sshll.u32 %s16358_s10, 6 }
 0x910   : > { %6471 = vmatprep.mubr.bf16.mxu1 %v6208_v59  ;;  %v6526_v59 = vld [vmem:[%s14594_s6 + $0x10] sm:$0xff]  ;;  %s8677_s7 = sadd.s32 %s9437_s3, %s9334_s4 }
 0x911   : > { %v6180_v5 = vsel %vm3344_vm0, %v9521_v39, %v10253_v40  ;;  %v6179_v16 = vsel %vm3344_vm0, %v14295_v44, %v10252_v35  ;;  %v14597_v14 = vsub.s32 0, %v14591_v58  ;;  %v14600_v1 = vsub.s32 1, %v14591_v58  ;;  %v6527_v35 = vld [vmem:[%s14594_s6 + $0x18] sm:$0xff]  ;;  %s9335_s19 = sshll.u32 %s8677_s7, 7 }
 0x912   : > { %v6211_v0 = vpack.c.bf16 %v6180_v5, %v6179_v16  ;;  %v10261_v29 = vpop.permute.xlu1 %10260 }
 0x913   : > { %v10263_v46 = vunpack.i.h.bf16 %v10261_v29  ;;  %v10262_v33 = vunpack.i.l.bf16 %v10261_v29  ;;  %v10236_v15 = vpop.permute.xlu0 %10235  ;;  %v14608_v52 = vrot.slane %v6588_v38, %v14597_v14 }
 0x914   : > { %v10238_v10 = vunpack.i.h.bf16 %v10236_v15  ;;  %v10237_v9 = vunpack.i.l.bf16 %v10236_v15  ;;  %6472 = vmatmul.mubr.bf16.gmra.mxu1 %v6207_v12 }
 0x915   : > { %v6182_v22 = vsel %vm3344_vm0, %v9527_v28, %v10263_v46  ;;  %v6181_v60 = vsel %vm3344_vm0, %v14315_v6, %v10262_v33 }
 0x916   : > { %v6213_v62 = vpack.c.bf16 %v6182_v22, %v6181_v60  ;;  %v10271_v7 = vpop.permute.xlu1 %10270  ;;  %v6193_v44 = vsel %vm3344_vm0, %v14463_v47, %v10237_v9  ;;  %v6194_v51 = vsel %vm3344_vm0, %v14465_v55, %v10238_v10  ;;  %v16293_v47 = vld [vmem:[#allocation100_spill] sm:$0xff] }
 0x917   : > { %v10273_v18 = vunpack.i.h.bf16 %v10271_v7  ;;  %v10272_v48 = vunpack.i.l.bf16 %v10271_v7  ;;  %v6210_v53 = vpack.c.bf16 %v6194_v51, %v6193_v44  ;;  %v6528_v10 = vld [vmem:[%s14594_s6 + $0x20] sm:$0xff]  ;;  %v6529_v22 = vld [vmem:[%s14594_s6 + $0x28] sm:$0xff]  ;;  %v6530_v44 = vld [vmem:[%s14594_s6 + $0x30] sm:$0xff] }
 0x919   : > { %v6184_v13 = vsel %vm3344_vm0, %v9533_v30, %v10273_v18  ;;  %v6183_v56 = vsel %vm3344_vm0, %v16292_v49, %v10272_v48  ;;  %6481 = vmatprep.mubr.bf16.mxu1 %v6210_v53  ;;  %v6531_v18 = vld [vmem:[%s14594_s6 + $0x38] sm:$0xff] }
 0x91a   : > { %v6215_v6 = vpack.c.bf16 %v6184_v13, %v6183_v56  ;;  %v6532_v56 = vld [vmem:[%s14594_s6 + $0x40] sm:$0xff] }
 0x91b   : > { %v10246_v41 = vpop.permute.xlu0 %10245 }
 0x91c   : > { %v10248_v42 = vunpack.i.h.bf16 %v10246_v41  ;;  %v10247_v17 = vunpack.i.l.bf16 %v10246_v41  ;;  %6482 = vmatmul.mubr.bf16.gmra.mxu1 %v6209_v34  ;;  %v14611_v34 = vrot.slane %v6588_v38, %v14600_v1 }
 0x91e   : > { %v6195_v55 = vsel %vm3344_vm0, %v16293_v47, %v10247_v17  ;;  %v6196_v20 = vsel %vm3344_vm0, %v16294_v2, %v10248_v42  ;;  %v6533_v17 = vld [vmem:[%s14594_s6 + $0x48] sm:$0xff] }
 0x91f   : > { %v6212_v63 = vpack.c.bf16 %v6196_v20, %v6195_v55 }
 0x921   : > { %6491 = vmatprep.mubr.bf16.mxu1 %v6212_v63  ;;  %v6534_v63 = vld [vmem:[%s14594_s6 + $0x50] sm:$0xff] }
 0x923   : > { %v10256_v37 = vpop.permute.xlu0 %10255 }
 0x924   : > { %v10258_v26 = vunpack.i.h.bf16 %v10256_v37  ;;  %v10257_v4 = vunpack.i.l.bf16 %v10256_v37  ;;  %6492 = vmatmul.mubr.bf16.gmra.mxu1 %v6211_v0 }
 0x926   : > { %v6197_v61 = vsel %vm3344_vm0, %v16295_v23, %v10257_v4  ;;  %v6198_v11 = vsel %vm3344_vm0, %v16296_v32, %v10258_v26  ;;  %v6535_v23 = vld [vmem:[%s14594_s6 + $0x58] sm:$0xff] }
 0x927   : > { %v6214_v31 = vpack.c.bf16 %v6198_v11, %v6197_v61 }
 0x929   : > { %6501 = vmatprep.mubr.bf16.mxu1 %v6214_v31 }
 0x92b   : > { %v10266_v19 = vpop.permute.xlu0 %10265 }
 0x92c   : > { %v10268_v57 = vunpack.i.h.bf16 %v10266_v19  ;;  %v10267_v25 = vunpack.i.l.bf16 %v10266_v19  ;;  %6502 = vmatmul.mubr.bf16.gmra.mxu1 %v6213_v62  ;;  %v6536_v19 = vld [vmem:[%s14594_s6 + $0x60] sm:$0xff] }
 0x92e   : > { %v6199_v24 = vsel %vm3344_vm0, %v16297_v50, %v10267_v25  ;;  %v6200_v8 = vsel %vm3344_vm0, %v16298_v54, %v10268_v57 }
 0x92f   : > { %v6216_v12 = vpack.c.bf16 %v6200_v8, %v6199_v24  ;;  %v6537_v24 = vld [vmem:[%s14594_s6 + $0x68] sm:$0xff] }
 0x931   : > { %6511 = vmatprep.mubr.bf16.mxu1 %v6216_v12 }
 0x934   : > { %6512 = vmatmul.mubr.bf16.gmra.mxu1 %v6215_v6 }
 0x9b9   : > { %v6443_v36 = vpop.f32.mrf.mxu1 }
 0x9ba   : > { %v6556_v21 = vadd.f32 %v6524_v45, %v6443_v36  ;;  %v6538_v45 = vld [vmem:[%s14594_s6 + $0x70] sm:$0xff] }
 0x9bb   : > { %v6445_v3 = vpop.f32.mrf.mxu1 }
 0x9bc   : > { %v6557_v39 = vadd.f32 %v6525_v43, %v6445_v3  ;;  %v14616_v5 = vadd.f32 %v14608_v52, %v6556_v21  ;;  %v6539_v21 = vld [vmem:[%s14594_s6 + $0x78] sm:$0xff] }
 0x9bd   : > { %v6447_v40 = vpop.f32.mrf.mxu1 }
 0x9be   : > { %v14619_v16 = vadd.f32 %v14611_v34, %v6557_v39  ;;  %v6558_v0 = vadd.f32 %v6526_v59, %v6447_v40 }
 0x9bf   : > { %v6449_v29 = vpop.f32.mrf.mxu1 }
 0x9c0   : > { %v6559_v28 = vadd.f32 %v6527_v35, %v6449_v29  ;;  %v6634_v46 = vadd.f32 %v14619_v16, %v14616_v5  ;;  %v14624_v33 = vadd.f32 %v14608_v52, %v6558_v0  ;;  %v6540_v35 = vld [vmem:[%s14594_s6 + $0x80] sm:$0xff] }
 0x9c2   : > { %v14627_v15 = vadd.f32 %v14611_v34, %v6559_v28  ;;  %6635 = vadd.xlane.f32.xlu0 %v6634_v46  ;;  %v6541_v46 = vld [vmem:[%s14594_s6 + $0x88] sm:$0xff] }
 0x9c4   : > { %16300 = vst [vmem:[#allocation116_spill] sm:$0xff] %v14627_v15  ;;  %v6453_v9 = vpop.f32.mrf.mxu1  ;;  %v6637_v60 = vadd.f32 %v14627_v15, %v14624_v33 }
 0x9c5   : > { %v6560_v62 = vadd.f32 %v6528_v10, %v6453_v9 }
 0x9c6   : > { %v6455_v7 = vpop.f32.mrf.mxu1  ;;  %6638 = vadd.xlane.f32.xlu1 %v6637_v60 }
 0x9c7   : > { %v6561_v51 = vadd.f32 %v6529_v22, %v6455_v7  ;;  %v14636_v48 = vadd.f32 %v14608_v52, %v6560_v62  ;;  %v6542_v62 = vld [vmem:[%s14594_s6 + $0x90] sm:$0xff] }
 0x9c8   : > { %v6457_v30 = vpop.f32.mrf.mxu1 }
 0x9c9   : > { %16301 = vst [vmem:[#allocation106_spill] sm:$0xff] %v14636_v48  ;;  %v14639_v53 = vadd.f32 %v14611_v34, %v6561_v51  ;;  %v6562_v13 = vadd.f32 %v6530_v44, %v6457_v30  ;;  %v6543_v30 = vld [vmem:[%s14594_s6 + $0x98] sm:$0xff] }
 0x9ca   : > { %v6459_v49 = vpop.f32.mrf.mxu1 }
 0x9cb   : > { %16302 = vst [vmem:[#allocation108_spill] sm:$0xff] %v14639_v53  ;;  %v6563_v6 = vadd.f32 %v6531_v18, %v6459_v49  ;;  %v6640_v41 = vadd.f32 %v14639_v53, %v14636_v48  ;;  %v14646_v47 = vadd.f32 %v14608_v52, %v6562_v13 }
 0x9cc   : > { %v6463_v42 = vpop.f32.mrf.mxu1 }
 0x9cd   : > { %16303 = vst [vmem:[#allocation112_spill] sm:$0xff] %v14646_v47  ;;  %v14649_v55 = vadd.f32 %v14611_v34, %v6563_v6  ;;  %v6564_v2 = vadd.f32 %v6532_v56, %v6463_v42  ;;  %6641 = vadd.xlane.f32.xlu0 %v6640_v41  ;;  %v6544_v6 = vld [vmem:[%s14594_s6 + $0xa0] sm:$0xff] }
 0x9ce   : > { %v6465_v20 = vpop.f32.mrf.mxu1 }
 0x9cf   : > { %16304 = vst [vmem:[#allocation109_spill] sm:$0xff] %v14649_v55  ;;  %v6565_v37 = vadd.f32 %v6533_v17, %v6465_v20  ;;  %v6643_v26 = vadd.f32 %v14649_v55, %v14646_v47  ;;  %v14656_v61 = vadd.f32 %v14608_v52, %v6564_v2  ;;  %v6545_v2 = vld [vmem:[%s14594_s6 + $0xa8] sm:$0xff] }
 0x9d0   : > { %v6467_v4 = vpop.f32.mrf.mxu1 }
 0x9d1   : > { %16305 = vst [vmem:[#allocation115_spill] sm:$0xff] %v14656_v61  ;;  %v14659_v32 = vadd.f32 %v14611_v34, %v6565_v37  ;;  %v6566_v11 = vadd.f32 %v6534_v63, %v6467_v4  ;;  %6644 = vadd.xlane.f32.xlu0 %v6643_v26  ;;  %v6546_v4 = vld [vmem:[%s14594_s6 + $0xb0] sm:$0xff] }
 0x9d2   : > { %v6469_v31 = vpop.f32.mrf.mxu1 }
 0x9d3   : > { %16306 = vst [vmem:[#allocation119_spill] sm:$0xff] %v14659_v32  ;;  %v6567_v57 = vadd.f32 %v6535_v23, %v6469_v31  ;;  %v6646_v25 = vadd.f32 %v14659_v32, %v14656_v61  ;;  %v14666_v54 = vadd.f32 %v14608_v52, %v6566_v11 }
 0x9d4   : > { %v6473_v50 = vpop.f32.mrf.mxu1 }
 0x9d5   : > { %16307 = vst [vmem:[#allocation107_spill] sm:$0xff] %v14666_v54  ;;  %v14669_v8 = vadd.f32 %v14611_v34, %v6567_v57  ;;  %v6568_v12 = vadd.f32 %v6536_v19, %v6473_v50  ;;  %6647 = vadd.xlane.f32.xlu1 %v6646_v25  ;;  %v6547_v19 = vld [vmem:[%s14594_s6 + $0xb8] sm:$0xff] }
 0x9d6   : > { %v6475_v27 = vpop.f32.mrf.mxu1 }
 0x9d7   : > { %16308 = vst [vmem:[#allocation114_spill] sm:$0xff] %v14669_v8  ;;  %v6569_v38 = vadd.f32 %v6537_v24, %v6475_v27  ;;  %v6649_v36 = vadd.f32 %v14669_v8, %v14666_v54  ;;  %v14676_v3 = vadd.f32 %v14608_v52, %v6568_v12  ;;  %v6548_v12 = vld [vmem:[%s14594_s6 + $0xc0] sm:$0xff] }
 0x9d8   : > { %v6477_v43 = vpop.f32.mrf.mxu1 }
 0x9d9   : > { %16309 = vst [vmem:[#allocation120_spill] sm:$0xff] %v14676_v3  ;;  %v14679_v59 = vadd.f32 %v14611_v34, %v6569_v38  ;;  %v6570_v39 = vadd.f32 %v6538_v45, %v6477_v43  ;;  %6650 = vadd.xlane.f32.xlu0 %v6649_v36  ;;  %v6549_v36 = vld [vmem:[%s14594_s6 + $0xc8] sm:$0xff] }
 0x9da   : > { %v6479_v40 = vpop.f32.mrf.mxu1 }
 0x9db   : > { %16310 = vst [vmem:[#allocation113_spill] sm:$0xff] %v14679_v59  ;;  %v6571_v0 = vadd.f32 %v6539_v21, %v6479_v40  ;;  %v6652_v29 = vadd.f32 %v14679_v59, %v14676_v3  ;;  %v14686_v10 = vadd.f32 %v14608_v52, %v6570_v39 }
 0x9dc   : > { %v6483_v28 = vpop.f32.mrf.mxu1 }
 0x9dd   : > { %16311 = vst [vmem:[#allocation117_spill] sm:$0xff] %v14686_v10  ;;  %v14689_v9 = vadd.f32 %v14611_v34, %v6571_v0  ;;  %v6572_v22 = vadd.f32 %v6540_v35, %v6483_v28  ;;  %6653 = vadd.xlane.f32.xlu1 %v6652_v29  ;;  %v6550_v35 = vld [vmem:[%s14594_s6 + $0xd0] sm:$0xff] }
 0x9de   : > { %v6485_v60 = vpop.f32.mrf.mxu1 }
 0x9df   : > { %16312 = vst [vmem:[#allocation127_spill] sm:$0xff] %v14689_v9  ;;  %v6573_v7 = vadd.f32 %v6541_v46, %v6485_v60  ;;  %v6655_v44 = vadd.f32 %v14689_v9, %v14686_v10  ;;  %v14696_v18 = vadd.f32 %v14608_v52, %v6572_v22  ;;  %v6551_v46 = vld [vmem:[%s14594_s6 + $0xd8] sm:$0xff] }
 0x9e0   : > { %v6487_v51 = vpop.f32.mrf.mxu1 }
 0x9e1   : > { %16313 = vst [vmem:[#allocation128_spill] sm:$0xff] %v14696_v18  ;;  %v14699_v13 = vadd.f32 %v14611_v34, %v6573_v7  ;;  %v6574_v49 = vadd.f32 %v6542_v62, %v6487_v51  ;;  %6656 = vadd.xlane.f32.xlu0 %v6655_v44  ;;  %v6552_v44 = vld [vmem:[%s14594_s6 + $0xe0] sm:$0xff] }
 0x9e2   : > { %v6489_v56 = vpop.f32.mrf.mxu1 }
 0x9e3   : > { %16314 = vst [vmem:[#allocation118_spill] sm:$0xff] %v14699_v13  ;;  %v6575_v41 = vadd.f32 %v6543_v30, %v6489_v56  ;;  %v6658_v42 = vadd.f32 %v14699_v13, %v14696_v18  ;;  %v14706_v20 = vadd.f32 %v14608_v52, %v6574_v49  ;;  %v6553_v56 = vld [vmem:[%s14594_s6 + $0xe8] sm:$0xff] }
 0x9e4   : > { %v6493_v17 = vpop.f32.mrf.mxu1 }
 0x9e5   : > { %16315 = vst [vmem:[#allocation121_spill] sm:$0xff] %v14706_v20  ;;  %v14709_v63 = vadd.f32 %v14611_v34, %v6575_v41  ;;  %v6576_v37 = vadd.f32 %v6544_v6, %v6493_v17  ;;  %6659 = vadd.xlane.f32.xlu1 %v6658_v42 }
 0x9e6   : > { %v6495_v26 = vpop.f32.mrf.mxu1 }
 0x9e7   : > { %16316 = vst [vmem:[#allocation122_spill] sm:$0xff] %v14709_v63  ;;  %v6577_v23 = vadd.f32 %v6545_v2, %v6495_v26  ;;  %v6661_v11 = vadd.f32 %v14709_v63, %v14706_v20  ;;  %v14716_v57 = vadd.f32 %v14608_v52, %v6576_v37  ;;  %v6554_v2 = vld [vmem:[%s14594_s6 + $0xf0] sm:$0xff] }
 0x9e8   : > { %v6497_v31 = vpop.f32.mrf.mxu1 }
 0x9e9   : > { %16317 = vst [vmem:[#allocation123_spill] sm:$0xff] %v14716_v57  ;;  %v14719_v25 = vadd.f32 %v14611_v34, %v6577_v23  ;;  %v6578_v50 = vadd.f32 %v6546_v4, %v6497_v31  ;;  %6662 = vadd.xlane.f32.xlu0 %v6661_v11  ;;  %v6555_v23 = vld [vmem:[%s14594_s6 + $0xf8] sm:$0xff]  ;;  %s16335_s6 = sld [smem:[#allocation173_spill]] }
 0x9ea   : > { %v6499_v24 = vpop.f32.mrf.mxu1 }
 0x9eb   : > { %16318 = vst [vmem:[#allocation124_spill] sm:$0xff] %v14719_v25  ;;  %v6579_v27 = vadd.f32 %v6547_v19, %v6499_v24  ;;  %v6664_v45 = vadd.f32 %v14719_v25, %v14716_v57  ;;  %v14726_v43 = vadd.f32 %v14608_v52, %v6578_v50 }
 0x9ec   : > { %v6503_v38 = vpop.f32.mrf.mxu1 }
 0x9ed   : > { %16319 = vst [vmem:[#allocation125_spill] sm:$0xff] %v14726_v43  ;;  %v14729_v21 = vadd.f32 %v14611_v34, %v6579_v27  ;;  %v6580_v39 = vadd.f32 %v6548_v12, %v6503_v38  ;;  %6665 = vadd.xlane.f32.xlu1 %v6664_v45 }
 0x9ee   : > { %v6505_v40 = vpop.f32.mrf.mxu1 }
 0x9ef   : > { %16320 = vst [vmem:[#allocation126_spill] sm:$0xff] %v14729_v21  ;;  %v6581_v0 = vadd.f32 %v6549_v36, %v6505_v40  ;;  %v6667_v29 = vadd.f32 %v14729_v21, %v14726_v43  ;;  %v14736_v22 = vadd.f32 %v14608_v52, %v6580_v39  ;;  %v10458_v36 = vld [vmem:[#allocation16 + $0xe0] ss:$16 sps:$4 sm:$0xff]   ;;  %v10460_v39 = vld [vmem:[#allocation16 + $0xe4] ss:$16 sps:$4 sm:$0xff]  }
 0x9f0   : > { %v6507_v28 = vpop.f32.mrf.mxu1  ;;  %v10461_v40 = vld [vmem:[#allocation16 + $0xe8] ss:$16 sps:$4 sm:$0xff]   ;;  %7399 = vmatprep.subr.bf16.mxu0 %v10460_v39  ;;  %v10500_v39 = vld [vmem:[#allocation16] ss:$16 sps:$4 sm:$0xff]  }
 0x9f1   : > { %16321 = vst [vmem:[#allocation129_spill] sm:$0xff] %v14736_v22  ;;  %v14739_v60 = vadd.f32 %v14611_v34, %v6581_v0  ;;  %v6582_v62 = vadd.f32 %v6550_v35, %v6507_v28  ;;  %6668 = vadd.xlane.f32.xlu0 %v6667_v29  ;;  %v10463_v35 = vld [vmem:[#allocation16 + $0xec] ss:$16 sps:$4 sm:$0xff]   ;;  %v10466_v0 = vld [vmem:[#allocation16 + $0xc4] ss:$16 sps:$4 sm:$0xff]   ;;  %7400 = vmatpush1.bf16.msra.mxu0 %v10458_v36 }
 0x9f2   : > { %v6509_v7 = vpop.f32.mrf.mxu1  ;;  %7512 = vmatprep.subr.bf16.mxu1 %v10463_v35  ;;  %v10464_v29 = vld [vmem:[#allocation16 + $0xc0] ss:$16 sps:$4 sm:$0xff]   ;;  %7401 = vmatprep.subr.bf16.mxu0 %v10466_v0  ;;  %v10467_v28 = vld [vmem:[#allocation16 + $0xc8] ss:$16 sps:$4 sm:$0xff]   ;;  %v10505_v36 = vld [vmem:[#allocation16 + $0xc] ss:$16 sps:$4 sm:$0xff]  }
 0x9f3   : > { %16322 = vst [vmem:[#allocation130_spill] sm:$0xff] %v14739_v60  ;;  %v6583_v51 = vadd.f32 %v6551_v46, %v6509_v7  ;;  %v6670_v30 = vadd.f32 %v14739_v60, %v14736_v22  ;;  %v14746_v6 = vadd.f32 %v14608_v52, %v6582_v62  ;;  %7513 = vmatpush1.bf16.msra.mxu1 %v10461_v40  ;;  %v10475_v46 = vld [vmem:[#allocation16 + $0xac] ss:$16 sps:$4 sm:$0xff]   ;;  %v10470_v62 = vld [vmem:[#allocation16 + $0xa0] ss:$16 sps:$4 sm:$0xff]  }
 0x9f4   : > { %v6513_v49 = vpop.f32.mrf.mxu1  ;;  %v10473_v7 = vld [vmem:[#allocation16 + $0xa8] ss:$16 sps:$4 sm:$0xff]   ;;  %v10508_v35 = vld [vmem:[#allocation16 + $0x1e4] ss:$16 sps:$4 sm:$0xff]   ;;  %v10511_v0 = vld [vmem:[#allocation16 + $0x1ec] ss:$16 sps:$4 sm:$0xff]  }
 0x9f5   : > { %16323 = vst [vmem:[#allocation131_spill] sm:$0xff] %v14746_v6  ;;  %v14749_v41 = vadd.f32 %v14611_v34, %v6583_v51  ;;  %v6584_v42 = vadd.f32 %v6552_v44, %v6513_v49  ;;  %6671 = vadd.xlane.f32.xlu1 %v6670_v30  ;;  %7402 = vmatpush1.bf16.msra.mxu0 %v10464_v29  ;;  %v10478_v44 = vld [vmem:[#allocation16 + $0x84] ss:$16 sps:$4 sm:$0xff]   ;;  %v10481_v51 = vld [vmem:[#allocation16 + $0x8c] ss:$16 sps:$4 sm:$0xff]  }
 0x9f6   : > { %v6515_v17 = vpop.f32.mrf.mxu1  ;;  %v10476_v30 = vld [vmem:[#allocation16 + $0x80] ss:$16 sps:$4 sm:$0xff]   ;;  %v10479_v49 = vld [vmem:[#allocation16 + $0x88] ss:$16 sps:$4 sm:$0xff]  }
 0x9f7   : > { %16324 = vst [vmem:[#allocation132_spill] sm:$0xff] %v14749_v41  ;;  %v6585_v37 = vadd.f32 %v6553_v56, %v6515_v17  ;;  %v6673_v26 = vadd.f32 %v14749_v41, %v14746_v6  ;;  %v14756_v11 = vadd.f32 %v14608_v52, %v6584_v42  ;;  %v10484_v56 = vld [vmem:[#allocation16 + $0x64] ss:$16 sps:$4 sm:$0xff]   ;;  %v10487_v42 = vld [vmem:[#allocation16 + $0x6c] ss:$16 sps:$4 sm:$0xff]  }
 0x9f8   : > { %v6517_v4 = vpop.f32.mrf.mxu1  ;;  %v10482_v17 = vld [vmem:[#allocation16 + $0x60] ss:$16 sps:$4 sm:$0xff]   ;;  %v10503_v40 = vld [vmem:[#allocation16 + $0x8] ss:$16 sps:$4 sm:$0xff]  }
 0x9f9   : > { %16325 = vst [vmem:[#allocation133_spill] sm:$0xff] %v14756_v11  ;;  %v14759_v31 = vadd.f32 %v14611_v34, %v6585_v37  ;;  %v6586_v19 = vadd.f32 %v6554_v2, %v6517_v4  ;;  %6674 = vadd.xlane.f32.xlu0 %v6673_v26  ;;  %v10485_v2 = vld [vmem:[#allocation16 + $0x68] ss:$16 sps:$4 sm:$0xff]   ;;  %v10490_v37 = vld [vmem:[#allocation16 + $0x44] ss:$16 sps:$4 sm:$0xff]  }
 0x9fa   : > { %v6519_v50 = vpop.f32.mrf.mxu1  ;;  %v10493_v26 = vld [vmem:[#allocation16 + $0x4c] ss:$16 sps:$4 sm:$0xff]   ;;  %v10488_v4 = vld [vmem:[#allocation16 + $0x40] ss:$16 sps:$4 sm:$0xff]   ;;  %v10509_v29 = vld [vmem:[#allocation16 + $0x1e8] ss:$16 sps:$4 sm:$0xff]  }
 0x9fb   : > { %16326 = vst [vmem:[#allocation136_spill] sm:$0xff] %v14759_v31  ;;  %v14762_v24 = vadd.f32 %v14608_v52, %v6586_v19  ;;  %v6587_v12 = vadd.f32 %v6555_v23, %v6519_v50  ;;  %v6676_v27 = vadd.f32 %v14759_v31, %v14756_v11  ;;  %v10469_v52 = vld [vmem:[#allocation16 + $0xcc] ss:$16 sps:$4 sm:$0xff]   ;;  %v10491_v23 = vld [vmem:[#allocation16 + $0x48] ss:$16 sps:$4 sm:$0xff]  }
 0x9fc   : > { %7514 = vmatprep.subr.bf16.mxu1 %v10469_v52  ;;  %v10496_v19 = vld [vmem:[#allocation16 + $0x24] ss:$16 sps:$4 sm:$0xff]   ;;  %v10499_v50 = vld [vmem:[#allocation16 + $0x2c] ss:$16 sps:$4 sm:$0xff]   ;;  %v10506_v52 = vld [vmem:[#allocation16 + $0x1e0] ss:$16 sps:$4 sm:$0xff]  }
 0x9fd   : > { %16327 = vst [vmem:[#allocation134_spill] sm:$0xff] %v14762_v24  ;;  %v14767_v45 = vadd.f32 %v14611_v34, %v6587_v12  ;;  %6677 = vadd.xlane.f32.xlu1 %v6676_v27  ;;  %v10472_v34 = vld [vmem:[#allocation16 + $0xa4] ss:$16 sps:$4 sm:$0xff]   ;;  %7515 = vmatpush1.bf16.msra.mxu1 %v10467_v28  ;;  %v10494_v12 = vld [vmem:[#allocation16 + $0x20] ss:$16 sps:$4 sm:$0xff]  }
 0x9fe   : > { %7403 = vmatprep.subr.bf16.mxu0 %v10472_v34  ;;  %7516 = vmatprep.subr.bf16.mxu1 %v10475_v46  ;;  %v10497_v27 = vld [vmem:[#allocation16 + $0x28] ss:$16 sps:$4 sm:$0xff]  }
 0x9ff   : > { %16328 = vst [vmem:[#allocation142_spill] sm:$0xff] %v14767_v45  ;;  %v6679_v38 = vadd.f32 %v14767_v45, %v14762_v24  ;;  %7404 = vmatpush1.bf16.msra.mxu0 %v10470_v62 }
 0xa00   : > { %7405 = vmatprep.subr.bf16.mxu0 %v10478_v44 }
 0xa01   : > { %6680 = vadd.xlane.f32.xlu0 %v6679_v38  ;;  %7517 = vmatpush1.bf16.msra.mxu1 %v10473_v7  ;;  %v10502_v38 = vld [vmem:[#allocation16 + $0x4] ss:$16 sps:$4 sm:$0xff]  }
 0xa02   : > { %7518 = vmatprep.subr.bf16.mxu1 %v10481_v51 }
 0xa03   : > { %7406 = vmatpush1.bf16.msra.mxu0 %v10476_v30 }
 0xa04   : > { %7407 = vmatprep.subr.bf16.mxu0 %v10484_v56 }
 0xa05   : > { %7519 = vmatpush1.bf16.msra.mxu1 %v10479_v49 }
 0xa06   : > { %7520 = vmatprep.subr.bf16.mxu1 %v10487_v42 }
 0xa07   : > { %7408 = vmatpush1.bf16.msra.mxu0 %v10482_v17 }
 0xa08   : > { %7409 = vmatprep.subr.bf16.mxu0 %v10490_v37 }
 0xa09   : > { %7521 = vmatpush1.bf16.msra.mxu1 %v10485_v2 }
 0xa0a   : > { %7522 = vmatprep.subr.bf16.mxu1 %v10493_v26 }
 0xa0b   : > { %7410 = vmatpush1.bf16.msra.mxu0 %v10488_v4 }
 0xa0c   : > { %7411 = vmatprep.subr.bf16.mxu0 %v10496_v19 }
 0xa0d   : > { %7523 = vmatpush1.bf16.msra.mxu1 %v10491_v23 }
 0xa0e   : > { %7524 = vmatprep.subr.bf16.mxu1 %v10499_v50 }
 0xa0f   : > { %7412 = vmatpush1.bf16.msra.mxu0 %v10494_v12 }
 0xa10   : > { %7413 = vmatprep.subr.bf16.mxu0 %v10502_v38 }
 0xa11   : > { %7525 = vmatpush1.bf16.msra.mxu1 %v10497_v27 }
 0xa12   : > { %7526 = vmatprep.subr.bf16.mxu1 %v10505_v36 }
 0xa13   : > { %7414 = vmatpush1.bf16.msra.mxu0 %v10500_v39 }
 0xa14   : > { %7415 = vmatprep.subr.bf16.mxu0 %v10508_v35 }
 0xa15   : > { %7527 = vmatpush1.bf16.msra.mxu1 %v10503_v40 }
 0xa16   : > { %7528 = vmatprep.subr.bf16.mxu1 %v10511_v0 }
 0xa17   : > { %7416 = vmatpush2.bf16.msra.mxu0 %v10506_v52 }
 0xa19   : > { %7529 = vmatpush2.bf16.msra.mxu1 %v10509_v29 }
 0xa4b   : > { %v6636_v28 = vpop.xlane.xlu0 %6635 }
 0xa4c   : > { %v6683_v34 = vmul.f32 0.00390625, %v6636_v28 }
 0xa4e   : > { %v14772_v46 = vsub.f32 %v14616_v5, %v6683_v34  ;;  %v14775_v62 = vsub.f32 %v14619_v16, %v6683_v34 }
 0xa4f   : > { %v6639_v7 = vpop.xlane.xlu1 %6638 }
 0xa50   : > { %v6731_v44 = vmul.f32 %v14772_v46, %v14772_v46  ;;  %v6732_v51 = vmul.f32 %v14775_v62, %v14775_v62  ;;  %v6684_v30 = vmul.f32 0.00390625, %v6639_v7 }
 0xa52   : > { %v14782_v49 = vsub.f32 %v14624_v33, %v6684_v30  ;;  %v14785_v56 = vsub.f32 %v14627_v15, %v6684_v30  ;;  %v6763_v42 = vadd.f32 %v6732_v51, %v6731_v44  ;;  %v10514_v51 = vld [vmem:[#allocation16 + $0x1c4] ss:$16 sps:$4 sm:$0xff]   ;;  %v10517_v30 = vld [vmem:[#allocation16 + $0x1cc] ss:$16 sps:$4 sm:$0xff]  }
 0xa53   : > { %7417 = vmatprep.subr.bf16.mxu0 %v10514_v51  ;;  %7530 = vmatprep.subr.bf16.mxu1 %v10517_v30 }
 0xa54   : > { %v6733_v17 = vmul.f32 %v14782_v49, %v14782_v49  ;;  %v6734_v2 = vmul.f32 %v14785_v56, %v14785_v56  ;;  %6764 = vadd.xlane.f32.xlu1 %v6763_v42 }
 0xa56   : > { %v6642_v37 = vpop.xlane.xlu0 %6641  ;;  %v6766_v26 = vadd.f32 %v6734_v2, %v6733_v17 }
 0xa57   : > { %v6685_v4 = vmul.f32 0.00390625, %v6642_v37  ;;  %v10512_v37 = vld [vmem:[#allocation16 + $0x1c0] ss:$16 sps:$4 sm:$0xff]  }
 0xa58   : > { %6767 = vadd.xlane.f32.xlu0 %v6766_v26  ;;  %v10515_v26 = vld [vmem:[#allocation16 + $0x1c8] ss:$16 sps:$4 sm:$0xff]   ;;  %7418 = vmatpush2.bf16.msra.mxu0 %v10512_v37 }
 0xa59   : > { %v14792_v23 = vsub.f32 %v14636_v48, %v6685_v4  ;;  %v14795_v19 = vsub.f32 %v14639_v53, %v6685_v4  ;;  %7531 = vmatpush2.bf16.msra.mxu1 %v10515_v26 }
 0xa5a   : > { %v6645_v50 = vpop.xlane.xlu0 %6644 }
 0xa5b   : > { %v6735_v12 = vmul.f32 %v14792_v23, %v14792_v23  ;;  %v6736_v27 = vmul.f32 %v14795_v19, %v14795_v19  ;;  %v6686_v38 = vmul.f32 0.00390625, %v6645_v50 }
 0xa5d   : > { %v14802_v36 = vsub.f32 %v14646_v47, %v6686_v38  ;;  %v14805_v39 = vsub.f32 %v14649_v55, %v6686_v38  ;;  %v6769_v40 = vadd.f32 %v6736_v27, %v6735_v12  ;;  %v10520_v38 = vld [vmem:[#allocation16 + $0x1a4] ss:$16 sps:$4 sm:$0xff]  }
 0xa5e   : > { %v6648_v35 = vpop.xlane.xlu1 %6647  ;;  %7419 = vmatprep.subr.bf16.mxu0 %v10520_v38  ;;  %v10527_v38 = vld [vmem:[#allocation16 + $0x188] ss:$16 sps:$4 sm:$0xff]  }
 0xa5f   : > { %v6737_v0 = vmul.f32 %v14802_v36, %v14802_v36  ;;  %v6738_v52 = vmul.f32 %v14805_v39, %v14805_v39  ;;  %v6687_v29 = vmul.f32 0.00390625, %v6648_v35  ;;  %6770 = vadd.xlane.f32.xlu1 %v6769_v40  ;;  %v10523_v40 = vld [vmem:[#allocation16 + $0x1ac] ss:$16 sps:$4 sm:$0xff]  }
 0xa60   : > { %7532 = vmatprep.subr.bf16.mxu1 %v10523_v40 }
 0xa61   : > { %v14812_v28 = vsub.f32 %v14656_v61, %v6687_v29  ;;  %v14815_v34 = vsub.f32 %v14659_v32, %v6687_v29  ;;  %v6772_v7 = vadd.f32 %v6738_v52, %v6737_v0  ;;  %v10518_v29 = vld [vmem:[#allocation16 + $0x1a0] ss:$16 sps:$4 sm:$0xff]   ;;  %v10562_v32 = vld [vmem:[#allocation17 + $0x64] ss:$8 sps:$4 sm:$0xff]  }
 0xa62   : > { %v6651_v44 = vpop.xlane.xlu0 %6650  ;;  %7420 = vmatpush2.bf16.msra.mxu0 %v10518_v29  ;;  %v10532_v29 = vld [vmem:[#allocation16 + $0x164] ss:$16 sps:$4 sm:$0xff]  }
 0xa63   : > { %v6739_v42 = vmul.f32 %v14812_v28, %v14812_v28  ;;  %v6740_v17 = vmul.f32 %v14815_v34, %v14815_v34  ;;  %v6688_v2 = vmul.f32 0.00390625, %v6651_v44  ;;  %6773 = vadd.xlane.f32.xlu0 %v6772_v7  ;;  %v10521_v7 = vld [vmem:[#allocation16 + $0x1a8] ss:$16 sps:$4 sm:$0xff]  }
 0xa64   : > { %7533 = vmatpush2.bf16.msra.mxu1 %v10521_v7  ;;  %v10535_v7 = vld [vmem:[#allocation16 + $0x16c] ss:$16 sps:$4 sm:$0xff]  }
 0xa65   : > { %v14822_v4 = vsub.f32 %v14666_v54, %v6688_v2  ;;  %v14825_v50 = vsub.f32 %v14669_v8, %v6688_v2  ;;  %v6775_v12 = vadd.f32 %v6740_v17, %v6739_v42  ;;  %v10526_v17 = vld [vmem:[#allocation16 + $0x184] ss:$16 sps:$4 sm:$0xff]   ;;  %v10529_v2 = vld [vmem:[#allocation16 + $0x18c] ss:$16 sps:$4 sm:$0xff]   ;;  %v10557_v54 = vld [vmem:[#allocation17 + $0x170] ss:$8 sps:$4 sm:$0xff]  }
 0xa66   : > { %v6654_v27 = vpop.xlane.xlu1 %6653  ;;  %7421 = vmatprep.subr.bf16.mxu0 %v10526_v17  ;;  %7534 = vmatprep.subr.bf16.mxu1 %v10529_v2  ;;  %v10530_v2 = vld [vmem:[#allocation16 + $0x160] ss:$16 sps:$4 sm:$0xff]  }
 0xa67   : > { %v6741_v35 = vmul.f32 %v14822_v4, %v14822_v4  ;;  %v6742_v0 = vmul.f32 %v14825_v50, %v14825_v50  ;;  %v6689_v52 = vmul.f32 0.00390625, %v6654_v27  ;;  %6776 = vadd.xlane.f32.xlu1 %v6775_v12  ;;  %v10524_v27 = vld [vmem:[#allocation16 + $0x180] ss:$16 sps:$4 sm:$0xff]  }
 0xa68   : > { %7422 = vmatpush2.bf16.msra.mxu0 %v10524_v27  ;;  %7535 = vmatpush2.bf16.msra.mxu1 %v10527_v38  ;;  %v10538_v38 = vld [vmem:[#allocation16 + $0x144] ss:$16 sps:$4 sm:$0xff]  }
 0xa69   : > { %v14832_v44 = vsub.f32 %v14676_v3, %v6689_v52  ;;  %v14835_v51 = vsub.f32 %v14679_v59, %v6689_v52  ;;  %v6778_v30 = vadd.f32 %v6742_v0, %v6741_v35  ;;  %7423 = vmatprep.subr.bf16.mxu0 %v10532_v29  ;;  %7536 = vmatprep.subr.bf16.mxu1 %v10535_v7  ;;  %v10536_v7 = vld [vmem:[#allocation16 + $0x140] ss:$16 sps:$4 sm:$0xff]  }
 0xa6a   : > { %v6657_v42 = vpop.xlane.xlu0 %6656 }
 0xa6b   : > { %v6743_v37 = vmul.f32 %v14832_v44, %v14832_v44  ;;  %v6744_v26 = vmul.f32 %v14835_v51, %v14835_v51  ;;  %v6690_v12 = vmul.f32 0.00390625, %v6657_v42  ;;  %6779 = vadd.xlane.f32.xlu0 %v6778_v30 }
 0xa6c   : > { %7424 = vmatpush2.bf16.msra.mxu0 %v10530_v2  ;;  %v10544_v2 = vld [vmem:[#allocation16 + $0x124] ss:$16 sps:$4 sm:$0xff]  }
 0xa6d   : > { %v14842_v40 = vsub.f32 %v14686_v10, %v6690_v12  ;;  %v14845_v35 = vsub.f32 %v14689_v9, %v6690_v12  ;;  %v6781_v0 = vadd.f32 %v6744_v26, %v6743_v37  ;;  %v10533_v10 = vld [vmem:[#allocation16 + $0x168] ss:$16 sps:$4 sm:$0xff]   ;;  %v10541_v9 = vld [vmem:[#allocation16 + $0x14c] ss:$16 sps:$4 sm:$0xff]   ;;  %7425 = vmatprep.subr.bf16.mxu0 %v10538_v38 }
 0xa6e   : > { %v6660_v52 = vpop.xlane.xlu1 %6659  ;;  %7537 = vmatpush2.bf16.msra.mxu1 %v10533_v10 }
 0xa6f   : > { %v6745_v42 = vmul.f32 %v14842_v40, %v14842_v40  ;;  %v6746_v30 = vmul.f32 %v14845_v35, %v14845_v35  ;;  %v6691_v17 = vmul.f32 0.00390625, %v6660_v52  ;;  %6782 = vadd.xlane.f32.xlu1 %v6781_v0  ;;  %7538 = vmatprep.subr.bf16.mxu1 %v10541_v9  ;;  %v10542_v9 = vld [vmem:[#allocation16 + $0x120] ss:$16 sps:$4 sm:$0xff]  }
 0xa70   : > { %7426 = vmatpush2.bf16.msra.mxu0 %v10536_v7  ;;  %v10550_v7 = vld [vmem:[#allocation16 + $0x104] ss:$16 sps:$4 sm:$0xff]  }
 0xa71   : > { %v14852_v12 = vsub.f32 %v14696_v18, %v6691_v17  ;;  %v14855_v37 = vsub.f32 %v14699_v13, %v6691_v17  ;;  %v6784_v26 = vadd.f32 %v6746_v30, %v6745_v42  ;;  %v10539_v18 = vld [vmem:[#allocation16 + $0x148] ss:$16 sps:$4 sm:$0xff]   ;;  %v10547_v13 = vld [vmem:[#allocation16 + $0x12c] ss:$16 sps:$4 sm:$0xff]   ;;  %7427 = vmatprep.subr.bf16.mxu0 %v10544_v2 }
 0xa72   : > { %v6663_v27 = vpop.xlane.xlu0 %6662  ;;  %7539 = vmatpush2.bf16.msra.mxu1 %v10539_v18 }
 0xa73   : > { %v6747_v52 = vmul.f32 %v14852_v12, %v14852_v12  ;;  %v6748_v0 = vmul.f32 %v14855_v37, %v14855_v37  ;;  %v6692_v29 = vmul.f32 0.00390625, %v6663_v27  ;;  %6785 = vadd.xlane.f32.xlu0 %v6784_v26  ;;  %7540 = vmatprep.subr.bf16.mxu1 %v10547_v13  ;;  %v10548_v13 = vld [vmem:[#allocation16 + $0x100] ss:$16 sps:$4 sm:$0xff]  }
 0xa74   : > { %7428 = vmatpush2.bf16.msra.mxu0 %v10542_v9 }
 0xa75   : > { %v14862_v17 = vsub.f32 %v14706_v20, %v6692_v29  ;;  %v14865_v10 = vsub.f32 %v14709_v63, %v6692_v29  ;;  %v6787_v42 = vadd.f32 %v6748_v0, %v6747_v52  ;;  %v10545_v20 = vld [vmem:[#allocation16 + $0x128] ss:$16 sps:$4 sm:$0xff]   ;;  %v10553_v63 = vld [vmem:[#allocation16 + $0x10c] ss:$16 sps:$4 sm:$0xff]   ;;  %7429 = vmatprep.subr.bf16.mxu0 %v10550_v7 }
 0xa76   : > { %v6666_v30 = vpop.xlane.xlu1 %6665  ;;  %7541 = vmatpush2.bf16.msra.mxu1 %v10545_v20 }
 0xa77   : > { %v6749_v27 = vmul.f32 %v14862_v17, %v14862_v17  ;;  %v6750_v26 = vmul.f32 %v14865_v10, %v14865_v10  ;;  %v6693_v38 = vmul.f32 0.00390625, %v6666_v30  ;;  %6788 = vadd.xlane.f32.xlu1 %v6787_v42  ;;  %7542 = vmatprep.subr.bf16.mxu1 %v10553_v63 }
 0xa78   : > { %7430 = vmatpush2.bf16.msra.mxu0 %v10548_v13 }
 0xa79   : > { %v14872_v29 = vsub.f32 %v14716_v57, %v6693_v38  ;;  %v14875_v18 = vsub.f32 %v14719_v25, %v6693_v38  ;;  %v6790_v52 = vadd.f32 %v6750_v26, %v6749_v27  ;;  %v10551_v57 = vld [vmem:[#allocation16 + $0x108] ss:$16 sps:$4 sm:$0xff]  }
 0xa7a   : > { %v6669_v0 = vpop.xlane.xlu0 %6668  ;;  %7543 = vmatpush2.bf16.msra.mxu1 %v10551_v57 }
 0xa7b   : > { %v6751_v30 = vmul.f32 %v14872_v29, %v14872_v29  ;;  %v6752_v42 = vmul.f32 %v14875_v18, %v14875_v18  ;;  %v6694_v2 = vmul.f32 0.00390625, %v6669_v0  ;;  %6791 = vadd.xlane.f32.xlu0 %v6790_v52 }
 0xa7d   : > { %v14882_v38 = vsub.f32 %v14726_v43, %v6694_v2  ;;  %v14885_v20 = vsub.f32 %v14729_v21, %v6694_v2  ;;  %v6793_v27 = vadd.f32 %v6752_v42, %v6751_v30 }
 0xa7e   : > { %v6672_v26 = vpop.xlane.xlu1 %6671 }
 0xa7f   : > { %v6753_v9 = vmul.f32 %v14882_v38, %v14882_v38  ;;  %v6754_v52 = vmul.f32 %v14885_v20, %v14885_v20  ;;  %v6695_v0 = vmul.f32 0.00390625, %v6672_v26  ;;  %6794 = vadd.xlane.f32.xlu1 %v6793_v27 }
 0xa81   : > { %v14892_v63 = vsub.f32 %v14736_v22, %v6695_v0  ;;  %v14895_v7 = vsub.f32 %v14739_v60, %v6695_v0  ;;  %v6796_v2 = vadd.f32 %v6754_v52, %v6753_v9 }
 0xa82   : > { %v6675_v21 = vpop.xlane.xlu0 %6674 }
 0xa83   : > { %v6755_v57 = vmul.f32 %v14892_v63, %v14892_v63  ;;  %v6756_v30 = vmul.f32 %v14895_v7, %v14895_v7  ;;  %v6696_v42 = vmul.f32 0.00390625, %v6675_v21  ;;  %6797 = vadd.xlane.f32.xlu0 %v6796_v2 }
 0xa85   : > { %v14902_v13 = vsub.f32 %v14746_v6, %v6696_v42  ;;  %v14905_v27 = vsub.f32 %v14749_v41, %v6696_v42  ;;  %v6799_v26 = vadd.f32 %v6756_v30, %v6755_v57 }
 0xa86   : > { %v6678_v22 = vpop.xlane.xlu1 %6677 }
 0xa87   : > { %v6757_v9 = vmul.f32 %v14902_v13, %v14902_v13  ;;  %v6758_v52 = vmul.f32 %v14905_v27, %v14905_v27  ;;  %v6697_v0 = vmul.f32 0.00390625, %v6678_v22  ;;  %6800 = vadd.xlane.f32.xlu1 %v6799_v26 }
 0xa89   : > { %v14912_v60 = vsub.f32 %v14756_v11, %v6697_v0  ;;  %v14915_v21 = vsub.f32 %v14759_v31, %v6697_v0  ;;  %v6802_v2 = vadd.f32 %v6758_v52, %v6757_v9  ;;  %v10556_v31 = vld [vmem:[#allocation17 + $0x74] ss:$8 sps:$4 sm:$0xff]  }
 0xa8a   : > { %v6681_v6 = vpop.xlane.xlu0 %6680  ;;  %v10559_v11 = vld [vmem:[#allocation17 + $0x174] ss:$8 sps:$4 sm:$0xff]   ;;  %8373 = vmatprep.subr.bf16.mxu0 %v10556_v31 }
 0xa8b   : > { %v6759_v57 = vmul.f32 %v14912_v60, %v14912_v60  ;;  %v6760_v30 = vmul.f32 %v14915_v21, %v14915_v21  ;;  %v6698_v42 = vmul.f32 0.00390625, %v6681_v6  ;;  %6803 = vadd.xlane.f32.xlu0 %v6802_v2  ;;  %8486 = vmatprep.subr.bf16.mxu1 %v10559_v11 }
 0xa8d   : > { %v14922_v41 = vsub.f32 %v14762_v24, %v6698_v42  ;;  %v14925_v22 = vsub.f32 %v14767_v45, %v6698_v42  ;;  %v6805_v26 = vadd.f32 %v6760_v30, %v6759_v57 }
 0xa8f   : > { %v6761_v0 = vmul.f32 %v14922_v41, %v14922_v41  ;;  %v6762_v9 = vmul.f32 %v14925_v22, %v14925_v22  ;;  %6806 = vadd.xlane.f32.xlu1 %v6805_v26  ;;  %v6632_v26 = vld [vmem:[%s16329_s26] sm:$0x3] }
 0xa91   : > { %v6808_v52 = vadd.f32 %v6762_v9, %v6761_v0  ;;  %v14935_v9 = vrot.slane %v6632_v26, %v14597_v14 }
 0xa93   : > { %6809 = vadd.xlane.f32.xlu0 %v6808_v52  ;;  %v6633_v52 = vld [vmem:[%s16330_s28] sm:$0x3]  ;;  %s15628_s28 = scalar_lea.hbm %s16365_s2, %s9335_s19 }
 0xadd   : > { %v6765_v6 = vpop.xlane.xlu1 %6764 }
 0xade   : > { %v6811_v2 = vmul.f32 0.00390625, %v6765_v6  ;;  %v14943_v6 = vrot.slane %v6632_v26, %v14600_v1 }
 0xae0   : > { %v6827_v24 = vadd.f32 1e-05, %v6811_v2 }
 0xae1   : > { %v6768_v43 = vpop.xlane.xlu0 %6767 }
 0xae2   : > { %11034 = vrsqrt.f32 %v6827_v24  ;;  %v6812_v42 = vmul.f32 0.00390625, %v6768_v43 }
 0xae4   : > { %v6828_v57 = vadd.f32 1e-05, %v6812_v42  ;;  %v14946_v42 = vrot.slane %v6633_v52, %v14597_v14 }
 0xae6   : > { %11036 = vrsqrt.f32 %v6828_v57  ;;  %v14949_v57 = vrot.slane %v6633_v52, %v14600_v1 }
 0xae8   : > { %v6771_v30 = vpop.xlane.xlu1 %6770 }
 0xae9   : > { %v6813_v45 = vmul.f32 0.00390625, %v6771_v30 }
 0xaeb   : > { %v6829_v25 = vadd.f32 1e-05, %v6813_v45 }
 0xaec   : > { %v6774_v59 = vpop.xlane.xlu0 %6773 }
 0xaed   : > { %11038 = vrsqrt.f32 %v6829_v25  ;;  %v6814_v0 = vmul.f32 0.00390625, %v6774_v59 }
 0xaef   : > { %v11035_v31 = vpop.eup %11034  ;;  %v6830_v11 = vadd.f32 1e-05, %v6814_v0 }
 0xaf0   : > { %v6859_v24 = vmul.f32 %v11035_v31, %v14772_v46  ;;  %v6777_v43 = vpop.xlane.xlu1 %6776  ;;  %v6860_v45 = vmul.f32 %v11035_v31, %v14775_v62 }
 0xaf1   : > { %11040 = vrsqrt.f32 %v6830_v11  ;;  %v6815_v25 = vmul.f32 0.00390625, %v6777_v43 }
 0xaf2   : > { %v6902_v46 = vmul.f32 %v14935_v9, %v6859_v24  ;;  %v6903_v26 = vmul.f32 %v14943_v6, %v6860_v45 }
 0xaf3   : > { %v11037_v59 = vpop.eup %11036  ;;  %v6831_v2 = vadd.f32 1e-05, %v6815_v25 }
 0xaf4   : > { %v6861_v30 = vmul.f32 %v11037_v59, %v14782_v49  ;;  %v6780_v0 = vpop.xlane.xlu0 %6779  ;;  %v6862_v62 = vmul.f32 %v11037_v59, %v14785_v56  ;;  %v6946_v52 = vadd.f32 %v14949_v57, %v6903_v26  ;;  %v6945_v24 = vadd.f32 %v14946_v42, %v6902_v46  ;;  %v10565_v26 = vld [vmem:[#allocation17 + $0x164] ss:$8 sps:$4 sm:$0xff]  }
 0xaf5   : > { %11042 = vrsqrt.f32 %v6831_v2  ;;  %v6816_v31 = vmul.f32 0.00390625, %v6780_v0  ;;  %v10554_v0 = vld [vmem:[#allocation17 + $0x70] ss:$8 sps:$4 sm:$0xff]  }
 0xaf6   : > { %v6904_v11 = vmul.f32 %v14935_v9, %v6861_v30  ;;  %v6905_v43 = vmul.f32 %v14943_v6, %v6862_v62 }
 0xaf7   : > { %v6832_v25 = vadd.f32 1e-05, %v6816_v31 }
 0xaf8   : > { %v6783_v3 = vpop.xlane.xlu1 %6782  ;;  %v6948_v8 = vadd.f32 %v14949_v57, %v6905_v43  ;;  %v6947_v49 = vadd.f32 %v14946_v42, %v6904_v11 }
 0xaf9   : > { %11044 = vrsqrt.f32 %v6832_v25  ;;  %v6817_v56 = vmul.f32 0.00390625, %v6783_v3  ;;  %v10560_v25 = vld [vmem:[#allocation17 + $0x60] ss:$8 sps:$4 sm:$0xff]  }
 0xafa   : > { %v11039_v59 = vpop.eup %11038  ;;  %v6978_v45 = vpack.c.bf16 %v6948_v8, %v6946_v52  ;;  %v6977_v2 = vpack.c.bf16 %v6947_v49, %v6945_v24  ;;  %v10568_v49 = vld [vmem:[#allocation17 + $0x54] ss:$8 sps:$4 sm:$0xff]  }
 0xafb   : > { %v6833_v30 = vadd.f32 1e-05, %v6817_v56  ;;  %v6864_v62 = vmul.f32 %v11039_v59, %v14795_v19  ;;  %v6863_v31 = vmul.f32 %v11039_v59, %v14792_v23  ;;  %v10563_v19 = vld [vmem:[#allocation17 + $0x160] ss:$8 sps:$4 sm:$0xff]   ;;  %v10571_v56 = vld [vmem:[#allocation17 + $0x154] ss:$8 sps:$4 sm:$0xff]  }
 0xafc   : > { %7431 = vmatprep.mubr.bf16.mxu0 %v6978_v45  ;;  %7544 = vmatprep.mubr.bf16.mxu1 %v6978_v45  ;;  %v6786_v43 = vpop.xlane.xlu0 %6785 }
 0xafd   : > { %11046 = vrsqrt.f32 %v6833_v30  ;;  %v6818_v46 = vmul.f32 0.00390625, %v6786_v43  ;;  %7432 = vmatmul.mubr.bf16.vlgmr.msra.gmra.mxu0 %v6977_v2  ;;  %7545 = vmatmul.mubr.bf16.vlgmr.msra.gmra.mxu1 %v6977_v2  ;;  %v6907_v8 = vmul.f32 %v14943_v6, %v6864_v62  ;;  %v6906_v11 = vmul.f32 %v14935_v9, %v6863_v31 }
 0xafe   : > { %v11041_v3 = vpop.eup %11040  ;;  %8374 = vmatpush1.bf16.msra.mxu0 %v10554_v0  ;;  %8487 = vmatpush1.bf16.msra.mxu1 %v10557_v54 }
 0xaff   : > { %v6834_v52 = vadd.f32 1e-05, %v6818_v46  ;;  %v6866_v23 = vmul.f32 %v11041_v3, %v14805_v39  ;;  %v6865_v24 = vmul.f32 %v11041_v3, %v14802_v36  ;;  %8375 = vmatprep.subr.bf16.mxu0 %v10562_v32  ;;  %8488 = vmatprep.subr.bf16.mxu1 %v10565_v26  ;;  %v6950_v54 = vadd.f32 %v14949_v57, %v6907_v8  ;;  %v10566_v39 = vld [vmem:[#allocation17 + $0x50] ss:$8 sps:$4 sm:$0xff]  }
 0xb00   : > { %v6789_v59 = vpop.xlane.xlu1 %6788  ;;  %v6949_v62 = vadd.f32 %v14946_v42, %v6906_v11  ;;  %v10569_v36 = vld [vmem:[#allocation17 + $0x150] ss:$8 sps:$4 sm:$0xff]  }
 0xb01   : > { %11048 = vrsqrt.f32 %v6834_v52  ;;  %v6819_v45 = vmul.f32 0.00390625, %v6789_v59  ;;  %v6909_v2 = vmul.f32 %v14943_v6, %v6866_v23  ;;  %v6908_v30 = vmul.f32 %v14935_v9, %v6865_v24 }
 0xb02   : > { %v11043_v0 = vpop.eup %11042  ;;  %8376 = vmatpush1.bf16.msra.mxu0 %v10560_v25  ;;  %8489 = vmatpush1.bf16.msra.mxu1 %v10563_v19  ;;  %v10574_v25 = vld [vmem:[#allocation17 + $0x44] ss:$8 sps:$4 sm:$0xff]  }
 0xb03   : > { %v6835_v32 = vadd.f32 1e-05, %v6819_v45  ;;  %v6952_v31 = vadd.f32 %v14949_v57, %v6909_v2  ;;  %v6951_v26 = vadd.f32 %v14946_v42, %v6908_v30  ;;  %v6868_v43 = vmul.f32 %v11043_v0, %v14815_v34  ;;  %8377 = vmatprep.subr.bf16.mxu0 %v10568_v49  ;;  %8490 = vmatprep.subr.bf16.mxu1 %v10571_v56  ;;  %v10577_v19 = vld [vmem:[#allocation17 + $0x144] ss:$8 sps:$4 sm:$0xff]   ;;  %v10572_v45 = vld [vmem:[#allocation17 + $0x40] ss:$8 sps:$4 sm:$0xff]  }
 0xb04   : > { %v6792_v46 = vpop.xlane.xlu0 %6791  ;;  %v6867_v3 = vmul.f32 %v11043_v0, %v14812_v28  ;;  %v10575_v34 = vld [vmem:[#allocation17 + $0x140] ss:$8 sps:$4 sm:$0xff]   ;;  %v10580_v2 = vld [vmem:[#allocation17 + $0x34] ss:$8 sps:$4 sm:$0xff]  }
 0xb05   : > { %11050 = vrsqrt.f32 %v6835_v32  ;;  %v6820_v8 = vmul.f32 0.00390625, %v6792_v46  ;;  %v6980_v52 = vpack.c.bf16 %v6952_v31, %v6950_v54  ;;  %v6979_v11 = vpack.c.bf16 %v6951_v26, %v6949_v62  ;;  %v10583_v30 = vld [vmem:[#allocation17 + $0x134] ss:$8 sps:$4 sm:$0xff]   ;;  %v10581_v31 = vld [vmem:[#allocation17 + $0x130] ss:$8 sps:$4 sm:$0xff]  }
 0xb06   : > { %v11045_v23 = vpop.eup %11044  ;;  %v6911_v24 = vmul.f32 %v14943_v6, %v6868_v43  ;;  %v6910_v59 = vmul.f32 %v14935_v9, %v6867_v3  ;;  %8378 = vmatpush1.bf16.msra.mxu0 %v10566_v39  ;;  %8491 = vmatpush1.bf16.msra.mxu1 %v10569_v36 }
 0xb07   : > { %v6836_v49 = vadd.f32 1e-05, %v6820_v8  ;;  %7441 = vmatprep.mubr.bf16.mxu0 %v6980_v52  ;;  %7554 = vmatprep.mubr.bf16.mxu1 %v6980_v52  ;;  %v6870_v28 = vmul.f32 %v11045_v23, %v14825_v50  ;;  %v6869_v56 = vmul.f32 %v11045_v23, %v14822_v4  ;;  %v10578_v4 = vld [vmem:[#allocation17 + $0x30] ss:$8 sps:$4 sm:$0xff]   ;;  %v10586_v23 = vld [vmem:[#allocation17 + $0x24] ss:$8 sps:$4 sm:$0xff]  }
 0xb08   : > { %v6795_v0 = vpop.xlane.xlu1 %6794  ;;  %7442 = vmatmul.mubr.bf16.gmra.mxu0 %v6979_v11  ;;  %7555 = vmatmul.mubr.bf16.gmra.mxu1 %v6979_v11  ;;  %v6954_v32 = vadd.f32 %v14949_v57, %v6911_v24  ;;  %v6953_v50 = vadd.f32 %v14946_v42, %v6910_v59  ;;  %v10589_v24 = vld [vmem:[#allocation17 + $0x124] ss:$8 sps:$4 sm:$0xff]  }
 0xb09   : > { %11052 = vrsqrt.f32 %v6836_v49  ;;  %v6821_v54 = vmul.f32 0.00390625, %v6795_v0  ;;  %v6913_v62 = vmul.f32 %v14943_v6, %v6870_v28  ;;  %v6912_v39 = vmul.f32 %v14935_v9, %v6869_v56  ;;  %8379 = vmatprep.subr.bf16.mxu0 %v10574_v25  ;;  %8492 = vmatprep.subr.bf16.mxu1 %v10577_v19  ;;  %v10584_v49 = vld [vmem:[#allocation17 + $0x20] ss:$8 sps:$4 sm:$0xff]  }
 0xb0a   : > { %v11047_v36 = vpop.eup %11046  ;;  %8380 = vmatpush1.bf16.msra.mxu0 %v10572_v45  ;;  %8493 = vmatpush1.bf16.msra.mxu1 %v10575_v34 }
 0xb0b   : > { %v6837_v26 = vadd.f32 1e-05, %v6821_v54  ;;  %v6956_v43 = vadd.f32 %v14949_v57, %v6913_v62  ;;  %v6955_v46 = vadd.f32 %v14946_v42, %v6912_v39  ;;  %v6872_v3 = vmul.f32 %v11047_v36, %v14835_v51  ;;  %8381 = vmatprep.subr.bf16.mxu0 %v10580_v2  ;;  %8494 = vmatprep.subr.bf16.mxu1 %v10583_v30  ;;  %v10587_v51 = vld [vmem:[#allocation17 + $0x120] ss:$8 sps:$4 sm:$0xff]   ;;  %v10592_v2 = vld [vmem:[#allocation17 + $0x14] ss:$8 sps:$4 sm:$0xff]  }
 0xb0c   : > { %v6798_v8 = vpop.xlane.xlu0 %6797  ;;  %v6871_v52 = vmul.f32 %v11047_v36, %v14832_v44  ;;  %v10595_v30 = vld [vmem:[#allocation17 + $0x114] ss:$8 sps:$4 sm:$0xff]  }
 0xb0d   : > { %11054 = vrsqrt.f32 %v6837_v26  ;;  %v6822_v11 = vmul.f32 0.00390625, %v6798_v8  ;;  %v6982_v25 = vpack.c.bf16 %v6956_v43, %v6954_v32  ;;  %v6981_v19 = vpack.c.bf16 %v6955_v46, %v6953_v50  ;;  %v10593_v50 = vld [vmem:[#allocation17 + $0x110] ss:$8 sps:$4 sm:$0xff]  }
 0xb0e   : > { %v11049_v59 = vpop.eup %11048  ;;  %v6915_v45 = vmul.f32 %v14943_v6, %v6872_v3  ;;  %v6914_v34 = vmul.f32 %v14935_v9, %v6871_v52  ;;  %8382 = vmatpush1.bf16.msra.mxu0 %v10578_v4  ;;  %8495 = vmatpush1.bf16.msra.mxu1 %v10581_v31 }
 0xb0f   : > { %v6838_v28 = vadd.f32 1e-05, %v6822_v11  ;;  %7451 = vmatprep.mubr.bf16.mxu0 %v6982_v25  ;;  %7564 = vmatprep.mubr.bf16.mxu1 %v6982_v25  ;;  %v6874_v44 = vmul.f32 %v11049_v59, %v14845_v35  ;;  %v6873_v56 = vmul.f32 %v11049_v59, %v14842_v40  ;;  %v10590_v40 = vld [vmem:[#allocation17 + $0x10] ss:$8 sps:$4 sm:$0xff]   ;;  %v10598_v25 = vld [vmem:[#allocation17 + $0x4] ss:$8 sps:$4 sm:$0xff]  }
 0xb10   : > { %v6801_v0 = vpop.xlane.xlu1 %6800  ;;  %7452 = vmatmul.mubr.bf16.gmra.mxu0 %v6981_v19  ;;  %7565 = vmatmul.mubr.bf16.gmra.mxu1 %v6981_v19  ;;  %v6958_v32 = vadd.f32 %v14949_v57, %v6915_v45  ;;  %v6957_v35 = vadd.f32 %v14946_v42, %v6914_v34  ;;  %v10601_v19 = vld [vmem:[#allocation17 + $0x104] ss:$8 sps:$4 sm:$0xff]   ;;  %v10596_v45 = vld [vmem:[#allocation17] ss:$8 sps:$4 sm:$0xff]  }
 0xb11   : > { %11056 = vrsqrt.f32 %v6838_v28  ;;  %v6823_v54 = vmul.f32 0.00390625, %v6801_v0  ;;  %v6917_v62 = vmul.f32 %v14943_v6, %v6874_v44  ;;  %v6916_v39 = vmul.f32 %v14935_v9, %v6873_v56  ;;  %8383 = vmatprep.subr.bf16.mxu0 %v10586_v23  ;;  %8496 = vmatprep.subr.bf16.mxu1 %v10589_v24 }
 0xb12   : > { %v11051_v36 = vpop.eup %11050  ;;  %8384 = vmatpush1.bf16.msra.mxu0 %v10584_v49  ;;  %8497 = vmatpush1.bf16.msra.mxu1 %v10587_v51 }
 0xb13   : > { %v6839_v4 = vadd.f32 1e-05, %v6823_v54  ;;  %v6960_v31 = vadd.f32 %v14949_v57, %v6917_v62  ;;  %v6959_v26 = vadd.f32 %v14946_v42, %v6916_v39  ;;  %v6876_v43 = vmul.f32 %v11051_v36, %v14855_v37  ;;  %8385 = vmatprep.subr.bf16.mxu0 %v10592_v2  ;;  %8498 = vmatprep.subr.bf16.mxu1 %v10595_v30  ;;  %v10599_v37 = vld [vmem:[#allocation17 + $0x100] ss:$8 sps:$4 sm:$0xff]  }
 0xb14   : > { %v6804_v46 = vpop.xlane.xlu0 %6803  ;;  %v6875_v3 = vmul.f32 %v11051_v36, %v14852_v12 }
 0xb15   : > { %11058 = vrsqrt.f32 %v6839_v4  ;;  %v6824_v8 = vmul.f32 0.00390625, %v6804_v46  ;;  %v6984_v52 = vpack.c.bf16 %v6960_v31, %v6958_v32  ;;  %v6983_v11 = vpack.c.bf16 %v6959_v26, %v6957_v35 }
 0xb16   : > { %v11053_v23 = vpop.eup %11052  ;;  %v6919_v24 = vmul.f32 %v14943_v6, %v6876_v43  ;;  %v6918_v59 = vmul.f32 %v14935_v9, %v6875_v3  ;;  %8386 = vmatpush1.bf16.msra.mxu0 %v10590_v40  ;;  %8499 = vmatpush1.bf16.msra.mxu1 %v10593_v50 }
 0xb17   : > { %v6840_v34 = vadd.f32 1e-05, %v6824_v8  ;;  %7461 = vmatprep.mubr.bf16.mxu0 %v6984_v52  ;;  %7574 = vmatprep.mubr.bf16.mxu1 %v6984_v52  ;;  %v6878_v12 = vmul.f32 %v11053_v23, %v14865_v10  ;;  %v6877_v49 = vmul.f32 %v11053_v23, %v14862_v17 }
 0xb18   : > { %v6807_v51 = vpop.xlane.xlu1 %6806  ;;  %7462 = vmatmul.mubr.bf16.gmra.mxu0 %v6983_v11  ;;  %7575 = vmatmul.mubr.bf16.gmra.mxu1 %v6983_v11  ;;  %v6962_v30 = vadd.f32 %v14949_v57, %v6919_v24  ;;  %v6961_v0 = vadd.f32 %v14946_v42, %v6918_v59 }
 0xb19   : > { %11060 = vrsqrt.f32 %v6840_v34  ;;  %v6825_v28 = vmul.f32 0.00390625, %v6807_v51  ;;  %v6921_v44 = vmul.f32 %v14943_v6, %v6878_v12  ;;  %v6920_v56 = vmul.f32 %v14935_v9, %v6877_v49  ;;  %8387 = vmatprep.subr.bf16.mxu0 %v10598_v25  ;;  %8500 = vmatprep.subr.bf16.mxu1 %v10601_v19 }
 0xb1a   : > { %v11055_v2 = vpop.eup %11054  ;;  %8388 = vmatpush1.bf16.msra.mxu0 %v10596_v45  ;;  %8501 = vmatpush1.bf16.msra.mxu1 %v10599_v37 }
 0xb1b   : > { %v6841_v10 = vadd.f32 1e-05, %v6825_v28  ;;  %v6964_v17 = vadd.f32 %v14949_v57, %v6921_v44  ;;  %v6963_v54 = vadd.f32 %v14946_v42, %v6920_v56  ;;  %v6880_v62 = vmul.f32 %v11055_v2, %v14875_v18 }
 0xb1c   : > { %v6810_v39 = vpop.xlane.xlu0 %6809  ;;  %v6879_v36 = vmul.f32 %v11055_v2, %v14872_v29 }
 0xb1d   : > { %11062 = vrsqrt.f32 %v6841_v10  ;;  %v6826_v32 = vmul.f32 0.00390625, %v6810_v39  ;;  %v6986_v35 = vpack.c.bf16 %v6964_v17, %v6962_v30  ;;  %v6985_v40 = vpack.c.bf16 %v6963_v54, %v6961_v0 }
 0xb1e   : > { %v11057_v50 = vpop.eup %11056  ;;  %v6923_v4 = vmul.f32 %v14943_v6, %v6880_v62  ;;  %v6922_v31 = vmul.f32 %v14935_v9, %v6879_v36 }
 0xb1f   : > { %v6842_v26 = vadd.f32 1e-05, %v6826_v32  ;;  %7471 = vmatprep.mubr.bf16.mxu0 %v6986_v35  ;;  %7584 = vmatprep.mubr.bf16.mxu1 %v6986_v35  ;;  %v6882_v43 = vmul.f32 %v11057_v50, %v14885_v20  ;;  %v6881_v46 = vmul.f32 %v11057_v50, %v14882_v38  ;;  %v10602_v50 = vld [vmem:[#allocation17 + $0xf0] ss:$8 sps:$4 sm:$0xff]  }
 0xb20   : > { %7472 = vmatmul.mubr.bf16.gmra.mxu0 %v6985_v40  ;;  %7585 = vmatmul.mubr.bf16.gmra.mxu1 %v6985_v40  ;;  %v6966_v8 = vadd.f32 %v14949_v57, %v6923_v4  ;;  %v6965_v52 = vadd.f32 %v14946_v42, %v6922_v31  ;;  %v10607_v40 = vld [vmem:[#allocation17 + $0x1f4] ss:$8 sps:$4 sm:$0xff]   ;;  %v10608_v4 = vld [vmem:[#allocation17 + $0xe0] ss:$8 sps:$4 sm:$0xff]  }
 0xb21   : > { %11064 = vrsqrt.f32 %v6842_v26  ;;  %v6925_v29 = vmul.f32 %v14943_v6, %v6882_v43  ;;  %v6924_v18 = vmul.f32 %v14935_v9, %v6881_v46  ;;  %8502 = vmatprep.subr.bf16.mxu1 %v10607_v40  ;;  %v10611_v31 = vld [vmem:[#allocation17 + $0x1e0] ss:$8 sps:$4 sm:$0xff]   ;;  %v10619_v26 = vld [vmem:[#allocation17 + $0x1d4] ss:$8 sps:$4 sm:$0xff]   ;;  %v10614_v43 = vld [vmem:[#allocation17 + $0xd0] ss:$8 sps:$4 sm:$0xff]  }
 0xb22   : > { %v11059_v3 = vpop.eup %11058  ;;  %v10617_v46 = vld [vmem:[#allocation17 + $0x1d0] ss:$8 sps:$4 sm:$0xff]  }
 0xb23   : > { %v6968_v11 = vadd.f32 %v14949_v57, %v6925_v29  ;;  %v6967_v25 = vadd.f32 %v14946_v42, %v6924_v18  ;;  %v6884_v20 = vmul.f32 %v11059_v3, %v14895_v7  ;;  %v6883_v38 = vmul.f32 %v11059_v3, %v14892_v63  ;;  %v10622_v29 = vld [vmem:[#allocation17 + $0xc4] ss:$8 sps:$4 sm:$0xff]   ;;  %v10620_v3 = vld [vmem:[#allocation17 + $0xc0] ss:$8 sps:$4 sm:$0xff]  }
 0xb24   : > { %v10625_v18 = vld [vmem:[#allocation17 + $0x1c4] ss:$8 sps:$4 sm:$0xff]  }
 0xb25   : > { %v6988_v19 = vpack.c.bf16 %v6968_v11, %v6966_v8  ;;  %v6987_v23 = vpack.c.bf16 %v6967_v25, %v6965_v52  ;;  %v6927_v59 = vmul.f32 %v14943_v6, %v6884_v20  ;;  %v6926_v45 = vmul.f32 %v14935_v9, %v6883_v38  ;;  %v10623_v8 = vld [vmem:[#allocation17 + $0x1c0] ss:$8 sps:$4 sm:$0xff]   ;;  %v10628_v52 = vld [vmem:[#allocation17 + $0xb4] ss:$8 sps:$4 sm:$0xff]   ;;  %v10626_v25 = vld [vmem:[#allocation17 + $0xb0] ss:$8 sps:$4 sm:$0xff]  }
 0xb26   : > { %v11061_v24 = vpop.eup %11060  ;;  %v10631_v11 = vld [vmem:[#allocation17 + $0x1b4] ss:$8 sps:$4 sm:$0xff]   ;;  %v10629_v20 = vld [vmem:[#allocation17 + $0x1b0] ss:$8 sps:$4 sm:$0xff]   ;;  %v10634_v38 = vld [vmem:[#allocation17 + $0xa4] ss:$8 sps:$4 sm:$0xff]  }
 0xb27   : > { %7481 = vmatprep.mubr.bf16.mxu0 %v6988_v19  ;;  %7594 = vmatprep.mubr.bf16.mxu1 %v6988_v19  ;;  %v6886_v37 = vmul.f32 %v11061_v24, %v14905_v27  ;;  %v6885_v34 = vmul.f32 %v11061_v24, %v14902_v13  ;;  %v6970_v49 = vadd.f32 %v14949_v57, %v6927_v59  ;;  %v10637_v19 = vld [vmem:[#allocation17 + $0x1a4] ss:$8 sps:$4 sm:$0xff]   ;;  %v10635_v24 = vld [vmem:[#allocation17 + $0x1a0] ss:$8 sps:$4 sm:$0xff]   ;;  %v10640_v59 = vld [vmem:[#allocation17 + $0x94] ss:$8 sps:$4 sm:$0xff]  }
 0xb28   : > { %7482 = vmatmul.mubr.bf16.gmra.mxu0 %v6987_v23  ;;  %7595 = vmatmul.mubr.bf16.gmra.mxu1 %v6987_v23  ;;  %v6969_v51 = vadd.f32 %v14946_v42, %v6926_v45  ;;  %v10632_v23 = vld [vmem:[#allocation17 + $0xa0] ss:$8 sps:$4 sm:$0xff]   ;;  %v10643_v45 = vld [vmem:[#allocation17 + $0x194] ss:$8 sps:$4 sm:$0xff]  }
 0xb29   : > { %v6929_v12 = vmul.f32 %v14943_v6, %v6886_v37  ;;  %v6928_v7 = vmul.f32 %v14935_v9, %v6885_v34  ;;  %v10638_v37 = vld [vmem:[#allocation17 + $0x90] ss:$8 sps:$4 sm:$0xff]  }
 0xb2a   : > { %v11063_v63 = vpop.eup %11062  ;;  %v10641_v34 = vld [vmem:[#allocation17 + $0x190] ss:$8 sps:$4 sm:$0xff]  }
 0xb2b   : > { %v6972_v28 = vadd.f32 %v14949_v57, %v6929_v12  ;;  %v6971_v44 = vadd.f32 %v14946_v42, %v6928_v7  ;;  %v6888_v56 = vmul.f32 %v11063_v63, %v14915_v21  ;;  %v6887_v27 = vmul.f32 %v11063_v63, %v14912_v60  ;;  %v10646_v12 = vld [vmem:[#allocation17 + $0x84] ss:$8 sps:$4 sm:$0xff]   ;;  %v10644_v63 = vld [vmem:[#allocation17 + $0x80] ss:$8 sps:$4 sm:$0xff]  }
 0xb2c   : > { %v10649_v7 = vld [vmem:[#allocation17 + $0x184] ss:$8 sps:$4 sm:$0xff]  }
 0xb2d   : > { %v6990_v13 = vpack.c.bf16 %v6972_v28, %v6970_v49  ;;  %v6989_v2 = vpack.c.bf16 %v6971_v44, %v6969_v51  ;;  %v6931_v0 = vmul.f32 %v14943_v6, %v6888_v56  ;;  %v6930_v54 = vmul.f32 %v14935_v9, %v6887_v27  ;;  %v10647_v49 = vld [vmem:[#allocation17 + $0x180] ss:$8 sps:$4 sm:$0xff]  }
 0xb2e   : > { %v11065_v30 = vpop.eup %11064  ;;  %v7057_v51 = vld [vmem:[%s16331_s9] sm:$0xf]  ;;  %v7069_v28 = vsub.s32 2, %v14591_v58  ;;  %v7073_v56 = vsub.s32 3, %v14591_v58  ;;  %s11566_s9 = smov [#allocation19]  }
 0xb2f   : > { %7491 = vmatprep.mubr.bf16.mxu0 %v6990_v13  ;;  %7604 = vmatprep.mubr.bf16.mxu1 %v6990_v13  ;;  %v6890_v10 = vmul.f32 %v11065_v30, %v14925_v22  ;;  %v6889_v17 = vmul.f32 %v11065_v30, %v14922_v41  ;;  %v6974_v60 = vadd.f32 %v14949_v57, %v6931_v0  ;;  %v10604_v41 = vld [vmem:[#allocation17 + $0xf4] ss:$8 sps:$4 sm:$0xff]   ;;  %s11419_s8 = sshll.u32 %s11566_s9, 4  ;;  %s11420_s8 = int_to_ptr.vmem [resolvable:$false] %s11419_s8 }
 0xb30   : > { %7492 = vmatmul.mubr.bf16.gmra.mxu0 %v6989_v2  ;;  %7605 = vmatmul.mubr.bf16.gmra.mxu1 %v6989_v2  ;;  %v6973_v36 = vadd.f32 %v14946_v42, %v6930_v54  ;;  %v15050_v44 = vrot.slane %v7057_v51, %v14597_v14  ;;  %v15053_v2 = vrot.slane %v7057_v51, %v7069_v28  ;;  %s11421_s5 = scalar_lea.vmem %s11420_s8, 8192  ;;  %p11422_p12 = scmp.lt.s32.totalorder %s15630_s27, %s11420_s8 }
 0xb31   : > { %v6933_v62 = vmul.f32 %v14943_v6, %v6890_v10  ;;  %v6932_v21 = vmul.f32 %v14935_v9, %v6889_v17  ;;  %v10605_v6 = vld [vmem:[#allocation17 + $0x1f0] ss:$8 sps:$4 sm:$0xff]   ;;  %8389 = vmatprep.subr.bf16.mxu0 %v10604_v41  ;;  %v10610_v9 = vld [vmem:[#allocation17 + $0xe4] ss:$8 sps:$4 sm:$0xff]   ;;  %v15056_v30 = vrot.slane %v7057_v51, %v14600_v1  ;;  %v15059_v54 = vrot.slane %v7057_v51, %v7073_v56  ;;  %p11423_p13 = scmp.lt.s32.totalorder %s11421_s5, %s11415_s13 }
 0xb32   : > { %8390 = vmatpush2.bf16.msra.mxu0 %v10602_v50  ;;  %8503 = vmatpush2.bf16.msra.mxu1 %v10605_v6 }
 0xb33   : > { %v6976_v39 = vadd.f32 %v14949_v57, %v6933_v62  ;;  %v6975_v32 = vadd.f32 %v14946_v42, %v6932_v21  ;;  %v10613_v57 = vld [vmem:[#allocation17 + $0x1e4] ss:$8 sps:$4 sm:$0xff]   ;;  %8391 = vmatprep.subr.bf16.mxu0 %v10610_v9  ;;  %v10616_v42 = vld [vmem:[#allocation17 + $0xd4] ss:$8 sps:$4 sm:$0xff]   ;;  %p11424_p0 = por %p11423_p13, %p11422_p12 }
 0xb34   : > { %8504 = vmatprep.subr.bf16.mxu1 %v10613_v57 }
 0xb35   : > { %v6992_v35 = vpack.c.bf16 %v6976_v39, %v6974_v60  ;;  %v6991_v22 = vpack.c.bf16 %v6975_v32, %v6973_v36  ;;  %p11425_p10 = pnand %p11424_p0, %p11418_p11 }
 0xb36   : > { %8392 = vmatpush2.bf16.msra.mxu0 %v10608_v4  ;;  %8505 = vmatpush2.bf16.msra.mxu1 %v10611_v31 }
 0xb37   : > { %7501 = vmatprep.mubr.bf16.mxu0 %v6992_v35  ;;  %7614 = vmatprep.mubr.bf16.mxu1 %v6992_v35 }
 0xb38   : > { %7502 = vmatmul.mubr.bf16.gmra.mxu0 %v6991_v22  ;;  %7615 = vmatmul.mubr.bf16.gmra.mxu1 %v6991_v22 }
 0xb39   : > { %8393 = vmatprep.subr.bf16.mxu0 %v10616_v42  ;;  %8506 = vmatprep.subr.bf16.mxu1 %v10619_v26 }
 0xb3a   : > { %8394 = vmatpush2.bf16.msra.mxu0 %v10614_v43  ;;  %8507 = vmatpush2.bf16.msra.mxu1 %v10617_v46 }
 0xb3b   : > { %8395 = vmatprep.subr.bf16.mxu0 %v10622_v29  ;;  %8508 = vmatprep.subr.bf16.mxu1 %v10625_v18 }
 0xb3e   : > { %8396 = vmatpush2.bf16.msra.mxu0 %v10620_v3  ;;  %8509 = vmatpush2.bf16.msra.mxu1 %v10623_v8 }
 0xb3f   : > { %8397 = vmatprep.subr.bf16.mxu0 %v10628_v52  ;;  %8510 = vmatprep.subr.bf16.mxu1 %v10631_v11 }
 0xb42   : > { %8398 = vmatpush2.bf16.msra.mxu0 %v10626_v25  ;;  %8511 = vmatpush2.bf16.msra.mxu1 %v10629_v20 }
 0xb43   : > { %8399 = vmatprep.subr.bf16.mxu0 %v10634_v38  ;;  %8512 = vmatprep.subr.bf16.mxu1 %v10637_v19 }
 0xb46   : > { %8400 = vmatpush2.bf16.msra.mxu0 %v10632_v23  ;;  %8513 = vmatpush2.bf16.msra.mxu1 %v10635_v24 }
 0xb47   : > { %8401 = vmatprep.subr.bf16.mxu0 %v10640_v59  ;;  %8514 = vmatprep.subr.bf16.mxu1 %v10643_v45 }
 0xb4a   : > { %8402 = vmatpush2.bf16.msra.mxu0 %v10638_v37  ;;  %8515 = vmatpush2.bf16.msra.mxu1 %v10641_v34 }
 0xb4b   : > { %8403 = vmatprep.subr.bf16.mxu0 %v10646_v12  ;;  %8516 = vmatprep.subr.bf16.mxu1 %v10649_v7 }
 0xb4e   : > { %8404 = vmatpush2.bf16.msra.mxu0 %v10644_v63  ;;  %8517 = vmatpush2.bf16.msra.mxu1 %v10647_v49 }
 0xbbd   : > { %v7433_v27 = vpop.f32.mrf.mxu0  ;;  %v7546_v13 = vpop.f32.mrf.mxu1 }
 0xbbe   : > { %v7434_v17 = vadd.f32 %v7433_v27, %v15050_v44  ;;  %v7547_v21 = vadd.f32 %v7546_v13, %v15053_v2 }
 0xbbf   : > { %v7435_v0 = vpop.f32.mrf.mxu0  ;;  %v7548_v10 = vpop.f32.mrf.mxu1 }
 0xbc0   : > { %v7436_v39 = vadd.f32 %v7435_v0, %v15056_v30  ;;  %v7689_v58 = vmul.f32 0.70710677, %v7434_v17  ;;  %v7549_v36 = vadd.f32 %v7548_v10, %v15059_v54  ;;  %v7691_v22 = vmul.f32 0.70710677, %v7547_v21 }
 0xbc1   : > { %v7437_v62 = vpop.f32.mrf.mxu0  ;;  %v7550_v60 = vpop.f32.mrf.mxu1  ;;  %v7625_v7 = vmul.f32 0.5, %v7434_v17  ;;  %v15073_v63 = vmul.f32 0.5, %v7547_v21 }
 0xbc2   : > { %v7438_v35 = vadd.f32 %v7437_v62, %v15050_v44  ;;  %v7551_v41 = vadd.f32 %v7550_v60, %v15053_v2  ;;  %v7690_v50 = vmul.f32 0.70710677, %v7436_v39  ;;  %11066 = verf.f32 %v7689_v58 }
 0xbc3   : > { %v7439_v32 = vpop.f32.mrf.mxu0  ;;  %v7552_v40 = vpop.f32.mrf.mxu1  ;;  %v7692_v9 = vmul.f32 0.70710677, %v7549_v36  ;;  %11068 = verf.f32 %v7691_v22  ;;  %v15075_v49 = vmul.f32 0.5, %v7436_v39  ;;  %v15078_v0 = vmul.f32 0.5, %v7549_v36 }
 0xbc4   : > { %v7440_v6 = vadd.f32 %v7439_v32, %v15056_v30  ;;  %v7693_v31 = vmul.f32 0.70710677, %v7438_v35  ;;  %v7695_v42 = vmul.f32 0.70710677, %v7551_v41  ;;  %11070 = verf.f32 %v7690_v50 }
 0xbc5   : > { %v7553_v29 = vadd.f32 %v7552_v40, %v15059_v54  ;;  %11072 = verf.f32 %v7692_v9  ;;  %v15081_v60 = vmul.f32 0.5, %v7438_v35  ;;  %v15083_v17 = vmul.f32 0.5, %v7551_v41 }
 0xbc6   : > { %v7694_v46 = vmul.f32 0.70710677, %v7440_v6  ;;  %11074 = verf.f32 %v7693_v31  ;;  %v15090_v40 = vmul.f32 0.5, %v7440_v6 }
 0xbc7   : > { %11076 = verf.f32 %v7695_v42  ;;  %v7696_v20 = vmul.f32 0.70710677, %v7553_v29  ;;  %v15092_v36 = vmul.f32 0.5, %v7553_v29 }
 0xbc8   : > { %v7443_v57 = vpop.f32.mrf.mxu0  ;;  %v7556_v4 = vpop.f32.mrf.mxu1  ;;  %11078 = verf.f32 %v7694_v46 }
 0xbc9   : > { %v7444_v18 = vadd.f32 %v7443_v57, %v15050_v44  ;;  %v7557_v52 = vadd.f32 %v7556_v4, %v15053_v2  ;;  %11080 = verf.f32 %v7696_v20 }
 0xbca   : > { %v7445_v26 = vpop.f32.mrf.mxu0  ;;  %v7558_v43 = vpop.f32.mrf.mxu1 }
 0xbcb   : > { %v7697_v38 = vmul.f32 0.70710677, %v7444_v18  ;;  %v7699_v59 = vmul.f32 0.70710677, %v7557_v52  ;;  %v7446_v45 = vadd.f32 %v7445_v26, %v15056_v30  ;;  %v7559_v51 = vadd.f32 %v7558_v43, %v15059_v54 }
 0xbcc   : > { %v7447_v3 = vpop.f32.mrf.mxu0  ;;  %v7560_v8 = vpop.f32.mrf.mxu1  ;;  %v15094_v50 = vmul.f32 0.5, %v7444_v18  ;;  %v15097_v41 = vmul.f32 0.5, %v7557_v52 }
 0xbcd   : > { %v7448_v19 = vadd.f32 %v7447_v3, %v15050_v44  ;;  %v7561_v37 = vadd.f32 %v7560_v8, %v15053_v2  ;;  %11082 = verf.f32 %v7697_v38  ;;  %v7698_v10 = vmul.f32 0.70710677, %v7446_v45 }
 0xbce   : > { %v7449_v11 = vpop.f32.mrf.mxu0  ;;  %v7562_v25 = vpop.f32.mrf.mxu1  ;;  %11084 = verf.f32 %v7699_v59  ;;  %v7700_v4 = vmul.f32 0.70710677, %v7559_v51  ;;  %v15103_v43 = vmul.f32 0.5, %v7446_v45  ;;  %v15105_v6 = vmul.f32 0.5, %v7559_v51 }
 0xbcf   : > { %v7701_v28 = vmul.f32 0.70710677, %v7448_v19  ;;  %v11067_v13 = vpop.eup %11066  ;;  %v7450_v62 = vadd.f32 %v7449_v11, %v15056_v30  ;;  %v7703_v21 = vmul.f32 0.70710677, %v7561_v37  ;;  %v7563_v39 = vadd.f32 %v7562_v25, %v15059_v54 }
 0xbd0   : > { %v7453_v23 = vpop.f32.mrf.mxu0  ;;  %v7566_v24 = vpop.f32.mrf.mxu1  ;;  %v7817_v57 = vadd.f32 1.0, %v11067_v13  ;;  %v15107_v18 = vmul.f32 0.5, %v7448_v19  ;;  %v15114_v38 = vmul.f32 0.5, %v7561_v37 }
 0xbd1   : > { %v11069_v22 = vpop.eup %11068  ;;  %v7454_v9 = vadd.f32 %v7453_v23, %v15050_v44  ;;  %11086 = verf.f32 %v7701_v28  ;;  %v7702_v46 = vmul.f32 0.70710677, %v7450_v62  ;;  %v7704_v3 = vmul.f32 0.70710677, %v7563_v39 }
 0xbd2   : > { %v7455_v34 = vpop.f32.mrf.mxu0  ;;  %v7568_v12 = vpop.f32.mrf.mxu1  ;;  %11088 = verf.f32 %v7698_v10  ;;  %v7567_v8 = vadd.f32 %v7566_v24, %v15053_v2  ;;  %v7819_v20 = vadd.f32 1.0, %v11069_v22  ;;  %v15117_v51 = vmul.f32 %v7817_v57, %v7625_v7 }
 0xbd3   : > { %v11071_v35 = vpop.eup %11070  ;;  %11090 = verf.f32 %v7703_v21  ;;  %v7705_v23 = vmul.f32 0.70710677, %v7454_v9  ;;  %v7456_v59 = vadd.f32 %v7455_v34, %v15056_v30  ;;  %v7569_v28 = vadd.f32 %v7568_v12, %v15059_v54 }
 0xbd4   : > { %v7457_v56 = vpop.f32.mrf.mxu0  ;;  %v7570_v27 = vpop.f32.mrf.mxu1  ;;  %v7818_v19 = vadd.f32 1.0, %v11071_v35  ;;  %11092 = verf.f32 %v7700_v4  ;;  %v7707_v61 = vmul.f32 0.70710677, %v7567_v8  ;;  %v15130_v12 = vmul.f32 0.5, %v7450_v62 }
 0xbd5   : > { %v11073_v26 = vpop.eup %11072  ;;  %11094 = verf.f32 %v7702_v46  ;;  %v7458_v22 = vadd.f32 %v7457_v56, %v15050_v44  ;;  %v15124_v34 = vadd.f32 %v7570_v27, %v15053_v2  ;;  %v7706_v4 = vmul.f32 0.70710677, %v7456_v59 }
 0xbd6   : > { %v15086_v58 = vpop.f32.mrf.mxu0  ;;  %v15088_v32 = vpop.f32.mrf.mxu1  ;;  %v7820_v10 = vadd.f32 1.0, %v11073_v26  ;;  %11096 = verf.f32 %v7704_v3  ;;  %v15133_v46 = vmul.f32 %v7819_v20, %v15073_v63  ;;  %v15135_v56 = vmul.f32 0.5, %v7563_v39 }
 0xbd7   : > { %v11075_v29 = vpop.eup %11074  ;;  %11098 = verf.f32 %v7705_v23  ;;  %v7708_v3 = vmul.f32 0.70710677, %v7569_v28  ;;  %v7709_v47 = vmul.f32 0.70710677, %v7458_v22  ;;  %v7460_v20 = vadd.f32 %v15086_v58, %v15056_v30 }
 0xbd8   : > { %v15099_v31 = vpop.f32.mrf.mxu0  ;;  %v15101_v42 = vpop.f32.mrf.mxu1  ;;  %v7821_v21 = vadd.f32 1.0, %v11075_v29  ;;  %v15137_v29 = vmul.f32 0.5, %v7454_v9  ;;  %v15145_v62 = vmul.f32 %v7820_v10, %v15078_v0  ;;  %11100 = verf.f32 %v7707_v61 }
 0xbd9   : > { %v11077_v25 = vpop.eup %11076  ;;  %v7711_v9 = vmul.f32 0.70710677, %v15124_v34  ;;  %11102 = verf.f32 %v7706_v4  ;;  %v15161_v10 = vmul.f32 0.5, %v7456_v59  ;;  %v7573_v61 = vadd.f32 %v15088_v32, %v15059_v54 }
 0xbda   : > { %v15110_v52 = vpop.f32.mrf.mxu0  ;;  %v15112_v11 = vpop.f32.mrf.mxu1  ;;  %v7823_v37 = vadd.f32 1.0, %v11077_v25  ;;  %v7885_v23 = vmul.f32 %v7821_v21, %v15081_v60  ;;  %11104 = verf.f32 %v7708_v3  ;;  %v7577_v59 = vadd.f32 %v15101_v42, %v15053_v2 }
 0xbdb   : > { %v11079_v45 = vpop.eup %11078  ;;  %11106 = verf.f32 %v7709_v47  ;;  %v15173_v4 = vmul.f32 0.5, %v7569_v28  ;;  %v7712_v42 = vmul.f32 0.70710677, %v7573_v61 }
 0xbdc   : > { %v7467_v13 = vpop.f32.mrf.mxu0  ;;  %v15120_v24 = vpop.f32.mrf.mxu1  ;;  %v7822_v57 = vadd.f32 1.0, %v11079_v45  ;;  %v7882_v45 = vmul.f32 %v7818_v19, %v15075_v49  ;;  %v15149_v39 = vmul.f32 %v7823_v37, %v15083_v17  ;;  %v15155_v49 = vmul.f32 0.5, %v7567_v8 }
 0xbdd   : > { %v11081_v26 = vpop.eup %11080  ;;  %v7945_v58 = vpack.c.bf16 %v7885_v23, %v15117_v51  ;;  %11108 = verf.f32 %v7711_v9  ;;  %v15176_v51 = vadd.f32 %v7467_v13, %v15050_v44  ;;  %v15185_v23 = vmul.f32 0.5, %v7458_v22 }
 0xbde   : > { %v15126_v7 = vpop.f32.mrf.mxu0  ;;  %v15128_v35 = vpop.f32.mrf.mxu1  ;;  %v7886_v53 = vmul.f32 %v7822_v57, %v15090_v40  ;;  %v7824_v48 = vadd.f32 1.0, %v11081_v26  ;;  %v7464_v40 = vadd.f32 %v15099_v31, %v15050_v44  ;;  %v7947_v37 = vpack.c.bf16 %v15149_v39, %v15133_v46 }
 0xbdf   : > { %v11083_v55 = vpop.eup %11082  ;;  %v7715_v39 = vmul.f32 0.70710677, %v7577_v59  ;;  %v15195_v9 = vmul.f32 0.5, %v15124_v34 }
 0xbe0   : > { %v15139_v27 = vpop.f32.mrf.mxu0  ;;  %v15141_v25 = vpop.f32.mrf.mxu1  ;;  %v7825_v19 = vadd.f32 1.0, %v11083_v55  ;;  %v7710_v55 = vmul.f32 0.70710677, %v7460_v20  ;;  %v7888_v32 = vmul.f32 %v7824_v48, %v15092_v36  ;;  %v7946_v47 = vpack.c.bf16 %v7886_v53, %v7882_v45 }
 0xbe1   : > { %v11085_v63 = vpop.eup %11084  ;;  %v7713_v28 = vmul.f32 0.70710677, %v7464_v40  ;;  %v7466_v53 = vadd.f32 %v15110_v52, %v15056_v30 }
 0xbe2   : > { %v15157_v0 = vpop.f32.mrf.mxu0  ;;  %v15159_v60 = vpop.f32.mrf.mxu1  ;;  %v7827_v21 = vadd.f32 1.0, %v11085_v63  ;;  %v15183_v46 = vmul.f32 %v7825_v19, %v15094_v50  ;;  %8405 = vmatprep.mubr.bf16.mxu0 %v7946_v47  ;;  %11110 = verf.f32 %v7710_v55  ;;  %v7579_v50 = vadd.f32 %v15112_v11, %v15059_v54 }
 0xbe3   : > { %v11087_v17 = vpop.eup %11086  ;;  %8406 = vmatmul.mubr.bf16.vlgmr.msra.gmra.mxu0 %v7945_v58  ;;  %v7581_v19 = vadd.f32 %v15120_v24, %v15053_v2  ;;  %v7948_v52 = vpack.c.bf16 %v7888_v32, %v15145_v62  ;;  %v15208_v58 = vmul.f32 0.5, %v7460_v20  ;;  %11112 = verf.f32 %v7712_v42 }
 0xbe4   : > { %v11089_v8 = vpop.eup %11088  ;;  %v15178_v26 = vpop.f32.mrf.mxu0  ;;  %v7829_v3 = vadd.f32 1.0, %v11087_v17  ;;  %v15188_v48 = vmul.f32 %v7827_v21, %v15097_v41  ;;  %v7717_v41 = vmul.f32 0.70710677, %v15176_v51  ;;  %11114 = verf.f32 %v7713_v28 }
 0xbe5   : > { %v11091_v57 = vpop.eup %11090  ;;  %v15180_v31 = vpop.f32.mrf.mxu1  ;;  %v7826_v36 = vadd.f32 1.0, %v11089_v8  ;;  %v7714_v47 = vmul.f32 0.70710677, %v7466_v53  ;;  %8518 = vmatprep.mubr.bf16.mxu1 %v7948_v52  ;;  %11116 = verf.f32 %v7715_v39  ;;  %v7716_v32 = vmul.f32 0.70710677, %v7579_v50 }
 0xbe6   : > { %v11093_v63 = vpop.eup %11092  ;;  %v7831_v45 = vadd.f32 1.0, %v11091_v57  ;;  %v15201_v17 = vpop.f32.mrf.mxu0  ;;  %v15206_v11 = vmul.f32 %v7829_v3, %v15107_v18  ;;  %8519 = vmatmul.mubr.bf16.vlgmr.msra.gmra.mxu1 %v7947_v37  ;;  %v15214_v18 = vmul.f32 0.5, %v7573_v61  ;;  %11118 = verf.f32 %v7717_v41 }
 0xbe7   : > { %v11095_v13 = vpop.eup %11094  ;;  %v15203_v21 = vpop.f32.mrf.mxu1  ;;  %v7828_v55 = vadd.f32 1.0, %v11093_v63  ;;  %v7890_v34 = vmul.f32 %v7826_v36, %v15103_v43  ;;  %v7719_v20 = vmul.f32 0.70710677, %v7581_v19  ;;  %v15225_v28 = vmul.f32 0.5, %v7464_v40 }
 0xbe8   : > { %v11097_v22 = vpop.eup %11096  ;;  %v7830_v57 = vadd.f32 1.0, %v11095_v13  ;;  %v15212_v24 = vmul.f32 %v7831_v45, %v15114_v38  ;;  %v15216_v3 = vpop.f32.mrf.mxu0  ;;  %v7949_v38 = vpack.c.bf16 %v15206_v11, %v15183_v46  ;;  %v7470_v37 = vadd.f32 %v15126_v7, %v15056_v30 }
 0xbe9   : > { %v11099_v8 = vpop.eup %11098  ;;  %v7832_v62 = vadd.f32 1.0, %v11097_v22  ;;  %v15218_v43 = vpop.f32.mrf.mxu1  ;;  %v15221_v36 = vmul.f32 %v7828_v55, %v15105_v6  ;;  %v15230_v45 = vmul.f32 0.5, %v7577_v59  ;;  %11120 = verf.f32 %v7714_v47 }
 0xbea   : > { %v11101_v63 = vpop.eup %11100  ;;  %v7833_v15 = vadd.f32 1.0, %v11099_v8  ;;  %v7894_v13 = vmul.f32 %v7830_v57, %v15130_v12  ;;  %v7583_v39 = vadd.f32 %v15128_v35, %v15059_v54  ;;  %v7951_v6 = vpack.c.bf16 %v15212_v24, %v15188_v48  ;;  %v15244_v35 = vpop.f32.mrf.mxu0 }
 0xbeb   : > { %v11103_v42 = vpop.eup %11102  ;;  %v7896_v46 = vmul.f32 %v7832_v62, %v15135_v56  ;;  %11122 = verf.f32 %v7716_v32  ;;  %v7474_v40 = vadd.f32 %v15139_v27, %v15050_v44  ;;  %v7835_v12 = vadd.f32 1.0, %v11101_v63  ;;  %v15246_v52 = vpop.f32.mrf.mxu1 }
 0xbec   : > { %v11105_v61 = vpop.eup %11104  ;;  %v15240_v41 = vmul.f32 %v7833_v15, %v15137_v29  ;;  %11124 = verf.f32 %v7719_v20  ;;  %v7587_v59 = vadd.f32 %v15141_v25, %v15053_v2  ;;  %v7834_v8 = vadd.f32 1.0, %v11103_v42 }
 0xbed   : > { %v11107_v22 = vpop.eup %11106  ;;  %v7836_v55 = vadd.f32 1.0, %v11105_v61  ;;  %v15248_v56 = vmul.f32 0.5, %v7466_v53  ;;  %v7718_v11 = vmul.f32 0.70710677, %v7470_v37  ;;  %v15250_v27 = vmul.f32 0.5, %v7579_v50  ;;  %v15264_v61 = vpop.f32.mrf.mxu0 }
 0xbee   : > { %v11109_v7 = vpop.eup %11108  ;;  %v7837_v57 = vadd.f32 1.0, %v11107_v22  ;;  %v15253_v15 = vmul.f32 0.5, %v15176_v51  ;;  %v7720_v29 = vmul.f32 0.70710677, %v7583_v39  ;;  %v7721_v62 = vmul.f32 0.70710677, %v7474_v40  ;;  %v15266_v51 = vpop.f32.mrf.mxu1 }
 0xbef   : > { %v7839_v47 = vadd.f32 1.0, %v11109_v7  ;;  %v7476_v25 = vadd.f32 %v15157_v0, %v15056_v30  ;;  %v7950_v32 = vpack.c.bf16 %v7894_v13, %v7890_v34  ;;  %v11111_v63 = vpop.eup %11110  ;;  %v15258_v20 = vmul.f32 %v7835_v12, %v15155_v49 }
 0xbf0   : > { %v15260_v53 = vmul.f32 0.5, %v7581_v19  ;;  %v7723_v42 = vmul.f32 0.70710677, %v7587_v59  ;;  %v7478_v50 = vadd.f32 %v15178_v26, %v15050_v44  ;;  %v15269_v22 = vmul.f32 %v7834_v8, %v15161_v10  ;;  %v11113_v19 = vpop.eup %11112 }
 0xbf1   : > { %v15272_v0 = vmul.f32 %v7836_v55, %v15173_v4  ;;  %11126 = verf.f32 %v7718_v11  ;;  %v7589_v49 = vadd.f32 %v15159_v60, %v15059_v54  ;;  %8415 = vmatprep.mubr.bf16.mxu0 %v7950_v32  ;;  %v15277_v34 = vmul.f32 %v7837_v57, %v15185_v23  ;;  %v11115_v10 = vpop.eup %11114  ;;  %v7489_v55 = vpop.f32.mrf.mxu0 }
 0xbf2   : > { %v15279_v26 = vmul.f32 0.5, %v7470_v37  ;;  %11128 = verf.f32 %v7720_v29  ;;  %v7591_v13 = vadd.f32 %v15180_v31, %v15053_v2  ;;  %8416 = vmatmul.mubr.bf16.gmra.mxu0 %v7949_v38  ;;  %v15284_v4 = vmul.f32 %v7839_v47, %v15195_v9  ;;  %v11117_v60 = vpop.eup %11116  ;;  %v7602_v11 = vpop.f32.mrf.mxu1 }
 0xbf3   : > { %v7838_v7 = vadd.f32 1.0, %v11111_v63  ;;  %11130 = verf.f32 %v7721_v62  ;;  %v7722_v12 = vmul.f32 0.70710677, %v7476_v25  ;;  %v7725_v8 = vmul.f32 0.70710677, %v7478_v50  ;;  %v11119_v57 = vpop.eup %11118 }
 0xbf4   : > { %11132 = verf.f32 %v7723_v42  ;;  %v7480_v23 = vadd.f32 %v15201_v17, %v15056_v30  ;;  %v7952_v37 = vpack.c.bf16 %v7896_v46, %v15221_v36  ;;  %v7840_v31 = vadd.f32 1.0, %v11113_v19 }
 0xbf5   : > { %v15289_v38 = vmul.f32 0.5, %v7583_v39  ;;  %v15291_v29 = vmul.f32 0.5, %v7474_v40  ;;  %v7724_v9 = vmul.f32 0.70710677, %v7589_v49  ;;  %v7841_v62 = vadd.f32 1.0, %v11115_v10  ;;  %v15307_v10 = vpop.f32.mrf.mxu0 }
 0xbf6   : > { %v15295_v32 = vmul.f32 0.5, %v7587_v59  ;;  %v7727_v63 = vmul.f32 0.70710677, %v7591_v13  ;;  %8528 = vmatprep.mubr.bf16.mxu1 %v7952_v37  ;;  %v11121_v17 = vpop.eup %11120  ;;  %v15298_v36 = vmul.f32 %v7838_v7, %v15208_v58  ;;  %v7843_v46 = vadd.f32 1.0, %v11117_v60  ;;  %v15309_v58 = vpop.f32.mrf.mxu1 }
 0xbf7   : > { %11134 = verf.f32 %v7722_v12  ;;  %v7593_v39 = vadd.f32 %v15203_v21, %v15059_v54  ;;  %8529 = vmatmul.mubr.bf16.gmra.mxu1 %v7951_v6  ;;  %v7845_v42 = vadd.f32 1.0, %v11119_v57  ;;  %v7726_v19 = vmul.f32 0.70710677, %v7480_v23 }
 0xbf8   : > { %v11123_v40 = vpop.eup %11122  ;;  %11136 = verf.f32 %v7725_v8  ;;  %v7904_v12 = vmul.f32 %v7840_v31, %v15214_v18  ;;  %v15312_v60 = vmul.f32 0.5, %v7476_v25  ;;  %v15314_v21 = vmul.f32 0.5, %v7589_v49 }
 0xbf9   : > { %v11125_v7 = vpop.eup %11124  ;;  %11138 = verf.f32 %v7724_v9  ;;  %v15317_v48 = vmul.f32 %v7841_v62, %v15225_v28  ;;  %v7842_v24 = vadd.f32 1.0, %v11121_v17  ;;  %v7486_v6 = vadd.f32 %v15244_v35, %v15056_v30  ;;  %v7495_v28 = vpop.f32.mrf.mxu0 }
 0xbfa   : > { %11140 = verf.f32 %v7727_v63  ;;  %v15322_v8 = vmul.f32 %v7843_v46, %v15230_v45  ;;  %v7844_v37 = vadd.f32 1.0, %v11123_v40  ;;  %v15324_v57 = vmul.f32 0.5, %v7478_v50  ;;  %v7608_v9 = vpop.f32.mrf.mxu1 }
 0xbfb   : > { %v7728_v18 = vmul.f32 0.70710677, %v7593_v39  ;;  %v15327_v25 = vmul.f32 %v7845_v42, %v15253_v15  ;;  %v7847_v49 = vadd.f32 1.0, %v11125_v7  ;;  %v15329_v31 = vmul.f32 0.5, %v7591_v13  ;;  %v7497_v42 = vpop.f32.mrf.mxu0 }
 0xbfc   : > { %11142 = verf.f32 %v7726_v19  ;;  %v15331_v62 = vmul.f32 0.5, %v7480_v23  ;;  %v7484_v35 = vadd.f32 %v15216_v3, %v15050_v44  ;;  %v15336_v45 = vadd.f32 %v7489_v55, %v15056_v30  ;;  %v7610_v19 = vpop.f32.mrf.mxu1 }
 0xbfd   : > { %v15339_v50 = vadd.f32 %v7602_v11, %v15059_v54  ;;  %v15342_v15 = vmul.f32 %v7842_v24, %v15248_v56  ;;  %v15344_v13 = vmul.f32 0.5, %v7593_v39  ;;  %v7730_v17 = vmul.f32 0.70710677, %v7486_v6 }
 0xbfe   : > { %v11127_v63 = vpop.eup %11126  ;;  %v7599_v23 = vadd.f32 %v15246_v52, %v15059_v54  ;;  %v15349_v40 = vmul.f32 %v7844_v37, %v15250_v27  ;;  %11144 = verf.f32 %v7728_v18  ;;  %v15353_v3 = vadd.f32 %v15218_v43, %v15053_v2 }
 0xbff   : > { %v11129_v46 = vpop.eup %11128  ;;  %v7734_v55 = vmul.f32 0.70710677, %v15336_v45  ;;  %v15359_v39 = vmul.f32 %v7847_v49, %v15260_v53  ;;  %v7488_v52 = vadd.f32 %v15264_v61, %v15050_v44  ;;  %v7736_v27 = vmul.f32 0.70710677, %v15339_v50 }
 0xc00   : > { %v11131_v11 = vpop.eup %11130  ;;  %v7846_v24 = vadd.f32 1.0, %v11127_v63  ;;  %v7729_v43 = vmul.f32 0.70710677, %v7484_v35  ;;  %v7954_v37 = vpack.c.bf16 %v15298_v36, %v15269_v22  ;;  %v7956_v18 = vpack.c.bf16 %v7904_v12, %v15272_v0 }
 0xc01   : > { %v11133_v7 = vpop.eup %11132  ;;  %v7848_v59 = vadd.f32 1.0, %v11129_v46  ;;  %11146 = verf.f32 %v7730_v17  ;;  %v7732_v56 = vmul.f32 0.70710677, %v7599_v23  ;;  %v7601_v53 = vadd.f32 %v15266_v51, %v15053_v2  ;;  %v7499_v17 = vpop.f32.mrf.mxu0 }
 0xc02   : > { %v7849_v49 = vadd.f32 1.0, %v11131_v11  ;;  %v7731_v61 = vmul.f32 0.70710677, %v15353_v3  ;;  %11148 = verf.f32 %v7734_v55  ;;  %8425 = vmatprep.mubr.bf16.mxu0 %v7954_v37  ;;  %8538 = vmatprep.mubr.bf16.mxu1 %v7956_v18  ;;  %v15371_v63 = vadd.f32 %v7495_v28, %v15056_v30  ;;  %v7612_v46 = vpop.f32.mrf.mxu1 }
 0xc03   : > { %v7959_v22 = vpack.c.bf16 %v15359_v39, %v15322_v8  ;;  %v7851_v0 = vadd.f32 1.0, %v11133_v7  ;;  %v15375_v36 = vmul.f32 0.5, %v7484_v35  ;;  %11150 = verf.f32 %v7736_v27 }
 0xc04   : > { %v11135_v47 = vpop.eup %11134  ;;  %v16332_v51 = vpack.c.bf16 %v15277_v34, %v15240_v41  ;;  %v16333_v12 = vpack.c.bf16 %v15284_v4, %v15258_v20  ;;  %v7910_v55 = vmul.f32 %v7846_v24, %v15279_v26  ;;  %11152 = verf.f32 %v7729_v43 }
 0xc05   : > { %v11137_v28 = vpop.eup %11136  ;;  %v15384_v11 = vmul.f32 0.5, %v7486_v6  ;;  %v7733_v7 = vmul.f32 0.70710677, %v7488_v52  ;;  %v7912_v27 = vmul.f32 %v7848_v59, %v15289_v38  ;;  %11154 = verf.f32 %v7732_v56  ;;  %v7503_v59 = vpop.f32.mrf.mxu0 }
 0xc06   : > { %8426 = vmatmul.mubr.bf16.gmra.mxu0 %v16332_v51  ;;  %8539 = vmatmul.mubr.bf16.gmra.mxu1 %v16333_v12  ;;  %v11139_v35 = vpop.eup %11138  ;;  %v7735_v37 = vmul.f32 0.70710677, %v7601_v53  ;;  %v15388_v41 = vadd.f32 %v7608_v9, %v15059_v54  ;;  %v15391_v20 = vmul.f32 %v7849_v49, %v15291_v29  ;;  %v7850_v4 = vadd.f32 1.0, %v11135_v47  ;;  %v15401_v56 = vpop.f32.mrf.mxu1 }
 0xc07   : > { %v11141_v34 = vpop.eup %11140  ;;  %11156 = verf.f32 %v7731_v61  ;;  %v7738_v26 = vmul.f32 0.70710677, %v15371_v63  ;;  %v15395_v6 = vmul.f32 %v7851_v0, %v15295_v32  ;;  %v7853_v24 = vadd.f32 1.0, %v11137_v28 }
 0xc08   : > { %v15397_v43 = vmul.f32 0.5, %v7599_v23  ;;  %v15399_v38 = vmul.f32 0.5, %v7488_v52  ;;  %v7852_v18 = vadd.f32 1.0, %v11139_v35  ;;  %11158 = verf.f32 %v7733_v7  ;;  %v7618_v28 = vpop.f32.mrf.mxu1 }
 0xc09   : > { %v11143_v9 = vpop.eup %11142  ;;  %v7740_v29 = vmul.f32 0.70710677, %v15388_v41  ;;  %v15405_v47 = vadd.f32 %v7497_v42, %v15050_v44  ;;  %v7855_v49 = vadd.f32 1.0, %v11141_v34  ;;  %v15407_v61 = vmul.f32 0.5, %v7601_v53 }
 0xc0a   : > { %11160 = verf.f32 %v7735_v37  ;;  %v15410_v32 = vadd.f32 %v7610_v19, %v15053_v2  ;;  %v15413_v23 = vmul.f32 %v7850_v4, %v15312_v60  ;;  %v15416_v52 = vadd.f32 %v7499_v17, %v15056_v30  ;;  %v7505_v60 = vpop.f32.mrf.mxu0 }
 0xc0b   : > { %11162 = verf.f32 %v7738_v26  ;;  %v15419_v0 = vadd.f32 %v7612_v46, %v15059_v54  ;;  %v11145_v51 = vpop.eup %11144  ;;  %v15422_v42 = vmul.f32 %v7853_v24, %v15324_v57  ;;  %v7854_v53 = vadd.f32 1.0, %v11143_v9 }
 0xc0c   : > { %v15426_v12 = vadd.f32 %v15307_v10, %v15050_v44  ;;  %v7958_v19 = vpack.c.bf16 %v7910_v55, %v15342_v15  ;;  %v15431_v17 = vadd.f32 %v15309_v58, %v15053_v2  ;;  %11164 = verf.f32 %v7740_v29 }
 0xc0d   : > { %v7741_v46 = vmul.f32 0.70710677, %v15405_v47  ;;  %v7742_v7 = vmul.f32 0.70710677, %v15416_v52  ;;  %v15436_v57 = vmul.f32 %v7855_v49, %v15329_v31  ;;  %v7743_v35 = vmul.f32 0.70710677, %v15410_v32 }
 0xc0e   : > { %v7744_v10 = vmul.f32 0.70710677, %v15419_v0  ;;  %8435 = vmatprep.mubr.bf16.mxu0 %v7958_v19  ;;  %v7960_v15 = vpack.c.bf16 %v7912_v27, %v15349_v40  ;;  %v11147_v55 = vpop.eup %11146  ;;  %v7670_v37 = vmul.f32 0.5, %v15336_v45  ;;  %v7672_v58 = vmul.f32 0.5, %v15339_v50  ;;  %v7507_v45 = vpop.f32.mrf.mxu0 }
 0xc0f   : > { %11166 = verf.f32 %v7742_v7  ;;  %v15444_v34 = vadd.f32 %v7503_v59, %v15050_v44  ;;  %v16334_v31 = vpack.c.bf16 %v15327_v25, %v15317_v48  ;;  %v11149_v4 = vpop.eup %11148  ;;  %v15450_v26 = vmul.f32 %v7852_v18, %v15314_v21  ;;  %v7620_v27 = vpop.f32.mrf.mxu1 }
 0xc10   : > { %v7856_v24 = vadd.f32 1.0, %v11145_v51  ;;  %v7737_v40 = vmul.f32 0.70710677, %v15426_v12  ;;  %11168 = verf.f32 %v7744_v10  ;;  %8548 = vmatprep.mubr.bf16.mxu1 %v7960_v15  ;;  %v11151_v50 = vpop.eup %11150  ;;  %v7961_v59 = vpack.c.bf16 %v15422_v42, %v15391_v20 }
 0xc11   : > { %8436 = vmatmul.mubr.bf16.gmra.mxu0 %v16334_v31  ;;  %v7918_v9 = vmul.f32 %v7854_v53, %v15331_v62  ;;  %v7739_v48 = vmul.f32 0.70710677, %v15431_v17  ;;  %11170 = verf.f32 %v7741_v46  ;;  %8549 = vmatmul.mubr.bf16.gmra.mxu1 %v7959_v22  ;;  %v11153_v21 = vpop.eup %11152  ;;  %v7963_v25 = vpack.c.bf16 %v15436_v57, %v15395_v6  ;;  %v7509_v46 = vpop.f32.mrf.mxu0 }
 0xc12   : > { %v7858_v18 = vadd.f32 1.0, %v11147_v55  ;;  %11172 = verf.f32 %v7743_v35  ;;  %v15463_v29 = vadd.f32 %v7505_v60, %v15056_v30  ;;  %v11155_v49 = vpop.eup %11154  ;;  %v7745_v20 = vmul.f32 0.70710677, %v15444_v34  ;;  %v7622_v55 = vpop.f32.mrf.mxu1 }
 0xc13   : > { %v15467_v62 = vadd.f32 %v7618_v28, %v15059_v54  ;;  %v15470_v51 = vadd.f32 %v7507_v45, %v15050_v44  ;;  %v15473_v8 = vadd.f32 %v7620_v27, %v15053_v2  ;;  %v7862_v22 = vadd.f32 1.0, %v11149_v4 }
 0xc14   : > { %v11157_v39 = vpop.eup %11156  ;;  %v7864_v42 = vadd.f32 1.0, %v11151_v50  ;;  %11174 = verf.f32 %v7737_v40  ;;  %v7746_v53 = vmul.f32 0.70710677, %v15463_v29  ;;  %v7920_v19 = vmul.f32 %v7856_v24, %v15344_v13 }
 0xc15   : > { %11176 = verf.f32 %v7739_v48  ;;  %v7674_v60 = vmul.f32 0.5, %v15371_v63  ;;  %v7748_v28 = vmul.f32 0.70710677, %v15467_v62  ;;  %v11159_v7 = vpop.eup %11158  ;;  %v7857_v44 = vadd.f32 1.0, %v11153_v21 }
 0xc16   : > { %v7860_v35 = vadd.f32 1.0, %v11155_v49  ;;  %v15481_v10 = vadd.f32 %v15401_v56, %v15053_v2  ;;  %v7749_v15 = vmul.f32 0.70710677, %v15470_v51  ;;  %v7859_v4 = vadd.f32 1.0, %v11157_v39 }
 0xc17   : > { %v11161_v31 = vpop.eup %11160  ;;  %v7922_v13 = vmul.f32 %v7858_v18, %v15384_v11  ;;  %11178 = verf.f32 %v7745_v20  ;;  %v7751_v63 = vmul.f32 0.70710677, %v15473_v8  ;;  %v7926_v40 = vmul.f32 %v7862_v22, %v7670_v37 }
 0xc18   : > { %v11163_v24 = vpop.eup %11162  ;;  %v7928_v45 = vmul.f32 %v7864_v42, %v7672_v58  ;;  %11180 = verf.f32 %v7746_v53  ;;  %v15487_v27 = vadd.f32 %v7509_v46, %v15056_v30  ;;  %v7861_v50 = vadd.f32 1.0, %v11159_v7 }
 0xc19   : > { %11182 = verf.f32 %v7748_v28  ;;  %v15490_v2 = vadd.f32 %v7622_v55, %v15059_v54  ;;  %v7962_v56 = vpack.c.bf16 %v7918_v9, %v15413_v23  ;;  %v11165_v48 = vpop.eup %11164  ;;  %v7924_v11 = vmul.f32 %v7860_v35, %v15397_v43 }
 0xc1a   : > { %v7747_v21 = vmul.f32 0.70710677, %v15481_v10  ;;  %11184 = verf.f32 %v7749_v15  ;;  %v7750_v37 = vmul.f32 0.70710677, %v15487_v27  ;;  %v7866_v58 = vadd.f32 1.0, %v11163_v24 }
 0xc1b   : > { %11186 = verf.f32 %v7751_v63  ;;  %v7752_v30 = vmul.f32 0.70710677, %v15490_v2  ;;  %8445 = vmatprep.mubr.bf16.mxu0 %v7962_v56  ;;  %v7964_v18 = vpack.c.bf16 %v7920_v19, %v15450_v26  ;;  %v7863_v54 = vadd.f32 1.0, %v11161_v31 }
 0xc1c   : > { %v11167_v49 = vpop.eup %11166  ;;  %11188 = verf.f32 %v7750_v37  ;;  %8446 = vmatmul.mubr.bf16.gmra.mxu0 %v7961_v59  ;;  %v7966_v23 = vpack.c.bf16 %v7926_v40, %v7922_v13  ;;  %v7968_v9 = vpack.c.bf16 %v7928_v45, %v7924_v11  ;;  %v7868_v43 = vadd.f32 1.0, %v11165_v48 }
 0xc1d   : > { %v11169_v20 = vpop.eup %11168  ;;  %v7678_v39 = vmul.f32 0.5, %v15416_v52  ;;  %v7870_v22 = vadd.f32 1.0, %v11167_v49  ;;  %11190 = verf.f32 %v7752_v30  ;;  %8558 = vmatprep.mubr.bf16.mxu1 %v7964_v18  ;;  %v7925_v53 = vmul.f32 %v7861_v50, %v15399_v38 }
 0xc1e   : > { %v11171_v42 = vpop.eup %11170  ;;  %v7680_v28 = vmul.f32 0.5, %v15419_v0  ;;  %v7872_v46 = vadd.f32 1.0, %v11169_v20  ;;  %11192 = verf.f32 %v7747_v21  ;;  %8559 = vmatmul.mubr.bf16.gmra.mxu1 %v7963_v25  ;;  %8455 = vmatprep.mubr.bf16.mxu0 %v7966_v23  ;;  %v7930_v59 = vmul.f32 %v7866_v58, %v7674_v60 }
 0xc1f   : > { %v11173_v26 = vpop.eup %11172  ;;  %v7676_v19 = vmul.f32 0.5, %v15388_v41  ;;  %v7934_v52 = vmul.f32 %v7870_v22, %v7678_v39  ;;  %8568 = vmatprep.mubr.bf16.mxu1 %v7968_v9  ;;  %v7921_v7 = vmul.f32 %v7857_v44, %v15375_v36  ;;  %v7667_v35 = vmul.f32 0.5, %v15353_v3 }
 0xc20   : > { %v7927_v38 = vmul.f32 %v7863_v54, %v15407_v61  ;;  %v7936_v0 = vmul.f32 %v7872_v46, %v7680_v28  ;;  %v7869_v25 = vadd.f32 1.0, %v11171_v42  ;;  %v7871_v63 = vadd.f32 1.0, %v11173_v26 }
 0xc21   : > { %v11175_v15 = vpop.eup %11174  ;;  %v7932_v55 = vmul.f32 %v7868_v43, %v7676_v19  ;;  %v7970_v31 = vpack.c.bf16 %v7934_v52, %v7930_v59  ;;  %v7923_v6 = vmul.f32 %v7859_v4, %v7667_v35  ;;  %v7965_v57 = vpack.c.bf16 %v7925_v53, %v7921_v7 }
 0xc22   : > { %v11177_v13 = vpop.eup %11176  ;;  %v7865_v40 = vadd.f32 1.0, %v11175_v15  ;;  %v7677_v45 = vmul.f32 0.5, %v15405_v47  ;;  %v7679_v61 = vmul.f32 0.5, %v15410_v32  ;;  %v7673_v50 = vmul.f32 0.5, %v15426_v12 }
 0xc23   : > { %v7972_v60 = vpack.c.bf16 %v7936_v0, %v7932_v55  ;;  %v7967_v41 = vpack.c.bf16 %v7927_v38, %v7923_v6  ;;  %v7867_v3 = vadd.f32 1.0, %v11177_v13  ;;  %v7675_v48 = vmul.f32 0.5, %v15431_v17 }
 0xc24   : > { %v11179_v24 = vpop.eup %11178  ;;  %8456 = vmatmul.mubr.bf16.gmra.mxu0 %v7965_v57  ;;  %v7933_v56 = vmul.f32 %v7869_v25, %v7677_v45  ;;  %v7935_v11 = vmul.f32 %v7871_v63, %v7679_v61  ;;  %v7929_v37 = vmul.f32 %v7865_v40, %v7673_v50  ;;  %v7682_v18 = vmul.f32 0.5, %v15463_v29 }
 0xc25   : > { %v11181_v36 = vpop.eup %11180  ;;  %8465 = vmatprep.mubr.bf16.mxu0 %v7970_v31  ;;  %v7931_v30 = vmul.f32 %v7867_v3, %v7675_v48  ;;  %v7684_v32 = vmul.f32 0.5, %v15467_v62  ;;  %v7686_v9 = vmul.f32 0.5, %v15487_v27  ;;  %v7685_v39 = vmul.f32 0.5, %v15470_v51 }
 0xc26   : > { %v11183_v44 = vpop.eup %11182  ;;  %8569 = vmatmul.mubr.bf16.gmra.mxu1 %v7967_v41  ;;  %v7874_v58 = vadd.f32 1.0, %v11181_v36  ;;  %v7969_v23 = vpack.c.bf16 %v7933_v56, %v7929_v37  ;;  %v7688_v22 = vmul.f32 0.5, %v15490_v2  ;;  %v7873_v53 = vadd.f32 1.0, %v11179_v24 }
 0xc27   : > { %v11185_v4 = vpop.eup %11184  ;;  %8578 = vmatprep.mubr.bf16.mxu1 %v7972_v60  ;;  %v7876_v49 = vadd.f32 1.0, %v11183_v44  ;;  %v7971_v17 = vpack.c.bf16 %v7935_v11, %v7931_v30  ;;  %v7681_v62 = vmul.f32 0.5, %v15444_v34  ;;  %v7687_v27 = vmul.f32 0.5, %v15473_v8  ;;  %v8041_v34 = vld [vmem:[%s16335_s6] sm:$0x3] }
 0xc28   : > { %v11187_v21 = vpop.eup %11186  ;;  %v7877_v12 = vadd.f32 1.0, %v11185_v4  ;;  %v7938_v28 = vmul.f32 %v7874_v58, %v7682_v18  ;;  %v7683_v2 = vmul.f32 0.5, %v15481_v10  ;;  %v15524_v8 = vrot.slane %v8041_v34, %v14597_v14  ;;  %v16336_v4 = vld [vmem:[#allocation116_spill] sm:$0xff] }
 0xc29   : > { %v11189_v47 = vpop.eup %11188  ;;  %v7879_v46 = vadd.f32 1.0, %v11187_v21  ;;  %v7940_v26 = vmul.f32 %v7876_v49, %v7684_v32  ;;  %v7937_v51 = vmul.f32 %v7873_v53, %v7681_v62  ;;  %v15527_v31 = vrot.slane %v8041_v34, %v14600_v1  ;;  %v16337_v32 = vld [vmem:[#allocation106_spill] sm:$0xff]  ;;  %v16340_v53 = vld [vmem:[#allocation109_spill] sm:$0xff] }
 0xc2a   : > { %v11191_v54 = vpop.eup %11190  ;;  %v7878_v20 = vadd.f32 1.0, %v11189_v47  ;;  %v7941_v52 = vmul.f32 %v7877_v12, %v7685_v39  ;;  %v16339_v39 = vld [vmem:[#allocation112_spill] sm:$0xff] }
 0xc2b   : > { %v11193_v43 = vpop.eup %11192  ;;  %v7880_v42 = vadd.f32 1.0, %v11191_v54  ;;  %v7943_v38 = vmul.f32 %v7879_v46, %v7687_v27 }
 0xc2c   : > { %v7942_v29 = vmul.f32 %v7878_v20, %v7686_v9  ;;  %8466 = vmatmul.mubr.bf16.gmra.mxu0 %v7969_v23  ;;  %v7875_v19 = vadd.f32 1.0, %v11193_v43  ;;  %v7973_v15 = vpack.c.bf16 %v7941_v52, %v7937_v51  ;;  %v16338_v9 = vld [vmem:[#allocation108_spill] sm:$0xff] }
 0xc2d   : > { %v7944_v59 = vmul.f32 %v7880_v42, %v7688_v22 }
 0xc2e   : > { %8579 = vmatmul.mubr.bf16.gmra.mxu1 %v7971_v17  ;;  %v7974_v7 = vpack.c.bf16 %v7942_v29, %v7938_v28  ;;  %v7939_v0 = vmul.f32 %v7875_v19, %v7683_v2 }
 0xc2f   : > { %v7976_v35 = vpack.c.bf16 %v7944_v59, %v7940_v26 }
 0xc30   : > { %8475 = vmatprep.mubr.bf16.mxu0 %v7974_v7  ;;  %v7975_v55 = vpack.c.bf16 %v7943_v38, %v7939_v0 }
 0xc31   : > { %8588 = vmatprep.mubr.bf16.mxu1 %v7976_v35  ;;  %v16341_v35 = vld [vmem:[#allocation115_spill] sm:$0xff] }
 0xc34   : > { %8476 = vmatmul.mubr.bf16.gmra.mxu0 %v7973_v15  ;;  %v16342_v15 = vld [vmem:[#allocation119_spill] sm:$0xff] }
 0xc36   : > { %8589 = vmatmul.mubr.bf16.gmra.mxu1 %v7975_v55 }
 0xca3   : > { %v8407_v10 = vpop.f32.mrf.mxu0 }
 0xca4   : > { %v8408_v13 = vadd.f32 %v8407_v10, %v15524_v8 }
 0xca5   : > { %v8409_v6 = vpop.f32.mrf.mxu0 }
 0xca6   : > { %v8410_v57 = vadd.f32 %v8409_v6, %v15527_v31  ;;  %v8520_v25 = vpop.f32.mrf.mxu1  ;;  %v16343_v6 = vld [vmem:[#allocation107_spill] sm:$0xff] }
 0xca7   : > { %v8411_v63 = vpop.f32.mrf.mxu0  ;;  %v8521_v60 = vadd.f32 %v8520_v25, %v8408_v13 }
 0xca8   : > { %v8412_v24 = vadd.f32 %v8411_v63, %v15524_v8  ;;  %v8522_v14 = vpop.f32.mrf.mxu1  ;;  %v16344_v63 = vld [vmem:[#allocation114_spill] sm:$0xff] }
 0xca9   : > { %v8413_v41 = vpop.f32.mrf.mxu0  ;;  %v8599_v40 = vadd.f32 %v8521_v60, %v14616_v5  ;;  %v8523_v1 = vadd.f32 %v8522_v14, %v8410_v57 }
 0xcaa   : > { %v8414_v45 = vadd.f32 %v8413_v41, %v15527_v31  ;;  %v8524_v36 = vpop.f32.mrf.mxu1 }
 0xcab   : > { %8631 = vst [vmem:[%s11889_s14] sm:$0xff] %v8599_v40  ;;  %v8600_v3 = vadd.f32 %v8523_v1, %v14619_v16  ;;  %v8525_v61 = vadd.f32 %v8524_v36, %v8412_v24 }
 0xcac   : > { %v8526_v44 = vpop.f32.mrf.mxu1 }
 0xcad   : > { %8632 = vst [vmem:[%s11889_s14 + $0x8] sm:$0xff] %v8600_v3  ;;  %v8601_v50 = vadd.f32 %v8525_v61, %v14624_v33  ;;  %v8527_v56 = vadd.f32 %v8526_v44, %v8414_v45  ;;  %v16345_v61 = vld [vmem:[#allocation120_spill] sm:$0xff] }
 0xcaf   : > { %8633 = vst [vmem:[%s11889_s14 + $0x10] sm:$0xff] %v8601_v50  ;;  %v8602_v48 = vadd.f32 %v8527_v56, %v16336_v4 }
 0xcb1   : > { %8634 = vst [vmem:[%s11889_s14 + $0x18] sm:$0xff] %v8602_v48 }
 0xcb2   : > { %v8417_v11 = vpop.f32.mrf.mxu0 }
 0xcb3   : > { %v8418_v5 = vadd.f32 %v8417_v11, %v15524_v8  ;;  %v16346_v11 = vld [vmem:[#allocation113_spill] sm:$0xff] }
 0xcb4   : > { %v8419_v21 = vpop.f32.mrf.mxu0 }
 0xcb5   : > { %v8420_v37 = vadd.f32 %v8419_v21, %v15527_v31 }
 0xcb6   : > { %v8421_v58 = vpop.f32.mrf.mxu0 }
 0xcb7   : > { %v8530_v16 = vpop.f32.mrf.mxu1  ;;  %v8422_v30 = vadd.f32 %v8421_v58, %v15524_v8 }
 0xcb8   : > { %v8531_v47 = vadd.f32 %v8530_v16, %v8418_v5  ;;  %v8423_v33 = vpop.f32.mrf.mxu0  ;;  %v16347_v16 = vld [vmem:[#allocation117_spill] sm:$0xff] }
 0xcb9   : > { %v8532_v18 = vpop.f32.mrf.mxu1  ;;  %v8424_v23 = vadd.f32 %v8423_v33, %v15527_v31  ;;  %v16348_v33 = vld [vmem:[#allocation127_spill] sm:$0xff] }
 0xcba   : > { %v8603_v49 = vadd.f32 %v8531_v47, %v16337_v32  ;;  %v8533_v54 = vadd.f32 %v8532_v18, %v8420_v37 }
 0xcbb   : > { %v8534_v12 = vpop.f32.mrf.mxu1 }
 0xcbc   : > { %8635 = vst [vmem:[%s11889_s14 + $0x20] sm:$0xff] %v8603_v49  ;;  %v8604_v20 = vadd.f32 %v8533_v54, %v16338_v9  ;;  %v8535_v43 = vadd.f32 %v8534_v12, %v8422_v30 }
 0xcbd   : > { %v8536_v17 = vpop.f32.mrf.mxu1 }
 0xcbe   : > { %8636 = vst [vmem:[%s11889_s14 + $0x28] sm:$0xff] %v8604_v20  ;;  %v8605_v22 = vadd.f32 %v8535_v43, %v16339_v39  ;;  %v8537_v42 = vadd.f32 %v8536_v17, %v8424_v23  ;;  %v16349_v17 = vld [vmem:[#allocation128_spill] sm:$0xff] }
 0xcc0   : > { %8637 = vst [vmem:[%s11889_s14 + $0x30] sm:$0xff] %v8605_v22  ;;  %v8606_v28 = vadd.f32 %v8537_v42, %v16340_v53 }
 0xcc2   : > { %8638 = vst [vmem:[%s11889_s14 + $0x38] sm:$0xff] %v8606_v28 }
 0xcc6   : > { %v8427_v46 = vpop.f32.mrf.mxu0  ;;  %v8540_v29 = vpop.f32.mrf.mxu1 }
 0xcc7   : > { %v8428_v62 = vadd.f32 %v8427_v46, %v15524_v8  ;;  %v16350_v46 = vld [vmem:[#allocation118_spill] sm:$0xff] }
 0xcc8   : > { %v8429_v26 = vpop.f32.mrf.mxu0  ;;  %v8542_v59 = vpop.f32.mrf.mxu1 }
 0xcc9   : > { %v8541_v19 = vadd.f32 %v8540_v29, %v8428_v62  ;;  %v8430_v52 = vadd.f32 %v8429_v26, %v15527_v31 }
 0xcca   : > { %v8431_v27 = vpop.f32.mrf.mxu0  ;;  %v8544_v7 = vpop.f32.mrf.mxu1 }
 0xccb   : > { %v8607_v51 = vadd.f32 %v8541_v19, %v16341_v35  ;;  %v8543_v2 = vadd.f32 %v8542_v59, %v8430_v52  ;;  %v8432_v38 = vadd.f32 %v8431_v27, %v15524_v8  ;;  %v16351_v52 = vld [vmem:[#allocation121_spill] sm:$0xff] }
 0xccc   : > { %v8433_v0 = vpop.f32.mrf.mxu0  ;;  %v8546_v13 = vpop.f32.mrf.mxu1 }
 0xccd   : > { %8639 = vst [vmem:[%s11889_s14 + $0x40] sm:$0xff] %v8607_v51  ;;  %v8608_v55 = vadd.f32 %v8543_v2, %v16342_v15  ;;  %v8545_v34 = vadd.f32 %v8544_v7, %v8432_v38  ;;  %v8434_v10 = vadd.f32 %v8433_v0, %v15527_v31  ;;  %v16352_v38 = vld [vmem:[#allocation122_spill] sm:$0xff] }
 0xccf   : > { %8640 = vst [vmem:[%s11889_s14 + $0x48] sm:$0xff] %v8608_v55  ;;  %v8609_v57 = vadd.f32 %v8545_v34, %v16343_v6  ;;  %v8547_v25 = vadd.f32 %v8546_v13, %v8434_v10  ;;  %v16353_v13 = vld [vmem:[#allocation123_spill] sm:$0xff] }
 0xcd1   : > { %8641 = vst [vmem:[%s11889_s14 + $0x50] sm:$0xff] %v8609_v57  ;;  %v8610_v60 = vadd.f32 %v8547_v25, %v16344_v63  ;;  %v8437_v24 = vpop.f32.mrf.mxu0  ;;  %v8550_v41 = vpop.f32.mrf.mxu1 }
 0xcd2   : > { %v8438_v14 = vadd.f32 %v8437_v24, %v15524_v8  ;;  %v16354_v24 = vld [vmem:[#allocation124_spill] sm:$0xff] }
 0xcd3   : > { %8642 = vst [vmem:[%s11889_s14 + $0x58] sm:$0xff] %v8610_v60  ;;  %v8439_v40 = vpop.f32.mrf.mxu0  ;;  %v8552_v36 = vpop.f32.mrf.mxu1 }
 0xcd4   : > { %v8551_v1 = vadd.f32 %v8550_v41, %v8438_v14  ;;  %v8440_v45 = vadd.f32 %v8439_v40, %v15527_v31 }
 0xcd5   : > { %v8441_v3 = vpop.f32.mrf.mxu0  ;;  %v8554_v4 = vpop.f32.mrf.mxu1 }
 0xcd6   : > { %v8611_v44 = vadd.f32 %v8551_v1, %v16345_v61  ;;  %v8553_v50 = vadd.f32 %v8552_v36, %v8440_v45  ;;  %v8442_v56 = vadd.f32 %v8441_v3, %v15524_v8  ;;  %v16355_v36 = vld [vmem:[#allocation125_spill] sm:$0xff] }
 0xcd7   : > { %v8443_v48 = vpop.f32.mrf.mxu0  ;;  %v8556_v58 = vpop.f32.mrf.mxu1 }
 0xcd8   : > { %8643 = vst [vmem:[%s11889_s14 + $0x60] sm:$0xff] %v8611_v44  ;;  %v8612_v5 = vadd.f32 %v8553_v50, %v16346_v11  ;;  %v8555_v21 = vadd.f32 %v8554_v4, %v8442_v56  ;;  %v8444_v37 = vadd.f32 %v8443_v48, %v15527_v31  ;;  %v16356_v4 = vld [vmem:[#allocation126_spill] sm:$0xff] }
 0xcda   : > { %8644 = vst [vmem:[%s11889_s14 + $0x68] sm:$0xff] %v8612_v5  ;;  %v8613_v47 = vadd.f32 %v8555_v21, %v16347_v16  ;;  %v8557_v30 = vadd.f32 %v8556_v58, %v8444_v37  ;;  %v16357_v58 = vld [vmem:[#allocation129_spill] sm:$0xff] }
 0xcdc   : > { %8645 = vst [vmem:[%s11889_s14 + $0x70] sm:$0xff] %v8613_v47  ;;  %v8614_v18 = vadd.f32 %v8557_v30, %v16348_v33  ;;  %v8447_v32 = vpop.f32.mrf.mxu0 }
 0xcdd   : > { %v8448_v49 = vadd.f32 %v8447_v32, %v15524_v8  ;;  %v16359_v32 = vld [vmem:[#allocation130_spill] sm:$0xff] }
 0xcde   : > { %8646 = vst [vmem:[%s11889_s14 + $0x78] sm:$0xff] %v8614_v18  ;;  %v8560_v54 = vpop.f32.mrf.mxu1  ;;  %v8449_v23 = vpop.f32.mrf.mxu0 }
 0xcdf   : > { %v8561_v12 = vadd.f32 %v8560_v54, %v8448_v49  ;;  %v8450_v9 = vadd.f32 %v8449_v23, %v15527_v31 }
 0xce0   : > { %v8562_v20 = vpop.f32.mrf.mxu1  ;;  %v8451_v43 = vpop.f32.mrf.mxu0 }
 0xce1   : > { %v8615_v39 = vadd.f32 %v8561_v12, %v16349_v17  ;;  %v8563_v22 = vadd.f32 %v8562_v20, %v8450_v9  ;;  %v8452_v42 = vadd.f32 %v8451_v43, %v15524_v8  ;;  %v16360_v20 = vld [vmem:[#allocation131_spill] sm:$0xff] }
 0xce2   : > { %v8564_v53 = vpop.f32.mrf.mxu1  ;;  %v8453_v28 = vpop.f32.mrf.mxu0 }
 0xce3   : > { %8647 = vst [vmem:[%s11889_s14 + $0x80] sm:$0xff] %v8615_v39  ;;  %v8616_v29 = vadd.f32 %v8563_v22, %v16350_v46  ;;  %v8565_v62 = vadd.f32 %v8564_v53, %v8452_v42  ;;  %v8454_v26 = vadd.f32 %v8453_v28, %v15527_v31  ;;  %v16361_v53 = vld [vmem:[#allocation132_spill] sm:$0xff] }
 0xce4   : > { %v8566_v59 = vpop.f32.mrf.mxu1  ;;  %v8457_v19 = vpop.f32.mrf.mxu0 }
 0xce5   : > { %8648 = vst [vmem:[%s11889_s14 + $0x88] sm:$0xff] %v8616_v29  ;;  %v8617_v27 = vadd.f32 %v8565_v62, %v16351_v52  ;;  %v8567_v7 = vadd.f32 %v8566_v59, %v8454_v26  ;;  %v8458_v35 = vadd.f32 %v8457_v19, %v15524_v8  ;;  %v16362_v59 = vld [vmem:[#allocation133_spill] sm:$0xff] }
 0xce6   : > { %v8570_v51 = vpop.f32.mrf.mxu1  ;;  %v8459_v2 = vpop.f32.mrf.mxu0 }
 0xce7   : > { %8649 = vst [vmem:[%s11889_s14 + $0x90] sm:$0xff] %v8617_v27  ;;  %v8618_v0 = vadd.f32 %v8567_v7, %v16352_v38  ;;  %v8571_v15 = vadd.f32 %v8570_v51, %v8458_v35  ;;  %v8460_v55 = vadd.f32 %v8459_v2, %v15527_v31  ;;  %v16363_v51 = vld [vmem:[#allocation136_spill] sm:$0xff] }
 0xce8   : > { %v8572_v34 = vpop.f32.mrf.mxu1  ;;  %v8461_v10 = vpop.f32.mrf.mxu0 }
 0xce9   : > { %8650 = vst [vmem:[%s11889_s14 + $0x98] sm:$0xff] %v8618_v0  ;;  %v8619_v6 = vadd.f32 %v8571_v15, %v16353_v13  ;;  %v8573_v57 = vadd.f32 %v8572_v34, %v8460_v55  ;;  %v8462_v25 = vadd.f32 %v8461_v10, %v15524_v8  ;;  %v16364_v55 = vld [vmem:[#allocation134_spill] sm:$0xff] }
 0xcea   : > { %v8574_v63 = vpop.f32.mrf.mxu1  ;;  %v8463_v60 = vpop.f32.mrf.mxu0 }
 0xceb   : > { %8651 = vst [vmem:[%s11889_s14 + $0xa0] sm:$0xff] %v8619_v6  ;;  %v8620_v14 = vadd.f32 %v8573_v57, %v16354_v24  ;;  %v8575_v41 = vadd.f32 %v8574_v63, %v8462_v25  ;;  %v8464_v40 = vadd.f32 %v8463_v60, %v15527_v31 }
 0xcec   : > { %v8576_v1 = vpop.f32.mrf.mxu1  ;;  %v8467_v45 = vpop.f32.mrf.mxu0 }
 0xced   : > { %8652 = vst [vmem:[%s11889_s14 + $0xa8] sm:$0xff] %v8620_v14  ;;  %v8621_v3 = vadd.f32 %v8575_v41, %v16355_v36  ;;  %v8577_v61 = vadd.f32 %v8576_v1, %v8464_v40  ;;  %v8468_v44 = vadd.f32 %v8467_v45, %v15524_v8 }
 0xcee   : > { %v8580_v50 = vpop.f32.mrf.mxu1  ;;  %v8469_v56 = vpop.f32.mrf.mxu0 }
 0xcef   : > { %8653 = vst [vmem:[%s11889_s14 + $0xb0] sm:$0xff] %v8621_v3  ;;  %v8622_v48 = vadd.f32 %v8577_v61, %v16356_v4  ;;  %v8581_v11 = vadd.f32 %v8580_v50, %v8468_v44  ;;  %v8470_v5 = vadd.f32 %v8469_v56, %v15527_v31 }
 0xcf0   : > { %v8582_v21 = vpop.f32.mrf.mxu1  ;;  %v8471_v37 = vpop.f32.mrf.mxu0 }
 0xcf1   : > { %8654 = vst [vmem:[%s11889_s14 + $0xb8] sm:$0xff] %v8622_v48  ;;  %v8623_v16 = vadd.f32 %v8581_v11, %v16357_v58  ;;  %v8583_v47 = vadd.f32 %v8582_v21, %v8470_v5  ;;  %v8472_v30 = vadd.f32 %v8471_v37, %v15524_v8 }
 0xcf2   : > { %v8584_v33 = vpop.f32.mrf.mxu1  ;;  %v8473_v18 = vpop.f32.mrf.mxu0 }
 0xcf3   : > { %8655 = vst [vmem:[%s11889_s14 + $0xc0] sm:$0xff] %v8623_v16  ;;  %v8624_v49 = vadd.f32 %v8583_v47, %v16359_v32  ;;  %v8585_v54 = vadd.f32 %v8584_v33, %v8472_v30  ;;  %v8474_v23 = vadd.f32 %v8473_v18, %v15527_v31 }
 0xcf4   : > { %v8586_v12 = vpop.f32.mrf.mxu1  ;;  %v8477_v9 = vpop.f32.mrf.mxu0 }
 0xcf5   : > { %8656 = vst [vmem:[%s11889_s14 + $0xc8] sm:$0xff] %v8624_v49  ;;  %v8625_v43 = vadd.f32 %v8585_v54, %v16360_v20  ;;  %v8587_v17 = vadd.f32 %v8586_v12, %v8474_v23  ;;  %v8478_v39 = vadd.f32 %v8477_v9, %v15524_v8 }
 0xcf6   : > { %v8590_v22 = vpop.f32.mrf.mxu1  ;;  %v8479_v42 = vpop.f32.mrf.mxu0 }
 0xcf7   : > { %8657 = vst [vmem:[%s11889_s14 + $0xd0] sm:$0xff] %v8625_v43  ;;  %v8626_v28 = vadd.f32 %v8587_v17, %v16361_v53  ;;  %v8591_v46 = vadd.f32 %v8590_v22, %v8478_v39  ;;  %v8480_v29 = vadd.f32 %v8479_v42, %v15527_v31 }
 0xcf8   : > { %v8592_v62 = vpop.f32.mrf.mxu1  ;;  %v8481_v26 = vpop.f32.mrf.mxu0 }
 0xcf9   : > { %8658 = vst [vmem:[%s11889_s14 + $0xd8] sm:$0xff] %v8626_v28  ;;  %v8627_v19 = vadd.f32 %v8591_v46, %v16362_v59  ;;  %v8593_v52 = vadd.f32 %v8592_v62, %v8480_v29  ;;  %v8482_v27 = vadd.f32 %v8481_v26, %v15524_v8  ;;  %v16366_v8 = vld [vmem:[#allocation142_spill] sm:$0xff] }
 0xcfa   : > { %v8594_v7 = vpop.f32.mrf.mxu1  ;;  %v8483_v35 = vpop.f32.mrf.mxu0 }
 0xcfb   : > { %8659 = vst [vmem:[%s11889_s14 + $0xe0] sm:$0xff] %v8627_v19  ;;  %v8628_v2 = vadd.f32 %v8593_v52, %v16363_v51  ;;  %v8595_v38 = vadd.f32 %v8594_v7, %v8482_v27  ;;  %v8484_v0 = vadd.f32 %v8483_v35, %v15527_v31 }
 0xcfc   : > { %v8596_v15 = vpop.f32.mrf.mxu1 }
 0xcfd   : > { %8660 = vst [vmem:[%s11889_s14 + $0xe8] sm:$0xff] %v8628_v2  ;;  %v8629_v34 = vadd.f32 %v8595_v38, %v16364_v55  ;;  %v8597_v10 = vadd.f32 %v8596_v15, %v8484_v0 }
 0xcff   : > { %8661 = vst [vmem:[%s11889_s14 + $0xf0] sm:$0xff] %v8629_v34  ;;  %v8630_v31 = vadd.f32 %v8597_v10, %v16366_v8 }
 0xd01   : > { %8662 = vst [vmem:[%s11889_s14 + $0xf8] sm:$0xff] %v8630_v31 }
 0xd02   : > { %11428 = shalt.err (!%p11425_p10)
}
 0xd03   : > { %s11429_s12 = scalar_lea.hbm %s15628_s28, 4096  ;;  %s11433_s10 = scalar_lea.hbm %s16365_s2, 16384 }
 0xd04   : > { %p11430_p2 = scmp.ne.s32.totalorder %s15628_s28, %s11429_s12  ;;  %p11434_p8 = scmp.lt.s32.totalorder %s15628_s28, %s16365_s2 }
 0xd05   : > { %p11435_p1 = scmp.lt.s32.totalorder %s11433_s10, %s11429_s12 }
 0xd06   : > { %p11431_p4 = pnand %p11430_p2, %p11828_p7 }
 0xd07   : > { %p11436_p5 = por %p11435_p1, %p11434_p8 }
 0xd08   : > { %p11432_p6 = pneg %p11431_p4 }
 0xd0a   : > { %p11437_p3 = pnand %p11436_p5, %p11432_p6 }
 0xd0c   : > { %11440 = shalt.err (!%p11437_p3)
}
 0xd0d   : > { %s11567_s7 = smov 256   ;;  %s11568_s19 = smov 16  }
 0xd0e   : > { %9884 = dma.vmem_to_hbm [thread:$0]  (%p11828_p7), %s15630_s27, 4096, %s15628_s28, %s15637_s16, %s11567_s7, %s11567_s7, %s11568_s19  }
 0xd0f PF: > { %p9931_p11 = scmp.ge.s32.totalorder %s11551_s23, 2  ;;  %s8695_s26 = sand.u32 1, %s11511_s29  }
 0xd10   : > { %s8696_s25 = scalar_lea.sflag [#allocation7], %s8695_s26 }
 0xd11   : > { %p9913_p12 = pnand %p9931_p11, %p11841_p9 }
 0xd13   : > { %p9914_p13 = pneg %p9913_p12 }
 0xd15   : > { %11506 = dma.done.wait (%p9914_p13), %s8696_s25, 4096  }
 0xd16   : > { %11508 = vsyncadd (%p9914_p13), %s8696_s25, 4294963200  ;;  %s34_s23 = sadd.s32 1, %s11551_s23   ;;  %s16367_s24 = sld [smem:[#allocation27_spill]] }
 0xd17   : > { %p31_p0 = scmp.ge.s32.totalorder %s34_s23, 6   ;;  %s16368_s27 = sld [smem:[#allocation28_spill]] }
 0xd18   : > { %s16369_s29 = smov %s11515_s30  ;;  %s16370_s30 = smov %s11519_s15 }
 0xd19   : > { %s16371_s15 = smov %s11836_s11  ;;  %s16372_s16 = smov %s11527_s17 }
 0xd1a   : > { %s16373_s17 = smov %s11531_s18  ;;  %s16374_s18 = smov %s11833_s1 }
 0xd1b   : > { %s16375_s19 = smov %s11543_s21  ;;  %s16376_s20 = smov %s11547_s22 }
 0xd1c   : > { %s16377_s21 = smov %s16367_s24  ;;  %33 = sbr.rel (!%p31_p0) target bundleno = 28 (0x1c), region = 155 }
 0xd1d   : > { %s16378_s22 = smov %s16368_s27 }
 0xd21   :  { %8701 = vsyncpa [#allocation6], 1 }
 0xd22   :  { %8703 = vsyncpa [#allocation6 + $0x1], 1 }
 0xd23   :  { %8704 = vsyncpa [#allocation9], 1 }
 0xd24   :  { %8705 = vsyncpa [#allocation12], 1 }
 0xd25   :  { %8706 = vsyncpa [#allocation15], 1 }
 0xd26   :  { %8707 = vsyncpa [#allocation18], 1 }
 0xd27   :  { %8708 = vsyncpa [#allocation7], 1 }
 0xd28   :  { %8710 = vsyncpa [#allocation7 + $0x1], 1 }

</bundles_post_ra>
